<compile_context>
chip_gen: v6e
topology: v6e:2x2x1
jax: 0.10.0
libtpu: 0.0.40
codegen_flags: <defaults>
</compile_context>

<pallas_src>
import functools

import jax
import jax.numpy as jnp
import numpy as np
from jax.experimental import pallas as pl
from jax.experimental.pallas import tpu as pltpu

HOTSPOT_DIM = 192
MULTI_SCALE_DIMS = (96, 96, 96, 96, 96)
N_TAPS = 27          # 3x3x3 conv taps
TAP_ROWS = 32        # tap axis padded to a sublane-friendly 32 (pad rows/cols are zero)


def _full_spec(shape):
    return pl.BlockSpec(shape, lambda i: (0,) * len(shape))


def _silu(x):
    # silu(x) = x * sigmoid(x); exp + divide lower cleanly to the EUP.
    return x / (1.0 + jnp.exp(-x))


# ----------------------------------------------------------------------------
# Fused kernel: hotspot MLP + 5x (conv-as-tap-sums) + pocket MLP
# ----------------------------------------------------------------------------
def _make_encoder_kernel(inv_nouts, n_scales):
    def kernel(*refs):
        (hf_ref, wht_ref, bh_ref, sel_ref, gselT_ref,
         bc_ref, w1t_ref, b1_ref, w2t_ref, b2_ref) = refs[:10]
        p = 10
        x_hbm = refs[p:p + n_scales]; p += n_scales          # (C, Ns) f32, HBM
        m_hbm = refs[p:p + n_scales]; p += n_scales          # (32, Ns) bf16, HBM
        w_hbm = refs[p:p + n_scales]; p += n_scales          # (C, 32*H) bf16, HBM
        hot_out_ref, pocket_out_ref = refs[p], refs[p + 1]; p += 2
        xb = refs[p:p + n_scales]; p += n_scales             # VMEM scratch
        mb = refs[p:p + n_scales]; p += n_scales
        wb = refs[p:p + n_scales]; p += n_scales
        sems = refs[p]                                        # DMA sems (n_scales, 3)

        # 1) kick off every HBM->VMEM copy up front; waits are interleaved with compute
        #    so scale s+1's DMA hides under scale s's matmuls (manual pipelining).
        copies = []
        for s in range(n_scales):
            trio = (pltpu.make_async_copy(x_hbm[s], xb[s], sems.at[s, 0]),
                    pltpu.make_async_copy(m_hbm[s], mb[s], sems.at[s, 1]),
                    pltpu.make_async_copy(w_hbm[s], wb[s], sems.at[s, 2]))
            for cp in trio:
                cp.start()
            copies.append(trio)

        # 2) hotspot branch: SiLU -> Linear(192 -> H)  (runs while scale-0 DMA lands)
        hot = jnp.dot(_silu(hf_ref[...]), wht_ref[...],
                      preferred_element_type=jnp.float32) + bh_ref[...]
        hot_out_ref[...] = hot.astype(hot_out_ref.dtype)

        # 3) per-scale conv-mean, with pocket_layer's first Linear folded in (no concat)
        h1 = b1_ref[...]                                          # (1, H) accumulator
        for s in range(n_scales):
            for cp in copies[s]:
                cp.wait()
            y = _silu(xb[s][...])                                 # f32 (C, Ns), silu once
            # per-tap spatial sums, contracting Ns (NT): taps[t, c] = sum_n M[t,n] y[c,n]
            taps = jax.lax.dot_general(
                mb[s][...], y.astype(jnp.bfloat16),
                (((1,), (1,)), ((), ())),
                preferred_element_type=jnp.float32)               # (32, C)
            # z[t, o*32 + t'] = sum_c taps[t, c] * w[o, c, t']
            z = jnp.dot(taps.astype(jnp.bfloat16), wb[s][...],
                        preferred_element_type=jnp.float32)       # (32, 32*H)
            # keep only diagonal blocks t == t' ...
            colsum = jnp.sum(z * sel_ref[...], axis=0, keepdims=True)   # (1, 32*H)
            # ... and sum each 32-lane group into its output channel o
            conv_sum = jax.lax.dot_general(
                colsum, gselT_ref[...], (((1,), (1,)), ((), ())),
                preferred_element_type=jnp.float32)               # (1, H)
            conv_mean = conv_sum * inv_nouts[s] + bc_ref[s:s + 1, :]
            h1 = h1 + jnp.dot(_silu(conv_mean), w1t_ref[s],
                              preferred_element_type=jnp.float32)
        pocket = jnp.dot(_silu(h1), w2t_ref[...],
                         preferred_element_type=jnp.float32) + b2_ref[...]
        pocket_out_ref[...] = pocket.astype(pocket_out_ref.dtype)

    return kernel


# ----------------------------------------------------------------------------
# Static helpers (host-side constants / layout glue)
# ----------------------------------------------------------------------------
@functools.lru_cache(maxsize=None)
def _tap_mask_np(d, h, w):
    """0/1 mask (32, d*h*w): row t sums the input window of conv tap t (rows >= 27 zero)."""
    do, ho, wo = d - 2, h - 2, w - 2
    m = np.zeros((TAP_ROWS, d * h * w), np.float32)
    iz, iy, ix = np.arange(d), np.arange(h), np.arange(w)
    t = 0
    for kz in range(3):
        for ky in range(3):
            for kx in range(3):
                cube = (((iz >= kz) & (iz < kz + do))[:, None, None]
                        & ((iy >= ky) & (iy < ky + ho))[None, :, None]
                        & ((ix >= kx) & (ix < kx + wo))[None, None, :])
                m[t] = cube.reshape(-1)
                t += 1
    return m


# ----------------------------------------------------------------------------
# Forward pass (single pallas_call)
# ----------------------------------------------------------------------------
def pharmacophore_encoder_forward(params, multi_scale_features, hotspot_positions,
                                  hotspot_features):
    hidden = params["w2t"].shape[0]
    n_scales = len(multi_scale_features)

    xs, masks, inv_nouts = [], [], []
    for feat in multi_scale_features:
        _, c, d, h, w = feat.shape
        ns = d * h * w
        xs.append(feat.reshape(c, ns))                                       # native (C, Ns)
        masks.append(jnp.asarray(_tap_mask_np(d, h, w), dtype=jnp.bfloat16))  # (32, Ns)
        inv_nouts.append(1.0 / float((d - 2) * (h - 2) * (w - 2)))
    w4s = list(params["conv_w4"])

    n_hot = int(hotspot_features.shape[0])
    hf_in = hotspot_features if n_hot > 0 else jnp.zeros((8, HOTSPOT_DIM), jnp.float32)

    auto_inputs = [hf_in, params["hotspot_wt"], params["hotspot_b"],
                   params["sel"], params["gselT"], params["conv_b"],
                   params["w1t"], params["b1"], params["w2t"], params["b2"]]
    any_inputs = [*xs, *masks, *w4s]

    in_specs = ([_full_spec(a.shape) for a in auto_inputs]
                + [pl.BlockSpec(memory_space=pl.ANY)] * len(any_inputs))
    out_shape = (jax.ShapeDtypeStruct((hf_in.shape[0], hidden), jnp.float32),
                 jax.ShapeDtypeStruct((1, hidden), jnp.float32))
    out_specs = tuple(_full_spec(s.shape) for s in out_shape)
    scratch_shapes = ([pltpu.VMEM(x.shape, jnp.float32) for x in xs]
                      + [pltpu.VMEM(m.shape, jnp.bfloat16) for m in masks]
                      + [pltpu.VMEM(wz.shape, jnp.bfloat16) for wz in w4s]
                      + [pltpu.SemaphoreType.DMA((n_scales, 3))])

    hot_out, pocket = pl.pallas_call(
        _make_encoder_kernel(tuple(inv_nouts), n_scales),
        grid=(1,),
        in_specs=in_specs,
        out_specs=out_specs,
        out_shape=out_shape,
        scratch_shapes=scratch_shapes,
        compiler_params=pltpu.CompilerParams(
            dimension_semantics=("arbitrary",),
            vmem_limit_bytes=32 * 1024 * 1024,   # ~3 MB working set; safe on v5e/v6e/v7x
        ),
    )(*auto_inputs, *any_inputs)

    if n_hot > 0:
        return hot_out, hotspot_positions, pocket[0]
    # TODO(synk): hotspot_infos list-of-dicts -> tensor stacking is host-side glue in the
    # original module; the empty case returns zeros exactly like the PyTorch code.
    return (jnp.zeros((0, hidden), jnp.float32),
            jnp.zeros((0, 3), jnp.float32), pocket[0])


# ----------------------------------------------------------------------------
# Parameter init (PyTorch layout) + one-time layout preparation for the kernel
# ----------------------------------------------------------------------------
def init_raw_params(key, hidden_dim):
    n_scales = len(MULTI_SCALE_DIMS)
    keys = jax.random.split(key, 6 + 2 * n_scales)
    raw = {
        "hotspot_w": jax.random.normal(keys[0], (hidden_dim, HOTSPOT_DIM), jnp.float32)
        * (2.0 / HOTSPOT_DIM) ** 0.5,
        "hotspot_b": 0.1 * jax.random.normal(keys[1], (hidden_dim,), jnp.float32),
        "pl_w1": jax.random.normal(keys[2], (hidden_dim, n_scales * hidden_dim), jnp.float32)
        * (2.0 / (n_scales * hidden_dim)) ** 0.5,
        "pl_b1": 0.1 * jax.random.normal(keys[3], (hidden_dim,), jnp.float32),
        "pl_w2": jax.random.normal(keys[4], (hidden_dim, hidden_dim), jnp.float32)
        * (2.0 / hidden_dim) ** 0.5,
        "pl_b2": 0.1 * jax.random.normal(keys[5], (hidden_dim,), jnp.float32),
    }
    convs = []
    for i, c in enumerate(MULTI_SCALE_DIMS):
        wc = jax.random.normal(keys[6 + 2 * i], (hidden_dim, c, 3, 3, 3), jnp.float32) \
            * (2.0 / (c * 27)) ** 0.5
        bc = 0.1 * jax.random.normal(keys[7 + 2 * i], (hidden_dim,), jnp.float32)
        convs.append((wc, bc))
    raw["convs"] = convs
    return raw


def prepare_params(raw):
    """One-time weight layout transforms (pre-transpose / pre-flatten / precompute masks)."""
    hidden = raw["pl_w2"].shape[0]
    n_scales = len(raw["convs"])
    ncol = hidden * TAP_ROWS
    conv_w4 = []
    for wc, _ in raw["convs"]:
        c = wc.shape[1]
        # (H, C, 3,3,3) -> (C, 32*H) with column index = out_channel*32 + tap (taps>=27 zero)
        w4 = wc.reshape(hidden, c, N_TAPS)
        w4 = jnp.pad(w4, ((0, 0), (0, 0), (0, TAP_ROWS - N_TAPS)))
        w4 = jnp.transpose(w4, (1, 0, 2)).reshape(c, ncol)
        conv_w4.append(w4.astype(jnp.bfloat16))
    # block-diagonal select (t == col%32) and lane-group reducer (o == col//32), host-side
    col = np.arange(ncol)
    sel = (col[None, :] % TAP_ROWS == np.arange(TAP_ROWS)[:, None]).astype(np.float32)
    gselT = (col[None, :] // TAP_ROWS == np.arange(hidden)[:, None]).astype(np.float32)
    return {
        "hotspot_wt": raw["hotspot_w"].T,                             # (192, H)
        "hotspot_b": raw["hotspot_b"].reshape(1, hidden),
        "conv_w4": conv_w4,                                           # 5 x (C, 32*H) bf16
        "conv_b": jnp.stack([b for _, b in raw["convs"]], axis=0),    # (n_scales, H)
        "sel": jnp.asarray(sel),                                      # (32, 32*H)
        "gselT": jnp.asarray(gselT),                                  # (H, 32*H)
        "w1t": raw["pl_w1"].T.reshape(n_scales, hidden, hidden),      # per-scale W1^T blocks
        "b1": raw["pl_b1"].reshape(1, hidden),
        "w2t": raw["pl_w2"].T,
        "b2": raw["pl_b2"].reshape(1, hidden),
    }


# ----------------------------------------------------------------------------
# Pure-JAX reference (correctness check)
# ----------------------------------------------------------------------------
def _ref_forward(raw, multi_scale_features, hpos, hfeat):
    hf = jax.nn.silu(hfeat) @ raw["hotspot_w"].T + raw["hotspot_b"]
    per = []
    for (wc, bc), feat in zip(raw["convs"], multi_scale_features):
        x = jax.nn.silu(feat[0])
        y = jax.lax.conv_general_dilated(
            x[None], wc, window_strides=(1, 1, 1), padding="VALID",
            dimension_numbers=("NCDHW", "OIDHW", "NCDHW"))[0] + bc[:, None, None, None]
        per.append(jnp.mean(y, axis=(1, 2, 3)))
    p = jnp.concatenate(per, axis=-1)
    h = jax.nn.silu(p) @ raw["pl_w1"].T + raw["pl_b1"]
    p = jax.nn.silu(h) @ raw["pl_w2"].T + raw["pl_b2"]
    return hf, hpos, p


if __name__ == "__main__":
    hidden_dim = 32
    key = jax.random.PRNGKey(0)
    kp, kh, kpos, kf = jax.random.split(key, 4)

    raw_params = init_raw_params(kp, hidden_dim)
    params = prepare_params(raw_params)

    # 5 multi-scale pocket features (batch=1, channels=96, small cubic grids)
    spatial_sizes = (10, 8, 6, 6, 6)
    feat_keys = jax.random.split(kf, len(MULTI_SCALE_DIMS))
    multi_scale_features = [
        jax.random.normal(feat_keys[i], (1, c, s, s, s), jnp.float32)
        for i, (c, s) in enumerate(zip(MULTI_SCALE_DIMS, spatial_sizes))
    ]

    # 8 hotspots
    n_hotspots = 8
    hotspot_positions = jax.random.normal(kpos, (n_hotspots, 3), jnp.float32) * 10.0
    hotspot_features = jax.random.normal(kh, (n_hotspots, HOTSPOT_DIM), jnp.float32)

    fwd = jax.jit(pharmacophore_encoder_forward)
    hf, hpos, pocket = fwd(params, multi_scale_features, hotspot_positions, hotspot_features)
    jax.block_until_ready((hf, hpos, pocket))

    assert hf.shape == (n_hotspots, hidden_dim)
    assert hpos.shape == (n_hotspots, 3)
    assert pocket.shape == (hidden_dim,)

    # correctness vs. pure-JAX reference
    rhf, rhpos, rpocket = _ref_forward(raw_params, multi_scale_features,
                                       hotspot_positions, hotspot_features)
    np.testing.assert_allclose(np.asarray(hf), np.asarray(rhf), rtol=1e-2, atol=2e-3)
    np.testing.assert_allclose(np.asarray(hpos), np.asarray(rhpos), rtol=0, atol=0)
    # conv weights / tap sums use bf16 MXU operands in the kernel -> slightly looser atol
    np.testing.assert_allclose(np.asarray(pocket), np.asarray(rpocket), rtol=1e-2, atol=5e-3)

    # empty-hotspot branch (static shape branch, matches PyTorch semantics)
    ehf, ehpos, epocket = pharmacophore_encoder_forward(
        params, multi_scale_features,
        jnp.zeros((0, 3), jnp.float32), jnp.zeros((0, HOTSPOT_DIM), jnp.float32))
    jax.block_until_ready((ehf, ehpos, epocket))
    assert ehf.shape == (0, hidden_dim) and ehpos.shape == (0, 3)
    np.testing.assert_allclose(np.asarray(epocket), np.asarray(rpocket), rtol=1e-2, atol=5e-3)

    print("KERNEL_OK")
</pallas_src>

<mosaic_0001>
module attributes {stable_mosaic.version = 11 : i64} {
  func.func @kernel(%arg0: i32, %arg1: memref<8x192xf32, #tpu.memory_space<vmem>>, %arg2: memref<192x32xf32, #tpu.memory_space<vmem>>, %arg3: memref<1x32xf32, #tpu.memory_space<vmem>>, %arg4: memref<32x1024xf32, #tpu.memory_space<vmem>>, %arg5: memref<32x1024xf32, #tpu.memory_space<vmem>>, %arg6: memref<5x32xf32, #tpu.memory_space<vmem>>, %arg7: memref<5x32x32xf32, #tpu.memory_space<vmem>>, %arg8: memref<1x32xf32, #tpu.memory_space<vmem>>, %arg9: memref<32x32xf32, #tpu.memory_space<vmem>>, %arg10: memref<1x32xf32, #tpu.memory_space<vmem>>, %arg11: memref<96x1000xf32, #tpu.memory_space<any>>, %arg12: memref<96x512xf32, #tpu.memory_space<any>>, %arg13: memref<96x216xf32, #tpu.memory_space<any>>, %arg14: memref<96x216xf32, #tpu.memory_space<any>>, %arg15: memref<96x216xf32, #tpu.memory_space<any>>, %arg16: memref<32x1000xbf16, #tpu.memory_space<any>>, %arg17: memref<32x512xbf16, #tpu.memory_space<any>>, %arg18: memref<32x216xbf16, #tpu.memory_space<any>>, %arg19: memref<32x216xbf16, #tpu.memory_space<any>>, %arg20: memref<32x216xbf16, #tpu.memory_space<any>>, %arg21: memref<96x1024xbf16, #tpu.memory_space<any>>, %arg22: memref<96x1024xbf16, #tpu.memory_space<any>>, %arg23: memref<96x1024xbf16, #tpu.memory_space<any>>, %arg24: memref<96x1024xbf16, #tpu.memory_space<any>>, %arg25: memref<96x1024xbf16, #tpu.memory_space<any>>, %arg26: memref<8x32xf32, #tpu.memory_space<vmem>>, %arg27: memref<1x32xf32, #tpu.memory_space<vmem>>, %arg28: memref<96x1000xf32, #tpu.memory_space<vmem>>, %arg29: memref<96x512xf32, #tpu.memory_space<vmem>>, %arg30: memref<96x216xf32, #tpu.memory_space<vmem>>, %arg31: memref<96x216xf32, #tpu.memory_space<vmem>>, %arg32: memref<96x216xf32, #tpu.memory_space<vmem>>, %arg33: memref<32x1000xbf16, #tpu.memory_space<vmem>>, %arg34: memref<32x512xbf16, #tpu.memory_space<vmem>>, %arg35: memref<32x216xbf16, #tpu.memory_space<vmem>>, %arg36: memref<32x216xbf16, #tpu.memory_space<vmem>>, %arg37: memref<32x216xbf16, #tpu.memory_space<vmem>>, %arg38: memref<96x1024xbf16, #tpu.memory_space<vmem>>, %arg39: memref<96x1024xbf16, #tpu.memory_space<vmem>>, %arg40: memref<96x1024xbf16, #tpu.memory_space<vmem>>, %arg41: memref<96x1024xbf16, #tpu.memory_space<vmem>>, %arg42: memref<96x1024xbf16, #tpu.memory_space<vmem>>, %arg43: memref<5x3x!tpu.dma_semaphore, #tpu.memory_space<semaphore_mem>>) attributes {dimension_semantics = [#tpu.dimension_semantics<arbitrary>], iteration_bounds = array<i64: 1>, scalar_prefetch = 0 : i64, scratch_operands = 16 : i64, tpu.core_type = #tpu.core_type<tc>, window_params = [{pipeline_mode = #tpu.pipeline_mode<synchronous>, transform_indices = @transform_0, window_bounds = array<i64: 8, 192>}, {pipeline_mode = #tpu.pipeline_mode<synchronous>, transform_indices = @transform_1, window_bounds = array<i64: 192, 32>}, {pipeline_mode = #tpu.pipeline_mode<synchronous>, transform_indices = @transform_2, window_bounds = array<i64: 1, 32>}, {pipeline_mode = #tpu.pipeline_mode<synchronous>, transform_indices = @transform_3, window_bounds = array<i64: 32, 1024>}, {pipeline_mode = #tpu.pipeline_mode<synchronous>, transform_indices = @transform_4, window_bounds = array<i64: 32, 1024>}, {pipeline_mode = #tpu.pipeline_mode<synchronous>, transform_indices = @transform_5, window_bounds = array<i64: 5, 32>}, {pipeline_mode = #tpu.pipeline_mode<synchronous>, transform_indices = @transform_6, window_bounds = array<i64: 5, 32, 32>}, {pipeline_mode = #tpu.pipeline_mode<synchronous>, transform_indices = @transform_7, window_bounds = array<i64: 1, 32>}, {pipeline_mode = #tpu.pipeline_mode<synchronous>, transform_indices = @transform_8, window_bounds = array<i64: 32, 32>}, {pipeline_mode = #tpu.pipeline_mode<synchronous>, transform_indices = @transform_9, window_bounds = array<i64: 1, 32>}, {}, {}, {}, {}, {}, {}, {}, {}, {}, {}, {}, {}, {}, {}, {}, {pipeline_mode = #tpu.pipeline_mode<synchronous>, transform_indices = @transform_25, window_bounds = array<i64: 8, 32>}, {pipeline_mode = #tpu.pipeline_mode<synchronous>, transform_indices = @transform_26, window_bounds = array<i64: 1, 32>}]} {
    %c0_i32 = arith.constant 0 : i32
    %c0_i32_0 = arith.constant 0 : i32
    %0 = tpu.memref_slice %arg43[%c0_i32, %c0_i32_0] : memref<5x3x!tpu.dma_semaphore, #tpu.memory_space<semaphore_mem>> -> memref<1x1x!tpu.dma_semaphore, #tpu.memory_space<semaphore_mem>>
    %1 = tpu.memref_squeeze %0 : memref<1x1x!tpu.dma_semaphore, #tpu.memory_space<semaphore_mem>> -> memref<!tpu.dma_semaphore, #tpu.memory_space<semaphore_mem>>
    tpu.enqueue_dma source(%arg11 : memref<96x1000xf32, #tpu.memory_space<any>>) target(%arg28 : memref<96x1000xf32, #tpu.memory_space<vmem>>) target_semaphore(%1 : memref<!tpu.dma_semaphore, #tpu.memory_space<semaphore_mem>>)
    %c0_i32_1 = arith.constant 0 : i32
    %c1_i32 = arith.constant 1 : i32
    %2 = tpu.memref_slice %arg43[%c0_i32_1, %c1_i32] : memref<5x3x!tpu.dma_semaphore, #tpu.memory_space<semaphore_mem>> -> memref<1x1x!tpu.dma_semaphore, #tpu.memory_space<semaphore_mem>>
    %3 = tpu.memref_squeeze %2 : memref<1x1x!tpu.dma_semaphore, #tpu.memory_space<semaphore_mem>> -> memref<!tpu.dma_semaphore, #tpu.memory_space<semaphore_mem>>
    tpu.enqueue_dma source(%arg16 : memref<32x1000xbf16, #tpu.memory_space<any>>) target(%arg33 : memref<32x1000xbf16, #tpu.memory_space<vmem>>) target_semaphore(%3 : memref<!tpu.dma_semaphore, #tpu.memory_space<semaphore_mem>>)
    %c0_i32_2 = arith.constant 0 : i32
    %c2_i32 = arith.constant 2 : i32
    %4 = tpu.memref_slice %arg43[%c0_i32_2, %c2_i32] : memref<5x3x!tpu.dma_semaphore, #tpu.memory_space<semaphore_mem>> -> memref<1x1x!tpu.dma_semaphore, #tpu.memory_space<semaphore_mem>>
    %5 = tpu.memref_squeeze %4 : memref<1x1x!tpu.dma_semaphore, #tpu.memory_space<semaphore_mem>> -> memref<!tpu.dma_semaphore, #tpu.memory_space<semaphore_mem>>
    tpu.enqueue_dma source(%arg21 : memref<96x1024xbf16, #tpu.memory_space<any>>) target(%arg38 : memref<96x1024xbf16, #tpu.memory_space<vmem>>) target_semaphore(%5 : memref<!tpu.dma_semaphore, #tpu.memory_space<semaphore_mem>>)
    %c1_i32_3 = arith.constant 1 : i32
    %c0_i32_4 = arith.constant 0 : i32
    %6 = tpu.memref_slice %arg43[%c1_i32_3, %c0_i32_4] : memref<5x3x!tpu.dma_semaphore, #tpu.memory_space<semaphore_mem>> -> memref<1x1x!tpu.dma_semaphore, #tpu.memory_space<semaphore_mem>>
    %7 = tpu.memref_squeeze %6 : memref<1x1x!tpu.dma_semaphore, #tpu.memory_space<semaphore_mem>> -> memref<!tpu.dma_semaphore, #tpu.memory_space<semaphore_mem>>
    tpu.enqueue_dma source(%arg12 : memref<96x512xf32, #tpu.memory_space<any>>) target(%arg29 : memref<96x512xf32, #tpu.memory_space<vmem>>) target_semaphore(%7 : memref<!tpu.dma_semaphore, #tpu.memory_space<semaphore_mem>>)
    %c1_i32_5 = arith.constant 1 : i32
    %c1_i32_6 = arith.constant 1 : i32
    %8 = tpu.memref_slice %arg43[%c1_i32_5, %c1_i32_6] : memref<5x3x!tpu.dma_semaphore, #tpu.memory_space<semaphore_mem>> -> memref<1x1x!tpu.dma_semaphore, #tpu.memory_space<semaphore_mem>>
    %9 = tpu.memref_squeeze %8 : memref<1x1x!tpu.dma_semaphore, #tpu.memory_space<semaphore_mem>> -> memref<!tpu.dma_semaphore, #tpu.memory_space<semaphore_mem>>
    tpu.enqueue_dma source(%arg17 : memref<32x512xbf16, #tpu.memory_space<any>>) target(%arg34 : memref<32x512xbf16, #tpu.memory_space<vmem>>) target_semaphore(%9 : memref<!tpu.dma_semaphore, #tpu.memory_space<semaphore_mem>>)
    %c1_i32_7 = arith.constant 1 : i32
    %c2_i32_8 = arith.constant 2 : i32
    %10 = tpu.memref_slice %arg43[%c1_i32_7, %c2_i32_8] : memref<5x3x!tpu.dma_semaphore, #tpu.memory_space<semaphore_mem>> -> memref<1x1x!tpu.dma_semaphore, #tpu.memory_space<semaphore_mem>>
    %11 = tpu.memref_squeeze %10 : memref<1x1x!tpu.dma_semaphore, #tpu.memory_space<semaphore_mem>> -> memref<!tpu.dma_semaphore, #tpu.memory_space<semaphore_mem>>
    tpu.enqueue_dma source(%arg22 : memref<96x1024xbf16, #tpu.memory_space<any>>) target(%arg39 : memref<96x1024xbf16, #tpu.memory_space<vmem>>) target_semaphore(%11 : memref<!tpu.dma_semaphore, #tpu.memory_space<semaphore_mem>>)
    %c2_i32_9 = arith.constant 2 : i32
    %c0_i32_10 = arith.constant 0 : i32
    %12 = tpu.memref_slice %arg43[%c2_i32_9, %c0_i32_10] : memref<5x3x!tpu.dma_semaphore, #tpu.memory_space<semaphore_mem>> -> memref<1x1x!tpu.dma_semaphore, #tpu.memory_space<semaphore_mem>>
    %13 = tpu.memref_squeeze %12 : memref<1x1x!tpu.dma_semaphore, #tpu.memory_space<semaphore_mem>> -> memref<!tpu.dma_semaphore, #tpu.memory_space<semaphore_mem>>
    tpu.enqueue_dma source(%arg13 : memref<96x216xf32, #tpu.memory_space<any>>) target(%arg30 : memref<96x216xf32, #tpu.memory_space<vmem>>) target_semaphore(%13 : memref<!tpu.dma_semaphore, #tpu.memory_space<semaphore_mem>>)
    %c2_i32_11 = arith.constant 2 : i32
    %c1_i32_12 = arith.constant 1 : i32
    %14 = tpu.memref_slice %arg43[%c2_i32_11, %c1_i32_12] : memref<5x3x!tpu.dma_semaphore, #tpu.memory_space<semaphore_mem>> -> memref<1x1x!tpu.dma_semaphore, #tpu.memory_space<semaphore_mem>>
    %15 = tpu.memref_squeeze %14 : memref<1x1x!tpu.dma_semaphore, #tpu.memory_space<semaphore_mem>> -> memref<!tpu.dma_semaphore, #tpu.memory_space<semaphore_mem>>
    tpu.enqueue_dma source(%arg18 : memref<32x216xbf16, #tpu.memory_space<any>>) target(%arg35 : memref<32x216xbf16, #tpu.memory_space<vmem>>) target_semaphore(%15 : memref<!tpu.dma_semaphore, #tpu.memory_space<semaphore_mem>>)
    %c2_i32_13 = arith.constant 2 : i32
    %c2_i32_14 = arith.constant 2 : i32
    %16 = tpu.memref_slice %arg43[%c2_i32_13, %c2_i32_14] : memref<5x3x!tpu.dma_semaphore, #tpu.memory_space<semaphore_mem>> -> memref<1x1x!tpu.dma_semaphore, #tpu.memory_space<semaphore_mem>>
    %17 = tpu.memref_squeeze %16 : memref<1x1x!tpu.dma_semaphore, #tpu.memory_space<semaphore_mem>> -> memref<!tpu.dma_semaphore, #tpu.memory_space<semaphore_mem>>
    tpu.enqueue_dma source(%arg23 : memref<96x1024xbf16, #tpu.memory_space<any>>) target(%arg40 : memref<96x1024xbf16, #tpu.memory_space<vmem>>) target_semaphore(%17 : memref<!tpu.dma_semaphore, #tpu.memory_space<semaphore_mem>>)
    %c3_i32 = arith.constant 3 : i32
    %c0_i32_15 = arith.constant 0 : i32
    %18 = tpu.memref_slice %arg43[%c3_i32, %c0_i32_15] : memref<5x3x!tpu.dma_semaphore, #tpu.memory_space<semaphore_mem>> -> memref<1x1x!tpu.dma_semaphore, #tpu.memory_space<semaphore_mem>>
    %19 = tpu.memref_squeeze %18 : memref<1x1x!tpu.dma_semaphore, #tpu.memory_space<semaphore_mem>> -> memref<!tpu.dma_semaphore, #tpu.memory_space<semaphore_mem>>
    tpu.enqueue_dma source(%arg14 : memref<96x216xf32, #tpu.memory_space<any>>) target(%arg31 : memref<96x216xf32, #tpu.memory_space<vmem>>) target_semaphore(%19 : memref<!tpu.dma_semaphore, #tpu.memory_space<semaphore_mem>>)
    %c3_i32_16 = arith.constant 3 : i32
    %c1_i32_17 = arith.constant 1 : i32
    %20 = tpu.memref_slice %arg43[%c3_i32_16, %c1_i32_17] : memref<5x3x!tpu.dma_semaphore, #tpu.memory_space<semaphore_mem>> -> memref<1x1x!tpu.dma_semaphore, #tpu.memory_space<semaphore_mem>>
    %21 = tpu.memref_squeeze %20 : memref<1x1x!tpu.dma_semaphore, #tpu.memory_space<semaphore_mem>> -> memref<!tpu.dma_semaphore, #tpu.memory_space<semaphore_mem>>
    tpu.enqueue_dma source(%arg19 : memref<32x216xbf16, #tpu.memory_space<any>>) target(%arg36 : memref<32x216xbf16, #tpu.memory_space<vmem>>) target_semaphore(%21 : memref<!tpu.dma_semaphore, #tpu.memory_space<semaphore_mem>>)
    %c3_i32_18 = arith.constant 3 : i32
    %c2_i32_19 = arith.constant 2 : i32
    %22 = tpu.memref_slice %arg43[%c3_i32_18, %c2_i32_19] : memref<5x3x!tpu.dma_semaphore, #tpu.memory_space<semaphore_mem>> -> memref<1x1x!tpu.dma_semaphore, #tpu.memory_space<semaphore_mem>>
    %23 = tpu.memref_squeeze %22 : memref<1x1x!tpu.dma_semaphore, #tpu.memory_space<semaphore_mem>> -> memref<!tpu.dma_semaphore, #tpu.memory_space<semaphore_mem>>
    tpu.enqueue_dma source(%arg24 : memref<96x1024xbf16, #tpu.memory_space<any>>) target(%arg41 : memref<96x1024xbf16, #tpu.memory_space<vmem>>) target_semaphore(%23 : memref<!tpu.dma_semaphore, #tpu.memory_space<semaphore_mem>>)
    %c4_i32 = arith.constant 4 : i32
    %c0_i32_20 = arith.constant 0 : i32
    %24 = tpu.memref_slice %arg43[%c4_i32, %c0_i32_20] : memref<5x3x!tpu.dma_semaphore, #tpu.memory_space<semaphore_mem>> -> memref<1x1x!tpu.dma_semaphore, #tpu.memory_space<semaphore_mem>>
    %25 = tpu.memref_squeeze %24 : memref<1x1x!tpu.dma_semaphore, #tpu.memory_space<semaphore_mem>> -> memref<!tpu.dma_semaphore, #tpu.memory_space<semaphore_mem>>
    tpu.enqueue_dma source(%arg15 : memref<96x216xf32, #tpu.memory_space<any>>) target(%arg32 : memref<96x216xf32, #tpu.memory_space<vmem>>) target_semaphore(%25 : memref<!tpu.dma_semaphore, #tpu.memory_space<semaphore_mem>>)
    %c4_i32_21 = arith.constant 4 : i32
    %c1_i32_22 = arith.constant 1 : i32
    %26 = tpu.memref_slice %arg43[%c4_i32_21, %c1_i32_22] : memref<5x3x!tpu.dma_semaphore, #tpu.memory_space<semaphore_mem>> -> memref<1x1x!tpu.dma_semaphore, #tpu.memory_space<semaphore_mem>>
    %27 = tpu.memref_squeeze %26 : memref<1x1x!tpu.dma_semaphore, #tpu.memory_space<semaphore_mem>> -> memref<!tpu.dma_semaphore, #tpu.memory_space<semaphore_mem>>
    tpu.enqueue_dma source(%arg20 : memref<32x216xbf16, #tpu.memory_space<any>>) target(%arg37 : memref<32x216xbf16, #tpu.memory_space<vmem>>) target_semaphore(%27 : memref<!tpu.dma_semaphore, #tpu.memory_space<semaphore_mem>>)
    %c4_i32_23 = arith.constant 4 : i32
    %c2_i32_24 = arith.constant 2 : i32
    %28 = tpu.memref_slice %arg43[%c4_i32_23, %c2_i32_24] : memref<5x3x!tpu.dma_semaphore, #tpu.memory_space<semaphore_mem>> -> memref<1x1x!tpu.dma_semaphore, #tpu.memory_space<semaphore_mem>>
    %29 = tpu.memref_squeeze %28 : memref<1x1x!tpu.dma_semaphore, #tpu.memory_space<semaphore_mem>> -> memref<!tpu.dma_semaphore, #tpu.memory_space<semaphore_mem>>
    tpu.enqueue_dma source(%arg25 : memref<96x1024xbf16, #tpu.memory_space<any>>) target(%arg42 : memref<96x1024xbf16, #tpu.memory_space<vmem>>) target_semaphore(%29 : memref<!tpu.dma_semaphore, #tpu.memory_space<semaphore_mem>>)
    %c0 = arith.constant 0 : index
    %c0_25 = arith.constant 0 : index
    %30 = vector.load %arg1[%c0, %c0_25] : memref<8x192xf32, #tpu.memory_space<vmem>>, vector<8x192xf32>
    %cst = arith.constant 0.000000e+00 : f32
    %31 = vector.broadcast %cst : f32 to vector<8x192xf32>
    %32 = arith.subf %31, %30 : vector<8x192xf32>
    %33 = math.exp %32 : vector<8x192xf32>
    %cst_26 = arith.constant 1.000000e+00 : f32
    %34 = vector.broadcast %cst_26 : f32 to vector<8x192xf32>
    %35 = arith.addf %34, %33 : vector<8x192xf32>
    %36 = arith.divf %30, %35 : vector<8x192xf32>
    %c0_27 = arith.constant 0 : index
    %c0_28 = arith.constant 0 : index
    %37 = vector.load %arg2[%c0_27, %c0_28] : memref<192x32xf32, #tpu.memory_space<vmem>>, vector<192x32xf32>
    %cst_29 = arith.constant dense<0.000000e+00> : vector<8x32xf32>
    %38 = tpu.matmul %36, %37, %cst_29 {dimension_numbers = #tpu.dot_dimension_numbers<[1], [0], [0], [1], [0, 0, 1, 1], [], []>} : vector<8x192xf32>, vector<192x32xf32>, vector<8x32xf32> -> vector<8x32xf32>
    %c0_30 = arith.constant 0 : index
    %c0_31 = arith.constant 0 : index
    %39 = vector.load %arg3[%c0_30, %c0_31] : memref<1x32xf32, #tpu.memory_space<vmem>>, vector<1x32xf32>
    %40 = vector.broadcast %39 : vector<1x32xf32> to vector<8x32xf32>
    %41 = arith.addf %38, %40 : vector<8x32xf32>
    %c0_32 = arith.constant 0 : index
    %c0_33 = arith.constant 0 : index
    %42 = vector.load %arg26[%c0_32, %c0_33] : memref<8x32xf32, #tpu.memory_space<vmem>>, vector<8x32xf32>
    tpu.vector_store %arg26[%c0_32, %c0_33], %41 {strides = array<i32>} : memref<8x32xf32, #tpu.memory_space<vmem>>, vector<8x32xf32>,
    %c0_34 = arith.constant 0 : index
    %c0_35 = arith.constant 0 : index
    %43 = vector.load %arg8[%c0_34, %c0_35] : memref<1x32xf32, #tpu.memory_space<vmem>>, vector<1x32xf32>
    %c0_i32_36 = arith.constant 0 : i32
    %c0_i32_37 = arith.constant 0 : i32
    %44 = tpu.memref_slice %arg43[%c0_i32_36, %c0_i32_37] : memref<5x3x!tpu.dma_semaphore, #tpu.memory_space<semaphore_mem>> -> memref<1x1x!tpu.dma_semaphore, #tpu.memory_space<semaphore_mem>>
    %45 = tpu.memref_squeeze %44 : memref<1x1x!tpu.dma_semaphore, #tpu.memory_space<semaphore_mem>> -> memref<!tpu.dma_semaphore, #tpu.memory_space<semaphore_mem>>
    tpu.wait_dma2 semaphore(%45 : memref<!tpu.dma_semaphore, #tpu.memory_space<semaphore_mem>>) src(%arg11 : memref<96x1000xf32, #tpu.memory_space<any>>) dst(%arg28 : memref<96x1000xf32, #tpu.memory_space<vmem>>)
    %c0_i32_38 = arith.constant 0 : i32
    %c1_i32_39 = arith.constant 1 : i32
    %46 = tpu.memref_slice %arg43[%c0_i32_38, %c1_i32_39] : memref<5x3x!tpu.dma_semaphore, #tpu.memory_space<semaphore_mem>> -> memref<1x1x!tpu.dma_semaphore, #tpu.memory_space<semaphore_mem>>
    %47 = tpu.memref_squeeze %46 : memref<1x1x!tpu.dma_semaphore, #tpu.memory_space<semaphore_mem>> -> memref<!tpu.dma_semaphore, #tpu.memory_space<semaphore_mem>>
    tpu.wait_dma2 semaphore(%47 : memref<!tpu.dma_semaphore, #tpu.memory_space<semaphore_mem>>) src(%arg16 : memref<32x1000xbf16, #tpu.memory_space<any>>) dst(%arg33 : memref<32x1000xbf16, #tpu.memory_space<vmem>>)
    %c0_i32_40 = arith.constant 0 : i32
    %c2_i32_41 = arith.constant 2 : i32
    %48 = tpu.memref_slice %arg43[%c0_i32_40, %c2_i32_41] : memref<5x3x!tpu.dma_semaphore, #tpu.memory_space<semaphore_mem>> -> memref<1x1x!tpu.dma_semaphore, #tpu.memory_space<semaphore_mem>>
    %49 = tpu.memref_squeeze %48 : memref<1x1x!tpu.dma_semaphore, #tpu.memory_space<semaphore_mem>> -> memref<!tpu.dma_semaphore, #tpu.memory_space<semaphore_mem>>
    tpu.wait_dma2 semaphore(%49 : memref<!tpu.dma_semaphore, #tpu.memory_space<semaphore_mem>>) src(%arg21 : memref<96x1024xbf16, #tpu.memory_space<any>>) dst(%arg38 : memref<96x1024xbf16, #tpu.memory_space<vmem>>)
    %c0_42 = arith.constant 0 : index
    %c0_43 = arith.constant 0 : index
    %50 = vector.load %arg28[%c0_42, %c0_43] : memref<96x1000xf32, #tpu.memory_space<vmem>>, vector<96x1000xf32>
    %cst_44 = arith.constant 0.000000e+00 : f32
    %51 = vector.broadcast %cst_44 : f32 to vector<96x1000xf32>
    %52 = arith.subf %51, %50 : vector<96x1000xf32>
    %53 = math.exp %52 : vector<96x1000xf32>
    %cst_45 = arith.constant 1.000000e+00 : f32
    %54 = vector.broadcast %cst_45 : f32 to vector<96x1000xf32>
    %55 = arith.addf %54, %53 : vector<96x1000xf32>
    %56 = arith.divf %50, %55 : vector<96x1000xf32>
    %c0_46 = arith.constant 0 : index
    %c0_47 = arith.constant 0 : index
    %57 = vector.load %arg33[%c0_46, %c0_47] : memref<32x1000xbf16, #tpu.memory_space<vmem>>, vector<32x1000xbf16>
    %58 = arith.truncf %56 : vector<96x1000xf32> to vector<96x1000xbf16>
    %cst_48 = arith.constant dense<0.000000e+00> : vector<32x96xf32>
    %59 = tpu.matmul %57, %58, %cst_48 {dimension_numbers = #tpu.dot_dimension_numbers<[1], [1], [0], [0], [0, 0, 1, 0], [], []>} : vector<32x1000xbf16>, vector<96x1000xbf16>, vector<32x96xf32> -> vector<32x96xf32>
    %60 = arith.truncf %59 : vector<32x96xf32> to vector<32x96xbf16>
    %c0_49 = arith.constant 0 : index
    %c0_50 = arith.constant 0 : index
    %61 = vector.load %arg38[%c0_49, %c0_50] : memref<96x1024xbf16, #tpu.memory_space<vmem>>, vector<96x1024xbf16>
    %cst_51 = arith.constant dense<0.000000e+00> : vector<32x1024xf32>
    %62 = tpu.matmul %60, %61, %cst_51 {dimension_numbers = #tpu.dot_dimension_numbers<[1], [0], [0], [1], [0, 0, 1, 1], [], []>} : vector<32x96xbf16>, vector<96x1024xbf16>, vector<32x1024xf32> -> vector<32x1024xf32>
    %c0_52 = arith.constant 0 : index
    %c0_53 = arith.constant 0 : index
    %63 = vector.load %arg4[%c0_52, %c0_53] : memref<32x1024xf32, #tpu.memory_space<vmem>>, vector<32x1024xf32>
    %64 = arith.mulf %62, %63 : vector<32x1024xf32>
    %cst_54 = arith.constant dense<0.000000e+00> : vector<1024xf32>
    %65 = vector.multi_reduction <add>, %64, %cst_54 [0] : vector<32x1024xf32> to vector<1024xf32>
    %66 = vector.shape_cast %65 : vector<1024xf32> to vector<1x1024xf32>
    %c0_55 = arith.constant 0 : index
    %c0_56 = arith.constant 0 : index
    %67 = vector.load %arg5[%c0_55, %c0_56] : memref<32x1024xf32, #tpu.memory_space<vmem>>, vector<32x1024xf32>
    %cst_57 = arith.constant dense<0.000000e+00> : vector<1x32xf32>
    %68 = tpu.matmul %66, %67, %cst_57 {dimension_numbers = #tpu.dot_dimension_numbers<[1], [1], [0], [0], [0, 0, 1, 0], [], []>} : vector<1x1024xf32>, vector<32x1024xf32>, vector<1x32xf32> -> vector<1x32xf32>
    %cst_58 = arith.constant 0.001953125 : f32
    %69 = vector.broadcast %cst_58 : f32 to vector<1x32xf32>
    %70 = arith.mulf %68, %69 : vector<1x32xf32>
    %c0_59 = arith.constant 0 : index
    %c0_60 = arith.constant 0 : index
    %71 = vector.load %arg6[%c0_59, %c0_60] : memref<5x32xf32, #tpu.memory_space<vmem>>, vector<1x32xf32>
    %72 = arith.addf %70, %71 : vector<1x32xf32>
    %cst_61 = arith.constant 0.000000e+00 : f32
    %73 = vector.broadcast %cst_61 : f32 to vector<1x32xf32>
    %74 = arith.subf %73, %72 : vector<1x32xf32>
    %75 = math.exp %74 : vector<1x32xf32>
    %cst_62 = arith.constant 1.000000e+00 : f32
    %76 = vector.broadcast %cst_62 : f32 to vector<1x32xf32>
    %77 = arith.addf %76, %75 : vector<1x32xf32>
    %78 = arith.divf %72, %77 : vector<1x32xf32>
    %c0_63 = arith.constant 0 : index
    %c0_64 = arith.constant 0 : index
    %c0_65 = arith.constant 0 : index
    %79 = vector.load %arg7[%c0_63, %c0_64, %c0_65] : memref<5x32x32xf32, #tpu.memory_space<vmem>>, vector<1x32x32xf32>
    %80 = vector.shape_cast %79 : vector<1x32x32xf32> to vector<32x32xf32>
    %cst_66 = arith.constant dense<0.000000e+00> : vector<1x32xf32>
    %81 = tpu.matmul %78, %80, %cst_66 {dimension_numbers = #tpu.dot_dimension_numbers<[1], [0], [0], [1], [0, 0, 1, 1], [], []>} : vector<1x32xf32>, vector<32x32xf32>, vector<1x32xf32> -> vector<1x32xf32>
    %82 = arith.addf %43, %81 : vector<1x32xf32>
    %c1_i32_67 = arith.constant 1 : i32
    %c0_i32_68 = arith.constant 0 : i32
    %83 = tpu.memref_slice %arg43[%c1_i32_67, %c0_i32_68] : memref<5x3x!tpu.dma_semaphore, #tpu.memory_space<semaphore_mem>> -> memref<1x1x!tpu.dma_semaphore, #tpu.memory_space<semaphore_mem>>
    %84 = tpu.memref_squeeze %83 : memref<1x1x!tpu.dma_semaphore, #tpu.memory_space<semaphore_mem>> -> memref<!tpu.dma_semaphore, #tpu.memory_space<semaphore_mem>>
    tpu.wait_dma2 semaphore(%84 : memref<!tpu.dma_semaphore, #tpu.memory_space<semaphore_mem>>) src(%arg12 : memref<96x512xf32, #tpu.memory_space<any>>) dst(%arg29 : memref<96x512xf32, #tpu.memory_space<vmem>>)
    %c1_i32_69 = arith.constant 1 : i32
    %c1_i32_70 = arith.constant 1 : i32
    %85 = tpu.memref_slice %arg43[%c1_i32_69, %c1_i32_70] : memref<5x3x!tpu.dma_semaphore, #tpu.memory_space<semaphore_mem>> -> memref<1x1x!tpu.dma_semaphore, #tpu.memory_space<semaphore_mem>>
    %86 = tpu.memref_squeeze %85 : memref<1x1x!tpu.dma_semaphore, #tpu.memory_space<semaphore_mem>> -> memref<!tpu.dma_semaphore, #tpu.memory_space<semaphore_mem>>
    tpu.wait_dma2 semaphore(%86 : memref<!tpu.dma_semaphore, #tpu.memory_space<semaphore_mem>>) src(%arg17 : memref<32x512xbf16, #tpu.memory_space<any>>) dst(%arg34 : memref<32x512xbf16, #tpu.memory_space<vmem>>)
    %c1_i32_71 = arith.constant 1 : i32
    %c2_i32_72 = arith.constant 2 : i32
    %87 = tpu.memref_slice %arg43[%c1_i32_71, %c2_i32_72] : memref<5x3x!tpu.dma_semaphore, #tpu.memory_space<semaphore_mem>> -> memref<1x1x!tpu.dma_semaphore, #tpu.memory_space<semaphore_mem>>
    %88 = tpu.memref_squeeze %87 : memref<1x1x!tpu.dma_semaphore, #tpu.memory_space<semaphore_mem>> -> memref<!tpu.dma_semaphore, #tpu.memory_space<semaphore_mem>>
    tpu.wait_dma2 semaphore(%88 : memref<!tpu.dma_semaphore, #tpu.memory_space<semaphore_mem>>) src(%arg22 : memref<96x1024xbf16, #tpu.memory_space<any>>) dst(%arg39 : memref<96x1024xbf16, #tpu.memory_space<vmem>>)
    %c0_73 = arith.constant 0 : index
    %c0_74 = arith.constant 0 : index
    %89 = vector.load %arg29[%c0_73, %c0_74] : memref<96x512xf32, #tpu.memory_space<vmem>>, vector<96x512xf32>
    %cst_75 = arith.constant 0.000000e+00 : f32
    %90 = vector.broadcast %cst_75 : f32 to vector<96x512xf32>
    %91 = arith.subf %90, %89 : vector<96x512xf32>
    %92 = math.exp %91 : vector<96x512xf32>
    %cst_76 = arith.constant 1.000000e+00 : f32
    %93 = vector.broadcast %cst_76 : f32 to vector<96x512xf32>
    %94 = arith.addf %93, %92 : vector<96x512xf32>
    %95 = arith.divf %89, %94 : vector<96x512xf32>
    %c0_77 = arith.constant 0 : index
    %c0_78 = arith.constant 0 : index
    %96 = vector.load %arg34[%c0_77, %c0_78] : memref<32x512xbf16, #tpu.memory_space<vmem>>, vector<32x512xbf16>
    %97 = arith.truncf %95 : vector<96x512xf32> to vector<96x512xbf16>
    %cst_79 = arith.constant dense<0.000000e+00> : vector<32x96xf32>
    %98 = tpu.matmul %96, %97, %cst_79 {dimension_numbers = #tpu.dot_dimension_numbers<[1], [1], [0], [0], [0, 0, 1, 0], [], []>} : vector<32x512xbf16>, vector<96x512xbf16>, vector<32x96xf32> -> vector<32x96xf32>
    %99 = arith.truncf %98 : vector<32x96xf32> to vector<32x96xbf16>
    %c0_80 = arith.constant 0 : index
    %c0_81 = arith.constant 0 : index
    %100 = vector.load %arg39[%c0_80, %c0_81] : memref<96x1024xbf16, #tpu.memory_space<vmem>>, vector<96x1024xbf16>
    %cst_82 = arith.constant dense<0.000000e+00> : vector<32x1024xf32>
    %101 = tpu.matmul %99, %100, %cst_82 {dimension_numbers = #tpu.dot_dimension_numbers<[1], [0], [0], [1], [0, 0, 1, 1], [], []>} : vector<32x96xbf16>, vector<96x1024xbf16>, vector<32x1024xf32> -> vector<32x1024xf32>
    %c0_83 = arith.constant 0 : index
    %c0_84 = arith.constant 0 : index
    %102 = vector.load %arg4[%c0_83, %c0_84] : memref<32x1024xf32, #tpu.memory_space<vmem>>, vector<32x1024xf32>
    %103 = arith.mulf %101, %102 : vector<32x1024xf32>
    %cst_85 = arith.constant dense<0.000000e+00> : vector<1024xf32>
    %104 = vector.multi_reduction <add>, %103, %cst_85 [0] : vector<32x1024xf32> to vector<1024xf32>
    %105 = vector.shape_cast %104 : vector<1024xf32> to vector<1x1024xf32>
    %c0_86 = arith.constant 0 : index
    %c0_87 = arith.constant 0 : index
    %106 = vector.load %arg5[%c0_86, %c0_87] : memref<32x1024xf32, #tpu.memory_space<vmem>>, vector<32x1024xf32>
    %cst_88 = arith.constant dense<0.000000e+00> : vector<1x32xf32>
    %107 = tpu.matmul %105, %106, %cst_88 {dimension_numbers = #tpu.dot_dimension_numbers<[1], [1], [0], [0], [0, 0, 1, 0], [], []>} : vector<1x1024xf32>, vector<32x1024xf32>, vector<1x32xf32> -> vector<1x32xf32>
    %cst_89 = arith.constant 0.00462962966 : f32
    %108 = vector.broadcast %cst_89 : f32 to vector<1x32xf32>
    %109 = arith.mulf %107, %108 : vector<1x32xf32>
    %c1 = arith.constant 1 : index
    %c0_90 = arith.constant 0 : index
    %110 = vector.load %arg6[%c1, %c0_90] : memref<5x32xf32, #tpu.memory_space<vmem>>, vector<1x32xf32>
    %111 = arith.addf %109, %110 : vector<1x32xf32>
    %cst_91 = arith.constant 0.000000e+00 : f32
    %112 = vector.broadcast %cst_91 : f32 to vector<1x32xf32>
    %113 = arith.subf %112, %111 : vector<1x32xf32>
    %114 = math.exp %113 : vector<1x32xf32>
    %cst_92 = arith.constant 1.000000e+00 : f32
    %115 = vector.broadcast %cst_92 : f32 to vector<1x32xf32>
    %116 = arith.addf %115, %114 : vector<1x32xf32>
    %117 = arith.divf %111, %116 : vector<1x32xf32>
    %c1_93 = arith.constant 1 : index
    %c0_94 = arith.constant 0 : index
    %c0_95 = arith.constant 0 : index
    %118 = vector.load %arg7[%c1_93, %c0_94, %c0_95] : memref<5x32x32xf32, #tpu.memory_space<vmem>>, vector<1x32x32xf32>
    %119 = vector.shape_cast %118 : vector<1x32x32xf32> to vector<32x32xf32>
    %cst_96 = arith.constant dense<0.000000e+00> : vector<1x32xf32>
    %120 = tpu.matmul %117, %119, %cst_96 {dimension_numbers = #tpu.dot_dimension_numbers<[1], [0], [0], [1], [0, 0, 1, 1], [], []>} : vector<1x32xf32>, vector<32x32xf32>, vector<1x32xf32> -> vector<1x32xf32>
    %121 = arith.addf %82, %120 : vector<1x32xf32>
    %c2_i32_97 = arith.constant 2 : i32
    %c0_i32_98 = arith.constant 0 : i32
    %122 = tpu.memref_slice %arg43[%c2_i32_97, %c0_i32_98] : memref<5x3x!tpu.dma_semaphore, #tpu.memory_space<semaphore_mem>> -> memref<1x1x!tpu.dma_semaphore, #tpu.memory_space<semaphore_mem>>
    %123 = tpu.memref_squeeze %122 : memref<1x1x!tpu.dma_semaphore, #tpu.memory_space<semaphore_mem>> -> memref<!tpu.dma_semaphore, #tpu.memory_space<semaphore_mem>>
    tpu.wait_dma2 semaphore(%123 : memref<!tpu.dma_semaphore, #tpu.memory_space<semaphore_mem>>) src(%arg13 : memref<96x216xf32, #tpu.memory_space<any>>) dst(%arg30 : memref<96x216xf32, #tpu.memory_space<vmem>>)
    %c2_i32_99 = arith.constant 2 : i32
    %c1_i32_100 = arith.constant 1 : i32
    %124 = tpu.memref_slice %arg43[%c2_i32_99, %c1_i32_100] : memref<5x3x!tpu.dma_semaphore, #tpu.memory_space<semaphore_mem>> -> memref<1x1x!tpu.dma_semaphore, #tpu.memory_space<semaphore_mem>>
    %125 = tpu.memref_squeeze %124 : memref<1x1x!tpu.dma_semaphore, #tpu.memory_space<semaphore_mem>> -> memref<!tpu.dma_semaphore, #tpu.memory_space<semaphore_mem>>
    tpu.wait_dma2 semaphore(%125 : memref<!tpu.dma_semaphore, #tpu.memory_space<semaphore_mem>>) src(%arg18 : memref<32x216xbf16, #tpu.memory_space<any>>) dst(%arg35 : memref<32x216xbf16, #tpu.memory_space<vmem>>)
    %c2_i32_101 = arith.constant 2 : i32
    %c2_i32_102 = arith.constant 2 : i32
    %126 = tpu.memref_slice %arg43[%c2_i32_101, %c2_i32_102] : memref<5x3x!tpu.dma_semaphore, #tpu.memory_space<semaphore_mem>> -> memref<1x1x!tpu.dma_semaphore, #tpu.memory_space<semaphore_mem>>
    %127 = tpu.memref_squeeze %126 : memref<1x1x!tpu.dma_semaphore, #tpu.memory_space<semaphore_mem>> -> memref<!tpu.dma_semaphore, #tpu.memory_space<semaphore_mem>>
    tpu.wait_dma2 semaphore(%127 : memref<!tpu.dma_semaphore, #tpu.memory_space<semaphore_mem>>) src(%arg23 : memref<96x1024xbf16, #tpu.memory_space<any>>) dst(%arg40 : memref<96x1024xbf16, #tpu.memory_space<vmem>>)
    %c0_103 = arith.constant 0 : index
    %c0_104 = arith.constant 0 : index
    %128 = vector.load %arg30[%c0_103, %c0_104] : memref<96x216xf32, #tpu.memory_space<vmem>>, vector<96x216xf32>
    %cst_105 = arith.constant 0.000000e+00 : f32
    %129 = vector.broadcast %cst_105 : f32 to vector<96x216xf32>
    %130 = arith.subf %129, %128 : vector<96x216xf32>
    %131 = math.exp %130 : vector<96x216xf32>
    %cst_106 = arith.constant 1.000000e+00 : f32
    %132 = vector.broadcast %cst_106 : f32 to vector<96x216xf32>
    %133 = arith.addf %132, %131 : vector<96x216xf32>
    %134 = arith.divf %128, %133 : vector<96x216xf32>
    %c0_107 = arith.constant 0 : index
    %c0_108 = arith.constant 0 : index
    %135 = vector.load %arg35[%c0_107, %c0_108] : memref<32x216xbf16, #tpu.memory_space<vmem>>, vector<32x216xbf16>
    %136 = arith.truncf %134 : vector<96x216xf32> to vector<96x216xbf16>
    %cst_109 = arith.constant dense<0.000000e+00> : vector<32x96xf32>
    %137 = tpu.matmul %135, %136, %cst_109 {dimension_numbers = #tpu.dot_dimension_numbers<[1], [1], [0], [0], [0, 0, 1, 0], [], []>} : vector<32x216xbf16>, vector<96x216xbf16>, vector<32x96xf32> -> vector<32x96xf32>
    %138 = arith.truncf %137 : vector<32x96xf32> to vector<32x96xbf16>
    %c0_110 = arith.constant 0 : index
    %c0_111 = arith.constant 0 : index
    %139 = vector.load %arg40[%c0_110, %c0_111] : memref<96x1024xbf16, #tpu.memory_space<vmem>>, vector<96x1024xbf16>
    %cst_112 = arith.constant dense<0.000000e+00> : vector<32x1024xf32>
    %140 = tpu.matmul %138, %139, %cst_112 {dimension_numbers = #tpu.dot_dimension_numbers<[1], [0], [0], [1], [0, 0, 1, 1], [], []>} : vector<32x96xbf16>, vector<96x1024xbf16>, vector<32x1024xf32> -> vector<32x1024xf32>
    %c0_113 = arith.constant 0 : index
    %c0_114 = arith.constant 0 : index
    %141 = vector.load %arg4[%c0_113, %c0_114] : memref<32x1024xf32, #tpu.memory_space<vmem>>, vector<32x1024xf32>
    %142 = arith.mulf %140, %141 : vector<32x1024xf32>
    %cst_115 = arith.constant dense<0.000000e+00> : vector<1024xf32>
    %143 = vector.multi_reduction <add>, %142, %cst_115 [0] : vector<32x1024xf32> to vector<1024xf32>
    %144 = vector.shape_cast %143 : vector<1024xf32> to vector<1x1024xf32>
    %c0_116 = arith.constant 0 : index
    %c0_117 = arith.constant 0 : index
    %145 = vector.load %arg5[%c0_116, %c0_117] : memref<32x1024xf32, #tpu.memory_space<vmem>>, vector<32x1024xf32>
    %cst_118 = arith.constant dense<0.000000e+00> : vector<1x32xf32>
    %146 = tpu.matmul %144, %145, %cst_118 {dimension_numbers = #tpu.dot_dimension_numbers<[1], [1], [0], [0], [0, 0, 1, 0], [], []>} : vector<1x1024xf32>, vector<32x1024xf32>, vector<1x32xf32> -> vector<1x32xf32>
    %cst_119 = arith.constant 1.562500e-02 : f32
    %147 = vector.broadcast %cst_119 : f32 to vector<1x32xf32>
    %148 = arith.mulf %146, %147 : vector<1x32xf32>
    %c2 = arith.constant 2 : index
    %c0_120 = arith.constant 0 : index
    %149 = vector.load %arg6[%c2, %c0_120] : memref<5x32xf32, #tpu.memory_space<vmem>>, vector<1x32xf32>
    %150 = arith.addf %148, %149 : vector<1x32xf32>
    %cst_121 = arith.constant 0.000000e+00 : f32
    %151 = vector.broadcast %cst_121 : f32 to vector<1x32xf32>
    %152 = arith.subf %151, %150 : vector<1x32xf32>
    %153 = math.exp %152 : vector<1x32xf32>
    %cst_122 = arith.constant 1.000000e+00 : f32
    %154 = vector.broadcast %cst_122 : f32 to vector<1x32xf32>
    %155 = arith.addf %154, %153 : vector<1x32xf32>
    %156 = arith.divf %150, %155 : vector<1x32xf32>
    %c2_123 = arith.constant 2 : index
    %c0_124 = arith.constant 0 : index
    %c0_125 = arith.constant 0 : index
    %157 = vector.load %arg7[%c2_123, %c0_124, %c0_125] : memref<5x32x32xf32, #tpu.memory_space<vmem>>, vector<1x32x32xf32>
    %158 = vector.shape_cast %157 : vector<1x32x32xf32> to vector<32x32xf32>
    %cst_126 = arith.constant dense<0.000000e+00> : vector<1x32xf32>
    %159 = tpu.matmul %156, %158, %cst_126 {dimension_numbers = #tpu.dot_dimension_numbers<[1], [0], [0], [1], [0, 0, 1, 1], [], []>} : vector<1x32xf32>, vector<32x32xf32>, vector<1x32xf32> -> vector<1x32xf32>
    %160 = arith.addf %121, %159 : vector<1x32xf32>
    %c3_i32_127 = arith.constant 3 : i32
    %c0_i32_128 = arith.constant 0 : i32
    %161 = tpu.memref_slice %arg43[%c3_i32_127, %c0_i32_128] : memref<5x3x!tpu.dma_semaphore, #tpu.memory_space<semaphore_mem>> -> memref<1x1x!tpu.dma_semaphore, #tpu.memory_space<semaphore_mem>>
    %162 = tpu.memref_squeeze %161 : memref<1x1x!tpu.dma_semaphore, #tpu.memory_space<semaphore_mem>> -> memref<!tpu.dma_semaphore, #tpu.memory_space<semaphore_mem>>
    tpu.wait_dma2 semaphore(%162 : memref<!tpu.dma_semaphore, #tpu.memory_space<semaphore_mem>>) src(%arg14 : memref<96x216xf32, #tpu.memory_space<any>>) dst(%arg31 : memref<96x216xf32, #tpu.memory_space<vmem>>)
    %c3_i32_129 = arith.constant 3 : i32
    %c1_i32_130 = arith.constant 1 : i32
    %163 = tpu.memref_slice %arg43[%c3_i32_129, %c1_i32_130] : memref<5x3x!tpu.dma_semaphore, #tpu.memory_space<semaphore_mem>> -> memref<1x1x!tpu.dma_semaphore, #tpu.memory_space<semaphore_mem>>
    %164 = tpu.memref_squeeze %163 : memref<1x1x!tpu.dma_semaphore, #tpu.memory_space<semaphore_mem>> -> memref<!tpu.dma_semaphore, #tpu.memory_space<semaphore_mem>>
    tpu.wait_dma2 semaphore(%164 : memref<!tpu.dma_semaphore, #tpu.memory_space<semaphore_mem>>) src(%arg19 : memref<32x216xbf16, #tpu.memory_space<any>>) dst(%arg36 : memref<32x216xbf16, #tpu.memory_space<vmem>>)
    %c3_i32_131 = arith.constant 3 : i32
    %c2_i32_132 = arith.constant 2 : i32
    %165 = tpu.memref_slice %arg43[%c3_i32_131, %c2_i32_132] : memref<5x3x!tpu.dma_semaphore, #tpu.memory_space<semaphore_mem>> -> memref<1x1x!tpu.dma_semaphore, #tpu.memory_space<semaphore_mem>>
    %166 = tpu.memref_squeeze %165 : memref<1x1x!tpu.dma_semaphore, #tpu.memory_space<semaphore_mem>> -> memref<!tpu.dma_semaphore, #tpu.memory_space<semaphore_mem>>
    tpu.wait_dma2 semaphore(%166 : memref<!tpu.dma_semaphore, #tpu.memory_space<semaphore_mem>>) src(%arg24 : memref<96x1024xbf16, #tpu.memory_space<any>>) dst(%arg41 : memref<96x1024xbf16, #tpu.memory_space<vmem>>)
    %c0_133 = arith.constant 0 : index
    %c0_134 = arith.constant 0 : index
    %167 = vector.load %arg31[%c0_133, %c0_134] : memref<96x216xf32, #tpu.memory_space<vmem>>, vector<96x216xf32>
    %cst_135 = arith.constant 0.000000e+00 : f32
    %168 = vector.broadcast %cst_135 : f32 to vector<96x216xf32>
    %169 = arith.subf %168, %167 : vector<96x216xf32>
    %170 = math.exp %169 : vector<96x216xf32>
    %cst_136 = arith.constant 1.000000e+00 : f32
    %171 = vector.broadcast %cst_136 : f32 to vector<96x216xf32>
    %172 = arith.addf %171, %170 : vector<96x216xf32>
    %173 = arith.divf %167, %172 : vector<96x216xf32>
    %c0_137 = arith.constant 0 : index
    %c0_138 = arith.constant 0 : index
    %174 = vector.load %arg36[%c0_137, %c0_138] : memref<32x216xbf16, #tpu.memory_space<vmem>>, vector<32x216xbf16>
    %175 = arith.truncf %173 : vector<96x216xf32> to vector<96x216xbf16>
    %cst_139 = arith.constant dense<0.000000e+00> : vector<32x96xf32>
    %176 = tpu.matmul %174, %175, %cst_139 {dimension_numbers = #tpu.dot_dimension_numbers<[1], [1], [0], [0], [0, 0, 1, 0], [], []>} : vector<32x216xbf16>, vector<96x216xbf16>, vector<32x96xf32> -> vector<32x96xf32>
    %177 = arith.truncf %176 : vector<32x96xf32> to vector<32x96xbf16>
    %c0_140 = arith.constant 0 : index
    %c0_141 = arith.constant 0 : index
    %178 = vector.load %arg41[%c0_140, %c0_141] : memref<96x1024xbf16, #tpu.memory_space<vmem>>, vector<96x1024xbf16>
    %cst_142 = arith.constant dense<0.000000e+00> : vector<32x1024xf32>
    %179 = tpu.matmul %177, %178, %cst_142 {dimension_numbers = #tpu.dot_dimension_numbers<[1], [0], [0], [1], [0, 0, 1, 1], [], []>} : vector<32x96xbf16>, vector<96x1024xbf16>, vector<32x1024xf32> -> vector<32x1024xf32>
    %c0_143 = arith.constant 0 : index
    %c0_144 = arith.constant 0 : index
    %180 = vector.load %arg4[%c0_143, %c0_144] : memref<32x1024xf32, #tpu.memory_space<vmem>>, vector<32x1024xf32>
    %181 = arith.mulf %179, %180 : vector<32x1024xf32>
    %cst_145 = arith.constant dense<0.000000e+00> : vector<1024xf32>
    %182 = vector.multi_reduction <add>, %181, %cst_145 [0] : vector<32x1024xf32> to vector<1024xf32>
    %183 = vector.shape_cast %182 : vector<1024xf32> to vector<1x1024xf32>
    %c0_146 = arith.constant 0 : index
    %c0_147 = arith.constant 0 : index
    %184 = vector.load %arg5[%c0_146, %c0_147] : memref<32x1024xf32, #tpu.memory_space<vmem>>, vector<32x1024xf32>
    %cst_148 = arith.constant dense<0.000000e+00> : vector<1x32xf32>
    %185 = tpu.matmul %183, %184, %cst_148 {dimension_numbers = #tpu.dot_dimension_numbers<[1], [1], [0], [0], [0, 0, 1, 0], [], []>} : vector<1x1024xf32>, vector<32x1024xf32>, vector<1x32xf32> -> vector<1x32xf32>
    %cst_149 = arith.constant 1.562500e-02 : f32
    %186 = vector.broadcast %cst_149 : f32 to vector<1x32xf32>
    %187 = arith.mulf %185, %186 : vector<1x32xf32>
    %c3 = arith.constant 3 : index
    %c0_150 = arith.constant 0 : index
    %188 = vector.load %arg6[%c3, %c0_150] : memref<5x32xf32, #tpu.memory_space<vmem>>, vector<1x32xf32>
    %189 = arith.addf %187, %188 : vector<1x32xf32>
    %cst_151 = arith.constant 0.000000e+00 : f32
    %190 = vector.broadcast %cst_151 : f32 to vector<1x32xf32>
    %191 = arith.subf %190, %189 : vector<1x32xf32>
    %192 = math.exp %191 : vector<1x32xf32>
    %cst_152 = arith.constant 1.000000e+00 : f32
    %193 = vector.broadcast %cst_152 : f32 to vector<1x32xf32>
    %194 = arith.addf %193, %192 : vector<1x32xf32>
    %195 = arith.divf %189, %194 : vector<1x32xf32>
    %c3_153 = arith.constant 3 : index
    %c0_154 = arith.constant 0 : index
    %c0_155 = arith.constant 0 : index
    %196 = vector.load %arg7[%c3_153, %c0_154, %c0_155] : memref<5x32x32xf32, #tpu.memory_space<vmem>>, vector<1x32x32xf32>
    %197 = vector.shape_cast %196 : vector<1x32x32xf32> to vector<32x32xf32>
    %cst_156 = arith.constant dense<0.000000e+00> : vector<1x32xf32>
    %198 = tpu.matmul %195, %197, %cst_156 {dimension_numbers = #tpu.dot_dimension_numbers<[1], [0], [0], [1], [0, 0, 1, 1], [], []>} : vector<1x32xf32>, vector<32x32xf32>, vector<1x32xf32> -> vector<1x32xf32>
    %199 = arith.addf %160, %198 : vector<1x32xf32>
    %c4_i32_157 = arith.constant 4 : i32
    %c0_i32_158 = arith.constant 0 : i32
    %200 = tpu.memref_slice %arg43[%c4_i32_157, %c0_i32_158] : memref<5x3x!tpu.dma_semaphore, #tpu.memory_space<semaphore_mem>> -> memref<1x1x!tpu.dma_semaphore, #tpu.memory_space<semaphore_mem>>
    %201 = tpu.memref_squeeze %200 : memref<1x1x!tpu.dma_semaphore, #tpu.memory_space<semaphore_mem>> -> memref<!tpu.dma_semaphore, #tpu.memory_space<semaphore_mem>>
    tpu.wait_dma2 semaphore(%201 : memref<!tpu.dma_semaphore, #tpu.memory_space<semaphore_mem>>) src(%arg15 : memref<96x216xf32, #tpu.memory_space<any>>) dst(%arg32 : memref<96x216xf32, #tpu.memory_space<vmem>>)
    %c4_i32_159 = arith.constant 4 : i32
    %c1_i32_160 = arith.constant 1 : i32
    %202 = tpu.memref_slice %arg43[%c4_i32_159, %c1_i32_160] : memref<5x3x!tpu.dma_semaphore, #tpu.memory_space<semaphore_mem>> -> memref<1x1x!tpu.dma_semaphore, #tpu.memory_space<semaphore_mem>>
    %203 = tpu.memref_squeeze %202 : memref<1x1x!tpu.dma_semaphore, #tpu.memory_space<semaphore_mem>> -> memref<!tpu.dma_semaphore, #tpu.memory_space<semaphore_mem>>
    tpu.wait_dma2 semaphore(%203 : memref<!tpu.dma_semaphore, #tpu.memory_space<semaphore_mem>>) src(%arg20 : memref<32x216xbf16, #tpu.memory_space<any>>) dst(%arg37 : memref<32x216xbf16, #tpu.memory_space<vmem>>)
    %c4_i32_161 = arith.constant 4 : i32
    %c2_i32_162 = arith.constant 2 : i32
    %204 = tpu.memref_slice %arg43[%c4_i32_161, %c2_i32_162] : memref<5x3x!tpu.dma_semaphore, #tpu.memory_space<semaphore_mem>> -> memref<1x1x!tpu.dma_semaphore, #tpu.memory_space<semaphore_mem>>
    %205 = tpu.memref_squeeze %204 : memref<1x1x!tpu.dma_semaphore, #tpu.memory_space<semaphore_mem>> -> memref<!tpu.dma_semaphore, #tpu.memory_space<semaphore_mem>>
    tpu.wait_dma2 semaphore(%205 : memref<!tpu.dma_semaphore, #tpu.memory_space<semaphore_mem>>) src(%arg25 : memref<96x1024xbf16, #tpu.memory_space<any>>) dst(%arg42 : memref<96x1024xbf16, #tpu.memory_space<vmem>>)
    %c0_163 = arith.constant 0 : index
    %c0_164 = arith.constant 0 : index
    %206 = vector.load %arg32[%c0_163, %c0_164] : memref<96x216xf32, #tpu.memory_space<vmem>>, vector<96x216xf32>
    %cst_165 = arith.constant 0.000000e+00 : f32
    %207 = vector.broadcast %cst_165 : f32 to vector<96x216xf32>
    %208 = arith.subf %207, %206 : vector<96x216xf32>
    %209 = math.exp %208 : vector<96x216xf32>
    %cst_166 = arith.constant 1.000000e+00 : f32
    %210 = vector.broadcast %cst_166 : f32 to vector<96x216xf32>
    %211 = arith.addf %210, %209 : vector<96x216xf32>
    %212 = arith.divf %206, %211 : vector<96x216xf32>
    %c0_167 = arith.constant 0 : index
    %c0_168 = arith.constant 0 : index
    %213 = vector.load %arg37[%c0_167, %c0_168] : memref<32x216xbf16, #tpu.memory_space<vmem>>, vector<32x216xbf16>
    %214 = arith.truncf %212 : vector<96x216xf32> to vector<96x216xbf16>
    %cst_169 = arith.constant dense<0.000000e+00> : vector<32x96xf32>
    %215 = tpu.matmul %213, %214, %cst_169 {dimension_numbers = #tpu.dot_dimension_numbers<[1], [1], [0], [0], [0, 0, 1, 0], [], []>} : vector<32x216xbf16>, vector<96x216xbf16>, vector<32x96xf32> -> vector<32x96xf32>
    %216 = arith.truncf %215 : vector<32x96xf32> to vector<32x96xbf16>
    %c0_170 = arith.constant 0 : index
    %c0_171 = arith.constant 0 : index
    %217 = vector.load %arg42[%c0_170, %c0_171] : memref<96x1024xbf16, #tpu.memory_space<vmem>>, vector<96x1024xbf16>
    %cst_172 = arith.constant dense<0.000000e+00> : vector<32x1024xf32>
    %218 = tpu.matmul %216, %217, %cst_172 {dimension_numbers = #tpu.dot_dimension_numbers<[1], [0], [0], [1], [0, 0, 1, 1], [], []>} : vector<32x96xbf16>, vector<96x1024xbf16>, vector<32x1024xf32> -> vector<32x1024xf32>
    %c0_173 = arith.constant 0 : index
    %c0_174 = arith.constant 0 : index
    %219 = vector.load %arg4[%c0_173, %c0_174] : memref<32x1024xf32, #tpu.memory_space<vmem>>, vector<32x1024xf32>
    %220 = arith.mulf %218, %219 : vector<32x1024xf32>
    %cst_175 = arith.constant dense<0.000000e+00> : vector<1024xf32>
    %221 = vector.multi_reduction <add>, %220, %cst_175 [0] : vector<32x1024xf32> to vector<1024xf32>
    %222 = vector.shape_cast %221 : vector<1024xf32> to vector<1x1024xf32>
    %c0_176 = arith.constant 0 : index
    %c0_177 = arith.constant 0 : index
    %223 = vector.load %arg5[%c0_176, %c0_177] : memref<32x1024xf32, #tpu.memory_space<vmem>>, vector<32x1024xf32>
    %cst_178 = arith.constant dense<0.000000e+00> : vector<1x32xf32>
    %224 = tpu.matmul %222, %223, %cst_178 {dimension_numbers = #tpu.dot_dimension_numbers<[1], [1], [0], [0], [0, 0, 1, 0], [], []>} : vector<1x1024xf32>, vector<32x1024xf32>, vector<1x32xf32> -> vector<1x32xf32>
    %cst_179 = arith.constant 1.562500e-02 : f32
    %225 = vector.broadcast %cst_179 : f32 to vector<1x32xf32>
    %226 = arith.mulf %224, %225 : vector<1x32xf32>
    %c4 = arith.constant 4 : index
    %c0_180 = arith.constant 0 : index
    %227 = vector.load %arg6[%c4, %c0_180] : memref<5x32xf32, #tpu.memory_space<vmem>>, vector<1x32xf32>
    %228 = arith.addf %226, %227 : vector<1x32xf32>
    %cst_181 = arith.constant 0.000000e+00 : f32
    %229 = vector.broadcast %cst_181 : f32 to vector<1x32xf32>
    %230 = arith.subf %229, %228 : vector<1x32xf32>
    %231 = math.exp %230 : vector<1x32xf32>
    %cst_182 = arith.constant 1.000000e+00 : f32
    %232 = vector.broadcast %cst_182 : f32 to vector<1x32xf32>
    %233 = arith.addf %232, %231 : vector<1x32xf32>
    %234 = arith.divf %228, %233 : vector<1x32xf32>
    %c4_183 = arith.constant 4 : index
    %c0_184 = arith.constant 0 : index
    %c0_185 = arith.constant 0 : index
    %235 = vector.load %arg7[%c4_183, %c0_184, %c0_185] : memref<5x32x32xf32, #tpu.memory_space<vmem>>, vector<1x32x32xf32>
    %236 = vector.shape_cast %235 : vector<1x32x32xf32> to vector<32x32xf32>
    %cst_186 = arith.constant dense<0.000000e+00> : vector<1x32xf32>
    %237 = tpu.matmul %234, %236, %cst_186 {dimension_numbers = #tpu.dot_dimension_numbers<[1], [0], [0], [1], [0, 0, 1, 1], [], []>} : vector<1x32xf32>, vector<32x32xf32>, vector<1x32xf32> -> vector<1x32xf32>
    %238 = arith.addf %199, %237 : vector<1x32xf32>
    %cst_187 = arith.constant 0.000000e+00 : f32
    %239 = vector.broadcast %cst_187 : f32 to vector<1x32xf32>
    %240 = arith.subf %239, %238 : vector<1x32xf32>
    %241 = math.exp %240 : vector<1x32xf32>
    %cst_188 = arith.constant 1.000000e+00 : f32
    %242 = vector.broadcast %cst_188 : f32 to vector<1x32xf32>
    %243 = arith.addf %242, %241 : vector<1x32xf32>
    %244 = arith.divf %238, %243 : vector<1x32xf32>
    %c0_189 = arith.constant 0 : index
    %c0_190 = arith.constant 0 : index
    %245 = vector.load %arg9[%c0_189, %c0_190] : memref<32x32xf32, #tpu.memory_space<vmem>>, vector<32x32xf32>
    %cst_191 = arith.constant dense<0.000000e+00> : vector<1x32xf32>
    %246 = tpu.matmul %244, %245, %cst_191 {dimension_numbers = #tpu.dot_dimension_numbers<[1], [0], [0], [1], [0, 0, 1, 1], [], []>} : vector<1x32xf32>, vector<32x32xf32>, vector<1x32xf32> -> vector<1x32xf32>
    %c0_192 = arith.constant 0 : index
    %c0_193 = arith.constant 0 : index
    %247 = vector.load %arg10[%c0_192, %c0_193] : memref<1x32xf32, #tpu.memory_space<vmem>>, vector<1x32xf32>
    %248 = arith.addf %246, %247 : vector<1x32xf32>
    %c0_194 = arith.constant 0 : index
    %c0_195 = arith.constant 0 : index
    %249 = vector.load %arg27[%c0_194, %c0_195] : memref<1x32xf32, #tpu.memory_space<vmem>>, vector<1x32xf32>
    tpu.vector_store %arg27[%c0_194, %c0_195], %248 {strides = array<i32>} : memref<1x32xf32, #tpu.memory_space<vmem>>, vector<1x32xf32>,
    return
  }
  func.func @transform_0(%arg0: i32) -> (i32, i32) {
    %c0_i32 = arith.constant 0 : i32
    %c0_i32_0 = arith.constant 0 : i32
    %c0_i32_1 = arith.constant 0 : i32
    return %c0_i32, %c0_i32_0 : i32, i32
  }
  func.func @transform_1(%arg0: i32) -> (i32, i32) {
    %c0_i32 = arith.constant 0 : i32
    %c0_i32_0 = arith.constant 0 : i32
    %c0_i32_1 = arith.constant 0 : i32
    return %c0_i32, %c0_i32_0 : i32, i32
  }
  func.func @transform_2(%arg0: i32) -> (i32, i32) {
    %c0_i32 = arith.constant 0 : i32
    %c0_i32_0 = arith.constant 0 : i32
    %c0_i32_1 = arith.constant 0 : i32
    return %c0_i32, %c0_i32_0 : i32, i32
  }
  func.func @transform_3(%arg0: i32) -> (i32, i32) {
    %c0_i32 = arith.constant 0 : i32
    %c0_i32_0 = arith.constant 0 : i32
    %c0_i32_1 = arith.constant 0 : i32
    return %c0_i32, %c0_i32_0 : i32, i32
  }
  func.func @transform_4(%arg0: i32) -> (i32, i32) {
    %c0_i32 = arith.constant 0 : i32
    %c0_i32_0 = arith.constant 0 : i32
    %c0_i32_1 = arith.constant 0 : i32
    return %c0_i32, %c0_i32_0 : i32, i32
  }
  func.func @transform_5(%arg0: i32) -> (i32, i32) {
    %c0_i32 = arith.constant 0 : i32
    %c0_i32_0 = arith.constant 0 : i32
    %c0_i32_1 = arith.constant 0 : i32
    return %c0_i32, %c0_i32_0 : i32, i32
  }
  func.func @transform_6(%arg0: i32) -> (i32, i32, i32) {
    %c0_i32 = arith.constant 0 : i32
    %c0_i32_0 = arith.constant 0 : i32
    %c0_i32_1 = arith.constant 0 : i32
    %c0_i32_2 = arith.constant 0 : i32
    return %c0_i32, %c0_i32_0, %c0_i32_1 : i32, i32, i32
  }
  func.func @transform_7(%arg0: i32) -> (i32, i32) {
    %c0_i32 = arith.constant 0 : i32
    %c0_i32_0 = arith.constant 0 : i32
    %c0_i32_1 = arith.constant 0 : i32
    return %c0_i32, %c0_i32_0 : i32, i32
  }
  func.func @transform_8(%arg0: i32) -> (i32, i32) {
    %c0_i32 = arith.constant 0 : i32
    %c0_i32_0 = arith.constant 0 : i32
    %c0_i32_1 = arith.constant 0 : i32
    return %c0_i32, %c0_i32_0 : i32, i32
  }
  func.func @transform_9(%arg0: i32) -> (i32, i32) {
    %c0_i32 = arith.constant 0 : i32
    %c0_i32_0 = arith.constant 0 : i32
    %c0_i32_1 = arith.constant 0 : i32
    return %c0_i32, %c0_i32_0 : i32, i32
  }
  func.func @transform_25(%arg0: i32) -> (i32, i32) {
    %c0_i32 = arith.constant 0 : i32
    %c0_i32_0 = arith.constant 0 : i32
    %c0_i32_1 = arith.constant 0 : i32
    return %c0_i32, %c0_i32_0 : i32, i32
  }
  func.func @transform_26(%arg0: i32) -> (i32, i32) {
    %c0_i32 = arith.constant 0 : i32
    %c0_i32_0 = arith.constant 0 : i32
    %c0_i32_1 = arith.constant 0 : i32
    return %c0_i32, %c0_i32_0 : i32, i32
  }
}

</mosaic_0001>

<bundles_post_ra>
// kernel: pharmacophore_encoder_forward.1
= control target key start
LH: loop header
LB: loop body
LE: loop exit
PB: predicated region body
PF: predicated region fallthrough
CT: control target
= control target key end

     0   :  { %s16163_s0 = inlined_call_operand.vmem [shape: f32[8,192], index: 0, kind: input, shape index: {}]   ;;  %s16164_s1 = inlined_call_operand.vmem [shape: f32[192,32], index: 1, kind: input, shape index: {}]   ;;  %s16165_s2 = inlined_call_operand.vmem [shape: f32[1,32], index: 2, kind: input, shape index: {}]   ;;  %s16166_s3 = inlined_call_operand.vmem [shape: f32[32,1024], index: 3, kind: input, shape index: {}]   ;;  %s16167_s4 = inlined_call_operand.vmem [shape: f32[32,1024], index: 4, kind: input, shape index: {}]   ;;  %s16168_s5 = inlined_call_operand.vmem [shape: f32[5,32], index: 5, kind: input, shape index: {}]   ;;  %s16169_s6 = inlined_call_operand.vmem [shape: f32[5,32,32], index: 6, kind: input, shape index: {}]   ;;  %s16170_s7 = inlined_call_operand.vmem [shape: f32[1,32], index: 7, kind: input, shape index: {}]   ;;  %s16171_s8 = inlined_call_operand.vmem [shape: f32[32,32], index: 8, kind: input, shape index: {}]   ;;  %s16172_s9 = inlined_call_operand.vmem [shape: f32[1,32], index: 9, kind: input, shape index: {}]   ;;  %s16173_s10 = inlined_call_operand.vmem [shape: f32[96,1000], index: 10, kind: input, shape index: {}]   ;;  %s16174_s11 = inlined_call_operand.vmem [shape: f32[96,512], index: 11, kind: input, shape index: {}]   ;;  %s16175_s12 = inlined_call_operand.vmem [shape: f32[96,216], index: 12, kind: input, shape index: {}]   ;;  %s16176_s13 = inlined_call_operand.vmem [shape: f32[96,216], index: 13, kind: input, shape index: {}]   ;;  %s16177_s14 = inlined_call_operand.vmem [shape: f32[96,216], index: 14, kind: input, shape index: {}]   ;;  %s16178_s15 = inlined_call_operand.vmem [shape: bf16[32,1000], index: 15, kind: input, shape index: {}]   ;;  %s16179_s16 = inlined_call_operand.vmem [shape: bf16[32,512], index: 16, kind: input, shape index: {}]   ;;  %s16180_s17 = inlined_call_operand.vmem [shape: bf16[32,216], index: 17, kind: input, shape index: {}, may-alias: {17,18,19}]   ;;  %s16181_s18 = inlined_call_operand.vmem [shape: bf16[32,216], index: 18, kind: input, shape index: {}, may-alias: {17,18,19}]   ;;  %s16182_s19 = inlined_call_operand.vmem [shape: bf16[32,216], index: 19, kind: input, shape index: {}, may-alias: {17,18,19}]   ;;  %s16183_s20 = inlined_call_operand.vmem [shape: bf16[96,1024], index: 20, kind: input, shape index: {}]   ;;  %s16184_s21 = inlined_call_operand.vmem [shape: bf16[96,1024], index: 21, kind: input, shape index: {}]   ;;  %s16185_s22 = inlined_call_operand.vmem [shape: bf16[96,1024], index: 22, kind: input, shape index: {}]   ;;  %s16186_s23 = inlined_call_operand.vmem [shape: bf16[96,1024], index: 23, kind: input, shape index: {}]   ;;  %s16187_s24 = inlined_call_operand.vmem [shape: bf16[96,1024], index: 24, kind: input, shape index: {}]   ;;  %s16188_s25 = inlined_call_operand.hbm [shape: f32[8,32], index: 25, kind: output, shape index: {0}]   ;;  %s16189_s26 = inlined_call_operand.hbm [shape: f32[1,32], index: 26, kind: output, shape index: {1}]  }
   0x1   :  { %16653 = sst [smem:[#allocation508_spill]] %s16163_s0 }
   0x2   :  { %16654 = sst [smem:[#allocation509_spill]] %s16164_s1 }
   0x3   :  { %16655 = sst [smem:[#allocation510_spill]] %s16165_s2 }
   0x4   :  { %16656 = sst [smem:[#allocation511_spill]] %s16166_s3 }
   0x5   :  { %16657 = sst [smem:[#allocation512_spill]] %s16167_s4 }
   0x6   :  { %16658 = sst [smem:[#allocation513_spill]] %s16168_s5 }
   0x7   :  { %16659 = sst [smem:[#allocation514_spill]] %s16169_s6 }
   0x8   :  { %16660 = sst [smem:[#allocation515_spill]] %s16170_s7 }
   0x9   :  { %16661 = sst [smem:[#allocation516_spill]] %s16171_s8 }
   0xa   :  { %16662 = sst [smem:[#allocation517_spill]] %s16172_s9 }
   0xb   :  { %16663 = sst [smem:[#allocation518_spill]] %s16173_s10 }
   0xc   :  { %32 = vsyncpa [#allocation19], 0 }
   0xd   :  { %33 = vsyncpa [#allocation21], 0  ;;  %s16664_s7 = sld [smem:[#allocation518_spill]] }
  0x13   :  { %v11356_v0 = vld [vmem:[%s16664_s7] sm:$0xff]  ;;  %v11361_v1 = vld [vmem:[%s16664_s7 + $0x8] sm:$0xff]  ;;  %v11366_v2 = vld [vmem:[%s16664_s7 + $0x10] sm:$0xff] }
  0x14   :  { %16665 = vst [vmem:[#allocation54_spill] sm:$0xff] %v11356_v0  ;;  %16666 = vst [vmem:[#allocation55_spill] sm:$0xff] %v11366_v2  ;;  %v11371_v3 = vld [vmem:[%s16664_s7 + $0x18] sm:$0xff]  ;;  %v11376_v4 = vld [vmem:[%s16664_s7 + $0x20] sm:$0xff] }
  0x15   :  { %16667 = vst [vmem:[#allocation56_spill] sm:$0xff] %v11376_v4  ;;  %v11381_v5 = vld [vmem:[%s16664_s7 + $0x28] sm:$0xff]  ;;  %v11386_v6 = vld [vmem:[%s16664_s7 + $0x30] sm:$0xff]  ;;  %v11391_v7 = vld [vmem:[%s16664_s7 + $0x38] sm:$0xff] }
  0x16   :  { %16668 = vst [vmem:[#allocation57_spill] sm:$0xff] %v11381_v5  ;;  %16669 = vst [vmem:[#allocation58_spill] sm:$0xff] %v11386_v6  ;;  %v11396_v8 = vld [vmem:[%s16664_s7 + $0x40] sm:$0xff]  ;;  %v11401_v9 = vld [vmem:[%s16664_s7 + $0x48] sm:$0xff] }
  0x17   :  { %16670 = vst [vmem:[#allocation59_spill] sm:$0xff] %v11391_v7  ;;  %16671 = vst [vmem:[#allocation60_spill] sm:$0xff] %v11396_v8  ;;  %v11406_v10 = vld [vmem:[%s16664_s7 + $0x50] sm:$0xff]  ;;  %v11411_v11 = vld [vmem:[%s16664_s7 + $0x58] sm:$0xff] }
  0x18   :  { %16672 = vst [vmem:[#allocation61_spill] sm:$0xff] %v11406_v10  ;;  %16673 = vst [vmem:[#allocation62_spill] sm:$0xff] %v11411_v11  ;;  %v11416_v12 = vld [vmem:[%s16664_s7 + $0x60] sm:$0xff]  ;;  %v11421_v13 = vld [vmem:[%s16664_s7 + $0x68] sm:$0xff] }
  0x19   :  { %16674 = vst [vmem:[#allocation63_spill] sm:$0xff] %v11416_v12  ;;  %16675 = vst [vmem:[#allocation64_spill] sm:$0xff] %v11421_v13  ;;  %v11426_v14 = vld [vmem:[%s16664_s7 + $0x70] sm:$0xff]  ;;  %v11431_v15 = vld [vmem:[%s16664_s7 + $0x78] sm:$0xff] }
  0x1a   :  { %16676 = vst [vmem:[#allocation65_spill] sm:$0xff] %v11426_v14  ;;  %16677 = vst [vmem:[#allocation66_spill] sm:$0xff] %v11431_v15  ;;  %v11436_v16 = vld [vmem:[%s16664_s7 + $0x80] sm:$0xff]  ;;  %v11441_v17 = vld [vmem:[%s16664_s7 + $0x88] sm:$0xff] }
  0x1b   :  { %v11446_v18 = vld [vmem:[%s16664_s7 + $0x90] sm:$0xff]  ;;  %v11451_v19 = vld [vmem:[%s16664_s7 + $0x98] sm:$0xff]  ;;  %v11456_v20 = vld [vmem:[%s16664_s7 + $0xa0] sm:$0xff] }
  0x1c   :  { %16678 = vst [vmem:[#allocation67_spill] sm:$0xff] %v11456_v20  ;;  %v11461_v21 = vld [vmem:[%s16664_s7 + $0xa8] sm:$0xff]  ;;  %v11466_v22 = vld [vmem:[%s16664_s7 + $0xb0] sm:$0xff]  ;;  %v11471_v23 = vld [vmem:[%s16664_s7 + $0xb8] sm:$0xff] }
  0x1d   :  { %16679 = vst [vmem:[#allocation68_spill] sm:$0xff] %v11461_v21  ;;  %16680 = vst [vmem:[#allocation69_spill] sm:$0xff] %v11466_v22  ;;  %v11476_v24 = vld [vmem:[%s16664_s7 + $0xc0] sm:$0xff]  ;;  %v11481_v25 = vld [vmem:[%s16664_s7 + $0xc8] sm:$0xff] }
  0x1e   :  { %16681 = vst [vmem:[#allocation70_spill] sm:$0xff] %v11471_v23  ;;  %v11486_v26 = vld [vmem:[%s16664_s7 + $0xd0] sm:$0xff]  ;;  %v11491_v27 = vld [vmem:[%s16664_s7 + $0xd8] sm:$0xff]  ;;  %v11496_v28 = vld [vmem:[%s16664_s7 + $0xe0] sm:$0xff] }
  0x1f   :  { %16682 = vst [vmem:[#allocation71_spill] sm:$0xff] %v11496_v28  ;;  %v11501_v29 = vld [vmem:[%s16664_s7 + $0xe8] sm:$0xff]  ;;  %v11506_v30 = vld [vmem:[%s16664_s7 + $0xf0] sm:$0xff]  ;;  %v11511_v31 = vld [vmem:[%s16664_s7 + $0xf8] sm:$0xff] }
  0x20   :  { %16683 = vst [vmem:[#allocation72_spill] sm:$0xff] %v11501_v29  ;;  %16684 = vst [vmem:[#allocation73_spill] sm:$0xff] %v11506_v30  ;;  %v11516_v32 = vld [vmem:[%s16664_s7 + $0x100] sm:$0xff]  ;;  %v11521_v33 = vld [vmem:[%s16664_s7 + $0x108] sm:$0xff] }
  0x21   :  { %16685 = vst [vmem:[#allocation74_spill] sm:$0xff] %v11511_v31  ;;  %v11526_v34 = vld [vmem:[%s16664_s7 + $0x110] sm:$0xff]  ;;  %v11531_v35 = vld [vmem:[%s16664_s7 + $0x118] sm:$0xff]  ;;  %v11536_v36 = vld [vmem:[%s16664_s7 + $0x120] sm:$0xff] }
  0x22   :  { %16686 = vst [vmem:[#allocation75_spill] sm:$0xff] %v11536_v36  ;;  %v11541_v37 = vld [vmem:[%s16664_s7 + $0x128] sm:$0xff]  ;;  %v11546_v38 = vld [vmem:[%s16664_s7 + $0x130] sm:$0xff]  ;;  %v11551_v39 = vld [vmem:[%s16664_s7 + $0x138] sm:$0xff] }
  0x23   :  { %16687 = vst [vmem:[#allocation76_spill] sm:$0xff] %v11541_v37  ;;  %16688 = vst [vmem:[#allocation77_spill] sm:$0xff] %v11546_v38  ;;  %v11556_v40 = vld [vmem:[%s16664_s7 + $0x140] sm:$0xff]  ;;  %v11561_v41 = vld [vmem:[%s16664_s7 + $0x148] sm:$0xff] }
  0x24   :  { %16689 = vst [vmem:[#allocation78_spill] sm:$0xff] %v11551_v39  ;;  %v11566_v42 = vld [vmem:[%s16664_s7 + $0x150] sm:$0xff]  ;;  %v11571_v43 = vld [vmem:[%s16664_s7 + $0x158] sm:$0xff]  ;;  %v11576_v44 = vld [vmem:[%s16664_s7 + $0x160] sm:$0xff] }
  0x25   :  { %16690 = vst [vmem:[#allocation79_spill] sm:$0xff] %v11576_v44  ;;  %v11581_v45 = vld [vmem:[%s16664_s7 + $0x168] sm:$0xff]  ;;  %v11586_v46 = vld [vmem:[%s16664_s7 + $0x170] sm:$0xff]  ;;  %v11591_v47 = vld [vmem:[%s16664_s7 + $0x178] sm:$0xff] }
  0x26   :  { %16691 = vst [vmem:[#allocation80_spill] sm:$0xff] %v11581_v45  ;;  %16692 = vst [vmem:[#allocation81_spill] sm:$0xff] %v11586_v46  ;;  %v11596_v48 = vld [vmem:[%s16664_s7 + $0x180] sm:$0xff]  ;;  %v11601_v49 = vld [vmem:[%s16664_s7 + $0x188] sm:$0xff] }
  0x27   :  { %16693 = vst [vmem:[#allocation82_spill] sm:$0xff] %v11591_v47  ;;  %16694 = vst [vmem:[#allocation83_spill] sm:$0xff] %v11596_v48  ;;  %v11606_v50 = vld [vmem:[%s16664_s7 + $0x190] sm:$0xff]  ;;  %v11611_v51 = vld [vmem:[%s16664_s7 + $0x198] sm:$0xff] }
  0x28   :  { %16695 = vst [vmem:[#allocation84_spill] sm:$0xff] %v11606_v50  ;;  %v11616_v52 = vld [vmem:[%s16664_s7 + $0x1a0] sm:$0xff]  ;;  %v11621_v53 = vld [vmem:[%s16664_s7 + $0x1a8] sm:$0xff]  ;;  %v11626_v54 = vld [vmem:[%s16664_s7 + $0x1b0] sm:$0xff] }
  0x29   :  { %16696 = vst [vmem:[#allocation85_spill] sm:$0xff] %v11616_v52  ;;  %16697 = vst [vmem:[#allocation86_spill] sm:$0xff] %v11621_v53  ;;  %v11631_v55 = vld [vmem:[%s16664_s7 + $0x1b8] sm:$0xff]  ;;  %v11636_v56 = vld [vmem:[%s16664_s7 + $0x1c0] sm:$0xff] }
  0x2a   :  { %16698 = vst [vmem:[#allocation87_spill] sm:$0xff] %v11626_v54  ;;  %16699 = vst [vmem:[#allocation88_spill] sm:$0xff] %v11631_v55  ;;  %v11641_v57 = vld [vmem:[%s16664_s7 + $0x1c8] sm:$0xff]  ;;  %v11646_v58 = vld [vmem:[%s16664_s7 + $0x1d0] sm:$0xff] }
  0x2b   :  { %16700 = vst [vmem:[#allocation89_spill] sm:$0xff] %v11636_v56  ;;  %16701 = vst [vmem:[#allocation90_spill] sm:$0xff] %v11646_v58  ;;  %v11651_v59 = vld [vmem:[%s16664_s7 + $0x1d8] sm:$0xff]  ;;  %v11656_v60 = vld [vmem:[%s16664_s7 + $0x1e0] sm:$0xff] }
  0x2c   :  { %16702 = vst [vmem:[#allocation91_spill] sm:$0xff] %v11656_v60  ;;  %v11661_v61 = vld [vmem:[%s16664_s7 + $0x1e8] sm:$0xff]  ;;  %v11666_v62 = vld [vmem:[%s16664_s7 + $0x1f0] sm:$0xff]  ;;  %v11671_v63 = vld [vmem:[%s16664_s7 + $0x1f8] sm:$0xff] }
  0x2d   :  { %16703 = vst [vmem:[#allocation92_spill] sm:$0xff] %v11661_v61  ;;  %16704 = vst [vmem:[#allocation93_spill] sm:$0xff] %v11666_v62  ;;  %v11676_v14 = vld [vmem:[%s16664_s7 + $0x200] sm:$0xff]  ;;  %v11681_v6 = vld [vmem:[%s16664_s7 + $0x208] sm:$0xff] }
  0x2e   :  { %16705 = vst [vmem:[#allocation94_spill] sm:$0xff] %v11671_v63  ;;  %v11686_v12 = vld [vmem:[%s16664_s7 + $0x210] sm:$0xff]  ;;  %v11691_v4 = vld [vmem:[%s16664_s7 + $0x218] sm:$0xff]  ;;  %v11696_v15 = vld [vmem:[%s16664_s7 + $0x220] sm:$0xff] }
  0x2f   :  { %16706 = vst [vmem:[#allocation95_spill] sm:$0xff] %v11696_v15  ;;  %v11701_v7 = vld [vmem:[%s16664_s7 + $0x228] sm:$0xff]  ;;  %v11706_v13 = vld [vmem:[%s16664_s7 + $0x230] sm:$0xff]  ;;  %v11711_v5 = vld [vmem:[%s16664_s7 + $0x238] sm:$0xff] }
  0x30   :  { %16707 = vst [vmem:[#allocation96_spill] sm:$0xff] %v11701_v7  ;;  %16708 = vst [vmem:[#allocation97_spill] sm:$0xff] %v11706_v13  ;;  %v11716_v30 = vld [vmem:[%s16664_s7 + $0x240] sm:$0xff]  ;;  %v11721_v22 = vld [vmem:[%s16664_s7 + $0x248] sm:$0xff] }
  0x31   :  { %16709 = vst [vmem:[#allocation98_spill] sm:$0xff] %v11711_v5  ;;  %v11726_v28 = vld [vmem:[%s16664_s7 + $0x250] sm:$0xff]  ;;  %v11731_v20 = vld [vmem:[%s16664_s7 + $0x258] sm:$0xff]  ;;  %v11736_v31 = vld [vmem:[%s16664_s7 + $0x260] sm:$0xff] }
  0x32   :  { %16710 = vst [vmem:[#allocation99_spill] sm:$0xff] %v11736_v31  ;;  %v11741_v23 = vld [vmem:[%s16664_s7 + $0x268] sm:$0xff]  ;;  %v11746_v29 = vld [vmem:[%s16664_s7 + $0x270] sm:$0xff]  ;;  %v11751_v21 = vld [vmem:[%s16664_s7 + $0x278] sm:$0xff] }
  0x33   :  { %16711 = vst [vmem:[#allocation100_spill] sm:$0xff] %v11741_v23  ;;  %16712 = vst [vmem:[#allocation101_spill] sm:$0xff] %v11746_v29  ;;  %v11756_v46 = vld [vmem:[%s16664_s7 + $0x280] sm:$0xff]  ;;  %v11761_v38 = vld [vmem:[%s16664_s7 + $0x288] sm:$0xff] }
  0x34   :  { %16713 = vst [vmem:[#allocation102_spill] sm:$0xff] %v11751_v21  ;;  %v11766_v44 = vld [vmem:[%s16664_s7 + $0x290] sm:$0xff]  ;;  %v11771_v36 = vld [vmem:[%s16664_s7 + $0x298] sm:$0xff]  ;;  %v11776_v47 = vld [vmem:[%s16664_s7 + $0x2a0] sm:$0xff] }
  0x35   :  { %16714 = vst [vmem:[#allocation103_spill] sm:$0xff] %v11776_v47  ;;  %v11781_v39 = vld [vmem:[%s16664_s7 + $0x2a8] sm:$0xff]  ;;  %v11786_v45 = vld [vmem:[%s16664_s7 + $0x2b0] sm:$0xff]  ;;  %v11791_v37 = vld [vmem:[%s16664_s7 + $0x2b8] sm:$0xff] }
  0x36   :  { %16715 = vst [vmem:[#allocation104_spill] sm:$0xff] %v11781_v39  ;;  %16716 = vst [vmem:[#allocation105_spill] sm:$0xff] %v11786_v45  ;;  %v11796_v62 = vld [vmem:[%s16664_s7 + $0x2c0] sm:$0xff]  ;;  %v11801_v54 = vld [vmem:[%s16664_s7 + $0x2c8] sm:$0xff] }
  0x37   :  { %16717 = vst [vmem:[#allocation106_spill] sm:$0xff] %v11791_v37  ;;  %v11806_v60 = vld [vmem:[%s16664_s7 + $0x2d0] sm:$0xff]  ;;  %v11811_v52 = vld [vmem:[%s16664_s7 + $0x2d8] sm:$0xff]  ;;  %v11816_v63 = vld [vmem:[%s16664_s7 + $0x2e0] sm:$0xff] }
  0x38   :  { %16718 = vst [vmem:[#allocation107_spill] sm:$0xff] %v11816_v63  ;;  %v11821_v55 = vld [vmem:[%s16664_s7 + $0x2e8] sm:$0xff]  ;;  %v11826_v61 = vld [vmem:[%s16664_s7 + $0x2f0] sm:$0xff]  ;;  %v11831_v53 = vld [vmem:[%s16664_s7 + $0x2f8] sm:$0xff] }
  0x39   :  { %16719 = vst [vmem:[#allocation108_spill] sm:$0xff] %v11821_v55  ;;  %16720 = vst [vmem:[#allocation109_spill] sm:$0xff] %v11826_v61 }
  0x3a   :  { %16721 = vst [vmem:[#allocation110_spill] sm:$0xff] %v11831_v53 }
  0x3b   :  { %287 = vsyncadd [#allocation17], 12288  ;;  %v11836_v29 = vld [vmem:[%s16178_s15] sm:$0xff]  ;;  %v11841_v13 = vld [vmem:[%s16178_s15 + $0x8] sm:$0xff] }
  0x3c   :  { %16722 = vst [vmem:[#allocation111_spill] sm:$0xff] %v11836_v29  ;;  %16723 = vst [vmem:[#allocation112_spill] sm:$0xff] %v11841_v13  ;;  %v11846_v31 = vld [vmem:[%s16178_s15 + $0x10] sm:$0xff]  ;;  %v11851_v15 = vld [vmem:[%s16178_s15 + $0x18] sm:$0xff] }
  0x3d   :  { %16724 = vst [vmem:[#allocation113_spill] sm:$0xff] %v11846_v31  ;;  %16725 = vst [vmem:[#allocation114_spill] sm:$0xff] %v11851_v15  ;;  %v11856_v21 = vld [vmem:[%s16178_s15 + $0x20] sm:$0xff]  ;;  %v11861_v5 = vld [vmem:[%s16178_s15 + $0x28] sm:$0xff] }
  0x3e   :  { %16726 = vst [vmem:[#allocation115_spill] sm:$0xff] %v11856_v21  ;;  %16727 = vst [vmem:[#allocation116_spill] sm:$0xff] %v11861_v5  ;;  %v11866_v23 = vld [vmem:[%s16178_s15 + $0x30] sm:$0xff]  ;;  %v11871_v31 = vld [vmem:[%s16178_s15 + $0x38] sm:$0xff] }
  0x3f   :  { %16728 = vst [vmem:[#allocation117_spill] sm:$0xff] %v11866_v23  ;;  %16729 = vst [vmem:[#allocation118_spill] sm:$0xff] %v11871_v31  ;;  %v11876_v15 = vld [vmem:[%s16178_s15 + $0x40] sm:$0xff]  ;;  %v11881_v7 = vld [vmem:[%s16178_s15 + $0x48] sm:$0xff] }
  0x40   :  { %16730 = vst [vmem:[#allocation119_spill] sm:$0xff] %v11876_v15  ;;  %16731 = vst [vmem:[#allocation120_spill] sm:$0xff] %v11881_v7  ;;  %v11886_v61 = vld [vmem:[%s16178_s15 + $0x50] sm:$0xff]  ;;  %v11891_v23 = vld [vmem:[%s16178_s15 + $0x58] sm:$0xff] }
  0x41   :  { %16732 = vst [vmem:[#allocation121_spill] sm:$0xff] %v11886_v61  ;;  %16733 = vst [vmem:[#allocation122_spill] sm:$0xff] %v11891_v23  ;;  %v11896_v31 = vld [vmem:[%s16178_s15 + $0x60] sm:$0xff]  ;;  %v11901_v15 = vld [vmem:[%s16178_s15 + $0x68] sm:$0xff] }
  0x42   :  { %16734 = vst [vmem:[#allocation123_spill] sm:$0xff] %v11896_v31  ;;  %16735 = vst [vmem:[#allocation124_spill] sm:$0xff] %v11901_v15  ;;  %v11906_v7 = vld [vmem:[%s16178_s15 + $0x70] sm:$0xff]  ;;  %v11911_v61 = vld [vmem:[%s16178_s15 + $0x78] sm:$0xff] }
  0x43   :  { %16736 = vst [vmem:[#allocation125_spill] sm:$0xff] %v11906_v7  ;;  %16737 = vst [vmem:[#allocation126_spill] sm:$0xff] %v11911_v61 }
  0x44   :  { %361 = vsyncadd [#allocation17 + $0x1], 2048  ;;  %v11916_v23 = vld [vmem:[%s16183_s20] sm:$0xff]  ;;  %v11921_v15 = vld [vmem:[%s16183_s20 + $0x8] sm:$0xff] }
  0x45   :  { %16738 = vst [vmem:[#allocation127_spill] sm:$0xff] %v11916_v23  ;;  %16739 = vst [vmem:[#allocation128_spill] sm:$0xff] %v11921_v15  ;;  %v11926_v7 = vld [vmem:[%s16183_s20 + $0x10] sm:$0xff]  ;;  %v11931_v61 = vld [vmem:[%s16183_s20 + $0x18] sm:$0xff] }
  0x46   :  { %16740 = vst [vmem:[#allocation129_spill] sm:$0xff] %v11926_v7  ;;  %16741 = vst [vmem:[#allocation130_spill] sm:$0xff] %v11931_v61  ;;  %v11936_v31 = vld [vmem:[%s16183_s20 + $0x20] sm:$0xff]  ;;  %v11941_v23 = vld [vmem:[%s16183_s20 + $0x28] sm:$0xff] }
  0x47   :  { %16742 = vst [vmem:[#allocation131_spill] sm:$0xff] %v11936_v31  ;;  %16743 = vst [vmem:[#allocation132_spill] sm:$0xff] %v11941_v23  ;;  %v11946_v15 = vld [vmem:[%s16183_s20 + $0x30] sm:$0xff]  ;;  %v11951_v7 = vld [vmem:[%s16183_s20 + $0x38] sm:$0xff] }
  0x48   :  { %16744 = vst [vmem:[#allocation133_spill] sm:$0xff] %v11946_v15  ;;  %16745 = vst [vmem:[#allocation134_spill] sm:$0xff] %v11951_v7  ;;  %v11956_v61 = vld [vmem:[%s16183_s20 + $0x40] sm:$0xff]  ;;  %v11961_v31 = vld [vmem:[%s16183_s20 + $0x48] sm:$0xff] }
  0x49   :  { %16746 = vst [vmem:[#allocation135_spill] sm:$0xff] %v11956_v61  ;;  %16747 = vst [vmem:[#allocation136_spill] sm:$0xff] %v11961_v31  ;;  %v11966_v23 = vld [vmem:[%s16183_s20 + $0x50] sm:$0xff]  ;;  %v11971_v15 = vld [vmem:[%s16183_s20 + $0x58] sm:$0xff] }
  0x4a   :  { %16748 = vst [vmem:[#allocation137_spill] sm:$0xff] %v11966_v23  ;;  %16749 = vst [vmem:[#allocation138_spill] sm:$0xff] %v11971_v15  ;;  %v11976_v7 = vld [vmem:[%s16183_s20 + $0x60] sm:$0xff]  ;;  %v11981_v61 = vld [vmem:[%s16183_s20 + $0x68] sm:$0xff] }
  0x4b   :  { %16750 = vst [vmem:[#allocation139_spill] sm:$0xff] %v11976_v7  ;;  %16751 = vst [vmem:[#allocation140_spill] sm:$0xff] %v11981_v61  ;;  %v11986_v31 = vld [vmem:[%s16183_s20 + $0x70] sm:$0xff]  ;;  %v11991_v23 = vld [vmem:[%s16183_s20 + $0x78] sm:$0xff] }
  0x4c   :  { %16752 = vst [vmem:[#allocation141_spill] sm:$0xff] %v11986_v31  ;;  %16753 = vst [vmem:[#allocation142_spill] sm:$0xff] %v11991_v23  ;;  %v11996_v15 = vld [vmem:[%s16183_s20 + $0x80] sm:$0xff]  ;;  %v12001_v7 = vld [vmem:[%s16183_s20 + $0x88] sm:$0xff] }
  0x4d   :  { %16754 = vst [vmem:[#allocation143_spill] sm:$0xff] %v11996_v15  ;;  %16755 = vst [vmem:[#allocation144_spill] sm:$0xff] %v12001_v7  ;;  %v12006_v61 = vld [vmem:[%s16183_s20 + $0x90] sm:$0xff]  ;;  %v12011_v31 = vld [vmem:[%s16183_s20 + $0x98] sm:$0xff] }
  0x4e   :  { %16756 = vst [vmem:[#allocation145_spill] sm:$0xff] %v12006_v61  ;;  %16757 = vst [vmem:[#allocation146_spill] sm:$0xff] %v12011_v31  ;;  %v12016_v23 = vld [vmem:[%s16183_s20 + $0xa0] sm:$0xff]  ;;  %v12021_v15 = vld [vmem:[%s16183_s20 + $0xa8] sm:$0xff] }
  0x4f   :  { %16758 = vst [vmem:[#allocation147_spill] sm:$0xff] %v12016_v23  ;;  %16759 = vst [vmem:[#allocation148_spill] sm:$0xff] %v12021_v15  ;;  %v12026_v7 = vld [vmem:[%s16183_s20 + $0xb0] sm:$0xff]  ;;  %v12031_v61 = vld [vmem:[%s16183_s20 + $0xb8] sm:$0xff] }
  0x50   :  { %16760 = vst [vmem:[#allocation149_spill] sm:$0xff] %v12026_v7  ;;  %16761 = vst [vmem:[#allocation150_spill] sm:$0xff] %v12031_v61  ;;  %v12036_v31 = vld [vmem:[%s16183_s20 + $0xc0] sm:$0xff]  ;;  %v12041_v23 = vld [vmem:[%s16183_s20 + $0xc8] sm:$0xff] }
  0x51   :  { %16762 = vst [vmem:[#allocation151_spill] sm:$0xff] %v12036_v31  ;;  %16763 = vst [vmem:[#allocation152_spill] sm:$0xff] %v12041_v23  ;;  %v12046_v15 = vld [vmem:[%s16183_s20 + $0xd0] sm:$0xff]  ;;  %v12051_v7 = vld [vmem:[%s16183_s20 + $0xd8] sm:$0xff] }
  0x52   :  { %16764 = vst [vmem:[#allocation153_spill] sm:$0xff] %v12046_v15  ;;  %16765 = vst [vmem:[#allocation154_spill] sm:$0xff] %v12051_v7  ;;  %v12056_v61 = vld [vmem:[%s16183_s20 + $0xe0] sm:$0xff]  ;;  %v12061_v31 = vld [vmem:[%s16183_s20 + $0xe8] sm:$0xff] }
  0x53   :  { %16766 = vst [vmem:[#allocation155_spill] sm:$0xff] %v12056_v61  ;;  %16767 = vst [vmem:[#allocation156_spill] sm:$0xff] %v12061_v31  ;;  %v12066_v23 = vld [vmem:[%s16183_s20 + $0xf0] sm:$0xff]  ;;  %v12071_v15 = vld [vmem:[%s16183_s20 + $0xf8] sm:$0xff] }
  0x54   :  { %16768 = vst [vmem:[#allocation157_spill] sm:$0xff] %v12066_v23  ;;  %16769 = vst [vmem:[#allocation158_spill] sm:$0xff] %v12071_v15  ;;  %v12076_v7 = vld [vmem:[%s16183_s20 + $0x100] sm:$0xff]  ;;  %v12081_v61 = vld [vmem:[%s16183_s20 + $0x108] sm:$0xff] }
  0x55   :  { %16770 = vst [vmem:[#allocation159_spill] sm:$0xff] %v12076_v7  ;;  %16771 = vst [vmem:[#allocation160_spill] sm:$0xff] %v12081_v61  ;;  %v12086_v31 = vld [vmem:[%s16183_s20 + $0x110] sm:$0xff]  ;;  %v12091_v23 = vld [vmem:[%s16183_s20 + $0x118] sm:$0xff] }
  0x56   :  { %16772 = vst [vmem:[#allocation161_spill] sm:$0xff] %v12086_v31  ;;  %16773 = vst [vmem:[#allocation162_spill] sm:$0xff] %v12091_v23  ;;  %v12096_v15 = vld [vmem:[%s16183_s20 + $0x120] sm:$0xff]  ;;  %v12101_v7 = vld [vmem:[%s16183_s20 + $0x128] sm:$0xff] }
  0x57   :  { %16774 = vst [vmem:[#allocation163_spill] sm:$0xff] %v12096_v15  ;;  %16775 = vst [vmem:[#allocation164_spill] sm:$0xff] %v12101_v7  ;;  %v12106_v61 = vld [vmem:[%s16183_s20 + $0x130] sm:$0xff]  ;;  %v12111_v31 = vld [vmem:[%s16183_s20 + $0x138] sm:$0xff] }
  0x58   :  { %16776 = vst [vmem:[#allocation165_spill] sm:$0xff] %v12106_v61  ;;  %16777 = vst [vmem:[#allocation166_spill] sm:$0xff] %v12111_v31  ;;  %v12116_v23 = vld [vmem:[%s16183_s20 + $0x140] sm:$0xff]  ;;  %v12121_v15 = vld [vmem:[%s16183_s20 + $0x148] sm:$0xff] }
  0x59   :  { %16778 = vst [vmem:[#allocation167_spill] sm:$0xff] %v12116_v23  ;;  %16779 = vst [vmem:[#allocation168_spill] sm:$0xff] %v12121_v15  ;;  %v12126_v7 = vld [vmem:[%s16183_s20 + $0x150] sm:$0xff]  ;;  %v12131_v61 = vld [vmem:[%s16183_s20 + $0x158] sm:$0xff] }
  0x5a   :  { %16780 = vst [vmem:[#allocation169_spill] sm:$0xff] %v12126_v7  ;;  %16781 = vst [vmem:[#allocation170_spill] sm:$0xff] %v12131_v61  ;;  %v12136_v31 = vld [vmem:[%s16183_s20 + $0x160] sm:$0xff]  ;;  %v12141_v23 = vld [vmem:[%s16183_s20 + $0x168] sm:$0xff] }
  0x5b   :  { %16782 = vst [vmem:[#allocation171_spill] sm:$0xff] %v12136_v31  ;;  %16783 = vst [vmem:[#allocation172_spill] sm:$0xff] %v12141_v23  ;;  %v12146_v15 = vld [vmem:[%s16183_s20 + $0x170] sm:$0xff]  ;;  %v12151_v7 = vld [vmem:[%s16183_s20 + $0x178] sm:$0xff] }
  0x5c   :  { %16784 = vst [vmem:[#allocation173_spill] sm:$0xff] %v12146_v15  ;;  %16785 = vst [vmem:[#allocation174_spill] sm:$0xff] %v12151_v7 }
  0x5d   :  { %499 = vsyncadd [#allocation17 + $0x2], 6144  ;;  %v12156_v61 = vld [vmem:[%s16174_s11] sm:$0xff]  ;;  %v12161_v23 = vld [vmem:[%s16174_s11 + $0x8] sm:$0xff] }
  0x5e   :  { %16786 = vst [vmem:[#allocation175_spill] sm:$0xff] %v12156_v61  ;;  %16787 = vst [vmem:[#allocation176_spill] sm:$0xff] %v12161_v23  ;;  %v12166_v15 = vld [vmem:[%s16174_s11 + $0x10] sm:$0xff]  ;;  %v12171_v7 = vld [vmem:[%s16174_s11 + $0x18] sm:$0xff] }
  0x5f   :  { %16788 = vst [vmem:[#allocation177_spill] sm:$0xff] %v12166_v15  ;;  %16789 = vst [vmem:[#allocation178_spill] sm:$0xff] %v12171_v7  ;;  %v12176_v31 = vld [vmem:[%s16174_s11 + $0x20] sm:$0xff]  ;;  %v12181_v61 = vld [vmem:[%s16174_s11 + $0x28] sm:$0xff] }
  0x60   :  { %16790 = vst [vmem:[#allocation179_spill] sm:$0xff] %v12176_v31  ;;  %16791 = vst [vmem:[#allocation180_spill] sm:$0xff] %v12181_v61  ;;  %v12186_v23 = vld [vmem:[%s16174_s11 + $0x30] sm:$0xff]  ;;  %v12191_v15 = vld [vmem:[%s16174_s11 + $0x38] sm:$0xff] }
  0x61   :  { %16792 = vst [vmem:[#allocation181_spill] sm:$0xff] %v12186_v23  ;;  %16793 = vst [vmem:[#allocation182_spill] sm:$0xff] %v12191_v15  ;;  %v12196_v7 = vld [vmem:[%s16174_s11 + $0x40] sm:$0xff]  ;;  %v12201_v31 = vld [vmem:[%s16174_s11 + $0x48] sm:$0xff] }
  0x62   :  { %16794 = vst [vmem:[#allocation183_spill] sm:$0xff] %v12196_v7  ;;  %16795 = vst [vmem:[#allocation184_spill] sm:$0xff] %v12201_v31  ;;  %v12206_v61 = vld [vmem:[%s16174_s11 + $0x50] sm:$0xff]  ;;  %v12211_v23 = vld [vmem:[%s16174_s11 + $0x58] sm:$0xff] }
  0x63   :  { %16796 = vst [vmem:[#allocation185_spill] sm:$0xff] %v12206_v61  ;;  %16797 = vst [vmem:[#allocation186_spill] sm:$0xff] %v12211_v23  ;;  %v12216_v15 = vld [vmem:[%s16174_s11 + $0x60] sm:$0xff]  ;;  %v12221_v7 = vld [vmem:[%s16174_s11 + $0x68] sm:$0xff] }
  0x64   :  { %16798 = vst [vmem:[#allocation187_spill] sm:$0xff] %v12216_v15  ;;  %16799 = vst [vmem:[#allocation188_spill] sm:$0xff] %v12221_v7  ;;  %v12226_v31 = vld [vmem:[%s16174_s11 + $0x70] sm:$0xff]  ;;  %v12231_v61 = vld [vmem:[%s16174_s11 + $0x78] sm:$0xff] }
  0x65   :  { %16800 = vst [vmem:[#allocation189_spill] sm:$0xff] %v12226_v31  ;;  %16801 = vst [vmem:[#allocation190_spill] sm:$0xff] %v12231_v61  ;;  %v12236_v23 = vld [vmem:[%s16174_s11 + $0x80] sm:$0xff]  ;;  %v12241_v15 = vld [vmem:[%s16174_s11 + $0x88] sm:$0xff] }
  0x66   :  { %16802 = vst [vmem:[#allocation191_spill] sm:$0xff] %v12236_v23  ;;  %16803 = vst [vmem:[#allocation192_spill] sm:$0xff] %v12241_v15  ;;  %v12246_v7 = vld [vmem:[%s16174_s11 + $0x90] sm:$0xff]  ;;  %v12251_v31 = vld [vmem:[%s16174_s11 + $0x98] sm:$0xff] }
  0x67   :  { %16804 = vst [vmem:[#allocation193_spill] sm:$0xff] %v12246_v7  ;;  %16805 = vst [vmem:[#allocation194_spill] sm:$0xff] %v12251_v31  ;;  %v12256_v61 = vld [vmem:[%s16174_s11 + $0xa0] sm:$0xff]  ;;  %v12261_v23 = vld [vmem:[%s16174_s11 + $0xa8] sm:$0xff] }
  0x68   :  { %16806 = vst [vmem:[#allocation195_spill] sm:$0xff] %v12256_v61  ;;  %16807 = vst [vmem:[#allocation196_spill] sm:$0xff] %v12261_v23  ;;  %v12266_v15 = vld [vmem:[%s16174_s11 + $0xb0] sm:$0xff]  ;;  %v12271_v7 = vld [vmem:[%s16174_s11 + $0xb8] sm:$0xff] }
  0x69   :  { %16808 = vst [vmem:[#allocation197_spill] sm:$0xff] %v12266_v15  ;;  %16809 = vst [vmem:[#allocation198_spill] sm:$0xff] %v12271_v7  ;;  %v12276_v31 = vld [vmem:[%s16174_s11 + $0xc0] sm:$0xff]  ;;  %v12281_v61 = vld [vmem:[%s16174_s11 + $0xc8] sm:$0xff] }
  0x6a   :  { %16810 = vst [vmem:[#allocation199_spill] sm:$0xff] %v12276_v31  ;;  %16811 = vst [vmem:[#allocation200_spill] sm:$0xff] %v12281_v61  ;;  %v12286_v23 = vld [vmem:[%s16174_s11 + $0xd0] sm:$0xff]  ;;  %v12291_v15 = vld [vmem:[%s16174_s11 + $0xd8] sm:$0xff] }
  0x6b   :  { %16812 = vst [vmem:[#allocation201_spill] sm:$0xff] %v12286_v23  ;;  %16813 = vst [vmem:[#allocation202_spill] sm:$0xff] %v12291_v15  ;;  %v12296_v7 = vld [vmem:[%s16174_s11 + $0xe0] sm:$0xff]  ;;  %v12301_v31 = vld [vmem:[%s16174_s11 + $0xe8] sm:$0xff] }
  0x6c   :  { %16814 = vst [vmem:[#allocation203_spill] sm:$0xff] %v12296_v7  ;;  %16815 = vst [vmem:[#allocation204_spill] sm:$0xff] %v12301_v31  ;;  %v12306_v61 = vld [vmem:[%s16174_s11 + $0xf0] sm:$0xff]  ;;  %v12311_v23 = vld [vmem:[%s16174_s11 + $0xf8] sm:$0xff] }
  0x6d   :  { %16816 = vst [vmem:[#allocation205_spill] sm:$0xff] %v12306_v61  ;;  %16817 = vst [vmem:[#allocation206_spill] sm:$0xff] %v12311_v23  ;;  %v12316_v15 = vld [vmem:[%s16174_s11 + $0x100] sm:$0xff]  ;;  %v12321_v7 = vld [vmem:[%s16174_s11 + $0x108] sm:$0xff] }
  0x6e   :  { %16818 = vst [vmem:[#allocation207_spill] sm:$0xff] %v12316_v15  ;;  %16819 = vst [vmem:[#allocation208_spill] sm:$0xff] %v12321_v7  ;;  %v12326_v31 = vld [vmem:[%s16174_s11 + $0x110] sm:$0xff]  ;;  %v12331_v61 = vld [vmem:[%s16174_s11 + $0x118] sm:$0xff] }
  0x6f   :  { %16820 = vst [vmem:[#allocation209_spill] sm:$0xff] %v12326_v31  ;;  %16821 = vst [vmem:[#allocation210_spill] sm:$0xff] %v12331_v61  ;;  %v12336_v23 = vld [vmem:[%s16174_s11 + $0x120] sm:$0xff]  ;;  %v12341_v15 = vld [vmem:[%s16174_s11 + $0x128] sm:$0xff] }
  0x70   :  { %16822 = vst [vmem:[#allocation211_spill] sm:$0xff] %v12336_v23  ;;  %16823 = vst [vmem:[#allocation212_spill] sm:$0xff] %v12341_v15  ;;  %v12346_v7 = vld [vmem:[%s16174_s11 + $0x130] sm:$0xff]  ;;  %v12351_v31 = vld [vmem:[%s16174_s11 + $0x138] sm:$0xff] }
  0x71   :  { %16824 = vst [vmem:[#allocation213_spill] sm:$0xff] %v12346_v7  ;;  %16825 = vst [vmem:[#allocation214_spill] sm:$0xff] %v12351_v31  ;;  %v12356_v61 = vld [vmem:[%s16174_s11 + $0x140] sm:$0xff]  ;;  %v12361_v23 = vld [vmem:[%s16174_s11 + $0x148] sm:$0xff] }
  0x72   :  { %16826 = vst [vmem:[#allocation215_spill] sm:$0xff] %v12356_v61  ;;  %16827 = vst [vmem:[#allocation216_spill] sm:$0xff] %v12361_v23  ;;  %v12366_v15 = vld [vmem:[%s16174_s11 + $0x150] sm:$0xff]  ;;  %v12371_v7 = vld [vmem:[%s16174_s11 + $0x158] sm:$0xff] }
  0x73   :  { %16828 = vst [vmem:[#allocation217_spill] sm:$0xff] %v12366_v15  ;;  %16829 = vst [vmem:[#allocation218_spill] sm:$0xff] %v12371_v7  ;;  %v12376_v31 = vld [vmem:[%s16174_s11 + $0x160] sm:$0xff]  ;;  %v12381_v61 = vld [vmem:[%s16174_s11 + $0x168] sm:$0xff] }
  0x74   :  { %16830 = vst [vmem:[#allocation219_spill] sm:$0xff] %v12376_v31  ;;  %16831 = vst [vmem:[#allocation220_spill] sm:$0xff] %v12381_v61  ;;  %v12386_v23 = vld [vmem:[%s16174_s11 + $0x170] sm:$0xff]  ;;  %v12391_v15 = vld [vmem:[%s16174_s11 + $0x178] sm:$0xff] }
  0x75   :  { %16832 = vst [vmem:[#allocation221_spill] sm:$0xff] %v12386_v23  ;;  %16833 = vst [vmem:[#allocation222_spill] sm:$0xff] %v12391_v15 }
  0x76   :  { %637 = vsyncadd [#allocation17 + $0x3], 6144  ;;  %v12396_v31 = vld [vmem:[%s16179_s16] sm:$0xff]  ;;  %v12401_v7 = vld [vmem:[%s16179_s16 + $0x8] sm:$0xff] }
  0x77   :  { %16834 = vst [vmem:[#allocation223_spill] sm:$0xff] %v12396_v31  ;;  %16835 = vst [vmem:[#allocation224_spill] sm:$0xff] %v12401_v7  ;;  %v12406_v23 = vld [vmem:[%s16179_s16 + $0x10] sm:$0xff]  ;;  %v12411_v15 = vld [vmem:[%s16179_s16 + $0x18] sm:$0xff] }
  0x78   :  { %16836 = vst [vmem:[#allocation225_spill] sm:$0xff] %v12406_v23  ;;  %16837 = vst [vmem:[#allocation226_spill] sm:$0xff] %v12411_v15  ;;  %v12416_v61 = vld [vmem:[%s16179_s16 + $0x20] sm:$0xff]  ;;  %v12421_v31 = vld [vmem:[%s16179_s16 + $0x28] sm:$0xff] }
  0x79   :  { %16838 = vst [vmem:[#allocation227_spill] sm:$0xff] %v12416_v61  ;;  %16839 = vst [vmem:[#allocation228_spill] sm:$0xff] %v12421_v31  ;;  %v12426_v7 = vld [vmem:[%s16179_s16 + $0x30] sm:$0xff]  ;;  %v12431_v23 = vld [vmem:[%s16179_s16 + $0x38] sm:$0xff] }
  0x7a   :  { %16840 = vst [vmem:[#allocation229_spill] sm:$0xff] %v12426_v7  ;;  %16841 = vst [vmem:[#allocation230_spill] sm:$0xff] %v12431_v23 }
  0x7b   :  { %695 = vsyncadd [#allocation17 + $0x4], 1024  ;;  %v12436_v61 = vld [vmem:[%s16184_s21] sm:$0xff]  ;;  %v12441_v31 = vld [vmem:[%s16184_s21 + $0x8] sm:$0xff] }
  0x7c   :  { %16842 = vst [vmem:[#allocation231_spill] sm:$0xff] %v12436_v61  ;;  %16843 = vst [vmem:[#allocation232_spill] sm:$0xff] %v12441_v31  ;;  %v12446_v7 = vld [vmem:[%s16184_s21 + $0x10] sm:$0xff]  ;;  %v12451_v23 = vld [vmem:[%s16184_s21 + $0x18] sm:$0xff] }
  0x7d   :  { %16844 = vst [vmem:[#allocation233_spill] sm:$0xff] %v12446_v7  ;;  %16845 = vst [vmem:[#allocation234_spill] sm:$0xff] %v12451_v23  ;;  %v12456_v15 = vld [vmem:[%s16184_s21 + $0x20] sm:$0xff]  ;;  %v12461_v61 = vld [vmem:[%s16184_s21 + $0x28] sm:$0xff] }
  0x7e   :  { %16846 = vst [vmem:[#allocation235_spill] sm:$0xff] %v12456_v15  ;;  %16847 = vst [vmem:[#allocation236_spill] sm:$0xff] %v12461_v61  ;;  %v12466_v31 = vld [vmem:[%s16184_s21 + $0x30] sm:$0xff]  ;;  %v12471_v7 = vld [vmem:[%s16184_s21 + $0x38] sm:$0xff] }
  0x7f   :  { %16848 = vst [vmem:[#allocation237_spill] sm:$0xff] %v12466_v31  ;;  %16849 = vst [vmem:[#allocation238_spill] sm:$0xff] %v12471_v7  ;;  %v12476_v23 = vld [vmem:[%s16184_s21 + $0x40] sm:$0xff]  ;;  %v12481_v15 = vld [vmem:[%s16184_s21 + $0x48] sm:$0xff] }
  0x80   :  { %16850 = vst [vmem:[#allocation239_spill] sm:$0xff] %v12476_v23  ;;  %16851 = vst [vmem:[#allocation240_spill] sm:$0xff] %v12481_v15  ;;  %v12486_v61 = vld [vmem:[%s16184_s21 + $0x50] sm:$0xff]  ;;  %v12491_v31 = vld [vmem:[%s16184_s21 + $0x58] sm:$0xff] }
  0x81   :  { %16852 = vst [vmem:[#allocation241_spill] sm:$0xff] %v12486_v61  ;;  %16853 = vst [vmem:[#allocation242_spill] sm:$0xff] %v12491_v31  ;;  %v12496_v7 = vld [vmem:[%s16184_s21 + $0x60] sm:$0xff]  ;;  %v12501_v23 = vld [vmem:[%s16184_s21 + $0x68] sm:$0xff] }
  0x82   :  { %16854 = vst [vmem:[#allocation243_spill] sm:$0xff] %v12496_v7  ;;  %16855 = vst [vmem:[#allocation244_spill] sm:$0xff] %v12501_v23  ;;  %v12506_v15 = vld [vmem:[%s16184_s21 + $0x70] sm:$0xff]  ;;  %v12511_v61 = vld [vmem:[%s16184_s21 + $0x78] sm:$0xff] }
  0x83   :  { %16856 = vst [vmem:[#allocation245_spill] sm:$0xff] %v12506_v15  ;;  %16857 = vst [vmem:[#allocation246_spill] sm:$0xff] %v12511_v61  ;;  %v12516_v31 = vld [vmem:[%s16184_s21 + $0x80] sm:$0xff]  ;;  %v12521_v7 = vld [vmem:[%s16184_s21 + $0x88] sm:$0xff] }
  0x84   :  { %16858 = vst [vmem:[#allocation247_spill] sm:$0xff] %v12516_v31  ;;  %16859 = vst [vmem:[#allocation248_spill] sm:$0xff] %v12521_v7  ;;  %v12526_v23 = vld [vmem:[%s16184_s21 + $0x90] sm:$0xff]  ;;  %v12531_v15 = vld [vmem:[%s16184_s21 + $0x98] sm:$0xff] }
  0x85   :  { %16860 = vst [vmem:[#allocation249_spill] sm:$0xff] %v12526_v23  ;;  %16861 = vst [vmem:[#allocation250_spill] sm:$0xff] %v12531_v15  ;;  %v12536_v61 = vld [vmem:[%s16184_s21 + $0xa0] sm:$0xff]  ;;  %v12541_v31 = vld [vmem:[%s16184_s21 + $0xa8] sm:$0xff] }
  0x86   :  { %16862 = vst [vmem:[#allocation251_spill] sm:$0xff] %v12536_v61  ;;  %16863 = vst [vmem:[#allocation252_spill] sm:$0xff] %v12541_v31  ;;  %v12546_v7 = vld [vmem:[%s16184_s21 + $0xb0] sm:$0xff]  ;;  %v12551_v23 = vld [vmem:[%s16184_s21 + $0xb8] sm:$0xff] }
  0x87   :  { %16864 = vst [vmem:[#allocation253_spill] sm:$0xff] %v12546_v7  ;;  %16865 = vst [vmem:[#allocation254_spill] sm:$0xff] %v12551_v23  ;;  %v12556_v15 = vld [vmem:[%s16184_s21 + $0xc0] sm:$0xff]  ;;  %v12561_v61 = vld [vmem:[%s16184_s21 + $0xc8] sm:$0xff] }
  0x88   :  { %16866 = vst [vmem:[#allocation255_spill] sm:$0xff] %v12556_v15  ;;  %16867 = vst [vmem:[#allocation256_spill] sm:$0xff] %v12561_v61  ;;  %v12566_v31 = vld [vmem:[%s16184_s21 + $0xd0] sm:$0xff]  ;;  %v12571_v7 = vld [vmem:[%s16184_s21 + $0xd8] sm:$0xff] }
  0x89   :  { %16868 = vst [vmem:[#allocation257_spill] sm:$0xff] %v12566_v31  ;;  %16869 = vst [vmem:[#allocation258_spill] sm:$0xff] %v12571_v7  ;;  %v12576_v23 = vld [vmem:[%s16184_s21 + $0xe0] sm:$0xff]  ;;  %v12581_v15 = vld [vmem:[%s16184_s21 + $0xe8] sm:$0xff] }
  0x8a   :  { %16870 = vst [vmem:[#allocation259_spill] sm:$0xff] %v12576_v23  ;;  %16871 = vst [vmem:[#allocation260_spill] sm:$0xff] %v12581_v15  ;;  %v12586_v61 = vld [vmem:[%s16184_s21 + $0xf0] sm:$0xff]  ;;  %v12591_v31 = vld [vmem:[%s16184_s21 + $0xf8] sm:$0xff] }
  0x8b   :  { %16872 = vst [vmem:[#allocation261_spill] sm:$0xff] %v12586_v61  ;;  %16873 = vst [vmem:[#allocation262_spill] sm:$0xff] %v12591_v31  ;;  %v12596_v7 = vld [vmem:[%s16184_s21 + $0x100] sm:$0xff]  ;;  %v12601_v23 = vld [vmem:[%s16184_s21 + $0x108] sm:$0xff] }
  0x8c   :  { %16874 = vst [vmem:[#allocation263_spill] sm:$0xff] %v12596_v7  ;;  %16875 = vst [vmem:[#allocation264_spill] sm:$0xff] %v12601_v23  ;;  %v12606_v15 = vld [vmem:[%s16184_s21 + $0x110] sm:$0xff]  ;;  %v12611_v61 = vld [vmem:[%s16184_s21 + $0x118] sm:$0xff] }
  0x8d   :  { %16876 = vst [vmem:[#allocation265_spill] sm:$0xff] %v12606_v15  ;;  %16877 = vst [vmem:[#allocation266_spill] sm:$0xff] %v12611_v61  ;;  %v12616_v31 = vld [vmem:[%s16184_s21 + $0x120] sm:$0xff]  ;;  %v12621_v7 = vld [vmem:[%s16184_s21 + $0x128] sm:$0xff] }
  0x8e   :  { %16878 = vst [vmem:[#allocation267_spill] sm:$0xff] %v12616_v31  ;;  %16879 = vst [vmem:[#allocation268_spill] sm:$0xff] %v12621_v7  ;;  %v12626_v23 = vld [vmem:[%s16184_s21 + $0x130] sm:$0xff]  ;;  %v12631_v15 = vld [vmem:[%s16184_s21 + $0x138] sm:$0xff] }
  0x8f   :  { %16880 = vst [vmem:[#allocation269_spill] sm:$0xff] %v12626_v23  ;;  %16881 = vst [vmem:[#allocation270_spill] sm:$0xff] %v12631_v15  ;;  %v12636_v61 = vld [vmem:[%s16184_s21 + $0x140] sm:$0xff]  ;;  %v12641_v31 = vld [vmem:[%s16184_s21 + $0x148] sm:$0xff] }
  0x90   :  { %16882 = vst [vmem:[#allocation271_spill] sm:$0xff] %v12636_v61  ;;  %16883 = vst [vmem:[#allocation272_spill] sm:$0xff] %v12641_v31  ;;  %v12646_v7 = vld [vmem:[%s16184_s21 + $0x150] sm:$0xff]  ;;  %v12651_v23 = vld [vmem:[%s16184_s21 + $0x158] sm:$0xff] }
  0x91   :  { %16884 = vst [vmem:[#allocation273_spill] sm:$0xff] %v12646_v7  ;;  %16885 = vst [vmem:[#allocation274_spill] sm:$0xff] %v12651_v23  ;;  %v12656_v15 = vld [vmem:[%s16184_s21 + $0x160] sm:$0xff]  ;;  %v12661_v61 = vld [vmem:[%s16184_s21 + $0x168] sm:$0xff] }
  0x92   :  { %16886 = vst [vmem:[#allocation275_spill] sm:$0xff] %v12656_v15  ;;  %16887 = vst [vmem:[#allocation276_spill] sm:$0xff] %v12661_v61  ;;  %v12666_v31 = vld [vmem:[%s16184_s21 + $0x170] sm:$0xff]  ;;  %v12671_v7 = vld [vmem:[%s16184_s21 + $0x178] sm:$0xff] }
  0x93   :  { %16888 = vst [vmem:[#allocation277_spill] sm:$0xff] %v12666_v31  ;;  %16889 = vst [vmem:[#allocation278_spill] sm:$0xff] %v12671_v7 }
  0x94   :  { %833 = vsyncadd [#allocation17 + $0x5], 6144  ;;  %v12676_v23 = vld [vmem:[%s16175_s12] sm:$0xff]  ;;  %v12681_v61 = vld [vmem:[%s16175_s12 + $0x8] sm:$0xff] }
  0x95   :  { %16890 = vst [vmem:[#allocation279_spill] sm:$0xff] %v12676_v23  ;;  %16891 = vst [vmem:[#allocation280_spill] sm:$0xff] %v12681_v61  ;;  %v12686_v31 = vld [vmem:[%s16175_s12 + $0x10] sm:$0xff]  ;;  %v12691_v7 = vld [vmem:[%s16175_s12 + $0x18] sm:$0xff] }
  0x96   :  { %16892 = vst [vmem:[#allocation281_spill] sm:$0xff] %v12686_v31  ;;  %16893 = vst [vmem:[#allocation282_spill] sm:$0xff] %v12691_v7  ;;  %v12696_v15 = vld [vmem:[%s16175_s12 + $0x20] sm:$0xff]  ;;  %v12701_v23 = vld [vmem:[%s16175_s12 + $0x28] sm:$0xff] }
  0x97   :  { %16894 = vst [vmem:[#allocation283_spill] sm:$0xff] %v12696_v15  ;;  %16895 = vst [vmem:[#allocation284_spill] sm:$0xff] %v12701_v23  ;;  %v12706_v61 = vld [vmem:[%s16175_s12 + $0x30] sm:$0xff]  ;;  %v12711_v31 = vld [vmem:[%s16175_s12 + $0x38] sm:$0xff] }
  0x98   :  { %16896 = vst [vmem:[#allocation285_spill] sm:$0xff] %v12706_v61  ;;  %16897 = vst [vmem:[#allocation286_spill] sm:$0xff] %v12711_v31  ;;  %v12716_v7 = vld [vmem:[%s16175_s12 + $0x40] sm:$0xff]  ;;  %v12721_v15 = vld [vmem:[%s16175_s12 + $0x48] sm:$0xff] }
  0x99   :  { %16898 = vst [vmem:[#allocation287_spill] sm:$0xff] %v12716_v7  ;;  %16899 = vst [vmem:[#allocation288_spill] sm:$0xff] %v12721_v15  ;;  %v12726_v23 = vld [vmem:[%s16175_s12 + $0x50] sm:$0xff]  ;;  %v12731_v61 = vld [vmem:[%s16175_s12 + $0x58] sm:$0xff] }
  0x9a   :  { %16900 = vst [vmem:[#allocation289_spill] sm:$0xff] %v12726_v23  ;;  %16901 = vst [vmem:[#allocation290_spill] sm:$0xff] %v12731_v61  ;;  %v12736_v31 = vld [vmem:[%s16175_s12 + $0x60] sm:$0xff]  ;;  %v12741_v7 = vld [vmem:[%s16175_s12 + $0x68] sm:$0xff] }
  0x9b   :  { %16902 = vst [vmem:[#allocation291_spill] sm:$0xff] %v12736_v31  ;;  %16903 = vst [vmem:[#allocation292_spill] sm:$0xff] %v12741_v7  ;;  %v12746_v15 = vld [vmem:[%s16175_s12 + $0x70] sm:$0xff]  ;;  %v12751_v23 = vld [vmem:[%s16175_s12 + $0x78] sm:$0xff] }
  0x9c   :  { %16904 = vst [vmem:[#allocation293_spill] sm:$0xff] %v12746_v15  ;;  %16905 = vst [vmem:[#allocation294_spill] sm:$0xff] %v12751_v23  ;;  %v12756_v61 = vld [vmem:[%s16175_s12 + $0x80] sm:$0xff]  ;;  %v12761_v31 = vld [vmem:[%s16175_s12 + $0x88] sm:$0xff] }
  0x9d   :  { %16906 = vst [vmem:[#allocation295_spill] sm:$0xff] %v12756_v61  ;;  %16907 = vst [vmem:[#allocation296_spill] sm:$0xff] %v12761_v31  ;;  %v12766_v7 = vld [vmem:[%s16175_s12 + $0x90] sm:$0xff]  ;;  %v12771_v15 = vld [vmem:[%s16175_s12 + $0x98] sm:$0xff] }
  0x9e   :  { %16908 = vst [vmem:[#allocation297_spill] sm:$0xff] %v12766_v7  ;;  %16909 = vst [vmem:[#allocation298_spill] sm:$0xff] %v12771_v15  ;;  %v12776_v23 = vld [vmem:[%s16175_s12 + $0xa0] sm:$0xff]  ;;  %v12781_v61 = vld [vmem:[%s16175_s12 + $0xa8] sm:$0xff] }
  0x9f   :  { %16910 = vst [vmem:[#allocation299_spill] sm:$0xff] %v12776_v23  ;;  %16911 = vst [vmem:[#allocation300_spill] sm:$0xff] %v12781_v61  ;;  %v12786_v31 = vld [vmem:[%s16175_s12 + $0xb0] sm:$0xff]  ;;  %v12791_v7 = vld [vmem:[%s16175_s12 + $0xb8] sm:$0xff] }
  0xa0   :  { %16912 = vst [vmem:[#allocation301_spill] sm:$0xff] %v12786_v31  ;;  %16913 = vst [vmem:[#allocation302_spill] sm:$0xff] %v12791_v7 }
  0xa1   :  { %923 = vsyncadd [#allocation17 + $0x6], 3072  ;;  %v12796_v15 = vld [vmem:[%s16180_s17] sm:$0xff]  ;;  %v12801_v23 = vld [vmem:[%s16180_s17 + $0x8] sm:$0xff] }
  0xa2   :  { %16914 = vst [vmem:[#allocation303_spill] sm:$0xff] %v12796_v15  ;;  %16915 = vst [vmem:[#allocation304_spill] sm:$0xff] %v12801_v23  ;;  %v12806_v31 = vld [vmem:[%s16180_s17 + $0x10] sm:$0xff]  ;;  %v12811_v7 = vld [vmem:[%s16180_s17 + $0x18] sm:$0xff] }
  0xa3   :  { %16916 = vst [vmem:[#allocation305_spill] sm:$0xff] %v12806_v31  ;;  %16917 = vst [vmem:[#allocation306_spill] sm:$0xff] %v12811_v7 }
  0xa4   :  { %973 = vsyncadd [#allocation17 + $0x7], 512  ;;  %v12816_v15 = vld [vmem:[%s16185_s22] sm:$0xff]  ;;  %v12821_v23 = vld [vmem:[%s16185_s22 + $0x8] sm:$0xff] }
  0xa5   :  { %16918 = vst [vmem:[#allocation307_spill] sm:$0xff] %v12816_v15  ;;  %16919 = vst [vmem:[#allocation308_spill] sm:$0xff] %v12821_v23  ;;  %v12826_v31 = vld [vmem:[%s16185_s22 + $0x10] sm:$0xff]  ;;  %v12831_v7 = vld [vmem:[%s16185_s22 + $0x18] sm:$0xff] }
  0xa6   :  { %16920 = vst [vmem:[#allocation309_spill] sm:$0xff] %v12826_v31  ;;  %16921 = vst [vmem:[#allocation310_spill] sm:$0xff] %v12831_v7  ;;  %v12836_v61 = vld [vmem:[%s16185_s22 + $0x20] sm:$0xff]  ;;  %v12841_v15 = vld [vmem:[%s16185_s22 + $0x28] sm:$0xff] }
  0xa7   :  { %16922 = vst [vmem:[#allocation311_spill] sm:$0xff] %v12836_v61  ;;  %16923 = vst [vmem:[#allocation312_spill] sm:$0xff] %v12841_v15  ;;  %v12846_v23 = vld [vmem:[%s16185_s22 + $0x30] sm:$0xff]  ;;  %v12851_v31 = vld [vmem:[%s16185_s22 + $0x38] sm:$0xff] }
  0xa8   :  { %16924 = vst [vmem:[#allocation313_spill] sm:$0xff] %v12846_v23  ;;  %16925 = vst [vmem:[#allocation314_spill] sm:$0xff] %v12851_v31  ;;  %v12856_v7 = vld [vmem:[%s16185_s22 + $0x40] sm:$0xff]  ;;  %v12861_v61 = vld [vmem:[%s16185_s22 + $0x48] sm:$0xff] }
  0xa9   :  { %16926 = vst [vmem:[#allocation315_spill] sm:$0xff] %v12856_v7  ;;  %16927 = vst [vmem:[#allocation316_spill] sm:$0xff] %v12861_v61  ;;  %v12866_v15 = vld [vmem:[%s16185_s22 + $0x50] sm:$0xff]  ;;  %v12871_v23 = vld [vmem:[%s16185_s22 + $0x58] sm:$0xff] }
  0xaa   :  { %16928 = vst [vmem:[#allocation317_spill] sm:$0xff] %v12866_v15  ;;  %16929 = vst [vmem:[#allocation318_spill] sm:$0xff] %v12871_v23  ;;  %v12876_v31 = vld [vmem:[%s16185_s22 + $0x60] sm:$0xff]  ;;  %v12881_v7 = vld [vmem:[%s16185_s22 + $0x68] sm:$0xff] }
  0xab   :  { %16930 = vst [vmem:[#allocation319_spill] sm:$0xff] %v12876_v31  ;;  %16931 = vst [vmem:[#allocation320_spill] sm:$0xff] %v12881_v7  ;;  %v12886_v61 = vld [vmem:[%s16185_s22 + $0x70] sm:$0xff]  ;;  %v12891_v15 = vld [vmem:[%s16185_s22 + $0x78] sm:$0xff] }
  0xac   :  { %16932 = vst [vmem:[#allocation321_spill] sm:$0xff] %v12886_v61  ;;  %16933 = vst [vmem:[#allocation322_spill] sm:$0xff] %v12891_v15  ;;  %v12896_v23 = vld [vmem:[%s16185_s22 + $0x80] sm:$0xff]  ;;  %v12901_v31 = vld [vmem:[%s16185_s22 + $0x88] sm:$0xff] }
  0xad   :  { %16934 = vst [vmem:[#allocation323_spill] sm:$0xff] %v12896_v23  ;;  %16935 = vst [vmem:[#allocation324_spill] sm:$0xff] %v12901_v31  ;;  %v12906_v7 = vld [vmem:[%s16185_s22 + $0x90] sm:$0xff]  ;;  %v12911_v61 = vld [vmem:[%s16185_s22 + $0x98] sm:$0xff] }
  0xae   :  { %16936 = vst [vmem:[#allocation325_spill] sm:$0xff] %v12906_v7  ;;  %16937 = vst [vmem:[#allocation326_spill] sm:$0xff] %v12911_v61  ;;  %v12916_v15 = vld [vmem:[%s16185_s22 + $0xa0] sm:$0xff]  ;;  %v12921_v23 = vld [vmem:[%s16185_s22 + $0xa8] sm:$0xff] }
  0xaf   :  { %16938 = vst [vmem:[#allocation327_spill] sm:$0xff] %v12916_v15  ;;  %16939 = vst [vmem:[#allocation328_spill] sm:$0xff] %v12921_v23  ;;  %v12926_v31 = vld [vmem:[%s16185_s22 + $0xb0] sm:$0xff]  ;;  %v12931_v7 = vld [vmem:[%s16185_s22 + $0xb8] sm:$0xff] }
  0xb0   :  { %16940 = vst [vmem:[#allocation329_spill] sm:$0xff] %v12926_v31  ;;  %16941 = vst [vmem:[#allocation330_spill] sm:$0xff] %v12931_v7  ;;  %v12936_v61 = vld [vmem:[%s16185_s22 + $0xc0] sm:$0xff]  ;;  %v12941_v15 = vld [vmem:[%s16185_s22 + $0xc8] sm:$0xff] }
  0xb1   :  { %16942 = vst [vmem:[#allocation331_spill] sm:$0xff] %v12936_v61  ;;  %16943 = vst [vmem:[#allocation332_spill] sm:$0xff] %v12941_v15  ;;  %v12946_v23 = vld [vmem:[%s16185_s22 + $0xd0] sm:$0xff]  ;;  %v12951_v31 = vld [vmem:[%s16185_s22 + $0xd8] sm:$0xff] }
  0xb2   :  { %16944 = vst [vmem:[#allocation333_spill] sm:$0xff] %v12946_v23  ;;  %16945 = vst [vmem:[#allocation334_spill] sm:$0xff] %v12951_v31  ;;  %v12956_v7 = vld [vmem:[%s16185_s22 + $0xe0] sm:$0xff]  ;;  %v12961_v61 = vld [vmem:[%s16185_s22 + $0xe8] sm:$0xff] }
  0xb3   :  { %16946 = vst [vmem:[#allocation335_spill] sm:$0xff] %v12956_v7  ;;  %16947 = vst [vmem:[#allocation336_spill] sm:$0xff] %v12961_v61  ;;  %v12966_v15 = vld [vmem:[%s16185_s22 + $0xf0] sm:$0xff]  ;;  %v12971_v23 = vld [vmem:[%s16185_s22 + $0xf8] sm:$0xff] }
  0xb4   :  { %16948 = vst [vmem:[#allocation337_spill] sm:$0xff] %v12966_v15  ;;  %16949 = vst [vmem:[#allocation338_spill] sm:$0xff] %v12971_v23  ;;  %v12976_v31 = vld [vmem:[%s16185_s22 + $0x100] sm:$0xff]  ;;  %v12981_v7 = vld [vmem:[%s16185_s22 + $0x108] sm:$0xff] }
  0xb5   :  { %16950 = vst [vmem:[#allocation339_spill] sm:$0xff] %v12976_v31  ;;  %16951 = vst [vmem:[#allocation340_spill] sm:$0xff] %v12981_v7  ;;  %v12986_v61 = vld [vmem:[%s16185_s22 + $0x110] sm:$0xff]  ;;  %v12991_v15 = vld [vmem:[%s16185_s22 + $0x118] sm:$0xff] }
  0xb6   :  { %16952 = vst [vmem:[#allocation341_spill] sm:$0xff] %v12986_v61  ;;  %16953 = vst [vmem:[#allocation342_spill] sm:$0xff] %v12991_v15  ;;  %v12996_v23 = vld [vmem:[%s16185_s22 + $0x120] sm:$0xff]  ;;  %v13001_v31 = vld [vmem:[%s16185_s22 + $0x128] sm:$0xff] }
  0xb7   :  { %16954 = vst [vmem:[#allocation343_spill] sm:$0xff] %v12996_v23  ;;  %16955 = vst [vmem:[#allocation344_spill] sm:$0xff] %v13001_v31  ;;  %v13006_v7 = vld [vmem:[%s16185_s22 + $0x130] sm:$0xff]  ;;  %v13011_v61 = vld [vmem:[%s16185_s22 + $0x138] sm:$0xff] }
  0xb8   :  { %16956 = vst [vmem:[#allocation345_spill] sm:$0xff] %v13006_v7  ;;  %16957 = vst [vmem:[#allocation346_spill] sm:$0xff] %v13011_v61  ;;  %v13016_v15 = vld [vmem:[%s16185_s22 + $0x140] sm:$0xff]  ;;  %v13021_v23 = vld [vmem:[%s16185_s22 + $0x148] sm:$0xff] }
  0xb9   :  { %16958 = vst [vmem:[#allocation347_spill] sm:$0xff] %v13016_v15  ;;  %16959 = vst [vmem:[#allocation348_spill] sm:$0xff] %v13021_v23  ;;  %v13026_v31 = vld [vmem:[%s16185_s22 + $0x150] sm:$0xff]  ;;  %v13031_v7 = vld [vmem:[%s16185_s22 + $0x158] sm:$0xff] }
  0xba   :  { %16960 = vst [vmem:[#allocation349_spill] sm:$0xff] %v13026_v31  ;;  %16961 = vst [vmem:[#allocation350_spill] sm:$0xff] %v13031_v7  ;;  %v13036_v61 = vld [vmem:[%s16185_s22 + $0x160] sm:$0xff]  ;;  %v13041_v15 = vld [vmem:[%s16185_s22 + $0x168] sm:$0xff] }
  0xbb   :  { %16962 = vst [vmem:[#allocation351_spill] sm:$0xff] %v13036_v61  ;;  %16963 = vst [vmem:[#allocation352_spill] sm:$0xff] %v13041_v15  ;;  %v13046_v23 = vld [vmem:[%s16185_s22 + $0x170] sm:$0xff]  ;;  %v13051_v31 = vld [vmem:[%s16185_s22 + $0x178] sm:$0xff] }
  0xbc   :  { %16964 = vst [vmem:[#allocation353_spill] sm:$0xff] %v13046_v23  ;;  %16965 = vst [vmem:[#allocation354_spill] sm:$0xff] %v13051_v31 }
  0xbd   :  { %1111 = vsyncadd [#allocation17 + $0x8], 6144  ;;  %v13056_v7 = vld [vmem:[%s16176_s13] sm:$0xff]  ;;  %v13061_v15 = vld [vmem:[%s16176_s13 + $0x8] sm:$0xff] }
  0xbe   :  { %16966 = vst [vmem:[#allocation355_spill] sm:$0xff] %v13056_v7  ;;  %16967 = vst [vmem:[#allocation356_spill] sm:$0xff] %v13061_v15  ;;  %v13066_v23 = vld [vmem:[%s16176_s13 + $0x10] sm:$0xff]  ;;  %v13071_v31 = vld [vmem:[%s16176_s13 + $0x18] sm:$0xff] }
  0xbf   :  { %16968 = vst [vmem:[#allocation357_spill] sm:$0xff] %v13066_v23  ;;  %16969 = vst [vmem:[#allocation358_spill] sm:$0xff] %v13071_v31  ;;  %v13076_v61 = vld [vmem:[%s16176_s13 + $0x20] sm:$0xff]  ;;  %v13081_v7 = vld [vmem:[%s16176_s13 + $0x28] sm:$0xff] }
  0xc0   :  { %16970 = vst [vmem:[#allocation359_spill] sm:$0xff] %v13076_v61  ;;  %16971 = vst [vmem:[#allocation360_spill] sm:$0xff] %v13081_v7  ;;  %v13086_v15 = vld [vmem:[%s16176_s13 + $0x30] sm:$0xff]  ;;  %v13091_v23 = vld [vmem:[%s16176_s13 + $0x38] sm:$0xff] }
  0xc1   :  { %16972 = vst [vmem:[#allocation361_spill] sm:$0xff] %v13086_v15  ;;  %16973 = vst [vmem:[#allocation362_spill] sm:$0xff] %v13091_v23  ;;  %v13096_v31 = vld [vmem:[%s16176_s13 + $0x40] sm:$0xff]  ;;  %v13101_v61 = vld [vmem:[%s16176_s13 + $0x48] sm:$0xff] }
  0xc2   :  { %16974 = vst [vmem:[#allocation363_spill] sm:$0xff] %v13096_v31  ;;  %16975 = vst [vmem:[#allocation364_spill] sm:$0xff] %v13101_v61  ;;  %v13106_v7 = vld [vmem:[%s16176_s13 + $0x50] sm:$0xff]  ;;  %v13111_v15 = vld [vmem:[%s16176_s13 + $0x58] sm:$0xff] }
  0xc3   :  { %16976 = vst [vmem:[#allocation365_spill] sm:$0xff] %v13106_v7  ;;  %16977 = vst [vmem:[#allocation366_spill] sm:$0xff] %v13111_v15  ;;  %v13116_v23 = vld [vmem:[%s16176_s13 + $0x60] sm:$0xff]  ;;  %v13121_v31 = vld [vmem:[%s16176_s13 + $0x68] sm:$0xff] }
  0xc4   :  { %16978 = vst [vmem:[#allocation367_spill] sm:$0xff] %v13116_v23  ;;  %16979 = vst [vmem:[#allocation368_spill] sm:$0xff] %v13121_v31  ;;  %v13126_v61 = vld [vmem:[%s16176_s13 + $0x70] sm:$0xff]  ;;  %v13131_v7 = vld [vmem:[%s16176_s13 + $0x78] sm:$0xff] }
  0xc5   :  { %16980 = vst [vmem:[#allocation369_spill] sm:$0xff] %v13126_v61  ;;  %16981 = vst [vmem:[#allocation370_spill] sm:$0xff] %v13131_v7  ;;  %v13136_v15 = vld [vmem:[%s16176_s13 + $0x80] sm:$0xff]  ;;  %v13141_v23 = vld [vmem:[%s16176_s13 + $0x88] sm:$0xff] }
  0xc6   :  { %16982 = vst [vmem:[#allocation371_spill] sm:$0xff] %v13136_v15  ;;  %16983 = vst [vmem:[#allocation372_spill] sm:$0xff] %v13141_v23  ;;  %v13146_v31 = vld [vmem:[%s16176_s13 + $0x90] sm:$0xff]  ;;  %v13151_v61 = vld [vmem:[%s16176_s13 + $0x98] sm:$0xff] }
  0xc7   :  { %16984 = vst [vmem:[#allocation373_spill] sm:$0xff] %v13146_v31  ;;  %16985 = vst [vmem:[#allocation374_spill] sm:$0xff] %v13151_v61  ;;  %v13156_v7 = vld [vmem:[%s16176_s13 + $0xa0] sm:$0xff]  ;;  %v13161_v15 = vld [vmem:[%s16176_s13 + $0xa8] sm:$0xff] }
  0xc8   :  { %16986 = vst [vmem:[#allocation375_spill] sm:$0xff] %v13156_v7  ;;  %16987 = vst [vmem:[#allocation376_spill] sm:$0xff] %v13161_v15  ;;  %v13166_v23 = vld [vmem:[%s16176_s13 + $0xb0] sm:$0xff]  ;;  %v13171_v31 = vld [vmem:[%s16176_s13 + $0xb8] sm:$0xff] }
  0xc9   :  { %16988 = vst [vmem:[#allocation377_spill] sm:$0xff] %v13166_v23  ;;  %16989 = vst [vmem:[#allocation378_spill] sm:$0xff] %v13171_v31 }
  0xca   :  { %1201 = vsyncadd [#allocation17 + $0x9], 3072  ;;  %v13176_v61 = vld [vmem:[%s16181_s18] sm:$0xff]  ;;  %v13181_v7 = vld [vmem:[%s16181_s18 + $0x8] sm:$0xff] }
  0xcb   :  { %16990 = vst [vmem:[#allocation379_spill] sm:$0xff] %v13176_v61  ;;  %16991 = vst [vmem:[#allocation380_spill] sm:$0xff] %v13181_v7  ;;  %v13186_v23 = vld [vmem:[%s16181_s18 + $0x10] sm:$0xff]  ;;  %v13191_v31 = vld [vmem:[%s16181_s18 + $0x18] sm:$0xff] }
  0xcc   :  { %16992 = vst [vmem:[#allocation381_spill] sm:$0xff] %v13186_v23  ;;  %16993 = vst [vmem:[#allocation382_spill] sm:$0xff] %v13191_v31 }
  0xcd   :  { %1251 = vsyncadd [#allocation17 + $0xa], 512  ;;  %v13196_v61 = vld [vmem:[%s16186_s23] sm:$0xff]  ;;  %v13201_v7 = vld [vmem:[%s16186_s23 + $0x8] sm:$0xff] }
  0xce   :  { %16994 = vst [vmem:[#allocation383_spill] sm:$0xff] %v13196_v61  ;;  %16995 = vst [vmem:[#allocation384_spill] sm:$0xff] %v13201_v7  ;;  %v13206_v23 = vld [vmem:[%s16186_s23 + $0x10] sm:$0xff]  ;;  %v13211_v31 = vld [vmem:[%s16186_s23 + $0x18] sm:$0xff] }
  0xcf   :  { %16996 = vst [vmem:[#allocation385_spill] sm:$0xff] %v13206_v23  ;;  %16997 = vst [vmem:[#allocation386_spill] sm:$0xff] %v13211_v31  ;;  %v13216_v15 = vld [vmem:[%s16186_s23 + $0x20] sm:$0xff]  ;;  %v13221_v61 = vld [vmem:[%s16186_s23 + $0x28] sm:$0xff] }
  0xd0   :  { %16998 = vst [vmem:[#allocation387_spill] sm:$0xff] %v13216_v15  ;;  %16999 = vst [vmem:[#allocation388_spill] sm:$0xff] %v13221_v61  ;;  %v13226_v7 = vld [vmem:[%s16186_s23 + $0x30] sm:$0xff]  ;;  %v13231_v23 = vld [vmem:[%s16186_s23 + $0x38] sm:$0xff] }
  0xd1   :  { %17000 = vst [vmem:[#allocation389_spill] sm:$0xff] %v13226_v7  ;;  %17001 = vst [vmem:[#allocation390_spill] sm:$0xff] %v13231_v23  ;;  %v13236_v31 = vld [vmem:[%s16186_s23 + $0x40] sm:$0xff]  ;;  %v13241_v15 = vld [vmem:[%s16186_s23 + $0x48] sm:$0xff] }
  0xd2   :  { %17002 = vst [vmem:[#allocation391_spill] sm:$0xff] %v13236_v31  ;;  %17003 = vst [vmem:[#allocation392_spill] sm:$0xff] %v13241_v15  ;;  %v13246_v61 = vld [vmem:[%s16186_s23 + $0x50] sm:$0xff]  ;;  %v13251_v7 = vld [vmem:[%s16186_s23 + $0x58] sm:$0xff] }
  0xd3   :  { %17004 = vst [vmem:[#allocation393_spill] sm:$0xff] %v13246_v61  ;;  %17005 = vst [vmem:[#allocation394_spill] sm:$0xff] %v13251_v7  ;;  %v13256_v23 = vld [vmem:[%s16186_s23 + $0x60] sm:$0xff]  ;;  %v13261_v31 = vld [vmem:[%s16186_s23 + $0x68] sm:$0xff] }
  0xd4   :  { %17006 = vst [vmem:[#allocation395_spill] sm:$0xff] %v13256_v23  ;;  %17007 = vst [vmem:[#allocation396_spill] sm:$0xff] %v13261_v31  ;;  %v13266_v15 = vld [vmem:[%s16186_s23 + $0x70] sm:$0xff]  ;;  %v13271_v61 = vld [vmem:[%s16186_s23 + $0x78] sm:$0xff] }
  0xd5   :  { %17008 = vst [vmem:[#allocation397_spill] sm:$0xff] %v13266_v15  ;;  %17009 = vst [vmem:[#allocation398_spill] sm:$0xff] %v13271_v61  ;;  %v13276_v7 = vld [vmem:[%s16186_s23 + $0x80] sm:$0xff]  ;;  %v13281_v23 = vld [vmem:[%s16186_s23 + $0x88] sm:$0xff] }
  0xd6   :  { %17010 = vst [vmem:[#allocation399_spill] sm:$0xff] %v13276_v7  ;;  %17011 = vst [vmem:[#allocation400_spill] sm:$0xff] %v13281_v23  ;;  %v13286_v31 = vld [vmem:[%s16186_s23 + $0x90] sm:$0xff]  ;;  %v13291_v15 = vld [vmem:[%s16186_s23 + $0x98] sm:$0xff] }
  0xd7   :  { %17012 = vst [vmem:[#allocation401_spill] sm:$0xff] %v13286_v31  ;;  %17013 = vst [vmem:[#allocation402_spill] sm:$0xff] %v13291_v15  ;;  %v13296_v61 = vld [vmem:[%s16186_s23 + $0xa0] sm:$0xff]  ;;  %v13301_v7 = vld [vmem:[%s16186_s23 + $0xa8] sm:$0xff] }
  0xd8   :  { %17014 = vst [vmem:[#allocation403_spill] sm:$0xff] %v13296_v61  ;;  %17015 = vst [vmem:[#allocation404_spill] sm:$0xff] %v13301_v7  ;;  %v13306_v23 = vld [vmem:[%s16186_s23 + $0xb0] sm:$0xff]  ;;  %v13311_v31 = vld [vmem:[%s16186_s23 + $0xb8] sm:$0xff] }
  0xd9   :  { %17016 = vst [vmem:[#allocation405_spill] sm:$0xff] %v13306_v23  ;;  %17017 = vst [vmem:[#allocation406_spill] sm:$0xff] %v13311_v31  ;;  %v13316_v15 = vld [vmem:[%s16186_s23 + $0xc0] sm:$0xff]  ;;  %v13321_v61 = vld [vmem:[%s16186_s23 + $0xc8] sm:$0xff] }
  0xda   :  { %17018 = vst [vmem:[#allocation407_spill] sm:$0xff] %v13316_v15  ;;  %17019 = vst [vmem:[#allocation408_spill] sm:$0xff] %v13321_v61  ;;  %v13326_v7 = vld [vmem:[%s16186_s23 + $0xd0] sm:$0xff]  ;;  %v13331_v23 = vld [vmem:[%s16186_s23 + $0xd8] sm:$0xff] }
  0xdb   :  { %17020 = vst [vmem:[#allocation409_spill] sm:$0xff] %v13326_v7  ;;  %17021 = vst [vmem:[#allocation410_spill] sm:$0xff] %v13331_v23  ;;  %v13336_v31 = vld [vmem:[%s16186_s23 + $0xe0] sm:$0xff]  ;;  %v13341_v15 = vld [vmem:[%s16186_s23 + $0xe8] sm:$0xff] }
  0xdc   :  { %17022 = vst [vmem:[#allocation411_spill] sm:$0xff] %v13336_v31  ;;  %17023 = vst [vmem:[#allocation412_spill] sm:$0xff] %v13341_v15  ;;  %v13346_v61 = vld [vmem:[%s16186_s23 + $0xf0] sm:$0xff]  ;;  %v13351_v7 = vld [vmem:[%s16186_s23 + $0xf8] sm:$0xff] }
  0xdd   :  { %17024 = vst [vmem:[#allocation413_spill] sm:$0xff] %v13346_v61  ;;  %17025 = vst [vmem:[#allocation414_spill] sm:$0xff] %v13351_v7  ;;  %v13356_v23 = vld [vmem:[%s16186_s23 + $0x100] sm:$0xff]  ;;  %v13361_v31 = vld [vmem:[%s16186_s23 + $0x108] sm:$0xff] }
  0xde   :  { %17026 = vst [vmem:[#allocation415_spill] sm:$0xff] %v13356_v23  ;;  %17027 = vst [vmem:[#allocation416_spill] sm:$0xff] %v13361_v31  ;;  %v13366_v15 = vld [vmem:[%s16186_s23 + $0x110] sm:$0xff]  ;;  %v13371_v61 = vld [vmem:[%s16186_s23 + $0x118] sm:$0xff] }
  0xdf   :  { %17028 = vst [vmem:[#allocation417_spill] sm:$0xff] %v13366_v15  ;;  %17029 = vst [vmem:[#allocation418_spill] sm:$0xff] %v13371_v61  ;;  %v13376_v7 = vld [vmem:[%s16186_s23 + $0x120] sm:$0xff]  ;;  %v13381_v23 = vld [vmem:[%s16186_s23 + $0x128] sm:$0xff] }
  0xe0   :  { %17030 = vst [vmem:[#allocation419_spill] sm:$0xff] %v13376_v7  ;;  %17031 = vst [vmem:[#allocation420_spill] sm:$0xff] %v13381_v23  ;;  %v13386_v31 = vld [vmem:[%s16186_s23 + $0x130] sm:$0xff]  ;;  %v13391_v15 = vld [vmem:[%s16186_s23 + $0x138] sm:$0xff] }
  0xe1   :  { %17032 = vst [vmem:[#allocation421_spill] sm:$0xff] %v13386_v31  ;;  %17033 = vst [vmem:[#allocation422_spill] sm:$0xff] %v13391_v15  ;;  %v13396_v61 = vld [vmem:[%s16186_s23 + $0x140] sm:$0xff]  ;;  %v13401_v7 = vld [vmem:[%s16186_s23 + $0x148] sm:$0xff] }
  0xe2   :  { %17034 = vst [vmem:[#allocation423_spill] sm:$0xff] %v13396_v61  ;;  %17035 = vst [vmem:[#allocation424_spill] sm:$0xff] %v13401_v7  ;;  %v13406_v23 = vld [vmem:[%s16186_s23 + $0x150] sm:$0xff]  ;;  %v13411_v31 = vld [vmem:[%s16186_s23 + $0x158] sm:$0xff] }
  0xe3   :  { %17036 = vst [vmem:[#allocation425_spill] sm:$0xff] %v13406_v23  ;;  %17037 = vst [vmem:[#allocation426_spill] sm:$0xff] %v13411_v31  ;;  %v13416_v15 = vld [vmem:[%s16186_s23 + $0x160] sm:$0xff]  ;;  %v13421_v61 = vld [vmem:[%s16186_s23 + $0x168] sm:$0xff] }
  0xe4   :  { %17038 = vst [vmem:[#allocation427_spill] sm:$0xff] %v13416_v15  ;;  %17039 = vst [vmem:[#allocation428_spill] sm:$0xff] %v13421_v61  ;;  %v13426_v7 = vld [vmem:[%s16186_s23 + $0x170] sm:$0xff]  ;;  %v13431_v23 = vld [vmem:[%s16186_s23 + $0x178] sm:$0xff] }
  0xe5   :  { %17040 = vst [vmem:[#allocation429_spill] sm:$0xff] %v13426_v7  ;;  %17041 = vst [vmem:[#allocation430_spill] sm:$0xff] %v13431_v23 }
  0xe6   :  { %1389 = vsyncadd [#allocation17 + $0xb], 6144  ;;  %v13436_v31 = vld [vmem:[%s16177_s14] sm:$0xff]  ;;  %v13441_v61 = vld [vmem:[%s16177_s14 + $0x8] sm:$0xff] }
  0xe7   :  { %17042 = vst [vmem:[#allocation431_spill] sm:$0xff] %v13436_v31  ;;  %17043 = vst [vmem:[#allocation432_spill] sm:$0xff] %v13441_v61  ;;  %v13446_v7 = vld [vmem:[%s16177_s14 + $0x10] sm:$0xff]  ;;  %v13451_v23 = vld [vmem:[%s16177_s14 + $0x18] sm:$0xff] }
  0xe8   :  { %17044 = vst [vmem:[#allocation433_spill] sm:$0xff] %v13446_v7  ;;  %17045 = vst [vmem:[#allocation434_spill] sm:$0xff] %v13451_v23  ;;  %v13456_v15 = vld [vmem:[%s16177_s14 + $0x20] sm:$0xff]  ;;  %v13461_v31 = vld [vmem:[%s16177_s14 + $0x28] sm:$0xff] }
  0xe9   :  { %17046 = vst [vmem:[#allocation435_spill] sm:$0xff] %v13456_v15  ;;  %17047 = vst [vmem:[#allocation436_spill] sm:$0xff] %v13461_v31  ;;  %v13466_v61 = vld [vmem:[%s16177_s14 + $0x30] sm:$0xff]  ;;  %v13471_v7 = vld [vmem:[%s16177_s14 + $0x38] sm:$0xff] }
  0xea   :  { %17048 = vst [vmem:[#allocation437_spill] sm:$0xff] %v13466_v61  ;;  %17049 = vst [vmem:[#allocation438_spill] sm:$0xff] %v13471_v7  ;;  %v13476_v23 = vld [vmem:[%s16177_s14 + $0x40] sm:$0xff]  ;;  %v13481_v15 = vld [vmem:[%s16177_s14 + $0x48] sm:$0xff] }
  0xeb   :  { %17050 = vst [vmem:[#allocation439_spill] sm:$0xff] %v13476_v23  ;;  %17051 = vst [vmem:[#allocation440_spill] sm:$0xff] %v13481_v15  ;;  %v13486_v31 = vld [vmem:[%s16177_s14 + $0x50] sm:$0xff]  ;;  %v13491_v61 = vld [vmem:[%s16177_s14 + $0x58] sm:$0xff] }
  0xec   :  { %17052 = vst [vmem:[#allocation441_spill] sm:$0xff] %v13486_v31  ;;  %17053 = vst [vmem:[#allocation442_spill] sm:$0xff] %v13491_v61  ;;  %v13496_v7 = vld [vmem:[%s16177_s14 + $0x60] sm:$0xff]  ;;  %v13501_v23 = vld [vmem:[%s16177_s14 + $0x68] sm:$0xff] }
  0xed   :  { %17054 = vst [vmem:[#allocation443_spill] sm:$0xff] %v13496_v7  ;;  %17055 = vst [vmem:[#allocation444_spill] sm:$0xff] %v13501_v23  ;;  %v13506_v15 = vld [vmem:[%s16177_s14 + $0x70] sm:$0xff]  ;;  %v13511_v31 = vld [vmem:[%s16177_s14 + $0x78] sm:$0xff] }
  0xee   :  { %17056 = vst [vmem:[#allocation445_spill] sm:$0xff] %v13506_v15  ;;  %17057 = vst [vmem:[#allocation446_spill] sm:$0xff] %v13511_v31  ;;  %v13516_v61 = vld [vmem:[%s16177_s14 + $0x80] sm:$0xff]  ;;  %v13521_v7 = vld [vmem:[%s16177_s14 + $0x88] sm:$0xff] }
  0xef   :  { %17058 = vst [vmem:[#allocation447_spill] sm:$0xff] %v13516_v61  ;;  %17059 = vst [vmem:[#allocation448_spill] sm:$0xff] %v13521_v7  ;;  %v13526_v23 = vld [vmem:[%s16177_s14 + $0x90] sm:$0xff]  ;;  %v13531_v15 = vld [vmem:[%s16177_s14 + $0x98] sm:$0xff] }
  0xf0   :  { %17060 = vst [vmem:[#allocation449_spill] sm:$0xff] %v13526_v23  ;;  %17061 = vst [vmem:[#allocation450_spill] sm:$0xff] %v13531_v15  ;;  %v13536_v31 = vld [vmem:[%s16177_s14 + $0xa0] sm:$0xff]  ;;  %v13541_v61 = vld [vmem:[%s16177_s14 + $0xa8] sm:$0xff] }
  0xf1   :  { %17062 = vst [vmem:[#allocation451_spill] sm:$0xff] %v13536_v31  ;;  %17063 = vst [vmem:[#allocation452_spill] sm:$0xff] %v13541_v61  ;;  %v13546_v7 = vld [vmem:[%s16177_s14 + $0xb0] sm:$0xff]  ;;  %v13551_v23 = vld [vmem:[%s16177_s14 + $0xb8] sm:$0xff] }
  0xf2   :  { %17064 = vst [vmem:[#allocation453_spill] sm:$0xff] %v13546_v7  ;;  %17065 = vst [vmem:[#allocation454_spill] sm:$0xff] %v13551_v23 }
  0xf3   :  { %1479 = vsyncadd [#allocation17 + $0xc], 3072  ;;  %v13556_v15 = vld [vmem:[%s16182_s19] sm:$0xff]  ;;  %v13561_v31 = vld [vmem:[%s16182_s19 + $0x8] sm:$0xff] }
  0xf4   :  { %17066 = vst [vmem:[#allocation455_spill] sm:$0xff] %v13556_v15  ;;  %17067 = vst [vmem:[#allocation456_spill] sm:$0xff] %v13561_v31  ;;  %v13566_v7 = vld [vmem:[%s16182_s19 + $0x10] sm:$0xff]  ;;  %v13571_v23 = vld [vmem:[%s16182_s19 + $0x18] sm:$0xff] }
  0xf5   :  { %17068 = vst [vmem:[#allocation457_spill] sm:$0xff] %v13566_v7  ;;  %17069 = vst [vmem:[#allocation458_spill] sm:$0xff] %v13571_v23 }
  0xf6   :  { %1529 = vsyncadd [#allocation17 + $0xd], 512  ;;  %v13576_v15 = vld [vmem:[%s16187_s24] sm:$0xff]  ;;  %v13581_v31 = vld [vmem:[%s16187_s24 + $0x8] sm:$0xff] }
  0xf7   :  { %17070 = vst [vmem:[#allocation459_spill] sm:$0xff] %v13576_v15  ;;  %17071 = vst [vmem:[#allocation460_spill] sm:$0xff] %v13581_v31  ;;  %v13586_v7 = vld [vmem:[%s16187_s24 + $0x10] sm:$0xff]  ;;  %v13591_v23 = vld [vmem:[%s16187_s24 + $0x18] sm:$0xff] }
  0xf8   :  { %17072 = vst [vmem:[#allocation461_spill] sm:$0xff] %v13586_v7  ;;  %17073 = vst [vmem:[#allocation462_spill] sm:$0xff] %v13591_v23  ;;  %v13596_v61 = vld [vmem:[%s16187_s24 + $0x20] sm:$0xff]  ;;  %v13601_v15 = vld [vmem:[%s16187_s24 + $0x28] sm:$0xff] }
  0xf9   :  { %17074 = vst [vmem:[#allocation463_spill] sm:$0xff] %v13596_v61  ;;  %17075 = vst [vmem:[#allocation464_spill] sm:$0xff] %v13601_v15  ;;  %v13606_v31 = vld [vmem:[%s16187_s24 + $0x30] sm:$0xff]  ;;  %v13611_v7 = vld [vmem:[%s16187_s24 + $0x38] sm:$0xff] }
  0xfa   :  { %17076 = vst [vmem:[#allocation465_spill] sm:$0xff] %v13606_v31  ;;  %17077 = vst [vmem:[#allocation466_spill] sm:$0xff] %v13611_v7  ;;  %v13616_v23 = vld [vmem:[%s16187_s24 + $0x40] sm:$0xff]  ;;  %v13621_v61 = vld [vmem:[%s16187_s24 + $0x48] sm:$0xff] }
  0xfb   :  { %17078 = vst [vmem:[#allocation467_spill] sm:$0xff] %v13616_v23  ;;  %17079 = vst [vmem:[#allocation468_spill] sm:$0xff] %v13621_v61  ;;  %v13626_v15 = vld [vmem:[%s16187_s24 + $0x50] sm:$0xff]  ;;  %v13631_v31 = vld [vmem:[%s16187_s24 + $0x58] sm:$0xff] }
  0xfc   :  { %17080 = vst [vmem:[#allocation469_spill] sm:$0xff] %v13626_v15  ;;  %17081 = vst [vmem:[#allocation470_spill] sm:$0xff] %v13631_v31  ;;  %v13636_v7 = vld [vmem:[%s16187_s24 + $0x60] sm:$0xff]  ;;  %v13641_v23 = vld [vmem:[%s16187_s24 + $0x68] sm:$0xff] }
  0xfd   :  { %17082 = vst [vmem:[#allocation471_spill] sm:$0xff] %v13636_v7  ;;  %17083 = vst [vmem:[#allocation472_spill] sm:$0xff] %v13641_v23  ;;  %v13646_v61 = vld [vmem:[%s16187_s24 + $0x70] sm:$0xff]  ;;  %v13651_v15 = vld [vmem:[%s16187_s24 + $0x78] sm:$0xff] }
  0xfe   :  { %17084 = vst [vmem:[#allocation473_spill] sm:$0xff] %v13646_v61  ;;  %17085 = vst [vmem:[#allocation474_spill] sm:$0xff] %v13651_v15  ;;  %v13656_v31 = vld [vmem:[%s16187_s24 + $0x80] sm:$0xff]  ;;  %v13661_v7 = vld [vmem:[%s16187_s24 + $0x88] sm:$0xff] }
  0xff   :  { %17086 = vst [vmem:[#allocation475_spill] sm:$0xff] %v13656_v31  ;;  %17087 = vst [vmem:[#allocation476_spill] sm:$0xff] %v13661_v7  ;;  %v13666_v23 = vld [vmem:[%s16187_s24 + $0x90] sm:$0xff]  ;;  %v13671_v61 = vld [vmem:[%s16187_s24 + $0x98] sm:$0xff] }
 0x100   :  { %17088 = vst [vmem:[#allocation477_spill] sm:$0xff] %v13666_v23  ;;  %17089 = vst [vmem:[#allocation478_spill] sm:$0xff] %v13671_v61  ;;  %v13676_v15 = vld [vmem:[%s16187_s24 + $0xa0] sm:$0xff]  ;;  %v13681_v31 = vld [vmem:[%s16187_s24 + $0xa8] sm:$0xff] }
 0x101   :  { %17090 = vst [vmem:[#allocation479_spill] sm:$0xff] %v13676_v15  ;;  %17091 = vst [vmem:[#allocation480_spill] sm:$0xff] %v13681_v31  ;;  %v13686_v7 = vld [vmem:[%s16187_s24 + $0xb0] sm:$0xff]  ;;  %v13691_v23 = vld [vmem:[%s16187_s24 + $0xb8] sm:$0xff] }
 0x102   :  { %17092 = vst [vmem:[#allocation481_spill] sm:$0xff] %v13686_v7  ;;  %17093 = vst [vmem:[#allocation482_spill] sm:$0xff] %v13691_v23  ;;  %v13696_v61 = vld [vmem:[%s16187_s24 + $0xc0] sm:$0xff]  ;;  %v13701_v15 = vld [vmem:[%s16187_s24 + $0xc8] sm:$0xff] }
 0x103   :  { %17094 = vst [vmem:[#allocation483_spill] sm:$0xff] %v13696_v61  ;;  %17095 = vst [vmem:[#allocation484_spill] sm:$0xff] %v13701_v15  ;;  %v13706_v31 = vld [vmem:[%s16187_s24 + $0xd0] sm:$0xff]  ;;  %v13711_v7 = vld [vmem:[%s16187_s24 + $0xd8] sm:$0xff] }
 0x104   :  { %17096 = vst [vmem:[#allocation485_spill] sm:$0xff] %v13706_v31  ;;  %17097 = vst [vmem:[#allocation486_spill] sm:$0xff] %v13711_v7  ;;  %v13716_v23 = vld [vmem:[%s16187_s24 + $0xe0] sm:$0xff]  ;;  %v13721_v61 = vld [vmem:[%s16187_s24 + $0xe8] sm:$0xff] }
 0x105   :  { %17098 = vst [vmem:[#allocation487_spill] sm:$0xff] %v13716_v23  ;;  %17099 = vst [vmem:[#allocation488_spill] sm:$0xff] %v13721_v61  ;;  %v13726_v15 = vld [vmem:[%s16187_s24 + $0xf0] sm:$0xff]  ;;  %v13731_v31 = vld [vmem:[%s16187_s24 + $0xf8] sm:$0xff] }
 0x106   :  { %17100 = vst [vmem:[#allocation489_spill] sm:$0xff] %v13726_v15  ;;  %17101 = vst [vmem:[#allocation490_spill] sm:$0xff] %v13731_v31  ;;  %v13736_v7 = vld [vmem:[%s16187_s24 + $0x100] sm:$0xff]  ;;  %v13741_v23 = vld [vmem:[%s16187_s24 + $0x108] sm:$0xff] }
 0x107   :  { %17102 = vst [vmem:[#allocation491_spill] sm:$0xff] %v13736_v7  ;;  %17103 = vst [vmem:[#allocation492_spill] sm:$0xff] %v13741_v23  ;;  %v13746_v61 = vld [vmem:[%s16187_s24 + $0x110] sm:$0xff]  ;;  %v13751_v15 = vld [vmem:[%s16187_s24 + $0x118] sm:$0xff] }
 0x108   :  { %17104 = vst [vmem:[#allocation493_spill] sm:$0xff] %v13746_v61  ;;  %17105 = vst [vmem:[#allocation494_spill] sm:$0xff] %v13751_v15  ;;  %v13756_v31 = vld [vmem:[%s16187_s24 + $0x120] sm:$0xff]  ;;  %v13761_v7 = vld [vmem:[%s16187_s24 + $0x128] sm:$0xff] }
 0x109   :  { %17106 = vst [vmem:[#allocation495_spill] sm:$0xff] %v13756_v31  ;;  %17107 = vst [vmem:[#allocation496_spill] sm:$0xff] %v13761_v7  ;;  %v13766_v23 = vld [vmem:[%s16187_s24 + $0x130] sm:$0xff]  ;;  %v13771_v61 = vld [vmem:[%s16187_s24 + $0x138] sm:$0xff] }
 0x10a   :  { %17108 = vst [vmem:[#allocation497_spill] sm:$0xff] %v13766_v23  ;;  %17109 = vst [vmem:[#allocation498_spill] sm:$0xff] %v13771_v61  ;;  %v13776_v15 = vld [vmem:[%s16187_s24 + $0x140] sm:$0xff]  ;;  %v13781_v31 = vld [vmem:[%s16187_s24 + $0x148] sm:$0xff] }
 0x10b   :  { %17110 = vst [vmem:[#allocation499_spill] sm:$0xff] %v13776_v15  ;;  %17111 = vst [vmem:[#allocation500_spill] sm:$0xff] %v13781_v31  ;;  %v13786_v7 = vld [vmem:[%s16187_s24 + $0x150] sm:$0xff]  ;;  %v13791_v23 = vld [vmem:[%s16187_s24 + $0x158] sm:$0xff] }
 0x10c   :  { %17112 = vst [vmem:[#allocation501_spill] sm:$0xff] %v13786_v7  ;;  %17113 = vst [vmem:[#allocation502_spill] sm:$0xff] %v13791_v23  ;;  %v13796_v61 = vld [vmem:[%s16187_s24 + $0x160] sm:$0xff]  ;;  %v13801_v15 = vld [vmem:[%s16187_s24 + $0x168] sm:$0xff] }
 0x10d   :  { %17114 = vst [vmem:[#allocation503_spill] sm:$0xff] %v13796_v61  ;;  %17115 = vst [vmem:[#allocation504_spill] sm:$0xff] %v13801_v15  ;;  %v13806_v31 = vld [vmem:[%s16187_s24 + $0x170] sm:$0xff]  ;;  %v13811_v7 = vld [vmem:[%s16187_s24 + $0x178] sm:$0xff] }
 0x10e   :  { %17116 = vst [vmem:[#allocation505_spill] sm:$0xff] %v13806_v31  ;;  %17117 = vst [vmem:[#allocation506_spill] sm:$0xff] %v13811_v7 }
 0x10f   :  { %1667 = vsyncadd [#allocation17 + $0xe], 6144  ;;  %s17118_s15 = sld [smem:[#allocation509_spill]]  ;;  %v16637_v61 = vmov 0.0   ;;  %vm1713_vm0 = vcmask 523264   ;;  %vm1787_vm1 = vcmask 261120  }
 0x110   :  { %1717 = vmatprep.subr.mxu0 %v16637_v61  ;;  %s17119_s21 = sld [smem:[#allocation508_spill]] }
 0x111   :  { %s17120_s18 = sld [smem:[#allocation515_spill]] }
 0x112   :  { %s17122_s29 = sld [smem:[#allocation510_spill]] }
 0x115   :  { %v1697_v23 = vld [vmem:[%s17118_s15 + $0x78] sm:$0xff]  ;;  %v1696_v15 = vld [vmem:[%s17118_s15 + $0x70] sm:$0xff]  ;;  %v1695_v31 = vld [vmem:[%s17118_s15 + $0x68] sm:$0xff] }
 0x116   :  { %1718 = vmatpush1.msra.mxu0 %v1697_v23  ;;  %v1694_v7 = vld [vmem:[%s17118_s15 + $0x60] sm:$0xff]  ;;  %v1693_v23 = vld [vmem:[%s17118_s15 + $0x58] sm:$0xff]  ;;  %v13835_v45 = vld [vmem:[%s17119_s21 + $0x8] sm:$0xff] }
 0x117   :  { %1719 = vmatprep.subr.mxu0 %v16637_v61  ;;  %v1671_v63 = vsub.f32 0.0, %v13835_v45  ;;  %v1691_v47 = vld [vmem:[%s17118_s15 + $0x48] sm:$0xff]  ;;  %v1690_v55 = vld [vmem:[%s17118_s15 + $0x40] sm:$0xff] }
 0x118   :  { %1720 = vmatpush1.msra.mxu0 %v1696_v15  ;;  %v13840_v15 = vld [vmem:[%s17119_s21] sm:$0xff] }
 0x119   :  { %1721 = vmatprep.subr.mxu0 %v16637_v61  ;;  %v1674_v53 = vmul.f32 1.442695, %v1671_v63  ;;  %v1688_v63 = vld [vmem:[%s17118_s15 + $0x30] sm:$0xff] }
 0x11a   :  { %1722 = vmatpush1.msra.mxu0 %v1695_v31  ;;  %v1692_v31 = vld [vmem:[%s17118_s15 + $0x50] sm:$0xff] }
 0x11b   :  { %1723 = vmatprep.subr.mxu0 %v16637_v61  ;;  %10243 = vpow2.f32 %v1674_v53  ;;  %v1685_v53 = vld [vmem:[%s17118_s15 + $0x18] sm:$0xff] }
 0x11c   :  { %1724 = vmatpush1.msra.mxu0 %v1694_v7  ;;  %v1670_v7 = vsub.f32 0.0, %v13840_v15 }
 0x11d   :  { %1725 = vmatprep.subr.mxu0 %v16637_v61 }
 0x11e   :  { %1726 = vmatpush1.msra.mxu0 %v1693_v23  ;;  %v1672_v37 = vmul.f32 1.442695, %v1670_v7  ;;  %v1689_v23 = vld [vmem:[%s17118_s15 + $0x38] sm:$0xff] }
 0x11f   :  { %1727 = vmatprep.subr.mxu0 %v16637_v61 }
 0x120   :  { %1728 = vmatpush1.msra.mxu0 %v1692_v31  ;;  %10245 = vpow2.f32 %v1672_v37  ;;  %v1687_v37 = vld [vmem:[%s17118_s15 + $0x28] sm:$0xff] }
 0x121   :  { %1729 = vmatprep.subr.mxu0 %v16637_v61 }
 0x122   :  { %1730 = vmatpush1.msra.mxu0 %v1691_v47  ;;  %v1686_v47 = vld [vmem:[%s17118_s15 + $0x20] sm:$0xff] }
 0x123   :  { %1731 = vmatprep.subr.mxu0 %v16637_v61 }
 0x124   :  { %1732 = vmatpush1.msra.mxu0 %v1690_v55  ;;  %v1684_v55 = vld [vmem:[%s17118_s15 + $0x10] sm:$0xff] }
 0x125   :  { %1733 = vmatprep.subr.mxu0 %v16637_v61 }
 0x126   :  { %1734 = vmatpush1.msra.mxu0 %v1689_v23  ;;  %v1683_v23 = vld [vmem:[%s17118_s15 + $0x8] sm:$0xff] }
 0x127   :  { %1735 = vmatprep.subr.mxu0 %v16637_v61 }
 0x128   :  { %1736 = vmatpush1.msra.mxu0 %v1688_v63  ;;  %v10244_v31 = vpop.eup %10243 }
 0x129   :  { %1737 = vmatprep.subr.mxu0 %v16637_v61  ;;  %v1677_v63 = vadd.f32 1.0, %v10244_v31  ;;  %v1703_v31 = vld [vmem:[%s17118_s15 + $0xa8] sm:$0xff] }
 0x12a   :  { %1738 = vmatpush1.msra.mxu0 %v1687_v37 }
 0x12b   :  { %1739 = vmatprep.subr.mxu0 %v16637_v61  ;;  %10247 = vrcp.f32 %v1677_v63  ;;  %v1700_v63 = vld [vmem:[%s17118_s15 + $0x90] sm:$0xff] }
 0x12c   :  { %1740 = vmatpush1.msra.mxu0 %v1686_v47  ;;  %v1682_v47 = vld [vmem:[%s17118_s15] sm:$0xff] }
 0x12d   :  { %1741 = vmatprep.subr.mxu0 %v16637_v61  ;;  %v10246_v7 = vpop.eup %10245 }
 0x12e   :  { %1742 = vmatpush1.msra.mxu0 %v1685_v53  ;;  %v1676_v37 = vadd.f32 1.0, %v10246_v7  ;;  %v1705_v53 = vld [vmem:[%s17118_s15 + $0xb8] sm:$0xff]  ;;  %v1702_v7 = vld [vmem:[%s17118_s15 + $0xa0] sm:$0xff] }
 0x12f   :  { %1743 = vmatprep.subr.mxu0 %v16637_v61 }
 0x130   :  { %1744 = vmatpush1.msra.mxu0 %v1684_v55  ;;  %10249 = vrcp.f32 %v1676_v37  ;;  %v1704_v55 = vld [vmem:[%s17118_s15 + $0xb0] sm:$0xff] }
 0x131   :  { %1745 = vmatprep.subr.mxu0 %v16637_v61 }
 0x132   :  { %1746 = vmatpush1.msra.mxu0 %v1683_v23  ;;  %v1701_v23 = vld [vmem:[%s17118_s15 + $0x98] sm:$0xff] }
 0x133   :  { %1747 = vmatprep.subr.mxu0 %v16637_v61 }
 0x134   :  { %1748 = vmatpush1.msra.mxu0 %v1682_v47 }
 0x135   :  { %1765 = vmatprep.subr.mxu0 %v16637_v61 }
 0x136   :  { %1766 = vmatpush2.msra.mxu0 %v1705_v53  ;;  %v1699_v53 = vld [vmem:[%s17118_s15 + $0x88] sm:$0xff] }
 0x137   :  { %1767 = vmatprep.subr.mxu0 %v16637_v61 }
 0x138   :  { %1768 = vmatpush2.msra.mxu0 %v1704_v55  ;;  %v10248_v37 = vpop.eup %10247 }
 0x139   :  { %1769 = vmatprep.subr.mxu0 %v16637_v61  ;;  %v1681_v55 = vmul.f32 %v10248_v37, %v13835_v45  ;;  %v9755_v45 = vld [vmem:[%s17122_s29] ss:$0 sm:$0xff] }
 0x13a   :  { %1770 = vmatpush2.msra.mxu0 %v1703_v31  ;;  %v1698_v31 = vld [vmem:[%s17118_s15 + $0x80] sm:$0xff] }
 0x13b   :  { %1771 = vmatprep.subr.mxu0 %v16637_v61  ;;  %9756 = vmatprep.mubr.msk.f32.mxu0 %vm1713_vm0, %v1681_v55 }
 0x13c   :  { %1772 = vmatpush2.msra.mxu0 %v1702_v7 }
 0x13d   :  { %1773 = vmatprep.subr.mxu0 %v16637_v61  ;;  %v10250_v47 = vpop.eup %10249 }
 0x13e   :  { %1774 = vmatpush2.msra.mxu0 %v1701_v23  ;;  %v1679_v7 = vmul.f32 %v10250_v47, %v13840_v15  ;;  %v13926_v23 = vld [vmem:[%s17120_s18] sm:$0x1] }
 0x13f   :  { %1775 = vmatprep.subr.mxu0 %v16637_v61  ;;  %17121 = vst [vmem:[#allocation507_spill] sm:$0xff] %v13926_v23 }
 0x140   :  { %1776 = vmatpush2.msra.mxu0 %v1700_v63 }
 0x141   :  { %1777 = vmatprep.subr.mxu0 %v16637_v61 }
 0x142   :  { %1778 = vmatpush2.msra.mxu0 %v1699_v53 }
 0x143   :  { %1779 = vmatprep.subr.mxu0 %v16637_v61 }
 0x144   :  { %1780 = vmatpush2.msra.mxu0 %v1698_v31 }
 0x145   :  { %1782 = vmatmul.mubr.f32.vlgmr.msra.gmra.mxu0 %v1679_v7 }
 0x205   :  { %v1783_v63 = vpop.f32.mrf.mxu0 }
 0x206   :  { %v1784_v37 = vadd.f32 %v9755_v45, %v1783_v63 }
 0x207   :  { %v1785_v55 = vpop.f32.mrf.mxu0 }
 0x208   :  { %1788 = vst.msk [vmem:[#allocation18] sm:$0xff] %vm1787_vm1, %v1784_v37 }
 0x209   :  { %11179 = dma.done.wait [#allocation17], 12288 }
 0x20a   :  { %11180 = vsyncadd [#allocation17], 4294955008 }
 0x20b   :  { %11181 = dma.done.wait [#allocation17 + $0x1], 2048 }
 0x20c   :  { %11182 = vsyncadd [#allocation17 + $0x1], 4294965248  ;;  %v1979_v15 = vsub.f32 0.0, %v11761_v38  ;;  %v1987_v47 = vsub.f32 0.0, %v11801_v54  ;;  %v1981_v53 = vsub.f32 0.0, %v11771_v36  ;;  %v1989_v31 = vsub.f32 0.0, %v11811_v52 }
 0x20d   :  { %11183 = dma.done.wait [#allocation17 + $0x2], 6144 }
 0x20e   :  { %11184 = vsyncadd [#allocation17 + $0x2], 4294961152  ;;  %v1978_v7 = vsub.f32 0.0, %v11756_v46  ;;  %v1986_v45 = vsub.f32 0.0, %v11796_v62  ;;  %v1980_v63 = vsub.f32 0.0, %v11766_v44  ;;  %v9758_v23 = vcombine.high %v11836_v29, %v11856_v21  ;;  %s17244_s9 = sld [smem:[#allocation512_spill]] }
 0x20f   :  { %v2156_v37 = vmul.f32 1.442695, %v1979_v15  ;;  %v2172_v55 = vmul.f32 1.442695, %v1987_v47  ;;  %v2160_v61 = vmul.f32 1.442695, %v1981_v53  ;;  %v9760_v2 = vcombine.high %v11841_v13, %v11861_v5 }
 0x210   :  { %v2176_v39 = vmul.f32 1.442695, %v1989_v31  ;;  %v1988_v10 = vsub.f32 0.0, %v11806_v60  ;;  %v2154_v8 = vmul.f32 1.442695, %v1978_v7  ;;  %v1963_v0 = vsub.f32 0.0, %v11681_v6  ;;  %2673 = vmatprep.mubr.bf16.mxu1 %v9758_v23 }
 0x211   :  { %10251 = vpow2.f32 %v2156_v37  ;;  %v2170_v11 = vmul.f32 1.442695, %v1986_v45  ;;  %v1971_v15 = vsub.f32 0.0, %v11721_v22  ;;  %2722 = vmatprep.mubr.bf16.mxu0 %v9760_v2  ;;  %v2158_v47 = vmul.f32 1.442695, %v1980_v63  ;;  %s17245_s6 = sld [smem:[#allocation511_spill]] }
 0x212   :  { %10253 = vpow2.f32 %v2172_v55  ;;  %v1965_v53 = vsub.f32 0.0, %v11691_v4  ;;  %v2174_v31 = vmul.f32 1.442695, %v1988_v10  ;;  %v1973_v29 = vsub.f32 0.0, %v11731_v20  ;;  %s17247_s12 = sld [smem:[#allocation514_spill]] }
 0x213   :  { %10255 = vpow2.f32 %v2160_v61  ;;  %v2124_v13 = vmul.f32 1.442695, %v1963_v0  ;;  %v1962_v7 = vsub.f32 0.0, %v11676_v14  ;;  %v2140_v37 = vmul.f32 1.442695, %v1971_v15  ;;  %s17248_s24 = sld [smem:[#allocation513_spill]] }
 0x214   :  { %10257 = vpow2.f32 %v2176_v39  ;;  %v1970_v23 = vsub.f32 0.0, %v11716_v30  ;;  %v2128_v45 = vmul.f32 1.442695, %v1965_v53  ;;  %v1964_v2 = vsub.f32 0.0, %v11686_v12 }
 0x215   :  { %10259 = vpow2.f32 %v2154_v8  ;;  %v2144_v61 = vmul.f32 1.442695, %v1973_v29  ;;  %v1972_v63 = vsub.f32 0.0, %v11726_v28  ;;  %v2122_v10 = vmul.f32 1.442695, %v1962_v7 }
 0x216   :  { %10261 = vpow2.f32 %v2170_v11  ;;  %v2138_v39 = vmul.f32 1.442695, %v1970_v23  ;;  %v2126_v0 = vmul.f32 1.442695, %v1964_v2  ;;  %vm2616_vm2 = vcmask 850944  }
 0x217   :  { %10263 = vpow2.f32 %v2158_v47  ;;  %v2142_v8 = vmul.f32 1.442695, %v1972_v63  ;;  %vm3127_vm3 = vcmask 785408   ;;  %vm11215_vm4 = vmmov 0  }
 0x218   :  { %10265 = vpow2.f32 %v2174_v31 }
 0x219   :  { %10267 = vpow2.f32 %v2124_v13 }
 0x21a   :  { %10269 = vpow2.f32 %v2140_v37 }
 0x21b   :  { %10271 = vpow2.f32 %v2128_v45 }
 0x21c   :  { %10273 = vpow2.f32 %v2144_v61 }
 0x21d   :  { %10275 = vpow2.f32 %v2122_v10 }
 0x21e   :  { %v10252_v11 = vpop.eup %10251  ;;  %10277 = vpow2.f32 %v2138_v39 }
 0x21f   :  { %v10254_v55 = vpop.eup %10253  ;;  %v2267_v15 = vadd.f32 1.0, %v10252_v11  ;;  %10279 = vpow2.f32 %v2126_v0  ;;  %v1947_v11 = vsub.f32 0.0, %v11601_v49 }
 0x220   :  { %v10256_v47 = vpop.eup %10255  ;;  %v2275_v53 = vadd.f32 1.0, %v10254_v55  ;;  %10281 = vpow2.f32 %v2142_v8 }
 0x221   :  { %v10258_v29 = vpop.eup %10257  ;;  %10283 = vrcp.f32 %v2267_v15  ;;  %v2269_v31 = vadd.f32 1.0, %v10256_v47  ;;  %v1955_v47 = vsub.f32 0.0, %v11641_v57 }
 0x222   :  { %v10260_v13 = vpop.eup %10259  ;;  %10285 = vrcp.f32 %v2275_v53  ;;  %v2277_v7 = vadd.f32 1.0, %v10258_v29 }
 0x223   :  { %v10262_v37 = vpop.eup %10261  ;;  %10287 = vrcp.f32 %v2269_v31  ;;  %v2266_v23 = vadd.f32 1.0, %v10260_v13 }
 0x224   :  { %v10264_v45 = vpop.eup %10263  ;;  %10289 = vrcp.f32 %v2277_v7  ;;  %v2274_v2 = vadd.f32 1.0, %v10262_v37  ;;  %v1949_v7 = vsub.f32 0.0, %v11611_v51  ;;  %v1957_v37 = vsub.f32 0.0, %v11651_v59 }
 0x225   :  { %v10266_v61 = vpop.eup %10265  ;;  %10291 = vrcp.f32 %v2266_v23  ;;  %v2268_v63 = vadd.f32 1.0, %v10264_v45 }
 0x226   :  { %v10268_v10 = vpop.eup %10267  ;;  %10293 = vrcp.f32 %v2274_v2  ;;  %v2276_v39 = vadd.f32 1.0, %v10266_v61  ;;  %v2092_v2 = vmul.f32 1.442695, %v1947_v11  ;;  %v1946_v61 = vsub.f32 0.0, %v11596_v48 }
 0x227   :  { %v10270_v0 = vpop.eup %10269  ;;  %10295 = vrcp.f32 %v2268_v63  ;;  %v2251_v8 = vadd.f32 1.0, %v10268_v10  ;;  %v2112_v11 = vmul.f32 1.442695, %v1957_v37 }
 0x228   :  { %v10272_v55 = vpop.eup %10271  ;;  %10297 = vrcp.f32 %v2276_v39  ;;  %v2259_v15 = vadd.f32 1.0, %v10270_v0  ;;  %v2108_v39 = vmul.f32 1.442695, %v1955_v47  ;;  %v1954_v0 = vsub.f32 0.0, %v11636_v56 }
 0x229   :  { %v10274_v53 = vpop.eup %10273  ;;  %10299 = vrcp.f32 %v2251_v8  ;;  %v2253_v29 = vadd.f32 1.0, %v10272_v55  ;;  %v1931_v47 = vsub.f32 0.0, %v11521_v33 }
 0x22a   :  { %v10276_v31 = vpop.eup %10275  ;;  %10301 = vrcp.f32 %v2259_v15  ;;  %v2261_v13 = vadd.f32 1.0, %v10274_v53  ;;  %v1948_v15 = vsub.f32 0.0, %v11606_v50  ;;  %v1956_v53 = vsub.f32 0.0, %v11646_v58 }
 0x22b   :  { %v10278_v23 = vpop.eup %10277  ;;  %10303 = vrcp.f32 %v2253_v29  ;;  %v2250_v45 = vadd.f32 1.0, %v10276_v31  ;;  %v2096_v31 = vmul.f32 1.442695, %v1949_v7  ;;  %v1939_v50 = vsub.f32 0.0, %v11561_v41 }
 0x22c   :  { %v10280_v63 = vpop.eup %10279  ;;  %10305 = vrcp.f32 %v2261_v13  ;;  %v2258_v10 = vadd.f32 1.0, %v10278_v23  ;;  %v2090_v13 = vmul.f32 1.442695, %v1946_v61  ;;  %v2094_v7 = vmul.f32 1.442695, %v1948_v15 }
 0x22d   :  { %v10282_v8 = vpop.eup %10281  ;;  %10307 = vrcp.f32 %v2250_v45  ;;  %v2252_v55 = vadd.f32 1.0, %v10280_v63  ;;  %v2106_v63 = vmul.f32 1.442695, %v1954_v0  ;;  %v2110_v37 = vmul.f32 1.442695, %v1956_v53 }
 0x22e   :  { %v10284_v5 = vpop.eup %10283  ;;  %10309 = vrcp.f32 %v2258_v10  ;;  %v2260_v29 = vadd.f32 1.0, %v10282_v8  ;;  %v1941_v0 = vsub.f32 0.0, %v11571_v43  ;;  %v2076_v15 = vmul.f32 1.442695, %v1939_v50 }
 0x22f   :  { %v10286_v21 = vpop.eup %10285  ;;  %v2445_v48 = vmul.f32 %v10284_v5, %v11761_v38  ;;  %10311 = vrcp.f32 %v2252_v55  ;;  %v1933_v38 = vsub.f32 0.0, %v11531_v35 }
 0x230   :  { %v10288_v23 = vpop.eup %10287  ;;  %v2461_v45 = vmul.f32 %v10286_v21, %v11801_v54  ;;  %10313 = vrcp.f32 %v2260_v29  ;;  %v2060_v54 = vmul.f32 1.442695, %v1931_v47  ;;  %v2080_v50 = vmul.f32 1.442695, %v1941_v0 }
 0x231   :  { %v10290_v58 = vpop.eup %10289  ;;  %v2449_v10 = vmul.f32 %v10288_v23, %v11771_v36  ;;  %10315 = vpow2.f32 %v2092_v2  ;;  %v1940_v23 = vsub.f32 0.0, %v11566_v42 }
 0x232   :  { %v10292_v8 = vpop.eup %10291  ;;  %v2531_v56 = vpack.c.bf16 %v2461_v45, %v2445_v48  ;;  %v2465_v5 = vmul.f32 %v10290_v58, %v11811_v52  ;;  %10317 = vpow2.f32 %v2108_v39  ;;  %v1930_v58 = vsub.f32 0.0, %v11516_v32 }
 0x233   :  { %v10294_v61 = vpop.eup %10293  ;;  %v2443_v21 = vmul.f32 %v10292_v8, %v11756_v46  ;;  %10319 = vpow2.f32 %v2096_v31  ;;  %v1938_v39 = vsub.f32 0.0, %v11556_v40 }
 0x234   :  { %v10296_v55 = vpop.eup %10295  ;;  %2645 = vmatprep.subr.bf16.mxu1 %v2531_v56  ;;  %v2533_v36 = vpack.c.bf16 %v2465_v5, %v2449_v10  ;;  %v2459_v2 = vmul.f32 %v10294_v61, %v11796_v62  ;;  %10321 = vpow2.f32 %v2112_v11  ;;  %v2064_v56 = vmul.f32 1.442695, %v1933_v38 }
 0x235   :  { %v10298_v48 = vpop.eup %10297  ;;  %v2447_v52 = vmul.f32 %v10296_v55, %v11766_v44  ;;  %10323 = vpow2.f32 %v2090_v13  ;;  %v1932_v11 = vsub.f32 0.0, %v11526_v34  ;;  %v2074_v8 = vmul.f32 1.442695, %v1938_v39 }
 0x236   :  { %v10300_v46 = vpop.eup %10299  ;;  %2694 = vmatprep.subr.bf16.mxu0 %v2533_v36  ;;  %v2530_v53 = vpack.c.bf16 %v2459_v2, %v2443_v21  ;;  %v2463_v29 = vmul.f32 %v10298_v48, %v11806_v60  ;;  %10325 = vpow2.f32 %v2106_v63  ;;  %v2058_v63 = vmul.f32 1.442695, %v1930_v58 }
 0x237   :  { %v10302_v31 = vpop.eup %10301  ;;  %v2413_v62 = vmul.f32 %v10300_v46, %v11681_v6  ;;  %10327 = vpow2.f32 %v2094_v7 }
 0x238   :  { %v10304_v44 = vpop.eup %10303  ;;  %2646 = vmatpush1.bf16.xpose.msra.mxu1 %v2530_v53  ;;  %v2532_v13 = vpack.c.bf16 %v2463_v29, %v2447_v52  ;;  %v2429_v47 = vmul.f32 %v10302_v31, %v11721_v22  ;;  %10329 = vpow2.f32 %v2110_v37  ;;  %v2062_v22 = vmul.f32 1.442695, %v1932_v11 }
 0x239   :  { %v10306_v45 = vpop.eup %10305  ;;  %v2417_v60 = vmul.f32 %v10304_v44, %v11691_v4  ;;  %10331 = vpow2.f32 %v2060_v54  ;;  %v2078_v4 = vmul.f32 1.442695, %v1940_v23 }
 0x23a   :  { %v10308_v10 = vpop.eup %10307  ;;  %2695 = vmatpush1.bf16.xpose.msra.mxu0 %v2532_v13  ;;  %v2523_v6 = vpack.c.bf16 %v2429_v47, %v2413_v62  ;;  %v2433_v7 = vmul.f32 %v10306_v45, %v11731_v20  ;;  %10333 = vpow2.f32 %v2076_v15  ;;  %v1915_v13 = vsub.f32 0.0, %v11441_v17 }
 0x23b   :  { %v10310_v5 = vpop.eup %10309  ;;  %v2411_v38 = vmul.f32 %v10308_v10, %v11676_v14  ;;  %10335 = vpow2.f32 %v2064_v56  ;;  %v1923_v45 = vsub.f32 0.0, %v11481_v25  ;;  %v1917_v10 = vsub.f32 0.0, %v11451_v19 }
 0x23c   :  { %v10312_v37 = vpop.eup %10311  ;;  %2647 = vmatprep.subr.bf16.mxu1 %v2523_v6  ;;  %v2525_v61 = vpack.c.bf16 %v2433_v7, %v2417_v60  ;;  %v2427_v21 = vmul.f32 %v10310_v5, %v11716_v30  ;;  %10337 = vpow2.f32 %v2080_v50 }
 0x23d   :  { %v10314_v54 = vpop.eup %10313  ;;  %v2415_v0 = vmul.f32 %v10312_v37, %v11686_v12  ;;  %10339 = vpow2.f32 %v2058_v63  ;;  %v1914_v37 = vsub.f32 0.0, %v11436_v16 }
 0x23e   :  { %v10316_v55 = vpop.eup %10315  ;;  %2696 = vmatprep.subr.bf16.mxu0 %v2525_v61  ;;  %v2522_v20 = vpack.c.bf16 %v2427_v21, %v2411_v38  ;;  %v2431_v36 = vmul.f32 %v10314_v54, %v11726_v28  ;;  %10341 = vpow2.f32 %v2074_v8  ;;  %v1925_v8 = vsub.f32 0.0, %v11491_v27 }
 0x23f   :  { %v10318_v14 = vpop.eup %10317  ;;  %v2235_v2 = vadd.f32 1.0, %v10316_v55  ;;  %10343 = vpow2.f32 %v2062_v22  ;;  %v2028_v22 = vmul.f32 1.442695, %v1915_v13  ;;  %v1922_v54 = vsub.f32 0.0, %v11476_v24 }
 0x240   :  { %v10320_v15 = vpop.eup %10319  ;;  %2648 = vmatpush1.bf16.xpose.msra.mxu1 %v2522_v20  ;;  %v2524_v48 = vpack.c.bf16 %v2431_v36, %v2415_v0  ;;  %v2243_v52 = vadd.f32 1.0, %v10318_v14  ;;  %10345 = vpow2.f32 %v2078_v4  ;;  %v2044_v4 = vmul.f32 1.442695, %v1923_v45  ;;  %v17124_v45 = vld [vmem:[#allocation62_spill] sm:$0xff] }
 0x241   :  { %v10322_v30 = vpop.eup %10321  ;;  %10347 = vrcp.f32 %v2235_v2  ;;  %v2237_v58 = vadd.f32 1.0, %v10320_v15  ;;  %v2032_v20 = vmul.f32 1.442695, %v1917_v10  ;;  %v1916_v36 = vsub.f32 0.0, %v11446_v18  ;;  %v17125_v10 = vld [vmem:[#allocation89_spill] sm:$0xff] }
 0x242   :  { %v10324_v39 = vpop.eup %10323  ;;  %2697 = vmatpush1.bf16.xpose.msra.mxu0 %v2524_v48  ;;  %10349 = vrcp.f32 %v2243_v52  ;;  %v2245_v12 = vadd.f32 1.0, %v10322_v30  ;;  %v2048_v15 = vmul.f32 1.442695, %v1925_v8  ;;  %v1924_v48 = vsub.f32 0.0, %v11486_v26 }
 0x243   :  { %v10326_v46 = vpop.eup %10325  ;;  %10351 = vrcp.f32 %v2237_v58  ;;  %v2234_v53 = vadd.f32 1.0, %v10324_v39  ;;  %v2026_v58 = vmul.f32 1.442695, %v1914_v37  ;;  %v1899_v39 = vsub.f32 0.0, %v11361_v1 }
 0x244   :  { %v10328_v28 = vpop.eup %10327  ;;  %10353 = vrcp.f32 %v2245_v12  ;;  %v2242_v29 = vadd.f32 1.0, %v10326_v46 }
 0x245   :  { %v10330_v56 = vpop.eup %10329  ;;  %10355 = vrcp.f32 %v2234_v53  ;;  %v2236_v31 = vadd.f32 1.0, %v10328_v28  ;;  %v2042_v53 = vmul.f32 1.442695, %v1922_v54  ;;  %v1907_v28 = vsub.f32 0.0, %v11401_v9 }
 0x246   :  { %v10332_v62 = vpop.eup %10331  ;;  %10357 = vrcp.f32 %v2242_v29  ;;  %v2244_v50 = vadd.f32 1.0, %v10330_v56 }
 0x247   :  { %v10334_v11 = vpop.eup %10333  ;;  %10359 = vrcp.f32 %v2236_v31  ;;  %v2219_v44 = vadd.f32 1.0, %v10332_v62  ;;  %v2030_v31 = vmul.f32 1.442695, %v1916_v36  ;;  %v1901_v62 = vsub.f32 0.0, %v11371_v3 }
 0x248   :  { %v10336_v47 = vpop.eup %10335  ;;  %10361 = vrcp.f32 %v2244_v50  ;;  %v2227_v23 = vadd.f32 1.0, %v10334_v11 }
 0x249   :  { %v10338_v60 = vpop.eup %10337  ;;  %10363 = vrcp.f32 %v2219_v44  ;;  %v2221_v63 = vadd.f32 1.0, %v10336_v47  ;;  %v2046_v44 = vmul.f32 1.442695, %v1924_v48  ;;  %v17123_v47 = vld [vmem:[#allocation83_spill] sm:$0xff] }
 0x24a   :  { %v10340_v6 = vpop.eup %10339  ;;  %10365 = vrcp.f32 %v2227_v23  ;;  %v2229_v7 = vadd.f32 1.0, %v10338_v60  ;;  %v1996_v23 = vmul.f32 1.442695, %v1899_v39  ;;  %v1909_v60 = vsub.f32 0.0, %v17124_v45 }
 0x24b   :  { %v10342_v5 = vpop.eup %10341  ;;  %10367 = vrcp.f32 %v2221_v63  ;;  %v2218_v38 = vadd.f32 1.0, %v10340_v6 }
 0x24c   :  { %v10344_v61 = vpop.eup %10343  ;;  %10369 = vrcp.f32 %v2229_v7  ;;  %v2226_v21 = vadd.f32 1.0, %v10342_v5  ;;  %v2012_v7 = vmul.f32 1.442695, %v1907_v28  ;;  %v17126_v5 = vld [vmem:[#allocation84_spill] sm:$0xff] }
 0x24d   :  { %v10346_v0 = vpop.eup %10345  ;;  %10371 = vrcp.f32 %v2218_v38  ;;  %v2220_v55 = vadd.f32 1.0, %v10344_v61 }
 0x24e   :  { %v10348_v14 = vpop.eup %10347  ;;  %10373 = vrcp.f32 %v2226_v21  ;;  %v2228_v2 = vadd.f32 1.0, %v10346_v0  ;;  %v17129_v0 = vld [vmem:[#allocation60_spill] sm:$0xff] }
 0x24f   :  { %v10350_v52 = vpop.eup %10349  ;;  %v2381_v30 = vmul.f32 %v10348_v14, %v11601_v49  ;;  %10375 = vrcp.f32 %v2220_v55  ;;  %v1906_v55 = vsub.f32 0.0, %v17129_v0  ;;  %v2016_v14 = vmul.f32 1.442695, %v1909_v60 }
 0x250   :  { %v10352_v12 = vpop.eup %10351  ;;  %v2397_v46 = vmul.f32 %v10350_v52, %v11641_v57  ;;  %10377 = vrcp.f32 %v2228_v2  ;;  %v17130_v2 = vld [vmem:[#allocation55_spill] sm:$0xff] }
 0x251   :  { %v10354_v29 = vpop.eup %10353  ;;  %v2385_v56 = vmul.f32 %v10352_v12, %v11611_v51  ;;  %10379 = vpow2.f32 %v2028_v22  ;;  %v17127_v22 = vld [vmem:[#allocation54_spill] sm:$0xff] }
 0x252   :  { %v10356_v50 = vpop.eup %10355  ;;  %v2515_v49 = vpack.c.bf16 %v2397_v46, %v2381_v30  ;;  %v2401_v11 = vmul.f32 %v10354_v29, %v11651_v59  ;;  %10381 = vpow2.f32 %v2044_v4  ;;  %v2000_v59 = vmul.f32 1.442695, %v1901_v62  ;;  %v17128_v4 = vld [vmem:[#allocation90_spill] sm:$0xff] }
 0x253   :  { %v10358_v13 = vpop.eup %10357  ;;  %v2379_v57 = vmul.f32 %v10356_v50, %v17123_v47  ;;  %10383 = vpow2.f32 %v2032_v20  ;;  %v1898_v37 = vsub.f32 0.0, %v17127_v22 }
 0x254   :  { %v10360_v63 = vpop.eup %10359  ;;  %2649 = vmatprep.subr.bf16.mxu1 %v2515_v49  ;;  %v2517_v51 = vpack.c.bf16 %v2401_v11, %v2385_v56  ;;  %v2395_v6 = vmul.f32 %v10358_v13, %v17125_v10  ;;  %10385 = vpow2.f32 %v2048_v15  ;;  %v1900_v15 = vsub.f32 0.0, %v17130_v2 }
 0x255   :  { %v10362_v8 = vpop.eup %10361  ;;  %v2383_v38 = vmul.f32 %v10360_v63, %v17126_v5  ;;  %10387 = vpow2.f32 %v2026_v58  ;;  %v17131_v58 = vld [vmem:[#allocation61_spill] sm:$0xff]  ;;  %v2010_v56 = vmul.f32 1.442695, %v1906_v55 }
 0x256   :  { %v10364_v61 = vpop.eup %10363  ;;  %2698 = vmatprep.subr.bf16.mxu0 %v2517_v51  ;;  %v2514_v21 = vpack.c.bf16 %v2395_v6, %v2379_v57  ;;  %v2399_v54 = vmul.f32 %v10362_v8, %v17128_v4  ;;  %10389 = vpow2.f32 %v2042_v53  ;;  %v1908_v39 = vsub.f32 0.0, %v17131_v58 }
 0x257   :  { %v10366_v20 = vpop.eup %10365  ;;  %v2349_v36 = vmul.f32 %v10364_v61, %v11521_v33  ;;  %10391 = vpow2.f32 %v2030_v31  ;;  %v1994_v53 = vmul.f32 1.442695, %v1898_v37 }
 0x258   :  { %v10368_v48 = vpop.eup %10367  ;;  %2650 = vmatpush1.bf16.xpose.msra.mxu1 %v2514_v21  ;;  %v2516_v52 = vpack.c.bf16 %v2399_v54, %v2383_v38  ;;  %v2365_v30 = vmul.f32 %v10366_v20, %v11561_v41  ;;  %10393 = vpow2.f32 %v2046_v44  ;;  %v1998_v41 = vmul.f32 1.442695, %v1900_v15  ;;  %v17132_v54 = vld [vmem:[#allocation104_spill] sm:$0xff] }
 0x259   :  { %v10370_v12 = vpop.eup %10369  ;;  %v2353_v46 = vmul.f32 %v10368_v48, %v11531_v35  ;;  %10395 = vpow2.f32 %v1996_v23  ;;  %v2014_v35 = vmul.f32 1.442695, %v1908_v39  ;;  %v1983_v55 = vsub.f32 0.0, %v17132_v54 }
 0x25a   :  { %v10372_v28 = vpop.eup %10371  ;;  %2699 = vmatpush1.bf16.xpose.msra.mxu0 %v2516_v52  ;;  %v2507_v33 = vpack.c.bf16 %v2365_v30, %v2349_v36  ;;  %v2369_v29 = vmul.f32 %v10370_v12, %v11571_v43  ;;  %10397 = vpow2.f32 %v2012_v7  ;;  %v17134_v30 = vld [vmem:[#allocation106_spill] sm:$0xff] }
 0x25b   :  { %v10374_v31 = vpop.eup %10373  ;;  %v2347_v62 = vmul.f32 %v10372_v28, %v11516_v32  ;;  %10399 = vpow2.f32 %v2000_v59  ;;  %v1985_v39 = vsub.f32 0.0, %v17134_v30 }
 0x25c   :  { %v10376_v50 = vpop.eup %10375  ;;  %2651 = vmatprep.subr.bf16.mxu1 %v2507_v33  ;;  %v2509_v49 = vpack.c.bf16 %v2369_v29, %v2353_v46  ;;  %v2363_v11 = vmul.f32 %v10374_v31, %v11556_v40  ;;  %10401 = vpow2.f32 %v2016_v14  ;;  %v17133_v14 = vld [vmem:[#allocation108_spill] sm:$0xff]  ;;  %v17136_v31 = vld [vmem:[#allocation103_spill] sm:$0xff] }
 0x25d   :  { %v10378_v44 = vpop.eup %10377  ;;  %v2351_v13 = vmul.f32 %v10376_v50, %v11526_v34  ;;  %10403 = vpow2.f32 %v1994_v53  ;;  %v1991_v15 = vsub.f32 0.0, %v17133_v14  ;;  %v17135_v53 = vld [vmem:[#allocation110_spill] sm:$0xff] }
 0x25e   :  { %v10380_v47 = vpop.eup %10379  ;;  %2700 = vmatprep.subr.bf16.mxu0 %v2509_v49  ;;  %v2506_v43 = vpack.c.bf16 %v2363_v11, %v2347_v62  ;;  %v2367_v57 = vmul.f32 %v10378_v44, %v11566_v42  ;;  %10405 = vpow2.f32 %v2010_v56  ;;  %v1993_v28 = vsub.f32 0.0, %v17135_v53  ;;  %v17137_v11 = vld [vmem:[#allocation107_spill] sm:$0xff] }
 0x25f   :  { %v10382_v32 = vpop.eup %10381  ;;  %v2203_v23 = vadd.f32 1.0, %v10380_v47  ;;  %10407 = vpow2.f32 %v1998_v41  ;;  %v2164_v56 = vmul.f32 1.442695, %v1983_v55  ;;  %v1982_v62 = vsub.f32 0.0, %v17136_v31 }
 0x260   :  { %v10384_v60 = vpop.eup %10383  ;;  %2652 = vmatpush1.bf16.xpose.msra.mxu1 %v2506_v43  ;;  %v2508_v63 = vpack.c.bf16 %v2367_v57, %v2351_v13  ;;  %v2211_v51 = vadd.f32 1.0, %v10382_v32  ;;  %10409 = vpow2.f32 %v2014_v35  ;;  %v2180_v49 = vmul.f32 1.442695, %v1991_v15  ;;  %v17138_v43 = vld [vmem:[#allocation105_spill] sm:$0xff] }
 0x261   :  { %v10386_v40 = vpop.eup %10385  ;;  %10411 = vrcp.f32 %v2203_v23  ;;  %v2205_v10 = vadd.f32 1.0, %v10384_v60  ;;  %v1990_v35 = vsub.f32 0.0, %v17137_v11  ;;  %v2168_v47 = vmul.f32 1.442695, %v1985_v39  ;;  %v17143_v39 = vld [vmem:[#allocation102_spill] sm:$0xff] }
 0x262   :  { %v10388_v6 = vpop.eup %10387  ;;  %2701 = vmatpush1.bf16.xpose.msra.mxu0 %v2508_v63  ;;  %10413 = vrcp.f32 %v2211_v51  ;;  %v2213_v34 = vadd.f32 1.0, %v10386_v40  ;;  %v1984_v57 = vsub.f32 0.0, %v17138_v43  ;;  %v2184_v60 = vmul.f32 1.442695, %v1993_v28  ;;  %v17139_v63 = vld [vmem:[#allocation109_spill] sm:$0xff] }
 0x263   :  { %v10390_v7 = vpop.eup %10389  ;;  %10415 = vrcp.f32 %v2205_v10  ;;  %v2202_v8 = vadd.f32 1.0, %v10388_v6  ;;  %v1992_v51 = vsub.f32 0.0, %v17139_v63  ;;  %v2162_v6 = vmul.f32 1.442695, %v1982_v62  ;;  %v17144_v62 = vld [vmem:[#allocation95_spill] sm:$0xff] }
 0x264   :  { %v10392_v42 = vpop.eup %10391  ;;  %10417 = vrcp.f32 %v2213_v34  ;;  %v2210_v5 = vadd.f32 1.0, %v10390_v7  ;;  %v17140_v34 = vld [vmem:[#allocation96_spill] sm:$0xff] }
 0x265   :  { %v10394_v38 = vpop.eup %10393  ;;  %10419 = vrcp.f32 %v2202_v8  ;;  %v2204_v59 = vadd.f32 1.0, %v10392_v42  ;;  %v1967_v7 = vsub.f32 0.0, %v17140_v34  ;;  %v2182_v15 = vmul.f32 1.442695, %v1992_v51  ;;  %v17147_v51 = vld [vmem:[#allocation101_spill] sm:$0xff] }
 0x266   :  { %v10396_v37 = vpop.eup %10395  ;;  %10421 = vrcp.f32 %v2210_v5  ;;  %v2212_v61 = vadd.f32 1.0, %v10394_v38  ;;  %v2178_v5 = vmul.f32 1.442695, %v1990_v35  ;;  %v17141_v38 = vld [vmem:[#allocation100_spill] sm:$0xff]  ;;  %v17145_v35 = vld [vmem:[#allocation99_spill] sm:$0xff] }
 0x267   :  { %v10398_v21 = vpop.eup %10397  ;;  %10423 = vrcp.f32 %v2204_v59  ;;  %v2187_v4 = vadd.f32 1.0, %v10396_v37  ;;  %v1975_v59 = vsub.f32 0.0, %v17141_v38 }
 0x268   :  { %v10400_v20 = vpop.eup %10399  ;;  %10425 = vrcp.f32 %v2212_v61  ;;  %v2195_v36 = vadd.f32 1.0, %v10398_v21  ;;  %v2166_v21 = vmul.f32 1.442695, %v1984_v57  ;;  %v17146_v57 = vld [vmem:[#allocation97_spill] sm:$0xff] }
 0x269   :  { %v10402_v48 = vpop.eup %10401  ;;  %10427 = vrcp.f32 %v2187_v4  ;;  %v2189_v52 = vadd.f32 1.0, %v10400_v20  ;;  %v17142_v4 = vld [vmem:[#allocation98_spill] sm:$0xff] }
 0x26a   :  { %v10404_v12 = vpop.eup %10403  ;;  %10429 = vrcp.f32 %v2195_v36  ;;  %v2197_v46 = vadd.f32 1.0, %v10402_v48  ;;  %v1969_v55 = vsub.f32 0.0, %v17142_v4 }
 0x26b   :  { %v10406_v33 = vpop.eup %10405  ;;  %10431 = vrcp.f32 %v2189_v52  ;;  %v2186_v29 = vadd.f32 1.0, %v10404_v12  ;;  %v2132_v52 = vmul.f32 1.442695, %v1967_v7  ;;  %v1977_v12 = vsub.f32 0.0, %v17143_v39 }
 0x26c   :  { %v10408_v41 = vpop.eup %10407  ;;  %10433 = vrcp.f32 %v2197_v46  ;;  %v2194_v50 = vadd.f32 1.0, %v10406_v33  ;;  %v2148_v33 = vmul.f32 1.442695, %v1975_v59 }
 0x26d   :  { %v10410_v44 = vpop.eup %10409  ;;  %10435 = vrcp.f32 %v2186_v29  ;;  %v2188_v13 = vadd.f32 1.0, %v10408_v41  ;;  %v1966_v41 = vsub.f32 0.0, %v17144_v62 }
 0x26e   :  { %v10412_v32 = vpop.eup %10411  ;;  %10437 = vrcp.f32 %v2194_v50  ;;  %v2196_v23 = vadd.f32 1.0, %v10410_v44  ;;  %v1974_v44 = vsub.f32 0.0, %v17145_v35 }
 0x26f   :  { %v10414_v40 = vpop.eup %10413  ;;  %v2317_v10 = vmul.f32 %v10412_v32, %v11441_v17  ;;  %10439 = vrcp.f32 %v2188_v13  ;;  %v1968_v32 = vsub.f32 0.0, %v17146_v57 }
 0x270   :  { %v10416_v8 = vpop.eup %10415  ;;  %v2333_v42 = vmul.f32 %v10414_v40, %v11481_v25  ;;  %10441 = vrcp.f32 %v2196_v23  ;;  %v1976_v40 = vsub.f32 0.0, %v17147_v51 }
 0x271   :  { %v10418_v37 = vpop.eup %10417  ;;  %v2321_v61 = vmul.f32 %v10416_v8, %v11451_v19  ;;  %10443 = vpow2.f32 %v2164_v56 }
 0x272   :  { %v10420_v20 = vpop.eup %10419  ;;  %v2499_v17 = vpack.c.bf16 %v2333_v42, %v2317_v10  ;;  %v2337_v36 = vmul.f32 %v10418_v37, %v11491_v27  ;;  %10445 = vpow2.f32 %v2180_v49  ;;  %v2136_v27 = vmul.f32 1.442695, %v1969_v55 }
 0x273   :  { %v10422_v48 = vpop.eup %10421  ;;  %v2315_v25 = vmul.f32 %v10420_v20, %v11436_v16  ;;  %10447 = vpow2.f32 %v2168_v47  ;;  %v2152_v47 = vmul.f32 1.442695, %v1977_v12  ;;  %v2146_v42 = vmul.f32 1.442695, %v1974_v44  ;;  %v17153_v44 = vld [vmem:[#allocation119_spill] sm:$0xff] }
 0x274   :  { %v10424_v46 = vpop.eup %10423  ;;  %2653 = vmatprep.subr.bf16.mxu1 %v2499_v17  ;;  %v2501_v19 = vpack.c.bf16 %v2337_v36, %v2321_v61  ;;  %v2331_v28 = vmul.f32 %v10422_v48, %v11476_v24  ;;  %10449 = vpow2.f32 %v2184_v60 }
 0x275   :  { %v10426_v29 = vpop.eup %10425  ;;  %v2319_v56 = vmul.f32 %v10424_v46, %v11446_v18  ;;  %10451 = vpow2.f32 %v2162_v6  ;;  %v2130_v6 = vmul.f32 1.442695, %v1966_v41  ;;  %v17151_v41 = vld [vmem:[#allocation112_spill] sm:$0xff] }
 0x276   :  { %v10428_v50 = vpop.eup %10427  ;;  %2702 = vmatprep.subr.bf16.mxu0 %v2501_v19  ;;  %v2498_v16 = vpack.c.bf16 %v2331_v28, %v2315_v25  ;;  %v2335_v49 = vmul.f32 %v10426_v29, %v11486_v26  ;;  %10453 = vpow2.f32 %v2178_v5  ;;  %v17148_v28 = vld [vmem:[#allocation115_spill] sm:$0xff] }
 0x277   :  { %v10430_v13 = vpop.eup %10429  ;;  %v2285_v24 = vmul.f32 %v10428_v50, %v11361_v1  ;;  %10455 = vpow2.f32 %v2166_v21 }
 0x278   :  { %v10432_v18 = vpop.eup %10431  ;;  %2654 = vmatpush1.bf16.xpose.msra.mxu1 %v2498_v16  ;;  %v2500_v23 = vpack.c.bf16 %v2335_v49, %v2319_v56  ;;  %v2301_v60 = vmul.f32 %v10430_v13, %v11401_v9  ;;  %10457 = vpow2.f32 %v2182_v15  ;;  %v2134_v9 = vmul.f32 1.442695, %v1968_v32  ;;  %v17152_v49 = vld [vmem:[#allocation123_spill] sm:$0xff]  ;;  %v17154_v32 = vld [vmem:[#allocation86_spill] sm:$0xff] }
 0x279   :  { %v10434_v10 = vpop.eup %10433  ;;  %v2289_v26 = vmul.f32 %v10432_v18, %v11371_v3  ;;  %10459 = vpow2.f32 %v2132_v52  ;;  %v2150_v3 = vmul.f32 1.442695, %v1976_v40  ;;  %v9766_v13 = vcombine.high %v17153_v44, %v17152_v49 }
 0x27a   :  { %v10436_v7 = vpop.eup %10435  ;;  %2703 = vmatpush1.bf16.xpose.msra.mxu0 %v2500_v23  ;;  %v2491_v1 = vpack.c.bf16 %v2301_v60, %v2285_v24  ;;  %v2305_v8 = vmul.f32 %v10434_v10, %v17124_v45  ;;  %10461 = vpow2.f32 %v2148_v33  ;;  %v17149_v33 = vld [vmem:[#allocation111_spill] sm:$0xff]  ;;  %v1951_v18 = vsub.f32 0.0, %v17154_v32  ;;  %v17155_v23 = vld [vmem:[#allocation92_spill] sm:$0xff] }
 0x27b   :  { %v10438_v5 = vpop.eup %10437  ;;  %v2283_v59 = vmul.f32 %v10436_v7, %v17127_v22  ;;  %10463 = vpow2.f32 %v2136_v27  ;;  %v17150_v27 = vld [vmem:[#allocation116_spill] sm:$0xff]  ;;  %v1959_v60 = vsub.f32 0.0, %v17155_v23 }
 0x27c   :  { %v10440_v37 = vpop.eup %10439  ;;  %2655 = vmatprep.subr.bf16.mxu1 %v2491_v1  ;;  %v2493_v61 = vpack.c.bf16 %v2305_v8, %v2289_v26  ;;  %v2299_v21 = vmul.f32 %v10438_v5, %v17129_v0  ;;  %10465 = vpow2.f32 %v2152_v47  ;;  %v9759_v50 = vcombine.low %v17151_v41, %v17150_v27  ;;  %v17156_v26 = vld [vmem:[#allocation88_spill] sm:$0xff]  ;;  %v17164_v27 = vld [vmem:[#allocation87_spill] sm:$0xff] }
 0x27d   :  { %v10442_v55 = vpop.eup %10441  ;;  %v2287_v20 = vmul.f32 %v10440_v37, %v17130_v2  ;;  %10467 = vpow2.f32 %v2130_v6  ;;  %v1953_v6 = vsub.f32 0.0, %v17156_v26  ;;  %v17157_v7 = vld [vmem:[#allocation124_spill] sm:$0xff]  ;;  %v1952_v41 = vsub.f32 0.0, %v17164_v27 }
 0x27e   :  { %v10444_v17 = vpop.eup %10443  ;;  %2704 = vmatprep.subr.bf16.mxu0 %v2493_v61  ;;  %v2490_v45 = vpack.c.bf16 %v2299_v21, %v2283_v59  ;;  %v2303_v36 = vmul.f32 %v10442_v55, %v17131_v58  ;;  %10469 = vpow2.f32 %v2146_v42  ;;  %v9757_v58 = vcombine.low %v17149_v33, %v17148_v28  ;;  %v17158_v1 = vld [vmem:[#allocation120_spill] sm:$0xff]  ;;  %v17159_v59 = vld [vmem:[#allocation94_spill] sm:$0xff]  ;;  %v17162_v28 = vld [vmem:[#allocation117_spill] sm:$0xff] }
 0x27f   :  { %v10446_v22 = vpop.eup %10445  ;;  %v2271_v15 = vadd.f32 1.0, %v10444_v17  ;;  %10471 = vpow2.f32 %v2134_v9  ;;  %v9768_v8 = vcombine.high %v17158_v1, %v17157_v7  ;;  %v1961_v9 = vsub.f32 0.0, %v17159_v59  ;;  %v17163_v33 = vld [vmem:[#allocation113_spill] sm:$0xff] }
 0x280   :  { %v10448_v48 = vpop.eup %10447  ;;  %2656 = vmatpush1.bf16.xpose.msra.mxu1 %v2490_v45  ;;  %v2492_v25 = vpack.c.bf16 %v2303_v36, %v2287_v20  ;;  %v2279_v52 = vadd.f32 1.0, %v10446_v22  ;;  %10473 = vpow2.f32 %v2150_v3  ;;  %v2100_v55 = vmul.f32 1.442695, %v1951_v18  ;;  %v17160_v22 = vld [vmem:[#allocation85_spill] sm:$0xff] }
 0x281   :  { %v10450_v0 = vpop.eup %10449  ;;  %10475 = vrcp.f32 %v2271_v15  ;;  %v2273_v12 = vadd.f32 1.0, %v10448_v48  ;;  %v2116_v20 = vmul.f32 1.442695, %v1959_v60  ;;  %v2104_v36 = vmul.f32 1.442695, %v1953_v6  ;;  %v17168_v6 = vld [vmem:[#allocation76_spill] sm:$0xff] }
 0x282   :  { %v10452_v46 = vpop.eup %10451  ;;  %2705 = vmatpush1.bf16.xpose.msra.mxu0 %v2492_v25  ;;  %10477 = vrcp.f32 %v2279_v52  ;;  %v2281_v2 = vadd.f32 1.0, %v10450_v0  ;;  %v1950_v15 = vsub.f32 0.0, %v17160_v22  ;;  %v2120_v52 = vmul.f32 1.442695, %v1961_v9 }
 0x283   :  { %v10454_v19 = vpop.eup %10453  ;;  %10479 = vrcp.f32 %v2273_v12  ;;  %v2270_v29 = vadd.f32 1.0, %v10452_v46  ;;  %v9765_v0 = vcombine.low %v17153_v44, %v17152_v49  ;;  %v17165_v49 = vld [vmem:[#allocation93_spill] sm:$0xff] }
 0x284   :  { %v10456_v56 = vpop.eup %10455  ;;  %10481 = vrcp.f32 %v2281_v2  ;;  %v2278_v16 = vadd.f32 1.0, %v10454_v19  ;;  %v17161_v2 = vld [vmem:[#allocation91_spill] sm:$0xff]  ;;  %v1960_v44 = vsub.f32 0.0, %v17165_v49 }
 0x285   :  { %v10458_v24 = vpop.eup %10457  ;;  %10483 = vrcp.f32 %v2270_v29  ;;  %v2272_v47 = vadd.f32 1.0, %v10456_v56  ;;  %v1958_v19 = vsub.f32 0.0, %v17161_v2 }
 0x286   :  { %v10460_v40 = vpop.eup %10459  ;;  %10485 = vrcp.f32 %v2278_v16  ;;  %v2280_v10 = vadd.f32 1.0, %v10458_v24  ;;  %v17166_v24 = vld [vmem:[#allocation118_spill] sm:$0xff] }
 0x287   :  { %v10462_v42 = vpop.eup %10461  ;;  %2674 = vmatmul.mubr.bf16.vlgmr.msra.gmra.mxu1 %v9757_v58  ;;  %10487 = vrcp.f32 %v2272_v47  ;;  %v2255_v5 = vadd.f32 1.0, %v10460_v40  ;;  %v9762_v58 = vcombine.high %v17163_v33, %v17162_v28  ;;  %v17167_v47 = vld [vmem:[#allocation114_spill] sm:$0xff] }
 0x288   :  { %v10464_v37 = vpop.eup %10463  ;;  %10489 = vrcp.f32 %v2280_v10  ;;  %v2263_v61 = vadd.f32 1.0, %v10462_v42  ;;  %2681 = vmatprep.mubr.bf16.mxu1 %v9766_v13  ;;  %v9764_v18 = vcombine.high %v17167_v47, %v17166_v24  ;;  %v2098_v10 = vmul.f32 1.442695, %v1950_v15 }
 0x289   :  { %v10466_v21 = vpop.eup %10465  ;;  %2723 = vmatmul.mubr.bf16.vlgmr.msra.gmra.mxu0 %v9759_v50  ;;  %10491 = vrcp.f32 %v2255_v5  ;;  %v2257_v3 = vadd.f32 1.0, %v10464_v37  ;;  %v9767_v50 = vcombine.low %v17158_v1, %v17157_v7  ;;  %v2114_v7 = vmul.f32 1.442695, %v1958_v19  ;;  %v17169_v1 = vld [vmem:[#allocation80_spill] sm:$0xff] }
 0x28a   :  { %v10468_v17 = vpop.eup %10467  ;;  %10493 = vrcp.f32 %v2263_v61  ;;  %v2265_v45 = vadd.f32 1.0, %v10466_v21  ;;  %2730 = vmatprep.mubr.bf16.mxu0 %v9768_v8  ;;  %v1935_v8 = vsub.f32 0.0, %v17168_v6  ;;  %v1943_v9 = vsub.f32 0.0, %v17169_v1 }
 0x28b   :  { %v10470_v48 = vpop.eup %10469  ;;  %10495 = vrcp.f32 %v2257_v3  ;;  %v2254_v25 = vadd.f32 1.0, %v10468_v17  ;;  %v2102_v21 = vmul.f32 1.442695, %v1952_v41  ;;  %v17170_v3 = vld [vmem:[#allocation78_spill] sm:$0xff] }
 0x28c   :  { %v10472_v12 = vpop.eup %10471  ;;  %10497 = vrcp.f32 %v2265_v45  ;;  %v2262_v46 = vadd.f32 1.0, %v10470_v48  ;;  %v2118_v48 = vmul.f32 1.442695, %v1960_v44 }
 0x28d   :  { %v10474_v29 = vpop.eup %10473  ;;  %10499 = vrcp.f32 %v2254_v25  ;;  %v2256_v56 = vadd.f32 1.0, %v10472_v12  ;;  %v17171_v12 = vld [vmem:[#allocation82_spill] sm:$0xff] }
 0x28e   :  { %v10476_v16 = vpop.eup %10475  ;;  %10501 = vrcp.f32 %v2262_v46  ;;  %v2264_v13 = vadd.f32 1.0, %v10474_v29 }
 0x28f   :  { %v10478_v60 = vpop.eup %10477  ;;  %v2453_v40 = vmul.f32 %v10476_v16, %v17132_v54  ;;  %10503 = vrcp.f32 %v2256_v56  ;;  %2682 = vmatmul.mubr.bf16.gmra.mxu1 %v9765_v0  ;;  %v1937_v54 = vsub.f32 0.0, %v17170_v3  ;;  %v2068_v0 = vmul.f32 1.442695, %v1935_v8  ;;  %v17172_v56 = vld [vmem:[#allocation75_spill] sm:$0xff]  ;;  %v17175_v8 = vld [vmem:[#allocation81_spill] sm:$0xff] }
 0x290   :  { %v10480_v42 = vpop.eup %10479  ;;  %v2469_v5 = vmul.f32 %v10478_v60, %v17133_v14  ;;  %10505 = vrcp.f32 %v2264_v13  ;;  %2771 = vmatprep.mubr.bf16.mxu1 %v9762_v58  ;;  %v2084_v58 = vmul.f32 1.442695, %v1943_v9  ;;  %v1934_v41 = vsub.f32 0.0, %v17172_v56  ;;  %v17173_v16 = vld [vmem:[#allocation79_spill] sm:$0xff] }
 0x291   :  { %v10482_v37 = vpop.eup %10481  ;;  %v2457_v61 = vmul.f32 %v10480_v42, %v17134_v30  ;;  %10507 = vpow2.f32 %v2100_v55  ;;  %2731 = vmatmul.mubr.bf16.gmra.mxu0 %v9767_v50  ;;  %v1945_v30 = vsub.f32 0.0, %v17171_v12  ;;  %v1942_v13 = vsub.f32 0.0, %v17173_v16 }
 0x292   :  { %v10484_v17 = vpop.eup %10483  ;;  %v2535_v45 = vpack.c.bf16 %v2469_v5, %v2453_v40  ;;  %v2473_v15 = vmul.f32 %v10482_v37, %v17135_v53  ;;  %10509 = vpow2.f32 %v2116_v20  ;;  %9779 = vmatprep.mubr.msk.bf16.mxu0 %vm2616_vm2, %v9764_v18  ;;  %v2072_v20 = vmul.f32 1.442695, %v1937_v54  ;;  %v17174_v18 = vld [vmem:[#allocation77_spill] sm:$0xff] }
 0x293   :  { %v10486_v14 = vpop.eup %10485  ;;  %v2451_v25 = vmul.f32 %v10484_v17, %v17136_v31  ;;  %10511 = vpow2.f32 %v2104_v36  ;;  %v1944_v42 = vsub.f32 0.0, %v17175_v8 }
 0x294   :  { %v10488_v55 = vpop.eup %10487  ;;  %2743 = vmatprep.subr.bf16.mxu1 %v2535_v45  ;;  %v2537_v46 = vpack.c.bf16 %v2473_v15, %v2457_v61  ;;  %v2467_v19 = vmul.f32 %v10486_v14, %v17137_v11  ;;  %10513 = vpow2.f32 %v2120_v52  ;;  %v2088_v52 = vmul.f32 1.442695, %v1945_v30 }
 0x295   :  { %v10490_v29 = vpop.eup %10489  ;;  %v2455_v53 = vmul.f32 %v10488_v55, %v17138_v43  ;;  %10515 = vpow2.f32 %v2098_v10  ;;  %v1936_v43 = vsub.f32 0.0, %v17174_v18  ;;  %v2082_v61 = vmul.f32 1.442695, %v1942_v13 }
 0x296   :  { %v10492_v50 = vpop.eup %10491  ;;  %9773 = vmatprep.subr.msk.bf16.mxu0 %vm2616_vm2, %v2537_v46  ;;  %v2534_v31 = vpack.c.bf16 %v2467_v19, %v2451_v25  ;;  %v2471_v36 = vmul.f32 %v10490_v29, %v17139_v63  ;;  %10517 = vpow2.f32 %v2114_v7  ;;  %v2066_v7 = vmul.f32 1.442695, %v1934_v41 }
 0x297   :  { %v10494_v44 = vpop.eup %10493  ;;  %v2421_v11 = vmul.f32 %v10492_v50, %v17140_v34  ;;  %10519 = vpow2.f32 %v2102_v21 }
 0x298   :  { %v10496_v60 = vpop.eup %10495  ;;  %2744 = vmatpush1.bf16.xpose.msra.mxu1 %v2534_v31  ;;  %v2536_v40 = vpack.c.bf16 %v2471_v36, %v2455_v53  ;;  %v2437_v10 = vmul.f32 %v10494_v44, %v17141_v38  ;;  %10521 = vpow2.f32 %v2118_v48  ;;  %v2070_v38 = vmul.f32 1.442695, %v1936_v43 }
 0x299   :  { %v10498_v5 = vpop.eup %10497  ;;  %v2425_v63 = vmul.f32 %v10496_v60, %v17142_v4  ;;  %10523 = vpow2.f32 %v2068_v0  ;;  %v2086_v4 = vmul.f32 1.442695, %v1944_v42 }
 0x29a   :  { %v10500_v9 = vpop.eup %10499  ;;  %2793 = vmatpush1.bf16.xpose.msra.mxu0 %v2536_v40  ;;  %v2527_v34 = vpack.c.bf16 %v2437_v10, %v2421_v11  ;;  %v2441_v37 = vmul.f32 %v10498_v5, %v17143_v39  ;;  %10525 = vpow2.f32 %v2084_v58  ;;  %v17177_v10 = vld [vmem:[#allocation72_spill] sm:$0xff] }
 0x29b   :  { %v10502_v21 = vpop.eup %10501  ;;  %v2419_v54 = vmul.f32 %v10500_v9, %v17144_v62  ;;  %10527 = vpow2.f32 %v2072_v20  ;;  %v1927_v42 = vsub.f32 0.0, %v17177_v10 }
 0x29c   :  { %v10504_v17 = vpop.eup %10503  ;;  %2745 = vmatprep.subr.bf16.mxu1 %v2527_v34  ;;  %v2529_v45 = vpack.c.bf16 %v2441_v37, %v2425_v63  ;;  %v2435_v15 = vmul.f32 %v10502_v21, %v17145_v35  ;;  %10529 = vpow2.f32 %v2088_v52  ;;  %v17176_v52 = vld [vmem:[#allocation68_spill] sm:$0xff] }
 0x29d   :  { %v10506_v48 = vpop.eup %10505  ;;  %v2423_v14 = vmul.f32 %v10504_v17, %v17146_v57  ;;  %10531 = vpow2.f32 %v2066_v7  ;;  %v1919_v43 = vsub.f32 0.0, %v17176_v52  ;;  %v17178_v7 = vld [vmem:[#allocation70_spill] sm:$0xff] }
 0x29e   :  { %v10508_v25 = vpop.eup %10507  ;;  %9774 = vmatprep.subr.msk.bf16.mxu0 %vm2616_vm2, %v2529_v45  ;;  %v2526_v39 = vpack.c.bf16 %v2435_v15, %v2419_v54  ;;  %v2439_v0 = vmul.f32 %v10506_v48, %v17147_v51  ;;  %10533 = vpow2.f32 %v2082_v61  ;;  %v1921_v9 = vsub.f32 0.0, %v17178_v7  ;;  %v17179_v61 = vld [vmem:[#allocation74_spill] sm:$0xff]  ;;  %v17180_v45 = vld [vmem:[#allocation67_spill] sm:$0xff] }
 0x29f   :  { %v10510_v62 = vpop.eup %10509  ;;  %v2239_v30 = vadd.f32 1.0, %v10508_v25  ;;  %10535 = vpow2.f32 %v2070_v38  ;;  %v1929_v21 = vsub.f32 0.0, %v17179_v61  ;;  %v2036_v17 = vmul.f32 1.442695, %v1919_v43  ;;  %v17181_v25 = vld [vmem:[#allocation71_spill] sm:$0xff] }
 0x2a0   :  { %v10512_v55 = vpop.eup %10511  ;;  %2746 = vmatpush1.bf16.xpose.msra.mxu1 %v2526_v39  ;;  %v2528_v46 = vpack.c.bf16 %v2439_v0, %v2423_v14  ;;  %v2247_v35 = vadd.f32 1.0, %v10510_v62  ;;  %10537 = vpow2.f32 %v2086_v4  ;;  %v1918_v15 = vsub.f32 0.0, %v17180_v45 }
 0x2a1   :  { %v10514_v19 = vpop.eup %10513  ;;  %10539 = vrcp.f32 %v2239_v30  ;;  %v2241_v58 = vadd.f32 1.0, %v10512_v55  ;;  %v2052_v14 = vmul.f32 1.442695, %v1927_v42  ;;  %v1926_v39 = vsub.f32 0.0, %v17181_v25  ;;  %v17182_v55 = vld [vmem:[#allocation69_spill] sm:$0xff]  ;;  %v17186_v42 = vld [vmem:[#allocation59_spill] sm:$0xff] }
 0x2a2   :  { %v10516_v57 = vpop.eup %10515  ;;  %2795 = vmatpush1.bf16.xpose.msra.mxu0 %v2528_v46  ;;  %10541 = vrcp.f32 %v2247_v35  ;;  %v2249_v29 = vadd.f32 1.0, %v10514_v19  ;;  %v2040_v30 = vmul.f32 1.442695, %v1921_v9  ;;  %v1920_v46 = vsub.f32 0.0, %v17182_v55 }
 0x2a3   :  { %v10518_v53 = vpop.eup %10517  ;;  %10543 = vrcp.f32 %v2241_v58  ;;  %v2238_v20 = vadd.f32 1.0, %v10516_v57  ;;  %v2056_v58 = vmul.f32 1.442695, %v1929_v21  ;;  %v17183_v57 = vld [vmem:[#allocation73_spill] sm:$0xff] }
 0x2a4   :  { %v10520_v51 = vpop.eup %10519  ;;  %10545 = vrcp.f32 %v2249_v29  ;;  %v2246_v41 = vadd.f32 1.0, %v10518_v53  ;;  %v1928_v29 = vsub.f32 0.0, %v17183_v57 }
 0x2a5   :  { %v10522_v50 = vpop.eup %10521  ;;  %10547 = vrcp.f32 %v2238_v20  ;;  %v2240_v31 = vadd.f32 1.0, %v10520_v51  ;;  %v2034_v51 = vmul.f32 1.442695, %v1918_v15 }
 0x2a6   :  { %v10524_v36 = vpop.eup %10523  ;;  %10549 = vrcp.f32 %v2246_v41  ;;  %v2248_v13 = vadd.f32 1.0, %v10522_v50  ;;  %v17184_v41 = vld [vmem:[#allocation57_spill] sm:$0xff] }
 0x2a7   :  { %v10526_v44 = vpop.eup %10525  ;;  %10551 = vrcp.f32 %v2240_v31  ;;  %v2223_v11 = vadd.f32 1.0, %v10524_v36  ;;  %v1903_v50 = vsub.f32 0.0, %v17184_v41 }
 0x2a8   :  { %v10528_v60 = vpop.eup %10527  ;;  %10553 = vrcp.f32 %v2248_v13  ;;  %v2231_v40 = vadd.f32 1.0, %v10526_v44  ;;  %v2050_v13 = vmul.f32 1.442695, %v1926_v39  ;;  %v17185_v44 = vld [vmem:[#allocation64_spill] sm:$0xff] }
 0x2a9   :  { %v10530_v5 = vpop.eup %10529  ;;  %10555 = vrcp.f32 %v2223_v11  ;;  %v2225_v63 = vadd.f32 1.0, %v10528_v60  ;;  %v1911_v11 = vsub.f32 0.0, %v17185_v44  ;;  %v2004_v21 = vmul.f32 1.442695, %v1903_v50  ;;  %v17191_v50 = vld [vmem:[#allocation65_spill] sm:$0xff] }
 0x2aa   :  { %v10532_v34 = vpop.eup %10531  ;;  %10557 = vrcp.f32 %v2231_v40  ;;  %v2233_v37 = vadd.f32 1.0, %v10530_v5  ;;  %v2038_v40 = vmul.f32 1.442695, %v1920_v46  ;;  %v1905_v5 = vsub.f32 0.0, %v17186_v42  ;;  %v17189_v46 = vld [vmem:[#allocation63_spill] sm:$0xff] }
 0x2ab   :  { %v10534_v54 = vpop.eup %10533  ;;  %10559 = vrcp.f32 %v2225_v63  ;;  %v2222_v38 = vadd.f32 1.0, %v10532_v34  ;;  %v2054_v34 = vmul.f32 1.442695, %v1928_v29  ;;  %v17190_v29 = vld [vmem:[#allocation58_spill] sm:$0xff] }
 0x2ac   :  { %v10536_v4 = vpop.eup %10535  ;;  %10561 = vrcp.f32 %v2233_v37  ;;  %v2230_v48 = vadd.f32 1.0, %v10534_v54  ;;  %v17187_v54 = vld [vmem:[#allocation66_spill] sm:$0xff] }
 0x2ad   :  { %v10538_v0 = vpop.eup %10537  ;;  %10563 = vrcp.f32 %v2222_v38  ;;  %v2224_v62 = vadd.f32 1.0, %v10536_v4  ;;  %v1913_v38 = vsub.f32 0.0, %v17187_v54  ;;  %v2020_v4 = vmul.f32 1.442695, %v1911_v11 }
 0x2ae   :  { %v10540_v35 = vpop.eup %10539  ;;  %10565 = vrcp.f32 %v2230_v48  ;;  %v2232_v19 = vadd.f32 1.0, %v10538_v0 }
 0x2af   :  { %v10542_v53 = vpop.eup %10541  ;;  %v2389_v20 = vmul.f32 %v10540_v35, %v17154_v32  ;;  %10567 = vrcp.f32 %v2224_v62  ;;  %v1910_v35 = vsub.f32 0.0, %v17189_v46 }
 0x2b0   :  { %v10544_v31 = vpop.eup %10543  ;;  %v2405_v36 = vmul.f32 %v10542_v53, %v17155_v23  ;;  %10569 = vrcp.f32 %v2232_v19 }
 0x2b1   :  { %v10546_v43 = vpop.eup %10545  ;;  %v2393_v60 = vmul.f32 %v10544_v31, %v17156_v26  ;;  %10571 = vpow2.f32 %v2036_v17  ;;  %v1912_v31 = vsub.f32 0.0, %v17191_v50 }
 0x2b2   :  { %v10548_v63 = vpop.eup %10547  ;;  %v2519_v32 = vpack.c.bf16 %v2405_v36, %v2389_v20  ;;  %v2409_v9 = vmul.f32 %v10546_v43, %v17159_v59  ;;  %10573 = vpow2.f32 %v2052_v14  ;;  %v2008_v59 = vmul.f32 1.442695, %v1905_v5  ;;  %v17188_v14 = vld [vmem:[#allocation56_spill] sm:$0xff] }
 0x2b3   :  { %v10550_v37 = vpop.eup %10549  ;;  %v2387_v23 = vmul.f32 %v10548_v63, %v17160_v22  ;;  %10575 = vpow2.f32 %v2040_v30  ;;  %v1902_v0 = vsub.f32 0.0, %v17188_v14 }
 0x2b4   :  { %v10552_v15 = vpop.eup %10551  ;;  %2747 = vmatprep.subr.bf16.mxu1 %v2519_v32  ;;  %v2521_v26 = vpack.c.bf16 %v2409_v9, %v2393_v60  ;;  %v2403_v17 = vmul.f32 %v10550_v37, %v17161_v2  ;;  %10577 = vpow2.f32 %v2056_v58  ;;  %v2024_v58 = vmul.f32 1.442695, %v1913_v38 }
 0x2b5   :  { %v10554_v48 = vpop.eup %10553  ;;  %v2391_v39 = vmul.f32 %v10552_v15, %v17164_v27  ;;  %10579 = vpow2.f32 %v2034_v51  ;;  %v1904_v27 = vsub.f32 0.0, %v17190_v29  ;;  %v2018_v60 = vmul.f32 1.442695, %v1910_v35 }
 0x2b6   :  { %v10556_v62 = vpop.eup %10555  ;;  %9775 = vmatprep.subr.msk.bf16.mxu0 %vm2616_vm2, %v2521_v26  ;;  %v2518_v22 = vpack.c.bf16 %v2403_v17, %v2387_v23  ;;  %v2407_v30 = vmul.f32 %v10554_v48, %v17165_v49  ;;  %10581 = vpow2.f32 %v2050_v13  ;;  %v2002_v13 = vmul.f32 1.442695, %v1902_v0 }
 0x2b7   :  { %v10558_v19 = vpop.eup %10557  ;;  %v2357_v2 = vmul.f32 %v10556_v62, %v17168_v6  ;;  %10583 = vpow2.f32 %v2038_v40 }
 0x2b8   :  { %v10560_v53 = vpop.eup %10559  ;;  %2748 = vmatpush1.bf16.xpose.msra.mxu1 %v2518_v22  ;;  %v2520_v20 = vpack.c.bf16 %v2407_v30, %v2391_v39  ;;  %v2373_v51 = vmul.f32 %v10558_v19, %v17169_v1  ;;  %10585 = vpow2.f32 %v2054_v34  ;;  %v2006_v1 = vmul.f32 1.442695, %v1904_v27 }
 0x2b9   :  { %v10562_v36 = vpop.eup %10561  ;;  %v2361_v49 = vmul.f32 %v10560_v53, %v17170_v3  ;;  %10587 = vpow2.f32 %v2004_v21  ;;  %v2022_v3 = vmul.f32 1.442695, %v1912_v31 }
 0x2ba   :  { %v10564_v11 = vpop.eup %10563  ;;  %2797 = vmatpush1.bf16.xpose.msra.mxu0 %v2520_v20  ;;  %v2511_v6 = vpack.c.bf16 %v2373_v51, %v2357_v2  ;;  %v2377_v43 = vmul.f32 %v10562_v36, %v17171_v12  ;;  %10589 = vpow2.f32 %v2020_v4 }
 0x2bb   :  { %v10566_v40 = vpop.eup %10565  ;;  %v2355_v5 = vmul.f32 %v10564_v11, %v17172_v56  ;;  %10591 = vpow2.f32 %v2008_v59 }
 0x2bc   :  { %v10568_v63 = vpop.eup %10567  ;;  %2749 = vmatprep.subr.bf16.mxu1 %v2511_v6  ;;  %v2513_v32 = vpack.c.bf16 %v2377_v43, %v2361_v49  ;;  %v2371_v9 = vmul.f32 %v10566_v40, %v17173_v16  ;;  %10593 = vpow2.f32 %v2024_v58 }
 0x2bd   :  { %v10570_v34 = vpop.eup %10569  ;;  %v2359_v37 = vmul.f32 %v10568_v63, %v17174_v18  ;;  %10595 = vpow2.f32 %v2002_v13 }
 0x2be   :  { %v10572_v23 = vpop.eup %10571  ;;  %9776 = vmatprep.subr.msk.bf16.mxu0 %vm2616_vm2, %v2513_v32  ;;  %v2510_v12 = vpack.c.bf16 %v2371_v9, %v2355_v5  ;;  %v2375_v21 = vmul.f32 %v10570_v34, %v17175_v8  ;;  %10597 = vpow2.f32 %v2018_v60 }
 0x2bf   :  { %v10574_v56 = vpop.eup %10573  ;;  %v2207_v38 = vadd.f32 1.0, %v10572_v23  ;;  %10599 = vpow2.f32 %v2006_v1 }
 0x2c0   :  { %v10576_v15 = vpop.eup %10575  ;;  %2750 = vmatpush1.bf16.xpose.msra.mxu1 %v2510_v12  ;;  %v2512_v26 = vpack.c.bf16 %v2375_v21, %v2359_v37  ;;  %v2215_v16 = vadd.f32 1.0, %v10574_v56  ;;  %10601 = vpow2.f32 %v2022_v3 }
 0x2c1   :  { %v10578_v17 = vpop.eup %10577  ;;  %10603 = vrcp.f32 %v2207_v38  ;;  %v2209_v4 = vadd.f32 1.0, %v10576_v15 }
 0x2c2   :  { %v10580_v18 = vpop.eup %10579  ;;  %2799 = vmatpush1.bf16.xpose.msra.mxu0 %v2512_v26  ;;  %10605 = vrcp.f32 %v2215_v16  ;;  %v2217_v48 = vadd.f32 1.0, %v10578_v17 }
 0x2c3   :  { %v10582_v39 = vpop.eup %10581  ;;  %10607 = vrcp.f32 %v2209_v4  ;;  %v2206_v59 = vadd.f32 1.0, %v10580_v18 }
 0x2c4   :  { %v10584_v8 = vpop.eup %10583  ;;  %10609 = vrcp.f32 %v2217_v48  ;;  %v2214_v0 = vadd.f32 1.0, %v10582_v39 }
 0x2c5   :  { %v10586_v62 = vpop.eup %10585  ;;  %10611 = vrcp.f32 %v2206_v59  ;;  %v2208_v22 = vadd.f32 1.0, %v10584_v8 }
 0x2c6   :  { %v10588_v30 = vpop.eup %10587  ;;  %10613 = vrcp.f32 %v2214_v0  ;;  %v2216_v35 = vadd.f32 1.0, %v10586_v62 }
 0x2c7   :  { %v10590_v19 = vpop.eup %10589  ;;  %10615 = vrcp.f32 %v2208_v22  ;;  %v2191_v2 = vadd.f32 1.0, %v10588_v30 }
 0x2c8   :  { %v10592_v58 = vpop.eup %10591  ;;  %10617 = vrcp.f32 %v2216_v35  ;;  %v2199_v27 = vadd.f32 1.0, %v10590_v19  ;;  %v17193_v35 = vld [vmem:[#allocation167_spill] sm:$0xff] }
 0x2c9   :  { %v10594_v53 = vpop.eup %10593  ;;  %10619 = vrcp.f32 %v2191_v2  ;;  %v2193_v20 = vadd.f32 1.0, %v10592_v58  ;;  %v17195_v58 = vld [vmem:[#allocation169_spill] sm:$0xff] }
 0x2ca   :  { %v10596_v51 = vpop.eup %10595  ;;  %10621 = vrcp.f32 %v2199_v27  ;;  %v2201_v31 = vadd.f32 1.0, %v10594_v53  ;;  %v17197_v53 = vld [vmem:[#allocation121_spill] sm:$0xff] }
 0x2cb   :  { %v10598_v36 = vpop.eup %10597  ;;  %10623 = vrcp.f32 %v2193_v20  ;;  %v2190_v49 = vadd.f32 1.0, %v10596_v51 }
 0x2cc   :  { %v10600_v13 = vpop.eup %10599  ;;  %10625 = vrcp.f32 %v2201_v31  ;;  %v2198_v11 = vadd.f32 1.0, %v10598_v36  ;;  %v17198_v31 = vld [vmem:[#allocation163_spill] sm:$0xff] }
 0x2cd   :  { %v10602_v6 = vpop.eup %10601  ;;  %10627 = vrcp.f32 %v2190_v49  ;;  %v2192_v43 = vadd.f32 1.0, %v10600_v13  ;;  %v17199_v36 = vld [vmem:[#allocation159_spill] sm:$0xff]  ;;  %v17200_v13 = vld [vmem:[#allocation126_spill] sm:$0xff] }
 0x2ce   :  { %v10604_v60 = vpop.eup %10603  ;;  %10629 = vrcp.f32 %v2198_v11  ;;  %v2200_v40 = vadd.f32 1.0, %v10602_v6  ;;  %v9814_v49 = vcombine.high %v17199_v36, %v17198_v31  ;;  %v17201_v11 = vld [vmem:[#allocation122_spill] sm:$0xff] }
 0x2cf   :  { %v10606_v5 = vpop.eup %10605  ;;  %v2325_v1 = vmul.f32 %v10604_v60, %v17176_v52  ;;  %10631 = vrcp.f32 %v2192_v43  ;;  %v9772_v6 = vcombine.high %v17201_v11, %v17200_v13 }
 0x2d0   :  { %v10608_v63 = vpop.eup %10607  ;;  %v2341_v32 = vmul.f32 %v10606_v5, %v17177_v10  ;;  %10633 = vrcp.f32 %v2200_v40  ;;  %v9813_v40 = vcombine.low %v17199_v36, %v17198_v31 }
 0x2d1   :  { %v10610_v9 = vpop.eup %10609  ;;  %v2329_v3 = vmul.f32 %v10608_v63, %v17178_v7 }
 0x2d2   :  { %v10612_v34 = vpop.eup %10611  ;;  %v2503_v37 = vpack.c.bf16 %v2341_v32, %v2325_v1  ;;  %v2345_v23 = vmul.f32 %v10610_v9, %v17179_v61  ;;  %v17206_v32 = vld [vmem:[#allocation157_spill] sm:$0xff] }
 0x2d3   :  { %v10614_v12 = vpop.eup %10613  ;;  %v2323_v21 = vmul.f32 %v10612_v34, %v17180_v45  ;;  %v17207_v9 = vld [vmem:[#allocation153_spill] sm:$0xff] }
 0x2d4   :  { %v10616_v56 = vpop.eup %10615  ;;  %2751 = vmatprep.subr.bf16.mxu1 %v2503_v37  ;;  %v2505_v38 = vpack.c.bf16 %v2345_v23, %v2329_v3  ;;  %v2339_v52 = vmul.f32 %v10614_v12, %v17181_v25  ;;  %v9810_v3 = vcombine.high %v17207_v9, %v17206_v32  ;;  %v9771_v37 = vcombine.low %v17201_v11, %v17200_v13  ;;  %v17208_v23 = vld [vmem:[#allocation147_spill] sm:$0xff] }
 0x2d5   :  { %v10618_v15 = vpop.eup %10617  ;;  %v2327_v26 = vmul.f32 %v10616_v56, %v17182_v55  ;;  %v17209_v12 = vld [vmem:[#allocation143_spill] sm:$0xff]  ;;  %v9809_v56 = vcombine.low %v17207_v9, %v17206_v32 }
 0x2d6   :  { %v10620_v10 = vpop.eup %10619  ;;  %9777 = vmatprep.subr.msk.bf16.mxu0 %vm2616_vm2, %v2505_v38  ;;  %v2502_v16 = vpack.c.bf16 %v2339_v52, %v2323_v21  ;;  %v2343_v7 = vmul.f32 %v10618_v15, %v17183_v57  ;;  %v9798_v21 = vcombine.high %v17209_v12, %v17208_v23  ;;  %v17210_v38 = vld [vmem:[#allocation149_spill] sm:$0xff] }
 0x2d7   :  { %v10622_v17 = vpop.eup %10621  ;;  %v2293_v61 = vmul.f32 %v10620_v10, %v17184_v41  ;;  %v17211_v52 = vld [vmem:[#allocation145_spill] sm:$0xff] }
 0x2d8   :  { %v10624_v4 = vpop.eup %10623  ;;  %2752 = vmatpush1.bf16.xpose.msra.mxu1 %v2502_v16  ;;  %v2504_v45 = vpack.c.bf16 %v2343_v7, %v2327_v26  ;;  %v2309_v18 = vmul.f32 %v10622_v17, %v17185_v44  ;;  %v17192_v44 = vld [vmem:[#allocation171_spill] sm:$0xff]  ;;  %v9802_v15 = vcombine.high %v17211_v52, %v17210_v38  ;;  %v9797_v26 = vcombine.low %v17209_v12, %v17208_v23  ;;  %v17222_v23 = vld [vmem:[#allocation164_spill] sm:$0xff] }
 0x2d9   :  { %v10626_v48 = vpop.eup %10625  ;;  %v2297_v25 = vmul.f32 %v10624_v4, %v17186_v42  ;;  %v9822_v19 = vcombine.high %v17193_v35, %v17192_v44  ;;  %v9821_v51 = vcombine.low %v17193_v35, %v17192_v44  ;;  %v9801_v10 = vcombine.low %v17211_v52, %v17210_v38  ;;  %v17212_v16 = vld [vmem:[#allocation139_spill] sm:$0xff]  ;;  %v17214_v4 = vld [vmem:[#allocation141_spill] sm:$0xff]  ;;  %v17223_v12 = vld [vmem:[#allocation160_spill] sm:$0xff] }
 0x2da   :  { %v10628_v39 = vpop.eup %10627  ;;  %2801 = vmatpush1.bf16.xpose.msra.mxu0 %v2504_v45  ;;  %v2495_v55 = vpack.c.bf16 %v2309_v18, %v2293_v61  ;;  %v2313_v59 = vmul.f32 %v10626_v48, %v17187_v54  ;;  %v17194_v54 = vld [vmem:[#allocation173_spill] sm:$0xff]  ;;  %v17213_v7 = vld [vmem:[#allocation135_spill] sm:$0xff]  ;;  %v11214_v44 = vmov 0  }
 0x2db   :  { %v10630_v8 = vpop.eup %10629  ;;  %v2291_v0 = vmul.f32 %v10628_v39, %v17188_v14  ;;  %v9826_v27 = vcombine.high %v17195_v58, %v17194_v54  ;;  %v9825_v43 = vcombine.low %v17195_v58, %v17194_v54  ;;  %v9790_v17 = vcombine.high %v17213_v7, %v17212_v16  ;;  %v17215_v45 = vld [vmem:[#allocation137_spill] sm:$0xff]  ;;  %v17217_v39 = vld [vmem:[#allocation127_spill] sm:$0xff] }
 0x2dc   :  { %v10632_v57 = vpop.eup %10631  ;;  %2753 = vmatprep.subr.bf16.mxu1 %v2495_v55  ;;  %v2497_v62 = vpack.c.bf16 %v2313_v59, %v2297_v25  ;;  %v2307_v41 = vmul.f32 %v10630_v8, %v17189_v46  ;;  %v9761_v46 = vcombine.low %v17163_v33, %v17162_v28  ;;  %v17202_v28 = vld [vmem:[#allocation165_spill] sm:$0xff]  ;;  %v9789_v61 = vcombine.low %v17213_v7, %v17212_v16  ;;  %v17216_v25 = vld [vmem:[#allocation131_spill] sm:$0xff]  ;;  %v17224_v7 = vld [vmem:[#allocation156_spill] sm:$0xff] }
 0x2dd   :  { %v10634_v22 = vpop.eup %10633  ;;  %v2295_v30 = vmul.f32 %v10632_v57, %v17190_v29  ;;  %v17196_v29 = vld [vmem:[#allocation125_spill] sm:$0xff]  ;;  %v9794_v18 = vcombine.high %v17215_v45, %v17214_v4  ;;  %v9793_v48 = vcombine.low %v17215_v45, %v17214_v4  ;;  %v9782_v55 = vcombine.high %v17217_v39, %v17216_v25 }
 0x2de   :  { %9778 = vmatprep.subr.msk.bf16.mxu0 %vm2616_vm2, %v2497_v62  ;;  %v2494_v42 = vpack.c.bf16 %v2307_v41, %v2291_v0  ;;  %v2311_v2 = vmul.f32 %v10634_v22, %v17191_v50  ;;  %v9770_v20 = vcombine.high %v17197_v53, %v17196_v29  ;;  %v9763_v50 = vcombine.low %v17167_v47, %v17166_v24  ;;  %v17203_v33 = vld [vmem:[#allocation161_spill] sm:$0xff]  ;;  %v17204_v24 = vld [vmem:[#allocation155_spill] sm:$0xff]  ;;  %v17220_v41 = vld [vmem:[#allocation172_spill] sm:$0xff] }
 0x2df   :  { %v9818_v60 = vcombine.high %v17203_v33, %v17202_v28  ;;  %v17205_v47 = vld [vmem:[#allocation151_spill] sm:$0xff]  ;;  %v9817_v1 = vcombine.low %v17203_v33, %v17202_v28  ;;  %v9769_v63 = vcombine.low %v17197_v53, %v17196_v29  ;;  %v9781_v59 = vcombine.low %v17217_v39, %v17216_v25  ;;  %v17218_v8 = vld [vmem:[#allocation133_spill] sm:$0xff]  ;;  %v17221_v22 = vld [vmem:[#allocation168_spill] sm:$0xff] }
 0x2e0   :  { %2754 = vmatpush1.bf16.xpose.msra.mxu1 %v2494_v42  ;;  %v2496_v14 = vpack.c.bf16 %v2311_v2, %v2295_v30  ;;  %v9806_v5 = vcombine.high %v17205_v47, %v17204_v24  ;;  %v9805_v34 = vcombine.low %v17205_v47, %v17204_v24  ;;  %v17219_v0 = vld [vmem:[#allocation129_spill] sm:$0xff]  ;;  %v9824_v30 = vcombine.high %v17221_v22, %v17220_v41 }
 0x2e1   :  { %3138 = vmatprep.subr.bf16.mxu1 %v9822_v19  ;;  %v9786_v57 = vcombine.high %v17219_v0, %v17218_v8  ;;  %v9785_v62 = vcombine.low %v17219_v0, %v17218_v8  ;;  %v17227_v8 = vld [vmem:[#allocation144_spill] sm:$0xff] }
 0x2e2   :  { %2803 = vmatpush1.bf16.xpose.msra.mxu0 %v2496_v14 }
 0x2e3   :  { %3244 = vmatprep.subr.bf16.mxu0 %v9826_v27 }
 0x2e7   :  { %2772 = vmatmul.mubr.bf16.vlgmr.msra.gmra.mxu1 %v9761_v46 }
 0x2e8   :  { %2779 = vmatprep.mubr.bf16.mxu1 %v9770_v20  ;;  %3139 = vmatpush1.bf16.msra.mxu1 %v9821_v51 }
 0x2e9   :  { %2821 = vmatmul.mubr.bf16.vlgmr.msra.gmra.mxu0 %v9763_v50  ;;  %3140 = vmatprep.subr.bf16.mxu1 %v9814_v49 }
 0x2ea   :  { %9780 = vmatprep.mubr.msk.bf16.mxu0 %vm2616_vm2, %v9772_v6  ;;  %3245 = vmatpush1.bf16.msra.mxu0 %v9825_v43 }
 0x2eb   :  { %3246 = vmatprep.subr.bf16.mxu0 %v9818_v60 }
 0x2ec   :  { %3141 = vmatpush1.bf16.msra.mxu1 %v9813_v40 }
 0x2ed   :  { %3142 = vmatprep.subr.bf16.mxu1 %v9806_v5 }
 0x2ee   :  { %3247 = vmatpush1.bf16.msra.mxu0 %v9817_v1 }
 0x2ef   :  { %2780 = vmatmul.mubr.bf16.gmra.mxu1 %v9769_v63  ;;  %3248 = vmatprep.subr.bf16.mxu0 %v9810_v3 }
 0x2f0   :  { %3143 = vmatpush1.bf16.msra.mxu1 %v9805_v34  ;;  %3166 = vmatprep.mubr.bf16.mxu1 %v11214_v44  ;;  %v9823_v34 = vcombine.low %v17221_v22, %v17220_v41  ;;  %v17229_v41 = vld [vmem:[#allocation136_spill] sm:$0xff] }
 0x2f1   :  { %2829 = vmatmul.mubr.bf16.gmra.mxu0 %v9771_v37  ;;  %3144 = vmatprep.subr.bf16.mxu1 %v9798_v21  ;;  %v9816_v21 = vcombine.high %v17223_v12, %v17222_v23 }
 0x2f2   :  { %3249 = vmatpush1.bf16.msra.mxu0 %v9809_v56  ;;  %3272 = vmatprep.mubr.bf16.mxu0 %v11214_v44 }
 0x2f3   :  { %3250 = vmatprep.subr.bf16.mxu0 %v9802_v15 }
 0x2f4   :  { %3145 = vmatpush1.bf16.msra.mxu1 %v9797_v26 }
 0x2f5   :  { %3146 = vmatprep.subr.bf16.mxu1 %v9790_v17  ;;  %v17225_v17 = vld [vmem:[#allocation152_spill] sm:$0xff] }
 0x2f6   :  { %3251 = vmatpush1.bf16.msra.mxu0 %v9801_v10  ;;  %v9815_v10 = vcombine.low %v17223_v12, %v17222_v23  ;;  %v9807_v39 = vcombine.low %v17225_v17, %v17224_v7  ;;  %v3482_v23 = vld [vmem:[%s17244_s9] sm:$0xff]  ;;  %v3511_v12 = vld [vmem:[%s17244_s9 + $0xe8] sm:$0xff] }
 0x2f7   :  { %3252 = vmatprep.subr.bf16.mxu0 %v9794_v18 }
 0x2f8   :  { %3147 = vmatpush1.bf16.msra.mxu1 %v9789_v61  ;;  %v9808_v61 = vcombine.high %v17225_v17, %v17224_v7  ;;  %v3513_v7 = vld [vmem:[%s17244_s9 + $0xf8] sm:$0xff] }
 0x2f9   :  { %3148 = vmatprep.subr.bf16.mxu1 %v9782_v55 }
 0x2fa   :  { %3253 = vmatpush1.bf16.msra.mxu0 %v9793_v48 }
 0x2fb   :  { %3254 = vmatprep.subr.bf16.mxu0 %v9786_v57 }
 0x2fc   :  { %3149 = vmatpush1.bf16.msra.mxu1 %v9781_v59  ;;  %v17226_v59 = vld [vmem:[#allocation148_spill] sm:$0xff] }
 0x2fd   :  { %3191 = vmatprep.subr.bf16.mxu1 %v9824_v30  ;;  %v9800_v0 = vcombine.high %v17227_v8, %v17226_v59  ;;  %v9799_v57 = vcombine.low %v17227_v8, %v17226_v59 }
 0x2fe   :  { %3255 = vmatpush1.bf16.msra.mxu0 %v9785_v62  ;;  %v17228_v62 = vld [vmem:[#allocation140_spill] sm:$0xff] }
 0x2ff   :  { %v9792_v22 = vcombine.high %v17229_v41, %v17228_v62  ;;  %v9791_v30 = vcombine.low %v17229_v41, %v17228_v62  ;;  %v3347_v62 = vld [vmem:[%s17245_s6 + $0x8] sm:$0xff] }
 0x347   :  { %v2675_v35 = vpop.f32.mrf.mxu1 }
 0x349   :  { %v2724_v19 = vpop.f32.mrf.mxu0  ;;  %v2677_v42 = vpop.f32.mrf.mxu1 }
 0x34a   :  { %v2725_v2 = vadd.f32 %v2724_v19, %v2675_v35  ;;  %v17230_v35 = vld [vmem:[#allocation132_spill] sm:$0xff] }
 0x34b   :  { %v2726_v54 = vpop.f32.mrf.mxu0  ;;  %v2678_v58 = vpop.f32.mrf.mxu1  ;;  %v17231_v19 = vld [vmem:[#allocation128_spill] sm:$0xff] }
 0x34c   :  { %v9784_v42 = vcombine.high %v17231_v19, %v17230_v35  ;;  %v17232_v54 = vld [vmem:[#allocation174_spill] sm:$0xff] }
 0x34d   :  { %v2727_v27 = vpop.f32.mrf.mxu0  ;;  %v2680_v14 = vpop.f32.mrf.mxu1 }
 0x34e   :  { %v2728_v46 = vadd.f32 %v2727_v27, %v2678_v58  ;;  %v17233_v58 = vld [vmem:[#allocation170_spill] sm:$0xff] }
 0x34f   :  { %v2729_v29 = vpop.f32.mrf.mxu0  ;;  %v2683_v53 = vpop.f32.mrf.mxu1  ;;  %v9828_v27 = vcombine.high %v17233_v58, %v17232_v54  ;;  %v9827_v14 = vcombine.low %v17233_v58, %v17232_v54 }
 0x350   :  { %v17235_v29 = vld [vmem:[#allocation162_spill] sm:$0xff] }
 0x351   :  { %v2685_v20 = vpop.f32.mrf.mxu1  ;;  %v2732_v51 = vpop.f32.mrf.mxu0 }
 0x352   :  { %v2733_v50 = vadd.f32 %v2732_v51, %v2683_v53  ;;  %v17236_v51 = vld [vmem:[#allocation158_spill] sm:$0xff] }
 0x353   :  { %v2686_v31 = vpop.f32.mrf.mxu1  ;;  %v2734_v36 = vpop.f32.mrf.mxu0 }
 0x355   :  { %v2688_v49 = vpop.f32.mrf.mxu1  ;;  %v2735_v13 = vpop.f32.mrf.mxu0 }
 0x356   :  { %v2736_v11 = vadd.f32 %v2735_v13, %v2686_v31  ;;  %v17238_v49 = vld [vmem:[#allocation150_spill] sm:$0xff] }
 0x357   :  { %v2737_v6 = vpop.f32.mrf.mxu0  ;;  %v17239_v13 = vld [vmem:[#allocation146_spill] sm:$0xff] }
 0x358   :  { %v9803_v6 = vcombine.low %v17239_v13, %v17238_v49 }
 0x3a7   :  { %v2773_v43 = vpop.f32.mrf.mxu1 }
 0x3a8   :  { %v2774_v60 = vadd.f32 %v2773_v43, %v2725_v2  ;;  %v9783_v2 = vcombine.low %v17231_v19, %v17230_v35  ;;  %v17240_v43 = vld [vmem:[#allocation142_spill] sm:$0xff] }
 0x3a9   :  { %v2822_v28 = vpop.f32.mrf.mxu0  ;;  %v2775_v33 = vpop.f32.mrf.mxu1 }
 0x3aa   :  { %v2823_v63 = vadd.f32 %v2822_v28, %v2774_v60  ;;  %v17241_v28 = vld [vmem:[#allocation138_spill] sm:$0xff] }
 0x3ab   :  { %v2824_v40 = vpop.f32.mrf.mxu0  ;;  %v2776_v24 = vpop.f32.mrf.mxu1  ;;  %v9796_v33 = vcombine.high %v17241_v28, %v17240_v43  ;;  %v9795_v60 = vcombine.low %v17241_v28, %v17240_v43  ;;  %v3375_v43 = vld [vmem:[%s17245_s6 + $0xe8] sm:$0xff]  ;;  %v3350_v28 = vld [vmem:[%s17245_s6 + $0x20] sm:$0xff] }
 0x3ac   :  { %v2777_v47 = vadd.f32 %v2776_v24, %v2728_v46  ;;  %v17234_v46 = vld [vmem:[#allocation166_spill] sm:$0xff] }
 0x3ad   :  { %v2825_v5 = vpop.f32.mrf.mxu0  ;;  %v2778_v1 = vpop.f32.mrf.mxu1  ;;  %v9820_v53 = vcombine.high %v17235_v29, %v17234_v46  ;;  %v9819_v20 = vcombine.low %v17235_v29, %v17234_v46  ;;  %v17242_v40 = vld [vmem:[#allocation134_spill] sm:$0xff] }
 0x3ae   :  { %v2826_v32 = vadd.f32 %v2825_v5, %v2777_v47  ;;  %v17243_v24 = vld [vmem:[#allocation130_spill] sm:$0xff] }
 0x3af   :  { %v2827_v9 = vpop.f32.mrf.mxu0  ;;  %v2781_v3 = vpop.f32.mrf.mxu1  ;;  %v9788_v47 = vcombine.high %v17243_v24, %v17242_v40  ;;  %v9787_v5 = vcombine.low %v17243_v24, %v17242_v40  ;;  %v3507_v1 = vld [vmem:[%s17244_s9 + $0xc8] sm:$0xff]  ;;  %v3366_v40 = vld [vmem:[%s17245_s6 + $0xa0] sm:$0xff] }
 0x3b0   :  { %v14218_v37 = vpack.c.bf16 %v2826_v32, %v2823_v63  ;;  %v2782_v52 = vadd.f32 %v2781_v3, %v2733_v50  ;;  %v17237_v50 = vld [vmem:[#allocation154_spill] sm:$0xff]  ;;  %3538 = vmatprep.subr.mxu0 %v3507_v1  ;;  %v3506_v63 = vld [vmem:[%s17244_s9 + $0xc0] sm:$0xff] }
 0x3b1   :  { %v2783_v56 = vpop.f32.mrf.mxu1  ;;  %v2830_v38 = vpop.f32.mrf.mxu0  ;;  %v9812_v31 = vcombine.high %v17237_v50, %v17236_v51  ;;  %v9811_v36 = vcombine.low %v17237_v50, %v17236_v51  ;;  %v3499_v32 = vld [vmem:[%s17244_s9 + $0x88] sm:$0xff]  ;;  %v3498_v9 = vld [vmem:[%s17244_s9 + $0x80] sm:$0xff] }
 0x3b2   :  { %9829 = vmatmul.mubr.msk.bf16.vlgmr.msra.gmra.mxu1 %vm3127_vm3, %v14218_v37  ;;  %9833 = vmatmul.mubr.msk.bf16.vlgmr.msra.gmra.mxu0 %vm3127_vm3, %v14218_v37  ;;  %v2831_v18 = vadd.f32 %v2830_v38, %v2782_v52  ;;  %v3491_v3 = vld [vmem:[%s17244_s9 + $0x48] sm:$0xff]  ;;  %v3508_v56 = vld [vmem:[%s17244_s9 + $0xd0] sm:$0xff]  ;;  %v3501_v38 = vld [vmem:[%s17244_s9 + $0x98] sm:$0xff] }
 0x3b3   :  { %3192 = vmatpush1.bf16.msra.mxu1 %v9823_v34  ;;  %v2784_v15 = vpop.f32.mrf.mxu1  ;;  %v2832_v26 = vpop.f32.mrf.mxu0  ;;  %3176 = vmatprep.mubr.bf16.mxu1 %v11214_v44  ;;  %v3490_v34 = vld [vmem:[%s17244_s9 + $0x40] sm:$0xff]  ;;  %v3500_v52 = vld [vmem:[%s17244_s9 + $0x90] sm:$0xff] }
 0x3b4   :  { %v2785_v16 = vadd.f32 %v2784_v15, %v2736_v11  ;;  %3193 = vmatprep.subr.bf16.mxu1 %v9816_v21  ;;  %3282 = vmatprep.mubr.bf16.mxu0 %v11214_v44  ;;  %v9804_v11 = vcombine.high %v17239_v13, %v17238_v49  ;;  %v3509_v21 = vld [vmem:[%s17244_s9 + $0xd8] sm:$0xff]  ;;  %v3492_v26 = vld [vmem:[%s17244_s9 + $0x50] sm:$0xff]  ;;  %v3358_v50 = vld [vmem:[%s17245_s6 + $0x60] sm:$0xff] }
 0x3b5   :  { %v2833_v4 = vpop.f32.mrf.mxu0  ;;  %v2786_v45 = vpop.f32.mrf.mxu1  ;;  %3539 = vmatpush1.xpose.msra.mxu0 %v3506_v63  ;;  %v3493_v15 = vld [vmem:[%s17244_s9 + $0x58] sm:$0xff] }
 0x3b6   :  { %v2834_v48 = vadd.f32 %v2833_v4, %v2785_v16  ;;  %3540 = vmatprep.subr.mxu0 %v3499_v32  ;;  %v3484_v16 = vld [vmem:[%s17244_s9 + $0x10] sm:$0xff] }
 0x3b7   :  { %3194 = vmatpush1.bf16.msra.mxu1 %v9815_v10  ;;  %v2835_v25 = vpop.f32.mrf.mxu0  ;;  %v3485_v10 = vld [vmem:[%s17244_s9 + $0x18] sm:$0xff] }
 0x3b8   :  { %v2838_v55 = vpack.c.bf16 %v2834_v48, %v2831_v18  ;;  %3195 = vmatprep.subr.bf16.mxu1 %v9808_v61  ;;  %v3354_v48 = vld [vmem:[%s17245_s6 + $0x40] sm:$0xff] }
 0x3b9   :  { %3541 = vmatpush1.xpose.msra.mxu0 %v3498_v9 }
 0x3ba   :  { %9830 = vmatmul.mubr.msk.bf16.gmra.mxu1 %vm3127_vm3, %v2838_v55  ;;  %9834 = vmatmul.mubr.msk.bf16.gmra.mxu0 %vm3127_vm3, %v2838_v55 }
 0x3bb   :  { %3196 = vmatpush1.bf16.msra.mxu1 %v9807_v39  ;;  %3219 = vmatprep.mubr.bf16.mxu1 %v11214_v44  ;;  %v3355_v39 = vld [vmem:[%s17245_s6 + $0x48] sm:$0xff] }
 0x3bc   :  { %3197 = vmatprep.subr.bf16.mxu1 %v9800_v0  ;;  %3542 = vmatprep.subr.mxu0 %v3491_v3  ;;  %v3359_v0 = vld [vmem:[%s17245_s6 + $0x68] sm:$0xff]  ;;  %v3374_v3 = vld [vmem:[%s17245_s6 + $0xe0] sm:$0xff] }
 0x3bd   :  { %3543 = vmatpush1.xpose.msra.mxu0 %v3490_v34 }
 0x3bf   :  { %3198 = vmatpush1.bf16.msra.mxu1 %v9799_v57  ;;  %v3362_v57 = vld [vmem:[%s17245_s6 + $0x80] sm:$0xff] }
 0x3c0   :  { %3199 = vmatprep.subr.bf16.mxu1 %v9792_v22  ;;  %v3351_v22 = vld [vmem:[%s17245_s6 + $0x28] sm:$0xff] }
 0x3c3   :  { %3200 = vmatpush1.bf16.msra.mxu1 %v9791_v30 }
 0x3c4   :  { %3201 = vmatprep.subr.bf16.mxu1 %v9784_v42  ;;  %v3363_v42 = vld [vmem:[%s17245_s6 + $0x88] sm:$0xff] }
 0x3c7   :  { %3202 = vmatpush1.bf16.msra.mxu1 %v9783_v2  ;;  %v3367_v2 = vld [vmem:[%s17245_s6 + $0xa8] sm:$0xff] }
 0x3c8   :  { %3297 = vmatprep.subr.bf16.mxu1 %v9828_v27 }
 0x3ca   :  { %9831 = vmatmul.mubr.msk.bf16.vlgmr.msra.gmra.mxu1 %vm3127_vm3, %v14218_v37 }
 0x3cb   :  { %3298 = vmatpush1.bf16.msra.mxu1 %v9827_v14  ;;  %3229 = vmatprep.mubr.bf16.mxu1 %v11214_v44 }
 0x3cc   :  { %3299 = vmatprep.subr.bf16.mxu1 %v9820_v53  ;;  %v3370_v53 = vld [vmem:[%s17245_s6 + $0xc0] sm:$0xff] }
 0x3cf   :  { %3300 = vmatpush1.bf16.msra.mxu1 %v9819_v20 }
 0x3d0   :  { %3301 = vmatprep.subr.bf16.mxu1 %v9812_v31 }
 0x3d2   :  { %9832 = vmatmul.mubr.msk.bf16.gmra.mxu1 %vm3127_vm3, %v2838_v55 }
 0x3d3   :  { %3302 = vmatpush1.bf16.msra.mxu1 %v9811_v36  ;;  %3325 = vmatprep.mubr.bf16.mxu1 %v11214_v44 }
 0x3d4   :  { %3303 = vmatprep.subr.bf16.mxu1 %v9804_v11 }
 0x3d7   :  { %3304 = vmatpush1.bf16.msra.mxu1 %v9803_v6  ;;  %v3371_v6 = vld [vmem:[%s17245_s6 + $0xc8] sm:$0xff] }
 0x3d8   :  { %3305 = vmatprep.subr.bf16.mxu1 %v9796_v33 }
 0x3db   :  { %3306 = vmatpush1.bf16.msra.mxu1 %v9795_v60 }
 0x3dc   :  { %3307 = vmatprep.subr.bf16.mxu1 %v9788_v47 }
 0x3df   :  { %3308 = vmatpush1.bf16.msra.mxu1 %v9787_v5 }
 0x3e0   :  { %3608 = vmatprep.subr.mxu1 %v3509_v21 }
 0x3e2   :  { %9835 = vmatmul.mubr.msk.bf16.vlgmr.msra.gmra.mxu1 %vm3127_vm3, %v14218_v37  ;;  %v3483_v37 = vld [vmem:[%s17244_s9 + $0x8] sm:$0xff] }
 0x3e3   :  { %3335 = vmatprep.mubr.bf16.mxu1 %v11214_v44  ;;  %3544 = vmatprep.subr.mxu0 %v3483_v37 }
 0x3e4   :  { %3545 = vmatpush1.xpose.msra.mxu0 %v3482_v23  ;;  %3609 = vmatpush1.xpose.msra.mxu1 %v3508_v56 }
 0x3e5   :  { %3678 = vmatprep.subr.mxu0 %v3511_v12  ;;  %3610 = vmatprep.subr.mxu1 %v3501_v38 }
 0x3e8   :  { %3611 = vmatpush1.xpose.msra.mxu1 %v3500_v52 }
 0x3e9   :  { %3612 = vmatprep.subr.mxu1 %v3493_v15 }
 0x3ea   :  { %9836 = vmatmul.mubr.msk.bf16.gmra.mxu1 %vm3127_vm3, %v2838_v55  ;;  %v3346_v55 = vld [vmem:[%s17245_s6] sm:$0xff] }
 0x3ec   :  { %3613 = vmatpush1.xpose.msra.mxu1 %v3492_v26 }
 0x3ed   :  { %3614 = vmatprep.subr.mxu1 %v3485_v10 }
 0x3f0   :  { %3615 = vmatpush1.xpose.msra.mxu1 %v3484_v16 }
 0x3f1   :  { %3748 = vmatprep.subr.mxu1 %v3513_v7 }
 0x472   :  { %v3168_v17 = vpop.f32.mrf.mxu1  ;;  %v3274_v61 = vpop.f32.mrf.mxu0 }
 0x473   :  { %v3378_v54 = vmul.f32 %v3346_v55, %v3168_v17  ;;  %v3382_v23 = vmul.f32 %v3350_v28, %v3274_v61 }
 0x474   :  { %v3170_v4 = vpop.f32.mrf.mxu1  ;;  %v3276_v45 = vpop.f32.mrf.mxu0 }
 0x475   :  { %v3379_v14 = vmul.f32 %v3347_v62, %v3170_v4  ;;  %v3383_v20 = vmul.f32 %v3351_v22, %v3276_v45  ;;  %v3356_v22 = vld [vmem:[%s17245_s6 + $0x50] sm:$0xff] }
 0x476   :  { %v3172_v18 = vpop.f32.mrf.mxu1  ;;  %v3278_v25 = vpop.f32.mrf.mxu0 }
 0x477   :  { %v3386_v41 = vmul.f32 %v3354_v48, %v3172_v18  ;;  %v3390_v47 = vmul.f32 %v3358_v50, %v3278_v25  ;;  %v3365_v50 = vld [vmem:[%s17245_s6 + $0x98] sm:$0xff] }
 0x478   :  { %v3174_v59 = vpop.f32.mrf.mxu1  ;;  %v3280_v8 = vpop.f32.mrf.mxu0 }
 0x479   :  { %v3387_v30 = vmul.f32 %v3355_v39, %v3174_v59  ;;  %v3391_v58 = vmul.f32 %v3359_v0, %v3280_v8  ;;  %v3410_v51 = vadd.f32 %v3386_v41, %v3378_v54  ;;  %v3446_v52 = vadd.f32 %v3390_v47, %v3382_v23  ;;  %v3373_v47 = vld [vmem:[%s17245_s6 + $0xd8] sm:$0xff] }
 0x47a   :  { %v3178_v35 = vpop.f32.mrf.mxu1  ;;  %v3284_v19 = vpop.f32.mrf.mxu0 }
 0x47b   :  { %v3394_v27 = vmul.f32 %v3362_v57, %v3178_v35  ;;  %v3419_v49 = vadd.f32 %v3387_v30, %v3379_v14  ;;  %v3455_v33 = vadd.f32 %v3391_v58, %v3383_v20  ;;  %v3398_v12 = vmul.f32 %v3366_v40, %v3284_v19  ;;  %v3348_v35 = vld [vmem:[%s17245_s6 + $0x10] sm:$0xff]  ;;  %v3357_v58 = vld [vmem:[%s17245_s6 + $0x58] sm:$0xff]  ;;  %v3510_v14 = vld [vmem:[%s17244_s9 + $0xe0] sm:$0xff] }
 0x47c   :  { %v3180_v46 = vpop.f32.mrf.mxu1  ;;  %v3286_v29 = vpop.f32.mrf.mxu0  ;;  %v3349_v20 = vld [vmem:[%s17245_s6 + $0x18] sm:$0xff]  ;;  %v3495_v40 = vld [vmem:[%s17244_s9 + $0x68] sm:$0xff] }
 0x47d   :  { %v3395_v31 = vmul.f32 %v3363_v42, %v3180_v46  ;;  %v3399_v36 = vmul.f32 %v3367_v2, %v3286_v29  ;;  %v3411_v60 = vadd.f32 %v3410_v51, %v3394_v27  ;;  %v3447_v7 = vadd.f32 %v3446_v52, %v3398_v12  ;;  %v3364_v27 = vld [vmem:[%s17245_s6 + $0x90] sm:$0xff]  ;;  %v3487_v12 = vld [vmem:[%s17244_s9 + $0x28] sm:$0xff]  ;;  %v3486_v52 = vld [vmem:[%s17244_s9 + $0x20] sm:$0xff] }
 0x47e   :  { %v3182_v13 = vpop.f32.mrf.mxu1  ;;  %v3288_v11 = vpop.f32.mrf.mxu0 }
 0x47f   :  { %v3402_v24 = vmul.f32 %v3370_v53, %v3182_v13  ;;  %v3420_v5 = vadd.f32 %v3419_v49, %v3395_v31  ;;  %v3456_v32 = vadd.f32 %v3455_v33, %v3399_v36  ;;  %v3406_v15 = vmul.f32 %v3374_v3, %v3288_v11  ;;  %v3503_v53 = vld [vmem:[%s17244_s9 + $0xa8] sm:$0xff]  ;;  %v3494_v3 = vld [vmem:[%s17244_s9 + $0x60] sm:$0xff] }
 0x480   :  { %v3184_v1 = vpop.f32.mrf.mxu1  ;;  %v3290_v63 = vpop.f32.mrf.mxu0 }
 0x481   :  { %v3412_v9 = vadd.f32 %v3411_v60, %v3402_v24  ;;  %v3403_v34 = vmul.f32 %v3371_v6, %v3184_v1  ;;  %v3407_v37 = vmul.f32 %v3375_v43, %v3290_v63  ;;  %v3448_v18 = vadd.f32 %v3447_v7, %v3406_v15  ;;  %v3372_v6 = vld [vmem:[%s17245_s6 + $0xd0] sm:$0xff]  ;;  %v3502_v43 = vld [vmem:[%s17244_s9 + $0xa0] sm:$0xff] }
 0x483   :  { %v3413_v21 = vrot.slane %v3412_v9, 4  ;;  %v3421_v56 = vadd.f32 %v3420_v5, %v3403_v34  ;;  %v3457_v38 = vadd.f32 %v3456_v32, %v3407_v37  ;;  %v3449_v8 = vrot.slane %v3448_v18, 4 }
 0x485   :  { %v3414_v26 = vadd.f32 %v3413_v21, %v3412_v9  ;;  %v3422_v10 = vrot.slane %v3421_v56, 4  ;;  %v3458_v16 = vrot.slane %v3457_v38, 4  ;;  %v3450_v2 = vadd.f32 %v3449_v8, %v3448_v18  ;;  %v3352_v8 = vld [vmem:[%s17245_s6 + $0x30] sm:$0xff] }
 0x487   :  { %v3415_v17 = vrot.slane %v3414_v26, 2  ;;  %v3423_v4 = vadd.f32 %v3422_v10, %v3421_v56  ;;  %v3459_v45 = vadd.f32 %v3458_v16, %v3457_v38  ;;  %v3451_v13 = vrot.slane %v3450_v2, 2 }
 0x489   :  { %v3416_v48 = vadd.f32 %v3415_v17, %v3414_v26  ;;  %v3424_v25 = vrot.slane %v3423_v4, 2  ;;  %v3460_v39 = vrot.slane %v3459_v45, 2  ;;  %v3452_v32 = vadd.f32 %v3451_v13, %v3450_v2 }
 0x48a   :  { %v3221_v55 = vpop.f32.mrf.mxu1  ;;  %v17246_v17 = vmov 0.0  }
 0x48b   :  { %v3425_v59 = vadd.f32 %v3424_v25, %v3423_v4  ;;  %v3417_v61 = vrot.slane %v3416_v48, 1  ;;  %v3461_v57 = vadd.f32 %v3460_v39, %v3459_v45  ;;  %v3380_v31 = vmul.f32 %v3348_v35, %v3221_v55 }
 0x48c   :  { %v3223_v0 = vpop.f32.mrf.mxu1  ;;  %v3453_v38 = vrot.slane %v3452_v32, 1 }
 0x48d   :  { %v3426_v62 = vrot.slane %v3425_v59, 1  ;;  %v3462_v30 = vrot.slane %v3461_v57, 1  ;;  %v3418_v42 = vadd.f32 %v3417_v61, %v3416_v48  ;;  %v3381_v28 = vmul.f32 %v3349_v20, %v3223_v0  ;;  %v3360_v61 = vld [vmem:[%s17245_s6 + $0x70] sm:$0xff] }
 0x48e   :  { %v3225_v41 = vpop.f32.mrf.mxu1  ;;  %v3454_v7 = vadd.f32 %v3453_v38, %v3452_v32 }
 0x48f   :  { %v3427_v19 = vadd.f32 %v3426_v62, %v3425_v59  ;;  %v3388_v46 = vmul.f32 %v3356_v22, %v3225_v41  ;;  %v3463_v29 = vadd.f32 %v3462_v30, %v3461_v57  ;;  %v3361_v41 = vld [vmem:[%s17245_s6 + $0x78] sm:$0xff]  ;;  %v3368_v22 = vld [vmem:[%s17245_s6 + $0xb0] sm:$0xff] }
 0x490   :  { %v3227_v54 = vpop.f32.mrf.mxu1  ;;  %v3512_v30 = vld [vmem:[%s17244_s9 + $0xf0] sm:$0xff] }
 0x491   :  { %3578 = vmatprep.mubr.f32.mxu0 %v3427_v19  ;;  %v3389_v36 = vmul.f32 %v3357_v58, %v3227_v54  ;;  %v3428_v33 = vadd.f32 %v3388_v46, %v3380_v31  ;;  %v3505_v19 = vld [vmem:[%s17244_s9 + $0xb8] sm:$0xff] }
 0x492   :  { %v3231_v51 = vpop.f32.mrf.mxu1  ;;  %3579 = vmatmul.mubr.f32.vlgmr.msra.gmra.mxu0 %v3418_v42  ;;  %v3353_v42 = vld [vmem:[%s17245_s6 + $0x38] sm:$0xff] }
 0x493   :  { %v3396_v49 = vmul.f32 %v3364_v27, %v3231_v51  ;;  %3679 = vmatpush1.xpose.msra.mxu0 %v3510_v14  ;;  %3718 = vmatprep.mubr.f32.mxu0 %v3463_v29  ;;  %v3437_v5 = vadd.f32 %v3389_v36, %v3381_v28  ;;  %v3369_v54 = vld [vmem:[%s17245_s6 + $0xb8] sm:$0xff]  ;;  %v3376_v29 = vld [vmem:[%s17245_s6 + $0xf0] sm:$0xff] }
 0x494   :  { %v3233_v11 = vpop.f32.mrf.mxu1  ;;  %3680 = vmatprep.subr.mxu0 %v3503_v53  ;;  %v3504_v53 = vld [vmem:[%s17244_s9 + $0xb0] sm:$0xff]  ;;  %v3497_v31 = vld [vmem:[%s17244_s9 + $0x78] sm:$0xff] }
 0x495   :  { %v3397_v60 = vmul.f32 %v3365_v50, %v3233_v11  ;;  %v3429_v1 = vadd.f32 %v3428_v33, %v3396_v49  ;;  %v3377_v49 = vld [vmem:[%s17245_s6 + $0xf8] sm:$0xff]  ;;  %v3496_v28 = vld [vmem:[%s17244_s9 + $0x70] sm:$0xff] }
 0x496   :  { %v3235_v24 = vpop.f32.mrf.mxu1 }
 0x497   :  { %v3404_v63 = vmul.f32 %v3372_v6, %v3235_v24  ;;  %3681 = vmatpush1.xpose.msra.mxu0 %v3502_v43  ;;  %v3438_v34 = vadd.f32 %v3437_v5, %v3397_v60  ;;  %v3489_v24 = vld [vmem:[%s17244_s9 + $0x38] sm:$0xff] }
 0x498   :  { %v3237_v9 = vpop.f32.mrf.mxu1  ;;  %3682 = vmatprep.subr.mxu0 %v3495_v40 }
 0x499   :  { %v3430_v37 = vadd.f32 %v3429_v1, %v3404_v63  ;;  %v3405_v23 = vmul.f32 %v3373_v47, %v3237_v9  ;;  %v3488_v1 = vld [vmem:[%s17244_s9 + $0x30] sm:$0xff] }
 0x49b   :  { %v3431_v21 = vrot.slane %v3430_v37, 4  ;;  %v3439_v56 = vadd.f32 %v3438_v34, %v3405_v23  ;;  %3683 = vmatpush1.xpose.msra.mxu0 %v3494_v3 }
 0x49c   :  { %3684 = vmatprep.subr.mxu0 %v3487_v12 }
 0x49d   :  { %v3432_v15 = vadd.f32 %v3431_v21, %v3430_v37  ;;  %v3440_v26 = vrot.slane %v3439_v56, 4 }
 0x49f   :  { %v3433_v10 = vrot.slane %v3432_v15, 2  ;;  %v3441_v16 = vadd.f32 %v3440_v26, %v3439_v56  ;;  %3685 = vmatpush1.xpose.msra.mxu0 %v3486_v52  ;;  %v3806_v52 = vld [vmem:[%s17247_s12 + $0x18] sm:$0xff]  ;;  %v3804_v26 = vld [vmem:[%s17247_s12 + $0x8] sm:$0xff] }
 0x4a0   :  { %10172 = vmatprep.subr.mxu0 %v17246_v17 }
 0x4a1   :  { %v3434_v4 = vadd.f32 %v3433_v10, %v3432_v15  ;;  %v3442_v45 = vrot.slane %v3441_v16, 2  ;;  %v3805_v15 = vld [vmem:[%s17247_s12 + $0x10] sm:$0xff]  ;;  %v3803_v10 = vld [vmem:[%s17247_s12] sm:$0xff] }
 0x4a2   :  { %v3327_v18 = vpop.f32.mrf.mxu1  ;;  %3719 = vmatmul.mubr.f32.vlgmr.msra.gmra.mxu0 %v3454_v7 }
 0x4a3   :  { %v3443_v48 = vadd.f32 %v3442_v45, %v3441_v16  ;;  %v3435_v25 = vrot.slane %v3434_v4, 1  ;;  %v3384_v58 = vmul.f32 %v3352_v8, %v3327_v18  ;;  %10173 = vmatpush3.msra.mxu0 %v3806_v52  ;;  %10180 = vmatprep.mubr.msk.f32.mxu0 %vm11215_vm4, %v17246_v17 }
 0x4a4   :  { %v3329_v39 = vpop.f32.mrf.mxu1  ;;  %10174 = vmatprep.subr.mxu0 %v17246_v17 }
 0x4a5   :  { %v3444_v55 = vrot.slane %v3443_v48, 1  ;;  %v3436_v57 = vadd.f32 %v3435_v25, %v3434_v4  ;;  %v3385_v20 = vmul.f32 %v3353_v42, %v3329_v39  ;;  %10175 = vmatpush3.msra.mxu0 %v3805_v15 }
 0x4a6   :  { %v3331_v59 = vpop.f32.mrf.mxu1  ;;  %10176 = vmatprep.subr.mxu0 %v17246_v17 }
 0x4a7   :  { %v3445_v0 = vadd.f32 %v3444_v55, %v3443_v48  ;;  %v3392_v35 = vmul.f32 %v3360_v61, %v3331_v59  ;;  %10177 = vmatpush3.msra.mxu0 %v3804_v26  ;;  %v3795_v61 = vld [vmem:[%s17248_s24] sm:$0x1] }
 0x4a8   :  { %v3333_v62 = vpop.f32.mrf.mxu1  ;;  %10178 = vmatprep.subr.mxu0 %v17246_v17 }
 0x4a9   :  { %3648 = vmatprep.mubr.f32.mxu1 %v3445_v0  ;;  %v3393_v27 = vmul.f32 %v3361_v41, %v3333_v62  ;;  %v3464_v51 = vadd.f32 %v3392_v35, %v3384_v58  ;;  %10179 = vmatpush3.msra.mxu0 %v3803_v10 }
 0x4aa   :  { %v3337_v2 = vpop.f32.mrf.mxu1  ;;  %3649 = vmatmul.mubr.f32.vlgmr.msra.gmra.mxu1 %v3436_v57 }
 0x4ab   :  { %v3400_v14 = vmul.f32 %v3368_v22, %v3337_v2  ;;  %3749 = vmatpush1.xpose.msra.mxu1 %v3512_v30  ;;  %v3473_v13 = vadd.f32 %v3393_v27, %v3385_v20  ;;  %v17249_v2 = vld [vmem:[#allocation507_spill] sm:$0xff] }
 0x4ac   :  { %v3339_v46 = vpop.f32.mrf.mxu1  ;;  %3750 = vmatprep.subr.mxu1 %v3505_v19 }
 0x4ad   :  { %v3401_v50 = vmul.f32 %v3369_v54, %v3339_v46  ;;  %v3465_v11 = vadd.f32 %v3464_v51, %v3400_v14 }
 0x4ae   :  { %v3341_v36 = vpop.f32.mrf.mxu1 }
 0x4af   :  { %v3408_v6 = vmul.f32 %v3376_v29, %v3341_v36  ;;  %3751 = vmatpush1.xpose.msra.mxu1 %v3504_v53  ;;  %v3474_v33 = vadd.f32 %v3473_v13, %v3401_v50 }
 0x4b0   :  { %v3343_v43 = vpop.f32.mrf.mxu1  ;;  %3752 = vmatprep.subr.mxu1 %v3497_v31 }
 0x4b1   :  { %v3466_v60 = vadd.f32 %v3465_v11, %v3408_v6  ;;  %v3409_v40 = vmul.f32 %v3377_v49, %v3343_v43 }
 0x4b3   :  { %v3467_v47 = vrot.slane %v3466_v60, 4  ;;  %v3475_v5 = vadd.f32 %v3474_v33, %v3409_v40  ;;  %3753 = vmatpush1.xpose.msra.mxu1 %v3496_v28 }
 0x4b4   :  { %3754 = vmatprep.subr.mxu1 %v3489_v24 }
 0x4b5   :  { %v3468_v63 = vadd.f32 %v3467_v47, %v3466_v60  ;;  %v3476_v32 = vrot.slane %v3475_v5, 4 }
 0x4b7   :  { %v3469_v9 = vrot.slane %v3468_v63, 2  ;;  %v3477_v3 = vadd.f32 %v3476_v32, %v3475_v5  ;;  %3755 = vmatpush1.xpose.msra.mxu1 %v3488_v1 }
 0x4b9   :  { %v3470_v34 = vadd.f32 %v3469_v9, %v3468_v63  ;;  %v3478_v37 = vrot.slane %v3477_v3, 2 }
 0x4bb   :  { %v3479_v23 = vadd.f32 %v3478_v37, %v3477_v3  ;;  %v3471_v12 = vrot.slane %v3470_v34, 1 }
 0x4bd   :  { %v3480_v21 = vrot.slane %v3479_v23, 1  ;;  %v3472_v38 = vadd.f32 %v3471_v12, %v3470_v34 }
 0x4bf   :  { %v3481_v56 = vadd.f32 %v3480_v21, %v3479_v23 }
 0x4c1   :  { %3788 = vmatprep.mubr.f32.mxu1 %v3481_v56 }
 0x4c2   :  { %3789 = vmatmul.mubr.f32.vlgmr.msra.gmra.mxu1 %v3472_v38 }
 0x552   :  { %v3580_v16 = vpop.f32.mrf.mxu0 }
 0x554   :  { %v3582_v7 = vpop.f32.mrf.mxu0 }
 0x562   :  { %v3720_v4 = vpop.f32.mrf.mxu0 }
 0x564   :  { %v3722_v45 = vpop.f32.mrf.mxu0 }
 0x56a   :  { %v3650_v18 = vpop.f32.mrf.mxu1 }
 0x56b   :  { %v3651_v25 = vadd.f32 %v3650_v18, %v3580_v16 }
 0x56c   :  { %v3652_v48 = vpop.f32.mrf.mxu1 }
 0x56d   :  { %v3721_v39 = vadd.f32 %v3720_v4, %v3651_v25 }
 0x582   :  { %v3790_v55 = vpop.f32.mrf.mxu1 }
 0x583   :  { %v3791_v59 = vadd.f32 %v3790_v55, %v3721_v39 }
 0x584   :  { %v3792_v8 = vpop.f32.mrf.mxu1 }
 0x585   :  { %v3794_v0 = vmul.f32 0.001953125, %v3791_v59 }
 0x587   :  { %v3796_v57 = vadd.f32 %v3795_v61, %v3794_v0 }
 0x589   :  { %v3797_v62 = vsub.f32 0.0, %v3796_v57 }
 0x58b   :  { %v3798_v41 = vmul.f32 1.442695, %v3797_v62 }
 0x58d   :  { %10635 = vpow2.f32 %v3798_v41 }
 0x59a   :  { %v10636_v22 = vpop.eup %10635 }
 0x59b   :  { %v3800_v30 = vadd.f32 1.0, %v10636_v22 }
 0x59d   :  { %10637 = vrcp.f32 %v3800_v30 }
 0x5aa   :  { %v10638_v35 = vpop.eup %10637 }
 0x5ab   :  { %v3802_v19 = vmul.f32 %v10638_v35, %v3796_v57 }
 0x5ad   :  { %10181 = vmatmul.mubr.msk.f32.vlgmr.msra.gmra.mxu0 %vm1787_vm1, %v3802_v19 }
 0x66d   :  { %v3876_v42 = vpop.f32.mrf.mxu0 }
 0x66e   :  { %v14497_v54 = vadd.f32 %v3876_v42, %v17249_v2 }
 0x66f   :  { %v10182_v58 = vpop.f32.mrf.mxu0 }
 0x670   :  { %11185 = dma.done.wait [#allocation17 + $0x3], 6144 }
 0x671   :  { %11186 = vsyncadd [#allocation17 + $0x3], 4294961152 }
 0x672   :  { %11187 = dma.done.wait [#allocation17 + $0x4], 1024 }
 0x673   :  { %11188 = vsyncadd [#allocation17 + $0x4], 4294966272  ;;  %v17250_v27 = vld [vmem:[#allocation216_spill] sm:$0xff]  ;;  %v17252_v53 = vld [vmem:[#allocation218_spill] sm:$0xff] }
 0x674   :  { %v3978_v14 = vsub.f32 0.0, %v17250_v27  ;;  %v17251_v46 = vld [vmem:[#allocation220_spill] sm:$0xff]  ;;  %v3980_v20 = vsub.f32 0.0, %v17252_v53  ;;  %v17253_v51 = vld [vmem:[#allocation222_spill] sm:$0xff] }
 0x675   :  { %v3982_v29 = vsub.f32 0.0, %v17251_v46  ;;  %v3984_v50 = vsub.f32 0.0, %v17253_v51 }
 0x676   :  { %11189 = dma.done.wait [#allocation17 + $0x5], 6144 }
 0x677   :  { %11190 = vsyncadd [#allocation17 + $0x5], 4294961152  ;;  %v17254_v31 = vld [vmem:[#allocation215_spill] sm:$0xff]  ;;  %v17256_v11 = vld [vmem:[#allocation217_spill] sm:$0xff]  ;;  %v4067_v43 = vmul.f32 1.442695, %v3978_v14 }
 0x678   :  { %v3977_v36 = vsub.f32 0.0, %v17254_v31  ;;  %v17255_v49 = vld [vmem:[#allocation219_spill] sm:$0xff]  ;;  %v3979_v6 = vsub.f32 0.0, %v17256_v11  ;;  %v4075_v28 = vmul.f32 1.442695, %v3982_v29  ;;  %v17257_v60 = vld [vmem:[#allocation225_spill] sm:$0xff] }
 0x679   :  { %v3981_v13 = vsub.f32 0.0, %v17255_v49  ;;  %v4071_v33 = vmul.f32 1.442695, %v3980_v20  ;;  %v17258_v40 = vld [vmem:[#allocation223_spill] sm:$0xff]  ;;  %v4079_v47 = vmul.f32 1.442695, %v3984_v50  ;;  %10639 = vpow2.f32 %v4067_v43 }
 0x67a   :  { %v9839_v24 = vcombine.high %v17258_v40, %v17257_v60  ;;  %v17259_v5 = vld [vmem:[#allocation221_spill] sm:$0xff]  ;;  %v17260_v63 = vld [vmem:[#allocation226_spill] sm:$0xff]  ;;  %v17261_v32 = vld [vmem:[#allocation224_spill] sm:$0xff]  ;;  %v4065_v3 = vmul.f32 1.442695, %v3977_v36  ;;  %10641 = vpow2.f32 %v4075_v28 }
 0x67b   :  { %v3983_v1 = vsub.f32 0.0, %v17259_v5  ;;  %v9841_v9 = vcombine.high %v17261_v32, %v17260_v63  ;;  %v17262_v34 = vld [vmem:[#allocation208_spill] sm:$0xff]  ;;  %v4073_v23 = vmul.f32 1.442695, %v3981_v13  ;;  %10643 = vpow2.f32 %v4071_v33  ;;  %v17264_v38 = vld [vmem:[#allocation210_spill] sm:$0xff]  ;;  %v17266_v7 = vld [vmem:[#allocation207_spill] sm:$0xff] }
 0x67c   :  { %v3970_v37 = vsub.f32 0.0, %v17262_v34  ;;  %4329 = vmatprep.mubr.bf16.mxu1 %v9839_v24  ;;  %v17263_v12 = vld [vmem:[#allocation212_spill] sm:$0xff]  ;;  %v4069_v56 = vmul.f32 1.442695, %v3979_v6  ;;  %v3972_v52 = vsub.f32 0.0, %v17264_v38  ;;  %10645 = vpow2.f32 %v4079_v47  ;;  %v17265_v26 = vld [vmem:[#allocation214_spill] sm:$0xff] }
 0x67d   :  { %v3974_v21 = vsub.f32 0.0, %v17263_v12  ;;  %4378 = vmatprep.mubr.bf16.mxu0 %v9841_v9  ;;  %v4077_v15 = vmul.f32 1.442695, %v3983_v1  ;;  %v3976_v10 = vsub.f32 0.0, %v17265_v26  ;;  %10647 = vpow2.f32 %v4065_v3  ;;  %v17267_v18 = vld [vmem:[#allocation211_spill] sm:$0xff]  ;;  %v17268_v39 = vld [vmem:[#allocation209_spill] sm:$0xff] }
 0x67e   :  { %v4051_v16 = vmul.f32 1.442695, %v3970_v37  ;;  %v3969_v4 = vsub.f32 0.0, %v17266_v7  ;;  %10649 = vpow2.f32 %v4073_v23  ;;  %v3973_v48 = vsub.f32 0.0, %v17267_v18  ;;  %v17269_v61 = vld [vmem:[#allocation213_spill] sm:$0xff]  ;;  %v17270_v1 = vld [vmem:[#allocation200_spill] sm:$0xff] }
 0x67f   :  { %v4059_v45 = vmul.f32 1.442695, %v3974_v21  ;;  %10651 = vpow2.f32 %v4069_v56  ;;  %v4055_v25 = vmul.f32 1.442695, %v3972_v52  ;;  %v3971_v55 = vsub.f32 0.0, %v17268_v39  ;;  %v17271_v23 = vld [vmem:[#allocation204_spill] sm:$0xff] }
 0x680   :  { %10653 = vpow2.f32 %v4077_v15  ;;  %v4063_v59 = vmul.f32 1.442695, %v3976_v10  ;;  %v3975_v8 = vsub.f32 0.0, %v17269_v61  ;;  %v4049_v0 = vmul.f32 1.442695, %v3969_v4 }
 0x681   :  { %10655 = vpow2.f32 %v4051_v16  ;;  %v4057_v57 = vmul.f32 1.442695, %v3973_v48  ;;  %v4053_v62 = vmul.f32 1.442695, %v3971_v55  ;;  %v3962_v9 = vsub.f32 0.0, %v17270_v1  ;;  %v17272_v16 = vld [vmem:[#allocation202_spill] sm:$0xff] }
 0x682   :  { %10657 = vpow2.f32 %v4059_v45  ;;  %v4061_v41 = vmul.f32 1.442695, %v3975_v8  ;;  %v3966_v21 = vsub.f32 0.0, %v17271_v23  ;;  %v3964_v4 = vsub.f32 0.0, %v17272_v16  ;;  %v17273_v45 = vld [vmem:[#allocation206_spill] sm:$0xff]  ;;  %v17274_v8 = vld [vmem:[#allocation199_spill] sm:$0xff] }
 0x683   :  { %10659 = vpow2.f32 %v4055_v25  ;;  %v3968_v48 = vsub.f32 0.0, %v17273_v45 }
 0x684   :  { %10661 = vpow2.f32 %v4063_v59  ;;  %v4035_v59 = vmul.f32 1.442695, %v3962_v9 }
 0x685   :  { %10663 = vpow2.f32 %v4049_v0  ;;  %v3961_v0 = vsub.f32 0.0, %v17274_v8 }
 0x686   :  { %v10640_v22 = vpop.eup %10639  ;;  %10665 = vpow2.f32 %v4057_v57 }
 0x687   :  { %v10642_v30 = vpop.eup %10641  ;;  %v4122_v35 = vadd.f32 1.0, %v10640_v22  ;;  %10667 = vpow2.f32 %v4053_v62  ;;  %v17275_v22 = vld [vmem:[#allocation203_spill] sm:$0xff] }
 0x688   :  { %v10644_v19 = vpop.eup %10643  ;;  %v4126_v42 = vadd.f32 1.0, %v10642_v30  ;;  %10669 = vpow2.f32 %v4061_v41  ;;  %v4043_v41 = vmul.f32 1.442695, %v3966_v21  ;;  %v3965_v30 = vsub.f32 0.0, %v17275_v22 }
 0x689   :  { %v10646_v2 = vpop.eup %10645  ;;  %10671 = vrcp.f32 %v4122_v35  ;;  %v4124_v58 = vadd.f32 1.0, %v10644_v19 }
 0x68a   :  { %v10648_v14 = vpop.eup %10647  ;;  %10673 = vrcp.f32 %v4126_v42  ;;  %v4128_v29 = vadd.f32 1.0, %v10646_v2  ;;  %v17276_v42 = vld [vmem:[#allocation201_spill] sm:$0xff]  ;;  %v4041_v9 = vmul.f32 1.442695, %v3965_v30 }
 0x68b   :  { %v10650_v20 = vpop.eup %10649  ;;  %10675 = vrcp.f32 %v4124_v58  ;;  %v4121_v50 = vadd.f32 1.0, %v10648_v14  ;;  %v3963_v2 = vsub.f32 0.0, %v17276_v42  ;;  %v17277_v58 = vld [vmem:[#allocation205_spill] sm:$0xff] }
 0x68c   :  { %v10652_v36 = vpop.eup %10651  ;;  %10677 = vrcp.f32 %v4128_v29  ;;  %v4125_v13 = vadd.f32 1.0, %v10650_v20  ;;  %v3967_v14 = vsub.f32 0.0, %v17277_v58 }
 0x68d   :  { %v10654_v6 = vpop.eup %10653  ;;  %10679 = vrcp.f32 %v4121_v50  ;;  %v4123_v43 = vadd.f32 1.0, %v10652_v36  ;;  %v4039_v50 = vmul.f32 1.442695, %v3964_v4  ;;  %v4047_v36 = vmul.f32 1.442695, %v3968_v48  ;;  %v17280_v48 = vld [vmem:[#allocation194_spill] sm:$0xff] }
 0x68e   :  { %v10656_v28 = vpop.eup %10655  ;;  %10681 = vrcp.f32 %v4125_v13  ;;  %v4127_v33 = vadd.f32 1.0, %v10654_v6 }
 0x68f   :  { %v10658_v24 = vpop.eup %10657  ;;  %10683 = vrcp.f32 %v4123_v43  ;;  %v4114_v47 = vadd.f32 1.0, %v10656_v28  ;;  %v4033_v43 = vmul.f32 1.442695, %v3961_v0  ;;  %v17278_v28 = vld [vmem:[#allocation192_spill] sm:$0xff] }
 0x690   :  { %v10660_v3 = vpop.eup %10659  ;;  %10685 = vrcp.f32 %v4127_v33  ;;  %v4118_v37 = vadd.f32 1.0, %v10658_v24  ;;  %v3954_v33 = vsub.f32 0.0, %v17278_v28 }
 0x691   :  { %v10662_v56 = vpop.eup %10661  ;;  %10687 = vrcp.f32 %v4114_v47  ;;  %v4116_v52 = vadd.f32 1.0, %v10660_v3  ;;  %v17279_v3 = vld [vmem:[#allocation196_spill] sm:$0xff] }
 0x692   :  { %v10664_v15 = vpop.eup %10663  ;;  %10689 = vrcp.f32 %v4118_v37  ;;  %v4120_v10 = vadd.f32 1.0, %v10662_v56  ;;  %v3958_v37 = vsub.f32 0.0, %v17279_v3  ;;  %v4019_v0 = vmul.f32 1.442695, %v3954_v33  ;;  %v17284_v33 = vld [vmem:[#allocation193_spill] sm:$0xff] }
 0x693   :  { %v10666_v25 = vpop.eup %10665  ;;  %10691 = vrcp.f32 %v4116_v52  ;;  %v4113_v55 = vadd.f32 1.0, %v10664_v15  ;;  %v4037_v52 = vmul.f32 1.442695, %v3963_v2  ;;  %v4045_v15 = vmul.f32 1.442695, %v3967_v14  ;;  %v17283_v14 = vld [vmem:[#allocation195_spill] sm:$0xff] }
 0x694   :  { %v10668_v57 = vpop.eup %10667  ;;  %10693 = vrcp.f32 %v4120_v10  ;;  %v4117_v62 = vadd.f32 1.0, %v10666_v25  ;;  %v3956_v25 = vsub.f32 0.0, %v17280_v48 }
 0x695   :  { %v10670_v35 = vpop.eup %10669  ;;  %10695 = vrcp.f32 %v4113_v55  ;;  %v4115_v19 = vadd.f32 1.0, %v10668_v57  ;;  %v17281_v57 = vld [vmem:[#allocation198_spill] sm:$0xff] }
 0x696   :  { %v10672_v29 = vpop.eup %10671  ;;  %10697 = vrcp.f32 %v4117_v62  ;;  %v4119_v20 = vadd.f32 1.0, %v10670_v35  ;;  %v3960_v62 = vsub.f32 0.0, %v17281_v57  ;;  %v4027_v35 = vmul.f32 1.442695, %v3958_v37  ;;  %v17285_v37 = vld [vmem:[#allocation197_spill] sm:$0xff] }
 0x697   :  { %v10674_v13 = vpop.eup %10673  ;;  %v4212_v6 = vmul.f32 %v10672_v29, %v17250_v27  ;;  %10699 = vrcp.f32 %v4115_v19  ;;  %v3957_v29 = vsub.f32 0.0, %v17283_v14 }
 0x698   :  { %v10676_v24 = vpop.eup %10675  ;;  %v4220_v47 = vmul.f32 %v10674_v13, %v17251_v46  ;;  %10701 = vrcp.f32 %v4119_v20  ;;  %v4023_v13 = vmul.f32 1.442695, %v3956_v25 }
 0x699   :  { %v10678_v21 = vpop.eup %10677  ;;  %v4216_v56 = vmul.f32 %v10676_v24, %v17252_v53  ;;  %10703 = vpow2.f32 %v4035_v59  ;;  %v3955_v24 = vsub.f32 0.0, %v17284_v33 }
 0x69a   :  { %v10680_v10 = vpop.eup %10679  ;;  %v4254_v4 = vpack.c.bf16 %v4220_v47, %v4212_v6  ;;  %v4224_v27 = vmul.f32 %v10678_v21, %v17253_v51  ;;  %10705 = vpow2.f32 %v4043_v41  ;;  %v17282_v41 = vld [vmem:[#allocation191_spill] sm:$0xff]  ;;  %v3959_v21 = vsub.f32 0.0, %v17285_v37 }
 0x69b   :  { %v10682_v55 = vpop.eup %10681  ;;  %v4210_v46 = vmul.f32 %v10680_v10, %v17254_v31  ;;  %10707 = vpow2.f32 %v4039_v50  ;;  %v3953_v2 = vsub.f32 0.0, %v17282_v41 }
 0x69c   :  { %v10684_v30 = vpop.eup %10683  ;;  %4301 = vmatprep.subr.bf16.mxu1 %v4254_v4  ;;  %v4256_v53 = vpack.c.bf16 %v4224_v27, %v4216_v56  ;;  %v4218_v59 = vmul.f32 %v10682_v55, %v17255_v49  ;;  %10709 = vpow2.f32 %v4047_v36  ;;  %v4031_v36 = vmul.f32 1.442695, %v3960_v62 }
 0x69d   :  { %v10686_v19 = vpop.eup %10685  ;;  %v4214_v51 = vmul.f32 %v10684_v30, %v17256_v11  ;;  %10711 = vpow2.f32 %v4033_v43  ;;  %v4025_v4 = vmul.f32 1.442695, %v3957_v29 }
 0x69e   :  { %v10688_v31 = vpop.eup %10687  ;;  %4350 = vmatprep.subr.bf16.mxu0 %v4256_v53  ;;  %v4253_v20 = vpack.c.bf16 %v4218_v59, %v4210_v46  ;;  %v4222_v50 = vmul.f32 %v10686_v19, %v17259_v5  ;;  %10713 = vpow2.f32 %v4041_v9  ;;  %v4017_v9 = vmul.f32 1.442695, %v3953_v2 }
 0x69f   :  { %v10690_v6 = vpop.eup %10689  ;;  %v4196_v49 = vmul.f32 %v10688_v31, %v17262_v34  ;;  %10715 = vpow2.f32 %v4037_v52 }
 0x6a0   :  { %v10692_v11 = vpop.eup %10691  ;;  %4302 = vmatpush1.bf16.xpose.msra.mxu1 %v4253_v20  ;;  %v4255_v43 = vpack.c.bf16 %v4222_v50, %v4214_v51  ;;  %v4204_v47 = vmul.f32 %v10690_v6, %v17263_v12  ;;  %10717 = vpow2.f32 %v4045_v15  ;;  %v4021_v12 = vmul.f32 1.442695, %v3955_v24 }
 0x6a1   :  { %v10694_v56 = vpop.eup %10693  ;;  %v4200_v5 = vmul.f32 %v10692_v11, %v17264_v38  ;;  %10719 = vpow2.f32 %v4019_v0  ;;  %v4029_v38 = vmul.f32 1.442695, %v3959_v21 }
 0x6a2   :  { %v10696_v10 = vpop.eup %10695  ;;  %4351 = vmatpush1.bf16.xpose.msra.mxu0 %v4255_v43  ;;  %v4250_v34 = vpack.c.bf16 %v4204_v47, %v4196_v49  ;;  %v4208_v52 = vmul.f32 %v10694_v56, %v17265_v26  ;;  %10721 = vpow2.f32 %v4027_v35  ;;  %v17286_v43 = vld [vmem:[#allocation184_spill] sm:$0xff] }
 0x6a3   :  { %v10698_v27 = vpop.eup %10697  ;;  %v4194_v25 = vmul.f32 %v10696_v10, %v17266_v7  ;;  %10723 = vpow2.f32 %v4023_v13  ;;  %v3946_v47 = vsub.f32 0.0, %v17286_v43 }
 0x6a4   :  { %v10700_v15 = vpop.eup %10699  ;;  %4303 = vmatprep.subr.bf16.mxu1 %v4250_v34  ;;  %v4252_v55 = vpack.c.bf16 %v4208_v52, %v4200_v5  ;;  %v4202_v46 = vmul.f32 %v10698_v27, %v17267_v18  ;;  %10725 = vpow2.f32 %v4031_v36  ;;  %v17287_v5 = vld [vmem:[#allocation188_spill] sm:$0xff]  ;;  %v17288_v52 = vld [vmem:[#allocation186_spill] sm:$0xff] }
 0x6a5   :  { %v10702_v0 = vpop.eup %10701  ;;  %v4198_v62 = vmul.f32 %v10700_v15, %v17268_v39  ;;  %10727 = vpow2.f32 %v4017_v9  ;;  %v3950_v9 = vsub.f32 0.0, %v17287_v5 }
 0x6a6   :  { %v10704_v30 = vpop.eup %10703  ;;  %4352 = vmatprep.subr.bf16.mxu0 %v4252_v55  ;;  %v4249_v26 = vpack.c.bf16 %v4202_v46, %v4194_v25  ;;  %v4206_v53 = vmul.f32 %v10702_v0, %v17269_v61  ;;  %10729 = vpow2.f32 %v4025_v4  ;;  %v3948_v4 = vsub.f32 0.0, %v17288_v52  ;;  %v17290_v0 = vld [vmem:[#allocation183_spill] sm:$0xff] }
 0x6a7   :  { %v10706_v7 = vpop.eup %10705  ;;  %v4106_v59 = vadd.f32 1.0, %v10704_v30  ;;  %10731 = vpow2.f32 %v4021_v12  ;;  %v17289_v12 = vld [vmem:[#allocation190_spill] sm:$0xff] }
 0x6a8   :  { %v10708_v35 = vpop.eup %10707  ;;  %4304 = vmatpush1.bf16.xpose.msra.mxu1 %v4249_v26  ;;  %v4251_v19 = vpack.c.bf16 %v4206_v53, %v4198_v62  ;;  %v4110_v51 = vadd.f32 1.0, %v10706_v7  ;;  %10733 = vpow2.f32 %v4029_v38  ;;  %v3952_v15 = vsub.f32 0.0, %v17289_v12  ;;  %v17291_v7 = vld [vmem:[#allocation187_spill] sm:$0xff] }
 0x6a9   :  { %v10710_v18 = vpop.eup %10709  ;;  %10735 = vrcp.f32 %v4106_v59  ;;  %v4108_v2 = vadd.f32 1.0, %v10708_v35  ;;  %v4003_v38 = vmul.f32 1.442695, %v3946_v47  ;;  %v3945_v62 = vsub.f32 0.0, %v17290_v0 }
 0x6aa   :  { %v10712_v29 = vpop.eup %10711  ;;  %4353 = vmatpush1.bf16.xpose.msra.mxu0 %v4251_v19  ;;  %10737 = vrcp.f32 %v4110_v51  ;;  %v4112_v39 = vadd.f32 1.0, %v10710_v18  ;;  %v4011_v53 = vmul.f32 1.442695, %v3950_v9  ;;  %v3949_v59 = vsub.f32 0.0, %v17291_v7  ;;  %v17292_v18 = vld [vmem:[#allocation185_spill] sm:$0xff] }
 0x6ab   :  { %v10714_v31 = vpop.eup %10713  ;;  %10739 = vrcp.f32 %v4108_v2  ;;  %v4105_v20 = vadd.f32 1.0, %v10712_v29  ;;  %v4007_v51 = vmul.f32 1.442695, %v3948_v4  ;;  %v3947_v2 = vsub.f32 0.0, %v17292_v18  ;;  %v17296_v4 = vld [vmem:[#allocation178_spill] sm:$0xff] }
 0x6ac   :  { %v10716_v61 = vpop.eup %10715  ;;  %10741 = vrcp.f32 %v4112_v39  ;;  %v4109_v50 = vadd.f32 1.0, %v10714_v31  ;;  %v4015_v31 = vmul.f32 1.442695, %v3952_v15  ;;  %v4009_v47 = vmul.f32 1.442695, %v3949_v59 }
 0x6ad   :  { %v10718_v13 = vpop.eup %10717  ;;  %10743 = vrcp.f32 %v4105_v20  ;;  %v4107_v6 = vadd.f32 1.0, %v10716_v61  ;;  %v17293_v20 = vld [vmem:[#allocation189_spill] sm:$0xff] }
 0x6ae   :  { %v10720_v49 = vpop.eup %10719  ;;  %10745 = vrcp.f32 %v4109_v50  ;;  %v4111_v36 = vadd.f32 1.0, %v10718_v13  ;;  %v3951_v61 = vsub.f32 0.0, %v17293_v20 }
 0x6af   :  { %v10722_v24 = vpop.eup %10721  ;;  %10747 = vrcp.f32 %v4107_v6  ;;  %v4098_v11 = vadd.f32 1.0, %v10720_v49  ;;  %v4001_v6 = vmul.f32 1.442695, %v3945_v62  ;;  %v17294_v49 = vld [vmem:[#allocation176_spill] sm:$0xff] }
 0x6b0   :  { %v10724_v21 = vpop.eup %10723  ;;  %10749 = vrcp.f32 %v4111_v36  ;;  %v4102_v56 = vadd.f32 1.0, %v10722_v24  ;;  %v3938_v36 = vsub.f32 0.0, %v17294_v49 }
 0x6b1   :  { %v10726_v10 = vpop.eup %10725  ;;  %10751 = vrcp.f32 %v4098_v11  ;;  %v4100_v34 = vadd.f32 1.0, %v10724_v21  ;;  %v17295_v21 = vld [vmem:[#allocation180_spill] sm:$0xff] }
 0x6b2   :  { %v10728_v27 = vpop.eup %10727  ;;  %10753 = vrcp.f32 %v4102_v56  ;;  %v4104_v25 = vadd.f32 1.0, %v10726_v10  ;;  %v3942_v56 = vsub.f32 0.0, %v17295_v21  ;;  %v3987_v62 = vmul.f32 1.442695, %v3938_v36  ;;  %v17300_v36 = vld [vmem:[#allocation177_spill] sm:$0xff] }
 0x6b3   :  { %v10730_v55 = vpop.eup %10729  ;;  %10755 = vrcp.f32 %v4100_v34  ;;  %v4097_v46 = vadd.f32 1.0, %v10728_v27  ;;  %v4005_v34 = vmul.f32 1.442695, %v3947_v2  ;;  %v3940_v27 = vsub.f32 0.0, %v17296_v4 }
 0x6b4   :  { %v10732_v30 = vpop.eup %10731  ;;  %10757 = vrcp.f32 %v4104_v25  ;;  %v4101_v26 = vadd.f32 1.0, %v10730_v55  ;;  %v4013_v55 = vmul.f32 1.442695, %v3951_v61  ;;  %v17299_v61 = vld [vmem:[#allocation179_spill] sm:$0xff] }
 0x6b5   :  { %v10734_v35 = vpop.eup %10733  ;;  %10759 = vrcp.f32 %v4097_v46  ;;  %v4099_v19 = vadd.f32 1.0, %v10732_v30  ;;  %v17297_v30 = vld [vmem:[#allocation182_spill] sm:$0xff] }
 0x6b6   :  { %v10736_v29 = vpop.eup %10735  ;;  %10761 = vrcp.f32 %v4101_v26  ;;  %v4103_v39 = vadd.f32 1.0, %v10734_v35  ;;  %v3944_v26 = vsub.f32 0.0, %v17297_v30  ;;  %v3995_v35 = vmul.f32 1.442695, %v3942_v56  ;;  %v17301_v56 = vld [vmem:[#allocation181_spill] sm:$0xff] }
 0x6b7   :  { %v10738_v50 = vpop.eup %10737  ;;  %v4180_v13 = vmul.f32 %v10736_v29, %v17270_v1  ;;  %10763 = vrcp.f32 %v4099_v19 }
 0x6b8   :  { %v10740_v24 = vpop.eup %10739  ;;  %v4188_v11 = vmul.f32 %v10738_v50, %v17271_v23  ;;  %10765 = vrcp.f32 %v4103_v39  ;;  %v3941_v50 = vsub.f32 0.0, %v17299_v61 }
 0x6b9   :  { %v10742_v9 = vpop.eup %10741  ;;  %v4184_v10 = vmul.f32 %v10740_v24, %v17272_v16  ;;  %10767 = vpow2.f32 %v4003_v38  ;;  %v3939_v24 = vsub.f32 0.0, %v17300_v36 }
 0x6ba   :  { %v10744_v25 = vpop.eup %10743  ;;  %v4246_v1 = vpack.c.bf16 %v4188_v11, %v4180_v13  ;;  %v4192_v15 = vmul.f32 %v10742_v9, %v17273_v45  ;;  %10769 = vpow2.f32 %v4011_v53  ;;  %v3991_v45 = vmul.f32 1.442695, %v3940_v27  ;;  %v17298_v53 = vld [vmem:[#allocation175_spill] sm:$0xff] }
 0x6bb   :  { %v10746_v46 = vpop.eup %10745  ;;  %v4178_v23 = vmul.f32 %v10744_v25, %v17274_v8  ;;  %10771 = vpow2.f32 %v4007_v51  ;;  %v3937_v29 = vsub.f32 0.0, %v17298_v53  ;;  %v3943_v9 = vsub.f32 0.0, %v17301_v56 }
 0x6bc   :  { %v10748_v59 = vpop.eup %10747  ;;  %4305 = vmatprep.subr.bf16.mxu1 %v4246_v1  ;;  %v4248_v16 = vpack.c.bf16 %v4192_v15, %v4184_v10  ;;  %v4186_v38 = vmul.f32 %v10746_v46, %v17275_v22  ;;  %10773 = vpow2.f32 %v4015_v31  ;;  %v3999_v31 = vmul.f32 1.442695, %v3944_v26 }
 0x6bd   :  { %v10750_v19 = vpop.eup %10749  ;;  %v4182_v2 = vmul.f32 %v10748_v59, %v17276_v42  ;;  %10775 = vpow2.f32 %v4001_v6  ;;  %v3993_v25 = vmul.f32 1.442695, %v3941_v50 }
 0x6be   :  { %v10752_v39 = vpop.eup %10751  ;;  %4354 = vmatprep.subr.bf16.mxu0 %v4248_v16  ;;  %v4245_v8 = vpack.c.bf16 %v4186_v38, %v4178_v23  ;;  %v4190_v51 = vmul.f32 %v10750_v19, %v17277_v58  ;;  %10777 = vpow2.f32 %v4009_v47  ;;  %v3985_v47 = vmul.f32 1.442695, %v3937_v29 }
 0x6bf   :  { %v10754_v13 = vpop.eup %10753  ;;  %v4164_v22 = vmul.f32 %v10752_v39, %v17278_v28  ;;  %10779 = vpow2.f32 %v4005_v34 }
 0x6c0   :  { %v10756_v42 = vpop.eup %10755  ;;  %4306 = vmatpush1.bf16.xpose.msra.mxu1 %v4245_v8  ;;  %v4247_v6 = vpack.c.bf16 %v4190_v51, %v4182_v2  ;;  %v4172_v11 = vmul.f32 %v10754_v13, %v17279_v3  ;;  %10781 = vpow2.f32 %v4013_v55  ;;  %v3989_v3 = vmul.f32 1.442695, %v3939_v24 }
 0x6c1   :  { %v10758_v10 = vpop.eup %10757  ;;  %v4168_v58 = vmul.f32 %v10756_v42, %v17280_v48  ;;  %10783 = vpow2.f32 %v3987_v62  ;;  %v3997_v48 = vmul.f32 1.442695, %v3943_v9 }
 0x6c2   :  { %v10760_v27 = vpop.eup %10759  ;;  %4355 = vmatpush1.bf16.xpose.msra.mxu0 %v4247_v6  ;;  %v4242_v28 = vpack.c.bf16 %v4172_v11, %v4164_v22  ;;  %v4176_v34 = vmul.f32 %v10758_v10, %v17281_v57  ;;  %10785 = vpow2.f32 %v3995_v35 }
 0x6c3   :  { %v10762_v1 = vpop.eup %10761  ;;  %v4162_v15 = vmul.f32 %v10760_v27, %v17282_v41  ;;  %10787 = vpow2.f32 %v3991_v45 }
 0x6c4   :  { %v10764_v55 = vpop.eup %10763  ;;  %4307 = vmatprep.subr.bf16.mxu1 %v4242_v28  ;;  %v4244_v46 = vpack.c.bf16 %v4176_v34, %v4168_v58  ;;  %v4170_v23 = vmul.f32 %v10762_v1, %v17283_v14  ;;  %10789 = vpow2.f32 %v3999_v31 }
 0x6c5   :  { %v10766_v62 = vpop.eup %10765  ;;  %v4166_v26 = vmul.f32 %v10764_v55, %v17284_v33  ;;  %10791 = vpow2.f32 %v3985_v47 }
 0x6c6   :  { %v10768_v59 = vpop.eup %10767  ;;  %4356 = vmatprep.subr.bf16.mxu0 %v4244_v46  ;;  %v4241_v57 = vpack.c.bf16 %v4170_v23, %v4162_v15  ;;  %v4174_v16 = vmul.f32 %v10766_v62, %v17285_v37  ;;  %10793 = vpow2.f32 %v3993_v25 }
 0x6c7   :  { %v10770_v41 = vpop.eup %10769  ;;  %v4090_v38 = vadd.f32 1.0, %v10768_v59  ;;  %10795 = vpow2.f32 %v3989_v3 }
 0x6c8   :  { %v10772_v35 = vpop.eup %10771  ;;  %4308 = vmatpush1.bf16.xpose.msra.mxu1 %v4241_v57  ;;  %v4243_v19 = vpack.c.bf16 %v4174_v16, %v4166_v26  ;;  %v4094_v2 = vadd.f32 1.0, %v10770_v41  ;;  %10797 = vpow2.f32 %v3997_v48 }
 0x6c9   :  { %v10774_v14 = vpop.eup %10773  ;;  %10799 = vrcp.f32 %v4090_v38  ;;  %v4092_v45 = vadd.f32 1.0, %v10772_v35 }
 0x6ca   :  { %v10776_v29 = vpop.eup %10775  ;;  %4357 = vmatpush1.bf16.xpose.msra.mxu0 %v4243_v19  ;;  %10801 = vrcp.f32 %v4094_v2  ;;  %v4096_v33 = vadd.f32 1.0, %v10774_v14 }
 0x6cb   :  { %v10778_v39 = vpop.eup %10777  ;;  %10803 = vrcp.f32 %v4092_v45  ;;  %v4089_v8 = vadd.f32 1.0, %v10776_v29 }
 0x6cc   :  { %v10780_v37 = vpop.eup %10779  ;;  %10805 = vrcp.f32 %v4096_v33  ;;  %v4093_v51 = vadd.f32 1.0, %v10778_v39 }
 0x6cd   :  { %v10782_v50 = vpop.eup %10781  ;;  %10807 = vrcp.f32 %v4089_v8  ;;  %v4091_v13 = vadd.f32 1.0, %v10780_v37 }
 0x6ce   :  { %v10784_v22 = vpop.eup %10783  ;;  %10809 = vrcp.f32 %v4093_v51  ;;  %v4095_v31 = vadd.f32 1.0, %v10782_v50 }
 0x6cf   :  { %v10786_v24 = vpop.eup %10785  ;;  %10811 = vrcp.f32 %v4091_v13  ;;  %v4082_v42 = vadd.f32 1.0, %v10784_v22 }
 0x6d0   :  { %v10788_v6 = vpop.eup %10787  ;;  %10813 = vrcp.f32 %v4095_v31  ;;  %v4086_v11 = vadd.f32 1.0, %v10786_v24 }
 0x6d1   :  { %v10790_v9 = vpop.eup %10789  ;;  %10815 = vrcp.f32 %v4082_v42  ;;  %v4084_v10 = vadd.f32 1.0, %v10788_v6  ;;  %v17303_v6 = vld [vmem:[#allocation271_spill] sm:$0xff] }
 0x6d2   :  { %v10792_v58 = vpop.eup %10791  ;;  %10817 = vrcp.f32 %v4086_v11  ;;  %v4088_v47 = vadd.f32 1.0, %v10790_v9 }
 0x6d3   :  { %v10794_v27 = vpop.eup %10793  ;;  %10819 = vrcp.f32 %v4084_v10  ;;  %v4081_v28 = vadd.f32 1.0, %v10792_v58  ;;  %v17304_v10 = vld [vmem:[#allocation276_spill] sm:$0xff] }
 0x6d4   :  { %v10796_v34 = vpop.eup %10795  ;;  %10821 = vrcp.f32 %v4088_v47  ;;  %v4085_v25 = vadd.f32 1.0, %v10794_v27  ;;  %v17306_v47 = vld [vmem:[#allocation229_spill] sm:$0xff] }
 0x6d5   :  { %v10798_v1 = vpop.eup %10797  ;;  %10823 = vrcp.f32 %v4081_v28  ;;  %v4083_v15 = vadd.f32 1.0, %v10796_v34  ;;  %v17308_v34 = vld [vmem:[#allocation267_spill] sm:$0xff] }
 0x6d6   :  { %v10800_v3 = vpop.eup %10799  ;;  %10825 = vrcp.f32 %v4085_v25  ;;  %v4087_v55 = vadd.f32 1.0, %v10798_v1  ;;  %v17309_v25 = vld [vmem:[#allocation263_spill] sm:$0xff] }
 0x6d7   :  { %v10802_v46 = vpop.eup %10801  ;;  %v4148_v23 = vmul.f32 %v10800_v3, %v17286_v43  ;;  %10827 = vrcp.f32 %v4083_v15  ;;  %v9879_v1 = vcombine.high %v17309_v25, %v17308_v34  ;;  %v17310_v15 = vld [vmem:[#allocation230_spill] sm:$0xff]  ;;  %v17311_v3 = vld [vmem:[#allocation228_spill] sm:$0xff] }
 0x6d8   :  { %v10804_v48 = vpop.eup %10803  ;;  %v4156_v62 = vmul.f32 %v10802_v46, %v17287_v5  ;;  %10829 = vrcp.f32 %v4087_v55  ;;  %v9845_v55 = vcombine.high %v17311_v3, %v17310_v15 }
 0x6d9   :  { %v10806_v26 = vpop.eup %10805  ;;  %v4152_v59 = vmul.f32 %v10804_v48, %v17288_v52  ;;  %v9878_v48 = vcombine.low %v17309_v25, %v17308_v34 }
 0x6da   :  { %v10808_v57 = vpop.eup %10807  ;;  %v4238_v16 = vpack.c.bf16 %v4156_v62, %v4148_v23  ;;  %v4160_v41 = vmul.f32 %v10806_v26, %v17289_v12 }
 0x6db   :  { %v10810_v38 = vpop.eup %10809  ;;  %v4146_v35 = vmul.f32 %v10808_v57, %v17290_v0  ;;  %v17316_v57 = vld [vmem:[#allocation260_spill] sm:$0xff] }
 0x6dc   :  { %v10812_v19 = vpop.eup %10811  ;;  %4309 = vmatprep.subr.bf16.mxu1 %v4238_v16  ;;  %v4240_v2 = vpack.c.bf16 %v4160_v41, %v4152_v59  ;;  %v4154_v43 = vmul.f32 %v10810_v38, %v17291_v7  ;;  %v17317_v16 = vld [vmem:[#allocation256_spill] sm:$0xff] }
 0x6dd   :  { %v10814_v14 = vpop.eup %10813  ;;  %v4150_v45 = vmul.f32 %v10812_v19, %v17292_v18  ;;  %v9873_v41 = vcombine.high %v17317_v16, %v17316_v57  ;;  %v17318_v19 = vld [vmem:[#allocation251_spill] sm:$0xff] }
 0x6de   :  { %v10816_v5 = vpop.eup %10815  ;;  %4358 = vmatprep.subr.bf16.mxu0 %v4240_v2  ;;  %v4237_v29 = vpack.c.bf16 %v4154_v43, %v4146_v35  ;;  %v4158_v52 = vmul.f32 %v10814_v14, %v17293_v20  ;;  %v9844_v35 = vcombine.low %v17311_v3, %v17310_v15  ;;  %v17319_v2 = vld [vmem:[#allocation247_spill] sm:$0xff]  ;;  %v9872_v14 = vcombine.low %v17317_v16, %v17316_v57 }
 0x6df   :  { %v10818_v33 = vpop.eup %10817  ;;  %v4132_v39 = vmul.f32 %v10816_v5, %v17294_v49  ;;  %v9863_v43 = vcombine.high %v17319_v2, %v17318_v19  ;;  %v17321_v5 = vld [vmem:[#allocation248_spill] sm:$0xff] }
 0x6e0   :  { %v10820_v12 = vpop.eup %10819  ;;  %4310 = vmatpush1.bf16.xpose.msra.mxu1 %v4237_v29  ;;  %v4239_v8 = vpack.c.bf16 %v4158_v52, %v4150_v45  ;;  %v4140_v0 = vmul.f32 %v10818_v33, %v17295_v21  ;;  %v17302_v21 = vld [vmem:[#allocation275_spill] sm:$0xff]  ;;  %v17320_v45 = vld [vmem:[#allocation252_spill] sm:$0xff]  ;;  %v9862_v52 = vcombine.low %v17319_v2, %v17318_v19  ;;  %v17340_v19 = vld [vmem:[#allocation262_spill] sm:$0xff] }
 0x6e1   :  { %v10822_v37 = vpop.eup %10821  ;;  %v4136_v51 = vmul.f32 %v10820_v12, %v17296_v4  ;;  %v9887_v11 = vcombine.high %v17303_v6, %v17302_v21  ;;  %v9886_v28 = vcombine.low %v17303_v6, %v17302_v21  ;;  %v9865_v29 = vcombine.high %v17321_v5, %v17320_v45  ;;  %v17323_v12 = vld [vmem:[#allocation239_spill] sm:$0xff]  ;;  %v17330_v21 = vld [vmem:[#allocation277_spill] sm:$0xff]  ;;  %v17341_v2 = vld [vmem:[#allocation258_spill] sm:$0xff] }
 0x6e2   :  { %v10824_v7 = vpop.eup %10823  ;;  %4359 = vmatpush1.bf16.xpose.msra.mxu0 %v4239_v8  ;;  %v4234_v50 = vpack.c.bf16 %v4140_v0, %v4132_v39  ;;  %v4144_v18 = vmul.f32 %v10822_v37, %v17297_v30  ;;  %v17305_v30 = vld [vmem:[#allocation272_spill] sm:$0xff]  ;;  %v9864_v33 = vcombine.low %v17321_v5, %v17320_v45  ;;  %v17322_v39 = vld [vmem:[#allocation243_spill] sm:$0xff]  ;;  %v17331_v6 = vld [vmem:[#allocation273_spill] sm:$0xff] }
 0x6e3   :  { %v10826_v13 = vpop.eup %10825  ;;  %v4130_v22 = vmul.f32 %v10824_v7, %v17298_v53  ;;  %v9889_v58 = vcombine.high %v17305_v30, %v17304_v10  ;;  %v9888_v46 = vcombine.low %v17305_v30, %v17304_v10  ;;  %v9855_v8 = vcombine.high %v17323_v12, %v17322_v39  ;;  %v17324_v0 = vld [vmem:[#allocation244_spill] sm:$0xff] }
 0x6e4   :  { %v10828_v20 = vpop.eup %10827  ;;  %4311 = vmatprep.subr.bf16.mxu1 %v4234_v50  ;;  %v4236_v31 = vpack.c.bf16 %v4144_v18, %v4136_v51  ;;  %v4138_v49 = vmul.f32 %v10826_v13, %v17299_v61  ;;  %v9838_v61 = vcombine.low %v17258_v40, %v17257_v60  ;;  %v17312_v60 = vld [vmem:[#allocation268_spill] sm:$0xff]  ;;  %v9854_v7 = vcombine.low %v17323_v12, %v17322_v39  ;;  %v17326_v18 = vld [vmem:[#allocation235_spill] sm:$0xff]  ;;  %v17342_v12 = vld [vmem:[#allocation253_spill] sm:$0xff] }
 0x6e5   :  { %v10830_v24 = vpop.eup %10829  ;;  %v4134_v42 = vmul.f32 %v10828_v20, %v17300_v36  ;;  %v17307_v36 = vld [vmem:[#allocation227_spill] sm:$0xff]  ;;  %v17313_v40 = vld [vmem:[#allocation264_spill] sm:$0xff] }
 0x6e6   :  { %4360 = vmatprep.subr.bf16.mxu0 %v4236_v31  ;;  %v4233_v4 = vpack.c.bf16 %v4138_v49, %v4130_v22  ;;  %v4142_v9 = vmul.f32 %v10830_v24, %v17301_v56  ;;  %v9843_v27 = vcombine.high %v17307_v36, %v17306_v47  ;;  %v9840_v56 = vcombine.low %v17261_v32, %v17260_v63  ;;  %v17314_v63 = vld [vmem:[#allocation259_spill] sm:$0xff]  ;;  %v17325_v37 = vld [vmem:[#allocation240_spill] sm:$0xff] }
 0x6e7   :  { %v9881_v23 = vcombine.high %v17313_v40, %v17312_v60  ;;  %v17315_v32 = vld [vmem:[#allocation255_spill] sm:$0xff]  ;;  %v9880_v26 = vcombine.low %v17313_v40, %v17312_v60  ;;  %v9842_v59 = vcombine.low %v17307_v36, %v17306_v47  ;;  %v9857_v51 = vcombine.high %v17325_v37, %v17324_v0  ;;  %v17328_v20 = vld [vmem:[#allocation236_spill] sm:$0xff]  ;;  %v17336_v40 = vld [vmem:[#allocation270_spill] sm:$0xff] }
 0x6e8   :  { %4312 = vmatpush1.bf16.xpose.msra.mxu1 %v4233_v4  ;;  %v4235_v53 = vpack.c.bf16 %v4142_v9, %v4134_v42  ;;  %v9871_v62 = vcombine.high %v17315_v32, %v17314_v63  ;;  %v9870_v38 = vcombine.low %v17315_v32, %v17314_v63  ;;  %v9856_v50 = vcombine.low %v17325_v37, %v17324_v0  ;;  %v17327_v13 = vld [vmem:[#allocation231_spill] sm:$0xff]  ;;  %v17329_v31 = vld [vmem:[#allocation232_spill] sm:$0xff]  ;;  %v17332_v4 = vld [vmem:[#allocation278_spill] sm:$0xff] }
 0x6e9   :  { %4695 = vmatprep.subr.bf16.mxu1 %v9887_v11  ;;  %v9847_v22 = vcombine.high %v17327_v13, %v17326_v18  ;;  %v9849_v49 = vcombine.high %v17329_v31, %v17328_v20  ;;  %v9846_v24 = vcombine.low %v17327_v13, %v17326_v18  ;;  %v9848_v42 = vcombine.low %v17329_v31, %v17328_v20  ;;  %v17333_v9 = vld [vmem:[#allocation274_spill] sm:$0xff]  ;;  %v17346_v13 = vld [vmem:[#allocation245_spill] sm:$0xff] }
 0x6ea   :  { %4361 = vmatpush1.bf16.xpose.msra.mxu0 %v4235_v53  ;;  %v9891_v11 = vcombine.high %v17331_v6, %v17330_v21  ;;  %v9893_v10 = vcombine.high %v17333_v9, %v17332_v4  ;;  %v9892_v15 = vcombine.low %v17333_v9, %v17332_v4  ;;  %v17344_v37 = vld [vmem:[#allocation254_spill] sm:$0xff] }
 0x6eb   :  { %4748 = vmatprep.subr.bf16.mxu0 %v9889_v58  ;;  %v17348_v31 = vld [vmem:[#allocation246_spill] sm:$0xff] }
 0x6ec   :  { %v17352_v9 = vld [vmem:[#allocation238_spill] sm:$0xff] }
 0x6ef   :  { %4330 = vmatmul.mubr.bf16.vlgmr.msra.gmra.mxu1 %v9838_v61 }
 0x6f0   :  { %4337 = vmatprep.mubr.bf16.mxu1 %v9843_v27  ;;  %4696 = vmatpush1.bf16.msra.mxu1 %v9886_v28 }
 0x6f1   :  { %4379 = vmatmul.mubr.bf16.vlgmr.msra.gmra.mxu0 %v9840_v56  ;;  %4697 = vmatprep.subr.bf16.mxu1 %v9879_v1  ;;  %v9890_v1 = vcombine.low %v17331_v6, %v17330_v21  ;;  %v17350_v6 = vld [vmem:[#allocation237_spill] sm:$0xff] }
 0x6f2   :  { %4386 = vmatprep.mubr.bf16.mxu0 %v9845_v55  ;;  %4749 = vmatpush1.bf16.msra.mxu0 %v9888_v46  ;;  %v17334_v55 = vld [vmem:[#allocation269_spill] sm:$0xff] }
 0x6f3   :  { %4750 = vmatprep.subr.bf16.mxu0 %v9881_v23  ;;  %v17335_v46 = vld [vmem:[#allocation265_spill] sm:$0xff]  ;;  %v17337_v23 = vld [vmem:[#allocation266_spill] sm:$0xff] }
 0x6f4   :  { %4698 = vmatpush1.bf16.msra.mxu1 %v9878_v48  ;;  %v9883_v60 = vcombine.high %v17335_v46, %v17334_v55  ;;  %v9885_v48 = vcombine.high %v17337_v23, %v17336_v40  ;;  %v9884_v57 = vcombine.low %v17337_v23, %v17336_v40  ;;  %v5039_v40 = vld [vmem:[%s17244_s9] sm:$0xff]  ;;  %v5041_v23 = vld [vmem:[%s17244_s9 + $0x10] sm:$0xff] }
 0x6f5   :  { %4699 = vmatprep.subr.bf16.mxu1 %v9871_v62 }
 0x6f6   :  { %4751 = vmatpush1.bf16.msra.mxu0 %v9880_v26 }
 0x6f7   :  { %4338 = vmatmul.mubr.bf16.gmra.mxu1 %v9842_v59  ;;  %4752 = vmatprep.subr.bf16.mxu0 %v9873_v41  ;;  %v9882_v59 = vcombine.low %v17335_v46, %v17334_v55  ;;  %v17338_v41 = vld [vmem:[#allocation261_spill] sm:$0xff]  ;;  %v5049_v55 = vld [vmem:[%s17244_s9 + $0x50] sm:$0xff] }
 0x6f8   :  { %4700 = vmatpush1.bf16.msra.mxu1 %v9870_v38  ;;  %4723 = vmatprep.mubr.bf16.mxu1 %v11214_v44  ;;  %v17339_v38 = vld [vmem:[#allocation257_spill] sm:$0xff] }
 0x6f9   :  { %4387 = vmatmul.mubr.bf16.gmra.mxu0 %v9844_v35  ;;  %4701 = vmatprep.subr.bf16.mxu1 %v9863_v43  ;;  %v9875_v35 = vcombine.high %v17339_v38, %v17338_v41  ;;  %v9877_v43 = vcombine.high %v17341_v2, %v17340_v19  ;;  %v5040_v46 = vld [vmem:[%s17244_s9 + $0x8] sm:$0xff] }
 0x6fa   :  { %4753 = vmatpush1.bf16.msra.mxu0 %v9872_v14  ;;  %4776 = vmatprep.mubr.bf16.mxu0 %v11214_v44 }
 0x6fb   :  { %4754 = vmatprep.subr.bf16.mxu0 %v9865_v29 }
 0x6fc   :  { %4702 = vmatpush1.bf16.msra.mxu1 %v9862_v52  ;;  %v9874_v52 = vcombine.low %v17339_v38, %v17338_v41  ;;  %v4913_v38 = vld [vmem:[%s17245_s6 + $0x50] sm:$0xff] }
 0x6fd   :  { %4703 = vmatprep.subr.bf16.mxu1 %v9855_v8  ;;  %v17343_v8 = vld [vmem:[#allocation249_spill] sm:$0xff] }
 0x6fe   :  { %4755 = vmatpush1.bf16.msra.mxu0 %v9864_v33  ;;  %v9876_v33 = vcombine.low %v17341_v2, %v17340_v19  ;;  %v9867_v0 = vcombine.high %v17343_v8, %v17342_v12  ;;  %v4912_v19 = vld [vmem:[%s17245_s6 + $0x48] sm:$0xff]  ;;  %v4914_v2 = vld [vmem:[%s17245_s6 + $0x58] sm:$0xff] }
 0x6ff   :  { %4756 = vmatprep.subr.bf16.mxu0 %v9857_v51  ;;  %v17345_v51 = vld [vmem:[#allocation250_spill] sm:$0xff] }
 0x700   :  { %4704 = vmatpush1.bf16.msra.mxu1 %v9854_v7  ;;  %v9869_v7 = vcombine.high %v17345_v51, %v17344_v37  ;;  %v9868_v18 = vcombine.low %v17345_v51, %v17344_v37 }
 0x701   :  { %4705 = vmatprep.subr.bf16.mxu1 %v9847_v22  ;;  %v17347_v22 = vld [vmem:[#allocation241_spill] sm:$0xff] }
 0x702   :  { %4757 = vmatpush1.bf16.msra.mxu0 %v9856_v50  ;;  %v9866_v50 = vcombine.low %v17343_v8, %v17342_v12  ;;  %v9859_v20 = vcombine.high %v17347_v22, %v17346_v13 }
 0x703   :  { %4758 = vmatprep.subr.bf16.mxu0 %v9849_v49  ;;  %v17349_v49 = vld [vmem:[#allocation242_spill] sm:$0xff] }
 0x704   :  { %4706 = vmatpush1.bf16.msra.mxu1 %v9846_v24  ;;  %v9861_v24 = vcombine.high %v17349_v49, %v17348_v31  ;;  %v9860_v21 = vcombine.low %v17349_v49, %v17348_v31 }
 0x705   :  { %4801 = vmatprep.subr.bf16.mxu1 %v9891_v11  ;;  %v17351_v11 = vld [vmem:[#allocation233_spill] sm:$0xff] }
 0x706   :  { %4759 = vmatpush1.bf16.msra.mxu0 %v9848_v42  ;;  %v9858_v42 = vcombine.low %v17347_v22, %v17346_v13  ;;  %v9851_v4 = vcombine.high %v17351_v11, %v17350_v6 }
 0x707   :  { %4854 = vmatprep.subr.bf16.mxu0 %v9893_v10  ;;  %v17353_v10 = vld [vmem:[#allocation234_spill] sm:$0xff] }
 0x7af   :  { %v4331_v30 = vpop.f32.mrf.mxu1 }
 0x7b1   :  { %v4380_v58 = vpop.f32.mrf.mxu0  ;;  %v4333_v53 = vpop.f32.mrf.mxu1 }
 0x7b2   :  { %v4381_v28 = vadd.f32 %v4380_v58, %v4331_v30  ;;  %v9853_v30 = vcombine.high %v17353_v10, %v17352_v9  ;;  %v9850_v58 = vcombine.low %v17351_v11, %v17350_v6  ;;  %v9852_v53 = vcombine.low %v17353_v10, %v17352_v9  ;;  %v4929_v6 = vld [vmem:[%s17245_s6 + $0xd0] sm:$0xff] }
 0x7b3   :  { %v4382_v61 = vpop.f32.mrf.mxu0  ;;  %v4334_v47 = vpop.f32.mrf.mxu1 }
 0x7b4   :  { %v5064_v61 = vld [vmem:[%s17244_s9 + $0xc8] sm:$0xff] }
 0x7b5   :  { %v4383_v36 = vpop.f32.mrf.mxu0  ;;  %v4336_v27 = vpop.f32.mrf.mxu1 }
 0x7b6   :  { %v4384_v56 = vadd.f32 %v4383_v36, %v4334_v47  ;;  %v5066_v47 = vld [vmem:[%s17244_s9 + $0xd8] sm:$0xff]  ;;  %v5063_v36 = vld [vmem:[%s17244_s9 + $0xc0] sm:$0xff]  ;;  %v5065_v27 = vld [vmem:[%s17244_s9 + $0xd0] sm:$0xff] }
 0x7b7   :  { %v4385_v34 = vpop.f32.mrf.mxu0  ;;  %v4339_v25 = vpop.f32.mrf.mxu1 }
 0x7b8   :  { %v4395_v3 = vpack.c.bf16 %v4384_v56, %v4381_v28  ;;  %v5056_v28 = vld [vmem:[%s17244_s9 + $0x88] sm:$0xff]  ;;  %v5058_v56 = vld [vmem:[%s17244_s9 + $0x98] sm:$0xff]  ;;  %v5055_v34 = vld [vmem:[%s17244_s9 + $0x80] sm:$0xff] }
 0x7b9   :  { %v4388_v63 = vpop.f32.mrf.mxu0  ;;  %v4341_v32 = vpop.f32.mrf.mxu1 }
 0x7ba   :  { %9894 = vmatmul.mubr.msk.bf16.vlgmr.msra.gmra.mxu1 %vm3127_vm3, %v4395_v3  ;;  %9896 = vmatmul.mubr.msk.bf16.vlgmr.msra.gmra.mxu0 %vm3127_vm3, %v4395_v3  ;;  %v4389_v16 = vadd.f32 %v4388_v63, %v4339_v25  ;;  %v5057_v25 = vld [vmem:[%s17244_s9 + $0x90] sm:$0xff]  ;;  %v5070_v63 = vld [vmem:[%s17244_s9 + $0xf8] sm:$0xff] }
 0x7bb   :  { %4802 = vmatpush1.bf16.msra.mxu1 %v9890_v1  ;;  %4855 = vmatpush1.bf16.msra.mxu0 %v9892_v15  ;;  %v4390_v62 = vpop.f32.mrf.mxu0  ;;  %v4342_v26 = vpop.f32.mrf.mxu1  ;;  %v5048_v1 = vld [vmem:[%s17244_s9 + $0x48] sm:$0xff]  ;;  %v5050_v15 = vld [vmem:[%s17244_s9 + $0x58] sm:$0xff] }
 0x7bc   :  { %4803 = vmatprep.subr.bf16.mxu1 %v9883_v60  ;;  %4856 = vmatprep.subr.bf16.mxu0 %v9885_v48  ;;  %v5042_v60 = vld [vmem:[%s17244_s9 + $0x18] sm:$0xff]  ;;  %v5068_v48 = vld [vmem:[%s17244_s9 + $0xe8] sm:$0xff] }
 0x7bd   :  { %v4391_v14 = vpop.f32.mrf.mxu0  ;;  %v4344_v45 = vpop.f32.mrf.mxu1  ;;  %4733 = vmatprep.mubr.bf16.mxu1 %v11214_v44  ;;  %4786 = vmatprep.mubr.bf16.mxu0 %v11214_v44 }
 0x7be   :  { %v4392_v5 = vadd.f32 %v4391_v14, %v4342_v26 }
 0x7bf   :  { %4804 = vmatpush1.bf16.msra.mxu1 %v9882_v59  ;;  %4857 = vmatpush1.bf16.msra.mxu0 %v9884_v57  ;;  %v4393_v29 = vpop.f32.mrf.mxu0 }
 0x7c0   :  { %v4396_v39 = vpack.c.bf16 %v4392_v5, %v4389_v16  ;;  %4805 = vmatprep.subr.bf16.mxu1 %v9875_v35  ;;  %4858 = vmatprep.subr.bf16.mxu0 %v9877_v43  ;;  %v4911_v16 = vld [vmem:[%s17245_s6 + $0x40] sm:$0xff]  ;;  %v4905_v43 = vld [vmem:[%s17245_s6 + $0x10] sm:$0xff] }
 0x7c1   :  { %v4903_v35 = vld [vmem:[%s17245_s6] sm:$0xff]  ;;  %v4921_v29 = vld [vmem:[%s17245_s6 + $0x90] sm:$0xff] }
 0x7c2   :  { %9895 = vmatmul.mubr.msk.bf16.gmra.mxu1 %vm3127_vm3, %v4396_v39  ;;  %9897 = vmatmul.mubr.msk.bf16.gmra.mxu0 %vm3127_vm3, %v4396_v39  ;;  %v4919_v5 = vld [vmem:[%s17245_s6 + $0x80] sm:$0xff] }
 0x7c3   :  { %4806 = vmatpush1.bf16.msra.mxu1 %v9874_v52  ;;  %4859 = vmatpush1.bf16.msra.mxu0 %v9876_v33  ;;  %v4904_v52 = vld [vmem:[%s17245_s6 + $0x8] sm:$0xff]  ;;  %v4906_v33 = vld [vmem:[%s17245_s6 + $0x18] sm:$0xff] }
 0x7c4   :  { %4807 = vmatprep.subr.bf16.mxu1 %v9867_v0  ;;  %4860 = vmatprep.subr.bf16.mxu0 %v9869_v7  ;;  %v4920_v7 = vld [vmem:[%s17245_s6 + $0x88] sm:$0xff] }
 0x7c5   :  { %4829 = vmatprep.mubr.bf16.mxu1 %v11214_v44  ;;  %4882 = vmatprep.mubr.bf16.mxu0 %v11214_v44 }
 0x7c7   :  { %4808 = vmatpush1.bf16.msra.mxu1 %v9866_v50  ;;  %4861 = vmatpush1.bf16.msra.mxu0 %v9868_v18  ;;  %v4922_v50 = vld [vmem:[%s17245_s6 + $0x98] sm:$0xff] }
 0x7c8   :  { %4809 = vmatprep.subr.bf16.mxu1 %v9859_v20  ;;  %4862 = vmatprep.subr.bf16.mxu0 %v9861_v24 }
 0x7cb   :  { %4810 = vmatpush1.bf16.msra.mxu1 %v9858_v42  ;;  %4863 = vmatpush1.bf16.msra.mxu0 %v9860_v21  ;;  %v4927_v21 = vld [vmem:[%s17245_s6 + $0xc0] sm:$0xff] }
 0x7cc   :  { %4811 = vmatprep.subr.bf16.mxu1 %v9851_v4  ;;  %4864 = vmatprep.subr.bf16.mxu0 %v9853_v30 }
 0x7cf   :  { %4812 = vmatpush1.bf16.msra.mxu1 %v9850_v58  ;;  %4865 = vmatpush1.bf16.msra.mxu0 %v9852_v53 }
 0x7d0   :  { %5095 = vmatprep.subr.mxu1 %v5064_v61  ;;  %5165 = vmatprep.subr.mxu0 %v5066_v47  ;;  %v4928_v47 = vld [vmem:[%s17245_s6 + $0xc8] sm:$0xff] }
 0x7d2   :  { %9898 = vmatmul.mubr.msk.bf16.vlgmr.msra.gmra.mxu1 %vm3127_vm3, %v4395_v3  ;;  %9900 = vmatmul.mubr.msk.bf16.vlgmr.msra.gmra.mxu0 %vm3127_vm3, %v4395_v3  ;;  %v5047_v3 = vld [vmem:[%s17244_s9 + $0x40] sm:$0xff] }
 0x7d3   :  { %4839 = vmatprep.mubr.bf16.mxu1 %v11214_v44  ;;  %4892 = vmatprep.mubr.bf16.mxu0 %v11214_v44 }
 0x7d4   :  { %5096 = vmatpush1.xpose.msra.mxu1 %v5063_v36  ;;  %5166 = vmatpush1.xpose.msra.mxu0 %v5065_v27  ;;  %v4930_v36 = vld [vmem:[%s17245_s6 + $0xd8] sm:$0xff] }
 0x7d5   :  { %5097 = vmatprep.subr.mxu1 %v5056_v28  ;;  %5167 = vmatprep.subr.mxu0 %v5058_v56 }
 0x7d8   :  { %5098 = vmatpush1.xpose.msra.mxu1 %v5055_v34  ;;  %5168 = vmatpush1.xpose.msra.mxu0 %v5057_v25 }
 0x7d9   :  { %5099 = vmatprep.subr.mxu1 %v5048_v1  ;;  %5169 = vmatprep.subr.mxu0 %v5050_v15 }
 0x7da   :  { %9899 = vmatmul.mubr.msk.bf16.gmra.mxu1 %vm3127_vm3, %v4396_v39  ;;  %9901 = vmatmul.mubr.msk.bf16.gmra.mxu0 %vm3127_vm3, %v4396_v39 }
 0x7dc   :  { %5100 = vmatpush1.xpose.msra.mxu1 %v5047_v3  ;;  %5170 = vmatpush1.xpose.msra.mxu0 %v5049_v55 }
 0x7dd   :  { %5101 = vmatprep.subr.mxu1 %v5040_v46  ;;  %5171 = vmatprep.subr.mxu0 %v5042_v60 }
 0x7e0   :  { %5102 = vmatpush1.xpose.msra.mxu1 %v5039_v40  ;;  %5172 = vmatpush1.xpose.msra.mxu0 %v5041_v23 }
 0x7e1   :  { %5235 = vmatprep.subr.mxu1 %v5068_v48  ;;  %5305 = vmatprep.subr.mxu0 %v5070_v63 }
 0x87a   :  { %v4725_v32 = vpop.f32.mrf.mxu1  ;;  %v4778_v62 = vpop.f32.mrf.mxu0 }
 0x87b   :  { %v4935_v18 = vmul.f32 %v4903_v35, %v4725_v32  ;;  %v4937_v13 = vmul.f32 %v4905_v43, %v4778_v62 }
 0x87c   :  { %v4727_v26 = vpop.f32.mrf.mxu1  ;;  %v4780_v59 = vpop.f32.mrf.mxu0 }
 0x87d   :  { %v4936_v31 = vmul.f32 %v4904_v52, %v4727_v26  ;;  %v4938_v49 = vmul.f32 %v4906_v33, %v4780_v59 }
 0x87e   :  { %v4729_v57 = vpop.f32.mrf.mxu1  ;;  %v4782_v41 = vpop.f32.mrf.mxu0 }
 0x87f   :  { %v4943_v39 = vmul.f32 %v4911_v16, %v4729_v57  ;;  %v4945_v12 = vmul.f32 %v4913_v38, %v4782_v41 }
 0x880   :  { %v4731_v14 = vpop.f32.mrf.mxu1  ;;  %v4784_v45 = vpop.f32.mrf.mxu0 }
 0x881   :  { %v4944_v8 = vmul.f32 %v4912_v19, %v4731_v14  ;;  %v4946_v0 = vmul.f32 %v4914_v2, %v4784_v45  ;;  %v4967_v11 = vadd.f32 %v4943_v39, %v4935_v18  ;;  %v4985_v4 = vadd.f32 %v4945_v12, %v4937_v13  ;;  %v4907_v13 = vld [vmem:[%s17245_s6 + $0x20] sm:$0xff] }
 0x882   :  { %v4735_v37 = vpop.f32.mrf.mxu1  ;;  %v4788_v51 = vpop.f32.mrf.mxu0 }
 0x883   :  { %v4951_v22 = vmul.f32 %v4919_v5, %v4735_v37  ;;  %v4953_v20 = vmul.f32 %v4921_v29, %v4788_v51  ;;  %v4976_v30 = vadd.f32 %v4944_v8, %v4936_v31  ;;  %v4994_v58 = vadd.f32 %v4946_v0, %v4938_v49  ;;  %v4915_v37 = vld [vmem:[%s17245_s6 + $0x60] sm:$0xff]  ;;  %v4909_v31 = vld [vmem:[%s17245_s6 + $0x30] sm:$0xff] }
 0x884   :  { %v4737_v24 = vpop.f32.mrf.mxu1  ;;  %v4790_v42 = vpop.f32.mrf.mxu0 }
 0x885   :  { %v4952_v9 = vmul.f32 %v4920_v7, %v4737_v24  ;;  %v4954_v10 = vmul.f32 %v4922_v50, %v4790_v42  ;;  %v4968_v27 = vadd.f32 %v4967_v11, %v4951_v22  ;;  %v4986_v28 = vadd.f32 %v4985_v4, %v4953_v20  ;;  %v4917_v7 = vld [vmem:[%s17245_s6 + $0x70] sm:$0xff]  ;;  %v4916_v22 = vld [vmem:[%s17245_s6 + $0x68] sm:$0xff]  ;;  %v4918_v20 = vld [vmem:[%s17245_s6 + $0x78] sm:$0xff] }
 0x886   :  { %v4739_v53 = vpop.f32.mrf.mxu1  ;;  %v4792_v61 = vpop.f32.mrf.mxu0  ;;  %v4923_v42 = vld [vmem:[%s17245_s6 + $0xa0] sm:$0xff] }
 0x887   :  { %v4959_v56 = vmul.f32 %v4927_v21, %v4739_v53  ;;  %v4961_v34 = vmul.f32 %v4929_v6, %v4792_v61  ;;  %v4977_v25 = vadd.f32 %v4976_v30, %v4952_v9  ;;  %v4995_v1 = vadd.f32 %v4994_v58, %v4954_v10  ;;  %v4925_v21 = vld [vmem:[%s17245_s6 + $0xb0] sm:$0xff]  ;;  %v4908_v9 = vld [vmem:[%s17245_s6 + $0x28] sm:$0xff]  ;;  %v4910_v10 = vld [vmem:[%s17245_s6 + $0x38] sm:$0xff] }
 0x888   :  { %v4741_v15 = vpop.f32.mrf.mxu1  ;;  %v4794_v3 = vpop.f32.mrf.mxu0  ;;  %v5067_v53 = vld [vmem:[%s17244_s9 + $0xe0] sm:$0xff] }
 0x889   :  { %v4969_v55 = vadd.f32 %v4968_v27, %v4959_v56  ;;  %v4987_v46 = vadd.f32 %v4986_v28, %v4961_v34  ;;  %v4960_v60 = vmul.f32 %v4928_v47, %v4741_v15  ;;  %v4962_v40 = vmul.f32 %v4930_v36, %v4794_v3  ;;  %v4924_v56 = vld [vmem:[%s17245_s6 + $0xa8] sm:$0xff]  ;;  %v4926_v34 = vld [vmem:[%s17245_s6 + $0xb8] sm:$0xff] }
 0x88b   :  { %v4970_v23 = vrot.slane %v4969_v55, 4  ;;  %v4988_v48 = vrot.slane %v4987_v46, 4  ;;  %v4978_v63 = vadd.f32 %v4977_v25, %v4960_v60  ;;  %v4996_v32 = vadd.f32 %v4995_v1, %v4962_v40  ;;  %v5069_v25 = vld [vmem:[%s17244_s9 + $0xf0] sm:$0xff]  ;;  %v5062_v60 = vld [vmem:[%s17244_s9 + $0xb8] sm:$0xff] }
 0x88d   :  { %v4971_v62 = vadd.f32 %v4970_v23, %v4969_v55  ;;  %v4989_v26 = vadd.f32 %v4988_v48, %v4987_v46  ;;  %v4979_v59 = vrot.slane %v4978_v63, 4  ;;  %v4997_v57 = vrot.slane %v4996_v32, 4  ;;  %v5060_v46 = vld [vmem:[%s17244_s9 + $0xa8] sm:$0xff] }
 0x88f   :  { %v4972_v16 = vrot.slane %v4971_v62, 2  ;;  %v4990_v41 = vrot.slane %v4989_v26, 2  ;;  %v4980_v38 = vadd.f32 %v4979_v59, %v4978_v63  ;;  %v4998_v35 = vadd.f32 %v4997_v57, %v4996_v32  ;;  %v4931_v32 = vld [vmem:[%s17245_s6 + $0xe0] sm:$0xff] }
 0x891   :  { %v4973_v19 = vadd.f32 %v4972_v16, %v4971_v62  ;;  %v4981_v2 = vrot.slane %v4980_v38, 2  ;;  %v4999_v43 = vrot.slane %v4998_v35, 2  ;;  %v4991_v14 = vadd.f32 %v4990_v41, %v4989_v26  ;;  %v4933_v62 = vld [vmem:[%s17245_s6 + $0xf0] sm:$0xff]  ;;  %v5059_v41 = vld [vmem:[%s17244_s9 + $0xa0] sm:$0xff] }
 0x892   :  { %v4831_v45 = vpop.f32.mrf.mxu1  ;;  %v4884_v5 = vpop.f32.mrf.mxu0 }
 0x893   :  { %v4982_v33 = vadd.f32 %v4981_v2, %v4980_v38  ;;  %v5000_v39 = vadd.f32 %v4999_v43, %v4998_v35  ;;  %v4974_v12 = vrot.slane %v4973_v19, 1  ;;  %v4992_v8 = vrot.slane %v4991_v14, 1  ;;  %v4932_v43 = vld [vmem:[%s17245_s6 + $0xe8] sm:$0xff] }
 0x894   :  { %v4833_v29 = vpop.f32.mrf.mxu1  ;;  %v4886_v52 = vpop.f32.mrf.mxu0  ;;  %v4939_v1 = vmul.f32 %v4907_v13, %v4831_v45  ;;  %v4941_v15 = vmul.f32 %v4909_v31, %v4884_v5  ;;  %v5061_v45 = vld [vmem:[%s17244_s9 + $0xb0] sm:$0xff]  ;;  %v5044_v31 = vld [vmem:[%s17244_s9 + $0x28] sm:$0xff] }
 0x895   :  { %v4983_v50 = vrot.slane %v4982_v33, 1  ;;  %v5001_v18 = vrot.slane %v5000_v39, 1  ;;  %v4975_v4 = vadd.f32 %v4974_v12, %v4973_v19  ;;  %v4993_v61 = vadd.f32 %v4992_v8, %v4991_v14  ;;  %v4934_v14 = vld [vmem:[%s17245_s6 + $0xf8] sm:$0xff] }
 0x896   :  { %v4835_v0 = vpop.f32.mrf.mxu1  ;;  %v4888_v51 = vpop.f32.mrf.mxu0  ;;  %v4940_v40 = vmul.f32 %v4908_v9, %v4833_v29  ;;  %v4942_v23 = vmul.f32 %v4910_v10, %v4886_v52  ;;  %v5054_v12 = vld [vmem:[%s17244_s9 + $0x78] sm:$0xff] }
 0x897   :  { %v4984_v6 = vadd.f32 %v4983_v50, %v4982_v33  ;;  %v5002_v11 = vadd.f32 %v5001_v18, %v5000_v39  ;;  %v4947_v30 = vmul.f32 %v4915_v37, %v4835_v0  ;;  %v4949_v58 = vmul.f32 %v4917_v7, %v4888_v51  ;;  %v5052_v39 = vld [vmem:[%s17244_s9 + $0x68] sm:$0xff] }
 0x898   :  { %v4837_v49 = vpop.f32.mrf.mxu1  ;;  %v4890_v24 = vpop.f32.mrf.mxu0 }
 0x899   :  { %v4948_v47 = vmul.f32 %v4916_v22, %v4837_v49  ;;  %v4950_v36 = vmul.f32 %v4918_v20, %v4890_v24  ;;  %5135 = vmatprep.mubr.f32.mxu1 %v4984_v6  ;;  %5205 = vmatprep.mubr.f32.mxu0 %v5002_v11  ;;  %v5003_v26 = vadd.f32 %v4947_v30, %v4939_v1  ;;  %v5051_v22 = vld [vmem:[%s17244_s9 + $0x60] sm:$0xff]  ;;  %v5053_v20 = vld [vmem:[%s17244_s9 + $0x70] sm:$0xff]  ;;  %v5046_v6 = vld [vmem:[%s17244_s9 + $0x38] sm:$0xff] }
 0x89a   :  { %v4841_v27 = vpop.f32.mrf.mxu1  ;;  %v4894_v28 = vpop.f32.mrf.mxu0  ;;  %5136 = vmatmul.mubr.f32.vlgmr.msra.gmra.mxu1 %v4975_v4  ;;  %5206 = vmatmul.mubr.f32.vlgmr.msra.gmra.mxu0 %v4993_v61  ;;  %v5021_v59 = vadd.f32 %v4949_v58, %v4941_v15  ;;  %v5043_v30 = vld [vmem:[%s17244_s9 + $0x20] sm:$0xff]  ;;  %v5045_v58 = vld [vmem:[%s17244_s9 + $0x30] sm:$0xff] }
 0x89b   :  { %v4955_v3 = vmul.f32 %v4923_v42, %v4841_v27  ;;  %v4957_v55 = vmul.f32 %v4925_v21, %v4894_v28  ;;  %5236 = vmatpush1.xpose.msra.mxu1 %v5067_v53  ;;  %5306 = vmatpush1.xpose.msra.mxu0 %v5069_v25  ;;  %v5012_v38 = vadd.f32 %v4948_v47, %v4940_v40 }
 0x89c   :  { %v4843_v48 = vpop.f32.mrf.mxu1  ;;  %v4896_v63 = vpop.f32.mrf.mxu0  ;;  %v5030_v35 = vadd.f32 %v4950_v36, %v4942_v23  ;;  %5237 = vmatprep.subr.mxu1 %v5060_v46  ;;  %5307 = vmatprep.subr.mxu0 %v5062_v60 }
 0x89d   :  { %v4956_v57 = vmul.f32 %v4924_v56, %v4843_v48  ;;  %v4958_v16 = vmul.f32 %v4926_v34, %v4896_v63  ;;  %v5004_v5 = vadd.f32 %v5003_v26, %v4955_v3  ;;  %v5022_v29 = vadd.f32 %v5021_v59, %v4957_v55  ;;  %v9905_v63 = vld [vmem:[%s17247_s12 + $0x38] sm:$0xff]  ;;  %v9902_v26 = vld [vmem:[%s17247_s12 + $0x20] sm:$0xff] }
 0x89e   :  { %v4845_v19 = vpop.f32.mrf.mxu1  ;;  %v4898_v2 = vpop.f32.mrf.mxu0 }
 0x89f   :  { %v4963_v52 = vmul.f32 %v4931_v32, %v4845_v19  ;;  %v4965_v33 = vmul.f32 %v4933_v62, %v4898_v2  ;;  %v5013_v8 = vadd.f32 %v5012_v38, %v4956_v57  ;;  %v5031_v0 = vadd.f32 %v5030_v35, %v4958_v16  ;;  %5238 = vmatpush1.xpose.msra.mxu1 %v5059_v41  ;;  %v9904_v32 = vld [vmem:[%s17247_s12 + $0x30] sm:$0xff]  ;;  %v9903_v62 = vld [vmem:[%s17247_s12 + $0x28] sm:$0xff] }
 0x8a0   :  { %v4847_v37 = vpop.f32.mrf.mxu1  ;;  %v4900_v51 = vpop.f32.mrf.mxu0  ;;  %5308 = vmatpush1.xpose.msra.mxu0 %v5061_v45  ;;  %5239 = vmatprep.subr.mxu1 %v5052_v39 }
 0x8a1   :  { %v5005_v7 = vadd.f32 %v5004_v5, %v4963_v52  ;;  %v5023_v50 = vadd.f32 %v5022_v29, %v4965_v33  ;;  %v4964_v18 = vmul.f32 %v4932_v43, %v4847_v37  ;;  %v4966_v13 = vmul.f32 %v4934_v14, %v4900_v51  ;;  %5309 = vmatprep.subr.mxu0 %v5054_v12  ;;  %v5352_v5 = vld [vmem:[%s17248_s24 + $0x1] sm:$0x1] }
 0x8a3   :  { %v5006_v49 = vrot.slane %v5005_v7, 4  ;;  %v5024_v24 = vrot.slane %v5023_v50, 4  ;;  %v5014_v42 = vadd.f32 %v5013_v8, %v4964_v18  ;;  %v5032_v21 = vadd.f32 %v5031_v0, %v4966_v13  ;;  %5240 = vmatpush1.xpose.msra.mxu1 %v5051_v22 }
 0x8a4   :  { %5310 = vmatpush1.xpose.msra.mxu0 %v5053_v20  ;;  %5241 = vmatprep.subr.mxu1 %v5044_v31 }
 0x8a5   :  { %v5007_v11 = vadd.f32 %v5006_v49, %v5005_v7  ;;  %v5025_v4 = vadd.f32 %v5024_v24, %v5023_v50  ;;  %v5015_v9 = vrot.slane %v5014_v42, 4  ;;  %v5033_v10 = vrot.slane %v5032_v21, 4  ;;  %5311 = vmatprep.subr.mxu0 %v5046_v6 }
 0x8a7   :  { %v5008_v53 = vrot.slane %v5007_v11, 2  ;;  %v5026_v61 = vrot.slane %v5025_v4, 2  ;;  %v5016_v47 = vadd.f32 %v5015_v9, %v5014_v42  ;;  %v5034_v36 = vadd.f32 %v5033_v10, %v5032_v21  ;;  %5242 = vmatpush1.xpose.msra.mxu1 %v5043_v30 }
 0x8a8   :  { %5312 = vmatpush1.xpose.msra.mxu0 %v5045_v58  ;;  %10183 = vmatprep.subr.mxu1 %v17246_v17 }
 0x8a9   :  { %v5009_v27 = vadd.f32 %v5008_v53, %v5007_v11  ;;  %v5027_v28 = vadd.f32 %v5026_v61, %v5025_v4  ;;  %v5017_v56 = vrot.slane %v5016_v47, 2  ;;  %v5035_v34 = vrot.slane %v5034_v36, 2 }
 0x8ab   :  { %v5018_v25 = vadd.f32 %v5017_v56, %v5016_v47  ;;  %v5036_v1 = vadd.f32 %v5035_v34, %v5034_v36  ;;  %v5010_v15 = vrot.slane %v5009_v27, 1  ;;  %v5028_v3 = vrot.slane %v5027_v28, 1 }
 0x8ad   :  { %v5019_v55 = vrot.slane %v5018_v25, 1  ;;  %v5037_v46 = vrot.slane %v5036_v1, 1  ;;  %v5011_v23 = vadd.f32 %v5010_v15, %v5009_v27  ;;  %v5029_v48 = vadd.f32 %v5028_v3, %v5027_v28 }
 0x8af   :  { %v5020_v60 = vadd.f32 %v5019_v55, %v5018_v25  ;;  %v5038_v40 = vadd.f32 %v5037_v46, %v5036_v1 }
 0x8b1   :  { %5275 = vmatprep.mubr.f32.mxu1 %v5020_v60  ;;  %5345 = vmatprep.mubr.f32.mxu0 %v5038_v40 }
 0x8b2   :  { %5276 = vmatmul.mubr.f32.vlgmr.msra.gmra.mxu1 %v5011_v23  ;;  %5346 = vmatmul.mubr.f32.vlgmr.msra.gmra.mxu0 %v5029_v48 }
 0x8b3   :  { %10191 = vmatprep.mubr.msk.f32.mxu1 %vm11215_vm4, %v17246_v17  ;;  %10184 = vmatpush3.msra.mxu1 %v9905_v63 }
 0x8b4   :  { %10185 = vmatprep.subr.mxu1 %v17246_v17 }
 0x8b5   :  { %10186 = vmatpush3.msra.mxu1 %v9904_v32 }
 0x8b6   :  { %10187 = vmatprep.subr.mxu1 %v17246_v17 }
 0x8b7   :  { %10188 = vmatpush3.msra.mxu1 %v9903_v62 }
 0x8b8   :  { %10189 = vmatprep.subr.mxu1 %v17246_v17 }
 0x8b9   :  { %10190 = vmatpush3.msra.mxu1 %v9902_v26 }
 0x95a   :  { %v5137_v59 = vpop.f32.mrf.mxu1  ;;  %v5207_v57 = vpop.f32.mrf.mxu0 }
 0x95b   :  { %v5208_v38 = vadd.f32 %v5207_v57, %v5137_v59 }
 0x95c   :  { %v5139_v16 = vpop.f32.mrf.mxu1  ;;  %v5209_v41 = vpop.f32.mrf.mxu0 }
 0x972   :  { %v5277_v35 = vpop.f32.mrf.mxu1  ;;  %v5347_v19 = vpop.f32.mrf.mxu0 }
 0x973   :  { %v5278_v2 = vadd.f32 %v5277_v35, %v5208_v38 }
 0x974   :  { %v5279_v43 = vpop.f32.mrf.mxu1  ;;  %v5349_v14 = vpop.f32.mrf.mxu0 }
 0x975   :  { %v5348_v45 = vadd.f32 %v5347_v19, %v5278_v2 }
 0x977   :  { %v5351_v29 = vmul.f32 0.0046296297, %v5348_v45 }
 0x979   :  { %v5353_v52 = vadd.f32 %v5352_v5, %v5351_v29 }
 0x97b   :  { %v5354_v33 = vsub.f32 0.0, %v5353_v52 }
 0x97d   :  { %v5355_v39 = vmul.f32 1.442695, %v5354_v33 }
 0x97f   :  { %10831 = vpow2.f32 %v5355_v39 }
 0x98c   :  { %v10832_v12 = vpop.eup %10831 }
 0x98d   :  { %v5357_v8 = vadd.f32 1.0, %v10832_v12 }
 0x98f   :  { %10833 = vrcp.f32 %v5357_v8 }
 0x99c   :  { %v10834_v0 = vpop.eup %10833 }
 0x99d   :  { %v5359_v37 = vmul.f32 %v10834_v0, %v5353_v52 }
 0x99f   :  { %10192 = vmatmul.mubr.msk.f32.vlgmr.msra.gmra.mxu1 %vm1787_vm1, %v5359_v37 }
 0xa5f   :  { %v5434_v51 = vpop.f32.mrf.mxu1 }
 0xa60   :  { %v14938_v7 = vadd.f32 %v5434_v51, %v14497_v54 }
 0xa61   :  { %v10193_v50 = vpop.f32.mrf.mxu1 }
 0xa62   :  { %11191 = dma.done.wait [#allocation17 + $0x6], 3072 }
 0xa63   :  { %11192 = vsyncadd [#allocation17 + $0x6], 4294964224 }
 0xa64   :  { %11193 = dma.done.wait [#allocation17 + $0x7], 512 }
 0xa65   :  { %11194 = vsyncadd [#allocation17 + $0x7], 4294966784  ;;  %v17354_v18 = vld [vmem:[#allocation300_spill] sm:$0xff]  ;;  %v17355_v22 = vld [vmem:[#allocation302_spill] sm:$0xff]  ;;  %6051 = vmatprep.mubr.bf16.mxu1 %v11214_v44 }
 0xa66   :  { %v5492_v13 = vsub.f32 0.0, %v17354_v18  ;;  %v5494_v20 = vsub.f32 0.0, %v17355_v22  ;;  %v17356_v31 = vld [vmem:[#allocation299_spill] sm:$0xff] }
 0xa67   :  { %v5491_v49 = vsub.f32 0.0, %v17356_v31 }
 0xa68   :  { %11195 = dma.done.wait [#allocation17 + $0x8], 6144 }
 0xa69   :  { %11196 = vsyncadd [#allocation17 + $0x8], 4294961152  ;;  %v17357_v24 = vld [vmem:[#allocation301_spill] sm:$0xff]  ;;  %v17358_v21 = vld [vmem:[#allocation296_spill] sm:$0xff]  ;;  %v5537_v10 = vmul.f32 1.442695, %v5492_v13 }
 0xa6a   :  { %v5493_v42 = vsub.f32 0.0, %v17357_v24  ;;  %v5488_v54 = vsub.f32 0.0, %v17358_v21  ;;  %v17359_v6 = vld [vmem:[#allocation298_spill] sm:$0xff]  ;;  %v17360_v4 = vld [vmem:[#allocation295_spill] sm:$0xff]  ;;  %v5541_v30 = vmul.f32 1.442695, %v5494_v20 }
 0xa6b   :  { %v5490_v11 = vsub.f32 0.0, %v17359_v6  ;;  %v5487_v9 = vsub.f32 0.0, %v17360_v4  ;;  %v5535_v58 = vmul.f32 1.442695, %v5491_v49  ;;  %v17361_v53 = vld [vmem:[#allocation304_spill] sm:$0xff]  ;;  %v17362_v61 = vld [vmem:[#allocation303_spill] sm:$0xff]  ;;  %10835 = vpow2.f32 %v5537_v10 }
 0xa6c   :  { %v9908_v47 = vcombine.high %v17362_v61, %v17361_v53  ;;  %vm5649_vm5 = vcmask 719872   ;;  %v5539_v36 = vmul.f32 1.442695, %v5493_v42  ;;  %v5529_v27 = vmul.f32 1.442695, %v5488_v54  ;;  %v17363_v28 = vld [vmem:[#allocation297_spill] sm:$0xff] }
 0xa6d   :  { %v5489_v56 = vsub.f32 0.0, %v17363_v28  ;;  %v17364_v34 = vld [vmem:[#allocation292_spill] sm:$0xff]  ;;  %10837 = vpow2.f32 %v5541_v30  ;;  %v5533_v1 = vmul.f32 1.442695, %v5490_v11  ;;  %v17365_v15 = vld [vmem:[#allocation294_spill] sm:$0xff]  ;;  %v17366_v46 = vld [vmem:[#allocation291_spill] sm:$0xff] }
 0xa6e   :  { %v5484_v25 = vsub.f32 0.0, %v17364_v34  ;;  %9917 = vmatprep.mubr.msk.bf16.mxu0 %vm5649_vm5, %v9908_v47  ;;  %v5486_v3 = vsub.f32 0.0, %v17365_v15  ;;  %10839 = vpow2.f32 %v5535_v58  ;;  %v5527_v55 = vmul.f32 1.442695, %v5487_v9  ;;  %v17367_v23 = vld [vmem:[#allocation293_spill] sm:$0xff]  ;;  %v17368_v32 = vld [vmem:[#allocation288_spill] sm:$0xff] }
 0xa6f   :  { %v5483_v60 = vsub.f32 0.0, %v17366_v46  ;;  %10841 = vpow2.f32 %v5539_v36  ;;  %v5531_v40 = vmul.f32 1.442695, %v5489_v56  ;;  %v5485_v48 = vsub.f32 0.0, %v17367_v23  ;;  %v17369_v59 = vld [vmem:[#allocation290_spill] sm:$0xff]  ;;  %v17370_v41 = vld [vmem:[#allocation287_spill] sm:$0xff] }
 0xa70   :  { %10843 = vpow2.f32 %v5529_v27  ;;  %v5521_v63 = vmul.f32 1.442695, %v5484_v25  ;;  %v5480_v62 = vsub.f32 0.0, %v17368_v32  ;;  %v5525_v26 = vmul.f32 1.442695, %v5486_v3  ;;  %v17371_v19 = vld [vmem:[#allocation289_spill] sm:$0xff] }
 0xa71   :  { %10845 = vpow2.f32 %v5533_v1  ;;  %v5482_v57 = vsub.f32 0.0, %v17369_v59  ;;  %v5519_v16 = vmul.f32 1.442695, %v5483_v60  ;;  %v5479_v38 = vsub.f32 0.0, %v17370_v41  ;;  %v17372_v29 = vld [vmem:[#allocation351_spill] sm:$0xff] }
 0xa72   :  { %10847 = vpow2.f32 %v5527_v55  ;;  %v5523_v35 = vmul.f32 1.442695, %v5485_v48  ;;  %v5481_v2 = vsub.f32 0.0, %v17371_v19  ;;  %v5513_v43 = vmul.f32 1.442695, %v5480_v62  ;;  %v17373_v52 = vld [vmem:[#allocation347_spill] sm:$0xff] }
 0xa73   :  { %10849 = vpow2.f32 %v5531_v40  ;;  %v5517_v14 = vmul.f32 1.442695, %v5482_v57  ;;  %v5511_v45 = vmul.f32 1.442695, %v5479_v38  ;;  %v9960_v33 = vcombine.high %v17373_v52, %v17372_v29  ;;  %v17374_v8 = vld [vmem:[#allocation343_spill] sm:$0xff] }
 0xa74   :  { %10851 = vpow2.f32 %v5521_v63  ;;  %v5515_v5 = vmul.f32 1.442695, %v5481_v2  ;;  %v9959_v39 = vcombine.low %v17373_v52, %v17372_v29  ;;  %v17375_v0 = vld [vmem:[#allocation339_spill] sm:$0xff] }
 0xa75   :  { %10853 = vpow2.f32 %v5525_v26  ;;  %v9952_v37 = vcombine.high %v17375_v0, %v17374_v8  ;;  %6023 = vmatprep.subr.bf16.mxu1 %v9960_v33  ;;  %v9951_v49 = vcombine.low %v17375_v0, %v17374_v8  ;;  %v17376_v11 = vld [vmem:[#allocation335_spill] sm:$0xff] }
 0xa76   :  { %10855 = vpow2.f32 %v5519_v16  ;;  %6024 = vmatpush1.bf16.msra.mxu1 %v9959_v39  ;;  %v17377_v9 = vld [vmem:[#allocation331_spill] sm:$0xff]  ;;  %v17383_v39 = vld [vmem:[#allocation286_spill] sm:$0xff] }
 0xa77   :  { %10857 = vpow2.f32 %v5523_v35  ;;  %6025 = vmatprep.subr.bf16.mxu1 %v9952_v37  ;;  %v9944_v10 = vcombine.high %v17377_v9, %v17376_v11  ;;  %v9943_v25 = vcombine.low %v17377_v9, %v17376_v11  ;;  %v17378_v55 = vld [vmem:[#allocation327_spill] sm:$0xff] }
 0xa78   :  { %10859 = vpow2.f32 %v5513_v43  ;;  %v10836_v12 = vpop.eup %10835  ;;  %v17379_v60 = vld [vmem:[#allocation323_spill] sm:$0xff]  ;;  %v17380_v43 = vld [vmem:[#allocation284_spill] sm:$0xff] }
 0xa79   :  { %10861 = vpow2.f32 %v5517_v14  ;;  %v5564_v50 = vadd.f32 1.0, %v10836_v12  ;;  %v9936_v40 = vcombine.high %v17379_v60, %v17378_v55  ;;  %v9935_v38 = vcombine.low %v17379_v60, %v17378_v55  ;;  %v17384_v37 = vld [vmem:[#allocation283_spill] sm:$0xff] }
 0xa7a   :  { %v10838_v51 = vpop.eup %10837  ;;  %10863 = vpow2.f32 %v5511_v45  ;;  %6026 = vmatpush1.bf16.msra.mxu1 %v9951_v49  ;;  %v5476_v14 = vsub.f32 0.0, %v17380_v43  ;;  %v17381_v45 = vld [vmem:[#allocation319_spill] sm:$0xff]  ;;  %v5478_v12 = vsub.f32 0.0, %v17383_v39 }
 0xa7b   :  { %v10840_v13 = vpop.eup %10839  ;;  %v5566_v20 = vadd.f32 1.0, %v10838_v51  ;;  %10865 = vpow2.f32 %v5515_v5  ;;  %6027 = vmatprep.subr.bf16.mxu1 %v9944_v10  ;;  %v17382_v5 = vld [vmem:[#allocation315_spill] sm:$0xff]  ;;  %v5475_v51 = vsub.f32 0.0, %v17384_v37  ;;  %v17386_v10 = vld [vmem:[#allocation280_spill] sm:$0xff] }
 0xa7c   :  { %v10842_v42 = vpop.eup %10841  ;;  %10867 = vrcp.f32 %v5564_v50  ;;  %v5563_v54 = vadd.f32 1.0, %v10840_v13  ;;  %v9928_v29 = vcombine.high %v17382_v5, %v17381_v45  ;;  %v5505_v9 = vmul.f32 1.442695, %v5476_v14  ;;  %v17388_v55 = vld [vmem:[#allocation279_spill] sm:$0xff] }
 0xa7d   :  { %v10844_v30 = vpop.eup %10843  ;;  %10869 = vrcp.f32 %v5566_v20  ;;  %v5565_v58 = vadd.f32 1.0, %v10842_v42  ;;  %v17385_v20 = vld [vmem:[#allocation285_spill] sm:$0xff]  ;;  %v9927_v42 = vcombine.low %v17382_v5, %v17381_v45  ;;  %v5471_v60 = vsub.f32 0.0, %v17388_v55 }
 0xa7e   :  { %v10846_v47 = vpop.eup %10845  ;;  %10871 = vrcp.f32 %v5563_v54  ;;  %v5560_v36 = vadd.f32 1.0, %v10844_v30  ;;  %6028 = vmatpush1.bf16.msra.mxu1 %v9943_v25  ;;  %v5477_v49 = vsub.f32 0.0, %v17385_v20  ;;  %v5472_v30 = vsub.f32 0.0, %v17386_v10 }
 0xa7f   :  { %v10848_v27 = vpop.eup %10847  ;;  %10873 = vrcp.f32 %v5565_v58  ;;  %v5562_v56 = vadd.f32 1.0, %v10846_v47  ;;  %6029 = vmatprep.subr.bf16.mxu1 %v9936_v40 }
 0xa80   :  { %v10850_v1 = vpop.eup %10849  ;;  %10875 = vrcp.f32 %v5560_v36  ;;  %v5559_v3 = vadd.f32 1.0, %v10848_v27  ;;  %v5509_v36 = vmul.f32 1.442695, %v5478_v12  ;;  %v17387_v27 = vld [vmem:[#allocation282_spill] sm:$0xff] }
 0xa81   :  { %v10852_v48 = vpop.eup %10851  ;;  %10877 = vrcp.f32 %v5562_v56  ;;  %v5561_v63 = vadd.f32 1.0, %v10850_v1  ;;  %v5474_v56 = vsub.f32 0.0, %v17387_v27 }
 0xa82   :  { %v10854_v62 = vpop.eup %10853  ;;  %10879 = vrcp.f32 %v5559_v3  ;;  %v5556_v26 = vadd.f32 1.0, %v10852_v48  ;;  %6030 = vmatpush1.bf16.msra.mxu1 %v9935_v38  ;;  %v5503_v3 = vmul.f32 1.442695, %v5475_v51  ;;  %v5497_v38 = vmul.f32 1.442695, %v5472_v30 }
 0xa83   :  { %v10856_v57 = vpop.eup %10855  ;;  %10881 = vrcp.f32 %v5561_v63  ;;  %v5558_v16 = vadd.f32 1.0, %v10854_v62  ;;  %6031 = vmatprep.subr.bf16.mxu1 %v9928_v29  ;;  %v5507_v63 = vmul.f32 1.442695, %v5477_v49  ;;  %v17389_v62 = vld [vmem:[#allocation281_spill] sm:$0xff]  ;;  %v5501_v14 = vmul.f32 1.442695, %v5474_v56 }
 0xa84   :  { %v10858_v35 = vpop.eup %10857  ;;  %10883 = vrcp.f32 %v5556_v26  ;;  %v5555_v2 = vadd.f32 1.0, %v10856_v57  ;;  %v5473_v26 = vsub.f32 0.0, %v17389_v62 }
 0xa85   :  { %v10860_v52 = vpop.eup %10859  ;;  %10885 = vrcp.f32 %v5558_v16  ;;  %v5557_v33 = vadd.f32 1.0, %v10858_v35 }
 0xa86   :  { %v10862_v8 = vpop.eup %10861  ;;  %10887 = vrcp.f32 %v5555_v2  ;;  %v5552_v0 = vadd.f32 1.0, %v10860_v52  ;;  %6032 = vmatpush1.bf16.msra.mxu1 %v9927_v42 }
 0xa87   :  { %v10864_v50 = vpop.eup %10863  ;;  %10889 = vrcp.f32 %v5557_v33  ;;  %v5554_v13 = vadd.f32 1.0, %v10862_v8 }
 0xa88   :  { %v10866_v54 = vpop.eup %10865  ;;  %10891 = vrcp.f32 %v5552_v0  ;;  %v5551_v11 = vadd.f32 1.0, %v10864_v50 }
 0xa89   :  { %v10868_v58 = vpop.eup %10867  ;;  %10893 = vrcp.f32 %v5554_v13  ;;  %v5553_v47 = vadd.f32 1.0, %v10866_v54 }
 0xa8a   :  { %v10870_v25 = vpop.eup %10869  ;;  %v5610_v1 = vmul.f32 %v10868_v58, %v17354_v18  ;;  %10895 = vrcp.f32 %v5551_v11 }
 0xa8b   :  { %v10872_v40 = vpop.eup %10871  ;;  %v5614_v48 = vmul.f32 %v10870_v25, %v17355_v22  ;;  %10897 = vrcp.f32 %v5553_v47  ;;  %v5495_v22 = vmul.f32 1.442695, %v5471_v60 }
 0xa8c   :  { %v10874_v57 = vpop.eup %10873  ;;  %v5608_v16 = vmul.f32 %v10872_v40, %v17356_v31  ;;  %10899 = vpow2.f32 %v5505_v9  ;;  %v5499_v31 = vmul.f32 1.442695, %v5473_v26 }
 0xa8d   :  { %v10876_v35 = vpop.eup %10875  ;;  %v5630_v2 = vpack.c.bf16 %v5614_v48, %v5610_v1  ;;  %v5612_v18 = vmul.f32 %v10874_v57, %v17357_v24  ;;  %10901 = vpow2.f32 %v5509_v36 }
 0xa8e   :  { %v10878_v45 = vpop.eup %10877  ;;  %v5602_v5 = vmul.f32 %v10876_v35, %v17358_v21  ;;  %10903 = vpow2.f32 %v5503_v3 }
 0xa8f   :  { %v10880_v29 = vpop.eup %10879  ;;  %9911 = vmatprep.subr.msk.bf16.mxu0 %vm5649_vm5, %v5630_v2  ;;  %v5629_v52 = vpack.c.bf16 %v5612_v18, %v5608_v16  ;;  %v5606_v33 = vmul.f32 %v10878_v45, %v17359_v6  ;;  %10905 = vpow2.f32 %v5507_v63 }
 0xa90   :  { %v10882_v12 = vpop.eup %10881  ;;  %10907 = vpow2.f32 %v5497_v38  ;;  %v5600_v0 = vmul.f32 %v10880_v29, %v17360_v4 }
 0xa91   :  { %v10884_v8 = vpop.eup %10883  ;;  %5679 = vmatpush1.bf16.xpose.msra.mxu0 %v5629_v52  ;;  %v5628_v24 = vpack.c.bf16 %v5606_v33, %v5602_v5  ;;  %v5604_v51 = vmul.f32 %v10882_v12, %v17363_v28  ;;  %10909 = vpow2.f32 %v5501_v14 }
 0xa92   :  { %v10886_v21 = vpop.eup %10885  ;;  %v5594_v50 = vmul.f32 %v10884_v8, %v17364_v34  ;;  %10911 = vpow2.f32 %v5495_v22 }
 0xa93   :  { %v10888_v13 = vpop.eup %10887  ;;  %9912 = vmatprep.subr.msk.bf16.mxu0 %vm5649_vm5, %v5628_v24  ;;  %v5598_v6 = vmul.f32 %v10886_v21, %v17365_v15  ;;  %10913 = vpow2.f32 %v5499_v31  ;;  %v5627_v54 = vpack.c.bf16 %v5604_v51, %v5600_v0 }
 0xa94   :  { %v10890_v49 = vpop.eup %10889  ;;  %v5592_v28 = vmul.f32 %v10888_v13, %v17366_v46  ;;  %v17391_v13 = vld [vmem:[#allocation349_spill] sm:$0xff] }
 0xa95   :  { %v10892_v42 = vpop.eup %10891  ;;  %v5626_v9 = vpack.c.bf16 %v5598_v6, %v5594_v50  ;;  %v5596_v34 = vmul.f32 %v10890_v49, %v17367_v23  ;;  %v17392_v49 = vld [vmem:[#allocation306_spill] sm:$0xff] }
 0xa96   :  { %v10894_v11 = vpop.eup %10893  ;;  %v5586_v36 = vmul.f32 %v10892_v42, %v17368_v32 }
 0xa97   :  { %v10896_v30 = vpop.eup %10895  ;;  %v5590_v15 = vmul.f32 %v10894_v11, %v17369_v59  ;;  %v5625_v48 = vpack.c.bf16 %v5596_v34, %v5592_v28  ;;  %v17395_v11 = vld [vmem:[#allocation341_spill] sm:$0xff] }
 0xa98   :  { %v10898_v4 = vpop.eup %10897  ;;  %v5584_v38 = vmul.f32 %v10896_v30, %v17370_v41  ;;  %v17396_v30 = vld [vmem:[#allocation337_spill] sm:$0xff] }
 0xa99   :  { %v10900_v58 = vpop.eup %10899  ;;  %5681 = vmatpush1.bf16.xpose.msra.mxu0 %v5627_v54  ;;  %v5624_v26 = vpack.c.bf16 %v5590_v15, %v5586_v36  ;;  %v5588_v35 = vmul.f32 %v10898_v4, %v17371_v19  ;;  %v17397_v4 = vld [vmem:[#allocation333_spill] sm:$0xff] }
 0xa9a   :  { %v10902_v47 = vpop.eup %10901  ;;  %9913 = vmatprep.subr.msk.bf16.mxu0 %vm5649_vm5, %v5626_v9  ;;  %v5548_v56 = vadd.f32 1.0, %v10900_v58  ;;  %v9947_v58 = vcombine.low %v17397_v4, %v17396_v30  ;;  %v17398_v28 = vld [vmem:[#allocation329_spill] sm:$0xff] }
 0xa9b   :  { %v10904_v25 = vpop.eup %10903  ;;  %v5550_v1 = vadd.f32 1.0, %v10902_v47  ;;  %v5623_v18 = vpack.c.bf16 %v5588_v35, %v5584_v38  ;;  %v17399_v34 = vld [vmem:[#allocation325_spill] sm:$0xff] }
 0xa9c   :  { %v10906_v3 = vpop.eup %10905  ;;  %10915 = vrcp.f32 %v5548_v56  ;;  %v5547_v60 = vadd.f32 1.0, %v10904_v25  ;;  %v9940_v47 = vcombine.high %v17399_v34, %v17398_v28  ;;  %v9939_v36 = vcombine.low %v17399_v34, %v17398_v28  ;;  %v17400_v15 = vld [vmem:[#allocation321_spill] sm:$0xff]  ;;  %v17424_v34 = vld [vmem:[#allocation330_spill] sm:$0xff] }
 0xa9d   :  { %v10908_v40 = vpop.eup %10907  ;;  %10917 = vrcp.f32 %v5550_v1  ;;  %v5549_v63 = vadd.f32 1.0, %v10906_v3  ;;  %v17401_v56 = vld [vmem:[#allocation317_spill] sm:$0xff]  ;;  %v17402_v3 = vld [vmem:[#allocation311_spill] sm:$0xff] }
 0xa9e   :  { %v10910_v46 = vpop.eup %10909  ;;  %10919 = vrcp.f32 %v5547_v60  ;;  %v5544_v23 = vadd.f32 1.0, %v10908_v40  ;;  %v9932_v25 = vcombine.high %v17401_v56, %v17400_v15  ;;  %v9931_v1 = vcombine.low %v17401_v56, %v17400_v15  ;;  %v17403_v60 = vld [vmem:[#allocation307_spill] sm:$0xff]  ;;  %v17426_v56 = vld [vmem:[#allocation322_spill] sm:$0xff] }
 0xa9f   :  { %v10912_v57 = vpop.eup %10911  ;;  %10921 = vrcp.f32 %v5549_v63  ;;  %v5546_v16 = vadd.f32 1.0, %v10910_v46  ;;  %v9920_v40 = vcombine.high %v17403_v60, %v17402_v3  ;;  %v17404_v63 = vld [vmem:[#allocation313_spill] sm:$0xff] }
 0xaa0   :  { %v10914_v32 = vpop.eup %10913  ;;  %10923 = vrcp.f32 %v5544_v23  ;;  %v5543_v59 = vadd.f32 1.0, %v10912_v57  ;;  %v17405_v46 = vld [vmem:[#allocation309_spill] sm:$0xff]  ;;  %v17406_v57 = vld [vmem:[#allocation352_spill] sm:$0xff] }
 0xaa1   :  { %5683 = vmatpush1.bf16.xpose.msra.mxu0 %v5625_v48  ;;  %10925 = vrcp.f32 %v5546_v16  ;;  %v5545_v2 = vadd.f32 1.0, %v10914_v32  ;;  %v9919_v48 = vcombine.low %v17403_v60, %v17402_v3  ;;  %6033 = vmatprep.subr.bf16.mxu1 %v9920_v40  ;;  %v9923_v23 = vcombine.low %v17405_v46, %v17404_v63  ;;  %v17407_v16 = vld [vmem:[#allocation348_spill] sm:$0xff]  ;;  %v17428_v60 = vld [vmem:[#allocation314_spill] sm:$0xff] }
 0xaa2   :  { %9914 = vmatprep.subr.msk.bf16.mxu0 %vm5649_vm5, %v5624_v26  ;;  %10927 = vrcp.f32 %v5543_v59  ;;  %v9924_v26 = vcombine.high %v17405_v46, %v17404_v63  ;;  %v9962_v32 = vcombine.high %v17407_v16, %v17406_v57  ;;  %v17429_v40 = vld [vmem:[#allocation310_spill] sm:$0xff] }
 0xaa3   :  { %10929 = vrcp.f32 %v5545_v2  ;;  %6034 = vmatpush1.bf16.msra.mxu1 %v9919_v48  ;;  %v9961_v2 = vcombine.low %v17407_v16, %v17406_v57  ;;  %v9926_v48 = vcombine.high %v17429_v40, %v17428_v60  ;;  %v9925_v63 = vcombine.low %v17429_v40, %v17428_v60  ;;  %v6392_v46 = vld [vmem:[%s17244_s9 + $0xc8] sm:$0xff]  ;;  %v6383_v57 = vld [vmem:[%s17244_s9 + $0x80] sm:$0xff] }
 0xaa4   :  { %6076 = vmatprep.subr.bf16.mxu1 %v9962_v32  ;;  %v6376_v16 = vld [vmem:[%s17244_s9 + $0x48] sm:$0xff]  ;;  %v6375_v32 = vld [vmem:[%s17244_s9 + $0x40] sm:$0xff] }
 0xaa9   :  { %v10916_v14 = vpop.eup %10915  ;;  %5685 = vmatpush1.bf16.xpose.msra.mxu0 %v5623_v18 }
 0xaaa   :  { %v10918_v45 = vpop.eup %10917  ;;  %v5578_v5 = vmul.f32 %v10916_v14, %v17380_v43  ;;  %v17408_v14 = vld [vmem:[#allocation344_spill] sm:$0xff] }
 0xaab   :  { %v10920_v22 = vpop.eup %10919  ;;  %v5582_v29 = vmul.f32 %v10918_v45, %v17383_v39  ;;  %v17409_v45 = vld [vmem:[#allocation340_spill] sm:$0xff] }
 0xaac   :  { %v10922_v52 = vpop.eup %10921  ;;  %v5576_v41 = vmul.f32 %v10920_v22, %v17384_v37 }
 0xaad   :  { %v10924_v33 = vpop.eup %10923  ;;  %v5622_v19 = vpack.c.bf16 %v5582_v29, %v5578_v5  ;;  %v5580_v31 = vmul.f32 %v10922_v52, %v17385_v20  ;;  %v17390_v20 = vld [vmem:[#allocation353_spill] sm:$0xff]  ;;  %v9954_v5 = vcombine.high %v17409_v45, %v17408_v14  ;;  %v9953_v52 = vcombine.low %v17409_v45, %v17408_v14  ;;  %v6386_v14 = vld [vmem:[%s17244_s9 + $0x98] sm:$0xff]  ;;  %v6385_v45 = vld [vmem:[%s17244_s9 + $0x90] sm:$0xff] }
 0xaae   :  { %v10926_v12 = vpop.eup %10925  ;;  %v5570_v8 = vmul.f32 %v10924_v33, %v17386_v10  ;;  %v9964_v6 = vcombine.high %v17391_v13, %v17390_v20  ;;  %v9907_v10 = vcombine.low %v17362_v61, %v17361_v53  ;;  %v9963_v54 = vcombine.low %v17391_v13, %v17390_v20  ;;  %v17411_v33 = vld [vmem:[#allocation332_spill] sm:$0xff] }
 0xaaf   :  { %v10928_v24 = vpop.eup %10927  ;;  %9915 = vmatprep.subr.msk.bf16.mxu0 %vm5649_vm5, %v5622_v19  ;;  %v5621_v0 = vpack.c.bf16 %v5580_v31, %v5576_v41  ;;  %v5574_v51 = vmul.f32 %v10926_v12, %v17387_v27  ;;  %v17393_v27 = vld [vmem:[#allocation305_spill] sm:$0xff]  ;;  %v9948_v53 = vcombine.high %v17397_v4, %v17396_v30  ;;  %v17410_v41 = vld [vmem:[#allocation336_spill] sm:$0xff] }
 0xab0   :  { %v10930_v43 = vpop.eup %10929  ;;  %v5568_v39 = vmul.f32 %v10928_v24, %v17388_v55  ;;  %v9910_v42 = vcombine.high %v17393_v27, %v17392_v49  ;;  %v17394_v55 = vld [vmem:[#allocation345_spill] sm:$0xff]  ;;  %v9909_v61 = vcombine.low %v17393_v27, %v17392_v49  ;;  %v9946_v19 = vcombine.high %v17411_v33, %v17410_v41 }
 0xab1   :  { %5687 = vmatpush1.bf16.xpose.msra.mxu0 %v5621_v0  ;;  %v5620_v21 = vpack.c.bf16 %v5574_v51, %v5570_v8  ;;  %v5572_v37 = vmul.f32 %v10930_v43, %v17389_v62  ;;  %v9956_v62 = vcombine.high %v17395_v11, %v17394_v55  ;;  %v9955_v9 = vcombine.low %v17395_v11, %v17394_v55  ;;  %v17412_v0 = vld [vmem:[#allocation328_spill] sm:$0xff] }
 0xab2   :  { %v9945_v8 = vcombine.low %v17411_v33, %v17410_v41  ;;  %v17413_v51 = vld [vmem:[#allocation324_spill] sm:$0xff] }
 0xab3   :  { %9916 = vmatprep.subr.msk.bf16.mxu0 %vm5649_vm5, %v5620_v21  ;;  %v5619_v50 = vpack.c.bf16 %v5572_v37, %v5568_v39  ;;  %v9938_v43 = vcombine.high %v17413_v51, %v17412_v0  ;;  %v9937_v39 = vcombine.low %v17413_v51, %v17412_v0  ;;  %v17414_v37 = vld [vmem:[#allocation320_spill] sm:$0xff]  ;;  %v6240_v51 = vld [vmem:[%s17245_s6 + $0x48] sm:$0xff] }
 0xab4   :  { %v6398_v41 = vld [vmem:[%s17244_s9 + $0xf8] sm:$0xff] }
 0xab9   :  { %5689 = vmatpush1.bf16.xpose.msra.mxu0 %v5619_v50  ;;  %v17415_v50 = vld [vmem:[#allocation316_spill] sm:$0xff] }
 0xaba   :  { %6129 = vmatprep.subr.bf16.mxu0 %v9964_v6  ;;  %v9930_v20 = vcombine.high %v17415_v50, %v17414_v37  ;;  %v9929_v13 = vcombine.low %v17415_v50, %v17414_v37  ;;  %v17416_v6 = vld [vmem:[#allocation312_spill] sm:$0xff]  ;;  %v6244_v37 = vld [vmem:[%s17245_s6 + $0x68] sm:$0xff] }
 0xabb   :  { %v6247_v50 = vld [vmem:[%s17245_s6 + $0x80] sm:$0xff] }
 0xac0   :  { %5707 = vmatmul.mubr.bf16.vlgmr.msra.gmra.mxu0 %v9907_v10  ;;  %v17417_v10 = vld [vmem:[#allocation308_spill] sm:$0xff] }
 0xac1   :  { %9918 = vmatprep.mubr.msk.bf16.mxu0 %vm5649_vm5, %v9910_v42  ;;  %6130 = vmatpush1.bf16.msra.mxu0 %v9963_v54  ;;  %v9922_v49 = vcombine.high %v17417_v10, %v17416_v6  ;;  %v9921_v27 = vcombine.low %v17417_v10, %v17416_v6  ;;  %v17418_v42 = vld [vmem:[#allocation354_spill] sm:$0xff] }
 0xac2   :  { %6131 = vmatprep.subr.bf16.mxu0 %v9956_v62  ;;  %v17419_v54 = vld [vmem:[#allocation350_spill] sm:$0xff] }
 0xac3   :  { %v9966_v55 = vcombine.high %v17419_v54, %v17418_v42  ;;  %v9965_v11 = vcombine.low %v17419_v54, %v17418_v42  ;;  %v17420_v62 = vld [vmem:[#allocation346_spill] sm:$0xff] }
 0xac4   :  { %v6236_v6 = vld [vmem:[%s17245_s6 + $0x28] sm:$0xff] }
 0xac5   :  { %6132 = vmatpush1.bf16.msra.mxu0 %v9955_v9  ;;  %v17421_v9 = vld [vmem:[#allocation342_spill] sm:$0xff] }
 0xac6   :  { %6133 = vmatprep.subr.bf16.mxu0 %v9948_v53  ;;  %v9958_v30 = vcombine.high %v17421_v9, %v17420_v62  ;;  %v9957_v4 = vcombine.low %v17421_v9, %v17420_v62  ;;  %v17422_v53 = vld [vmem:[#allocation338_spill] sm:$0xff] }
 0xac7   :  { %v6248_v42 = vld [vmem:[%s17245_s6 + $0x88] sm:$0xff] }
 0xac8   :  { %5715 = vmatmul.mubr.bf16.gmra.mxu0 %v9909_v61  ;;  %v17423_v61 = vld [vmem:[#allocation334_spill] sm:$0xff] }
 0xac9   :  { %6134 = vmatpush1.bf16.msra.mxu0 %v9947_v58  ;;  %6157 = vmatprep.mubr.bf16.mxu0 %v11214_v44  ;;  %v9950_v58 = vcombine.high %v17423_v61, %v17422_v53  ;;  %v9949_v28 = vcombine.low %v17423_v61, %v17422_v53  ;;  %v6252_v54 = vld [vmem:[%s17245_s6 + $0xa8] sm:$0xff]  ;;  %v6255_v53 = vld [vmem:[%s17245_s6 + $0xc0] sm:$0xff] }
 0xaca   :  { %6135 = vmatprep.subr.bf16.mxu0 %v9940_v47  ;;  %v17425_v47 = vld [vmem:[#allocation326_spill] sm:$0xff] }
 0xacb   :  { %v9941_v15 = vcombine.low %v17425_v47, %v17424_v34 }
 0xacd   :  { %6136 = vmatpush1.bf16.msra.mxu0 %v9939_v36  ;;  %v9942_v36 = vcombine.high %v17425_v47, %v17424_v34 }
 0xace   :  { %6137 = vmatprep.subr.bf16.mxu0 %v9932_v25  ;;  %v17427_v25 = vld [vmem:[#allocation318_spill] sm:$0xff] }
 0xacf   :  { %v9933_v3 = vcombine.low %v17427_v25, %v17426_v56 }
 0xad1   :  { %6138 = vmatpush1.bf16.msra.mxu0 %v9931_v1  ;;  %v9934_v1 = vcombine.high %v17427_v25, %v17426_v56  ;;  %v6256_v25 = vld [vmem:[%s17245_s6 + $0xc8] sm:$0xff] }
 0xad2   :  { %6139 = vmatprep.subr.bf16.mxu0 %v9924_v26  ;;  %v6391_v26 = vld [vmem:[%s17244_s9 + $0xc0] sm:$0xff] }
 0xad5   :  { %6140 = vmatpush1.bf16.msra.mxu0 %v9923_v23  ;;  %v6384_v23 = vld [vmem:[%s17244_s9 + $0x88] sm:$0xff] }
 0xad6   :  { %6423 = vmatprep.subr.mxu0 %v6392_v46 }
 0xb80   :  { %v5708_v59 = vpop.f32.mrf.mxu0 }
 0xb82   :  { %v5710_v38 = vpop.f32.mrf.mxu0 }
 0xb83   :  { %v6367_v38 = vld [vmem:[%s17244_s9] sm:$0xff] }
 0xb84   :  { %v5711_v35 = vpop.f32.mrf.mxu0 }
 0xb85   :  { %v15058_v18 = vpack.c.bf16 %v5711_v35, %v5708_v59  ;;  %v6368_v59 = vld [vmem:[%s17244_s9 + $0x8] sm:$0xff] }
 0xb86   :  { %v5713_v22 = vpop.f32.mrf.mxu0  ;;  %v6396_v35 = vld [vmem:[%s17244_s9 + $0xe8] sm:$0xff] }
 0xb87   :  { %9967 = vmatmul.mubr.msk.bf16.vlgmr.msra.gmra.mxu1 %vm3127_vm3, %v15058_v18  ;;  %9971 = vmatmul.mubr.msk.bf16.vlgmr.msra.gmra.mxu0 %vm3127_vm3, %v15058_v18  ;;  %v6377_v22 = vld [vmem:[%s17244_s9 + $0x50] sm:$0xff] }
 0xb88   :  { %6077 = vmatpush1.bf16.msra.mxu1 %v9961_v2  ;;  %v5716_v29 = vpop.f32.mrf.mxu0  ;;  %6061 = vmatprep.mubr.bf16.mxu1 %v11214_v44  ;;  %v6394_v2 = vld [vmem:[%s17244_s9 + $0xd8] sm:$0xff] }
 0xb89   :  { %6078 = vmatprep.subr.bf16.mxu1 %v9954_v5  ;;  %6167 = vmatprep.mubr.bf16.mxu0 %v11214_v44  ;;  %v6378_v5 = vld [vmem:[%s17244_s9 + $0x58] sm:$0xff] }
 0xb8a   :  { %v5718_v31 = vpop.f32.mrf.mxu0  ;;  %6424 = vmatpush1.xpose.msra.mxu0 %v6391_v26 }
 0xb8b   :  { %6425 = vmatprep.subr.mxu0 %v6384_v23 }
 0xb8c   :  { %6079 = vmatpush1.bf16.msra.mxu1 %v9953_v52  ;;  %v5719_v12 = vpop.f32.mrf.mxu0  ;;  %v6369_v52 = vld [vmem:[%s17244_s9 + $0x10] sm:$0xff] }
 0xb8d   :  { %v5724_v24 = vpack.c.bf16 %v5719_v12, %v5716_v29  ;;  %6080 = vmatprep.subr.bf16.mxu1 %v9946_v19  ;;  %v6370_v29 = vld [vmem:[%s17244_s9 + $0x18] sm:$0xff] }
 0xb8e   :  { %v5721_v21 = vpop.f32.mrf.mxu0  ;;  %6426 = vmatpush1.xpose.msra.mxu0 %v6383_v57 }
 0xb8f   :  { %9968 = vmatmul.mubr.msk.bf16.gmra.mxu1 %vm3127_vm3, %v5724_v24  ;;  %9972 = vmatmul.mubr.msk.bf16.gmra.mxu0 %vm3127_vm3, %v5724_v24 }
 0xb90   :  { %6081 = vmatpush1.bf16.msra.mxu1 %v9945_v8  ;;  %6104 = vmatprep.mubr.bf16.mxu1 %v11214_v44 }
 0xb91   :  { %6082 = vmatprep.subr.bf16.mxu1 %v9938_v43  ;;  %6427 = vmatprep.subr.mxu0 %v6376_v16  ;;  %v6231_v43 = vld [vmem:[%s17245_s6] sm:$0xff] }
 0xb92   :  { %6428 = vmatpush1.xpose.msra.mxu0 %v6375_v32 }
 0xb93   :  { %6429 = vmatprep.subr.mxu0 %v6368_v59  ;;  %v6259_v59 = vld [vmem:[%s17245_s6 + $0xe0] sm:$0xff] }
 0xb94   :  { %6083 = vmatpush1.bf16.msra.mxu1 %v9937_v39 }
 0xb95   :  { %6084 = vmatprep.subr.bf16.mxu1 %v9930_v20  ;;  %v6232_v20 = vld [vmem:[%s17245_s6 + $0x8] sm:$0xff] }
 0xb96   :  { %6430 = vmatpush1.xpose.msra.mxu0 %v6367_v38 }
 0xb97   :  { %6563 = vmatprep.subr.mxu0 %v6396_v35 }
 0xb98   :  { %6085 = vmatpush1.bf16.msra.mxu1 %v9929_v13 }
 0xb99   :  { %6086 = vmatprep.subr.bf16.mxu1 %v9922_v49 }
 0xb9c   :  { %6087 = vmatpush1.bf16.msra.mxu1 %v9921_v27 }
 0xb9d   :  { %6182 = vmatprep.subr.bf16.mxu1 %v9966_v55 }
 0xb9f   :  { %9969 = vmatmul.mubr.msk.bf16.vlgmr.msra.gmra.mxu1 %vm3127_vm3, %v15058_v18 }
 0xba0   :  { %6183 = vmatpush1.bf16.msra.mxu1 %v9965_v11  ;;  %6114 = vmatprep.mubr.bf16.mxu1 %v11214_v44 }
 0xba1   :  { %6184 = vmatprep.subr.bf16.mxu1 %v9958_v30 }
 0xba4   :  { %6185 = vmatpush1.bf16.msra.mxu1 %v9957_v4 }
 0xba5   :  { %6186 = vmatprep.subr.bf16.mxu1 %v9950_v58 }
 0xba7   :  { %9970 = vmatmul.mubr.msk.bf16.gmra.mxu1 %vm3127_vm3, %v5724_v24 }
 0xba8   :  { %6187 = vmatpush1.bf16.msra.mxu1 %v9949_v28  ;;  %6210 = vmatprep.mubr.bf16.mxu1 %v11214_v44  ;;  %v6243_v28 = vld [vmem:[%s17245_s6 + $0x60] sm:$0xff] }
 0xba9   :  { %6188 = vmatprep.subr.bf16.mxu1 %v9942_v36 }
 0xbac   :  { %6189 = vmatpush1.bf16.msra.mxu1 %v9941_v15 }
 0xbad   :  { %6190 = vmatprep.subr.bf16.mxu1 %v9934_v1  ;;  %v6260_v1 = vld [vmem:[%s17245_s6 + $0xe8] sm:$0xff] }
 0xbb0   :  { %6191 = vmatpush1.bf16.msra.mxu1 %v9933_v3  ;;  %v6235_v3 = vld [vmem:[%s17245_s6 + $0x20] sm:$0xff] }
 0xbb1   :  { %6192 = vmatprep.subr.bf16.mxu1 %v9926_v48  ;;  %v6251_v48 = vld [vmem:[%s17245_s6 + $0xa0] sm:$0xff] }
 0xbb4   :  { %6193 = vmatpush1.bf16.msra.mxu1 %v9925_v63 }
 0xbb5   :  { %6493 = vmatprep.subr.mxu1 %v6394_v2 }
 0xbb7   :  { %9973 = vmatmul.mubr.msk.bf16.vlgmr.msra.gmra.mxu1 %vm3127_vm3, %v15058_v18  ;;  %v6393_v18 = vld [vmem:[%s17244_s9 + $0xd0] sm:$0xff] }
 0xbb8   :  { %6220 = vmatprep.mubr.bf16.mxu1 %v11214_v44  ;;  %6494 = vmatpush1.xpose.msra.mxu1 %v6393_v18 }
 0xbb9   :  { %6495 = vmatprep.subr.mxu1 %v6386_v14 }
 0xbbc   :  { %6496 = vmatpush1.xpose.msra.mxu1 %v6385_v45 }
 0xbbd   :  { %6497 = vmatprep.subr.mxu1 %v6378_v5 }
 0xbbf   :  { %9974 = vmatmul.mubr.msk.bf16.gmra.mxu1 %vm3127_vm3, %v5724_v24  ;;  %v6239_v24 = vld [vmem:[%s17245_s6 + $0x40] sm:$0xff] }
 0xbc0   :  { %6498 = vmatpush1.xpose.msra.mxu1 %v6377_v22 }
 0xbc1   :  { %6499 = vmatprep.subr.mxu1 %v6370_v29 }
 0xbc4   :  { %6500 = vmatpush1.xpose.msra.mxu1 %v6369_v52 }
 0xbc5   :  { %6633 = vmatprep.subr.mxu1 %v6398_v41 }
 0xc47   :  { %v6053_v33 = vpop.f32.mrf.mxu1  ;;  %v6159_v19 = vpop.f32.mrf.mxu0 }
 0xc48   :  { %v6263_v55 = vmul.f32 %v6231_v43, %v6053_v33  ;;  %v6267_v2 = vmul.f32 %v6235_v3, %v6159_v19  ;;  %v6257_v3 = vld [vmem:[%s17245_s6 + $0xd0] sm:$0xff] }
 0xc49   :  { %v6055_v31 = vpop.f32.mrf.mxu1  ;;  %v6161_v12 = vpop.f32.mrf.mxu0 }
 0xc4a   :  { %v6264_v9 = vmul.f32 %v6232_v20, %v6055_v31  ;;  %v6268_v61 = vmul.f32 %v6236_v6, %v6161_v12 }
 0xc4b   :  { %v6057_v8 = vpop.f32.mrf.mxu1  ;;  %v6163_v0 = vpop.f32.mrf.mxu0 }
 0xc4c   :  { %v6271_v13 = vmul.f32 %v6239_v24, %v6057_v8  ;;  %v6275_v46 = vmul.f32 %v6243_v28, %v6163_v0  ;;  %v6234_v28 = vld [vmem:[%s17245_s6 + $0x18] sm:$0xff] }
 0xc4d   :  { %v6059_v21 = vpop.f32.mrf.mxu1  ;;  %v6165_v39 = vpop.f32.mrf.mxu0 }
 0xc4e   :  { %v6272_v10 = vmul.f32 %v6240_v51, %v6059_v21  ;;  %v6276_v11 = vmul.f32 %v6244_v37, %v6165_v39  ;;  %v6295_v58 = vadd.f32 %v6271_v13, %v6263_v55  ;;  %v6331_v22 = vadd.f32 %v6275_v46, %v6267_v2  ;;  %v6380_v46 = vld [vmem:[%s17244_s9 + $0x68] sm:$0xff] }
 0xc4f   :  { %v6063_v49 = vpop.f32.mrf.mxu1  ;;  %v6169_v27 = vpop.f32.mrf.mxu0 }
 0xc50   :  { %v6279_v62 = vmul.f32 %v6247_v50, %v6063_v49  ;;  %v6304_v36 = vadd.f32 %v6272_v10, %v6264_v9  ;;  %v6340_v60 = vadd.f32 %v6276_v11, %v6268_v61  ;;  %v6283_v18 = vmul.f32 %v6251_v48, %v6169_v27  ;;  %v6241_v49 = vld [vmem:[%s17245_s6 + $0x50] sm:$0xff]  ;;  %v6242_v9 = vld [vmem:[%s17245_s6 + $0x58] sm:$0xff] }
 0xc51   :  { %v6065_v30 = vpop.f32.mrf.mxu1  ;;  %v6171_v4 = vpop.f32.mrf.mxu0 }
 0xc52   :  { %v6280_v34 = vmul.f32 %v6248_v42, %v6065_v30  ;;  %v6284_v47 = vmul.f32 %v6252_v54, %v6171_v4  ;;  %v6296_v40 = vadd.f32 %v6295_v58, %v6279_v62  ;;  %v6332_v31 = vadd.f32 %v6331_v22, %v6283_v18  ;;  %v6233_v42 = vld [vmem:[%s17245_s6 + $0x10] sm:$0xff]  ;;  %v6395_v4 = vld [vmem:[%s17244_s9 + $0xe0] sm:$0xff]  ;;  %v6388_v58 = vld [vmem:[%s17244_s9 + $0xa8] sm:$0xff] }
 0xc53   :  { %v6067_v15 = vpop.f32.mrf.mxu1  ;;  %v6173_v56 = vpop.f32.mrf.mxu0  ;;  %v6249_v30 = vld [vmem:[%s17245_s6 + $0x90] sm:$0xff] }
 0xc54   :  { %v6287_v63 = vmul.f32 %v6255_v53, %v6067_v15  ;;  %v6305_v26 = vadd.f32 %v6304_v36, %v6280_v34  ;;  %v6341_v16 = vadd.f32 %v6340_v60, %v6284_v47  ;;  %v6291_v29 = vmul.f32 %v6259_v59, %v6173_v56  ;;  %v6250_v47 = vld [vmem:[%s17245_s6 + $0x98] sm:$0xff]  ;;  %v6387_v60 = vld [vmem:[%s17244_s9 + $0xa0] sm:$0xff] }
 0xc55   :  { %v6069_v23 = vpop.f32.mrf.mxu1  ;;  %v6175_v57 = vpop.f32.mrf.mxu0 }
 0xc56   :  { %v6297_v32 = vadd.f32 %v6296_v40, %v6287_v63  ;;  %v6288_v38 = vmul.f32 %v6256_v25, %v6069_v23  ;;  %v6292_v35 = vmul.f32 %v6260_v1, %v6175_v57  ;;  %v6333_v0 = vadd.f32 %v6332_v31, %v6291_v29  ;;  %v6258_v23 = vld [vmem:[%s17245_s6 + $0xd8] sm:$0xff] }
 0xc58   :  { %v6298_v14 = vrot.slane %v6297_v32, 4  ;;  %v6306_v45 = vadd.f32 %v6305_v26, %v6288_v38  ;;  %v6342_v5 = vadd.f32 %v6341_v16, %v6292_v35  ;;  %v6334_v50 = vrot.slane %v6333_v0, 4  ;;  %v6379_v35 = vld [vmem:[%s17244_s9 + $0x60] sm:$0xff] }
 0xc5a   :  { %v6299_v52 = vadd.f32 %v6298_v14, %v6297_v32  ;;  %v6307_v41 = vrot.slane %v6306_v45, 4  ;;  %v6343_v33 = vrot.slane %v6342_v5, 4  ;;  %v6335_v11 = vadd.f32 %v6334_v50, %v6333_v0  ;;  %v6245_v50 = vld [vmem:[%s17245_s6 + $0x70] sm:$0xff] }
 0xc5c   :  { %v6300_v12 = vrot.slane %v6299_v52, 2  ;;  %v6308_v8 = vadd.f32 %v6307_v41, %v6306_v45  ;;  %v6344_v24 = vadd.f32 %v6343_v33, %v6342_v5  ;;  %v6336_v25 = vrot.slane %v6335_v11, 2  ;;  %v6372_v45 = vld [vmem:[%s17244_s9 + $0x28] sm:$0xff] }
 0xc5e   :  { %v6301_v51 = vadd.f32 %v6300_v12, %v6299_v52  ;;  %v6309_v43 = vrot.slane %v6308_v8, 2  ;;  %v6345_v21 = vrot.slane %v6344_v24, 2  ;;  %v6337_v59 = vadd.f32 %v6336_v25, %v6335_v11  ;;  %v6371_v52 = vld [vmem:[%s17244_s9 + $0x20] sm:$0xff]  ;;  %v6238_v11 = vld [vmem:[%s17245_s6 + $0x38] sm:$0xff] }
 0xc5f   :  { %v6106_v39 = vpop.f32.mrf.mxu1  ;;  %v6262_v25 = vld [vmem:[%s17245_s6 + $0xf8] sm:$0xff] }
 0xc60   :  { %v6310_v37 = vadd.f32 %v6309_v43, %v6308_v8  ;;  %v6302_v19 = vrot.slane %v6301_v51, 1  ;;  %v6346_v13 = vadd.f32 %v6345_v21, %v6344_v24  ;;  %v6265_v36 = vmul.f32 %v6233_v42, %v6106_v39  ;;  %v6397_v42 = vld [vmem:[%s17244_s9 + $0xf0] sm:$0xff] }
 0xc61   :  { %v6108_v20 = vpop.f32.mrf.mxu1  ;;  %v6338_v29 = vrot.slane %v6337_v59, 1 }
 0xc62   :  { %v6311_v6 = vrot.slane %v6310_v37, 1  ;;  %v6347_v27 = vrot.slane %v6346_v13, 1  ;;  %v6303_v55 = vadd.f32 %v6302_v19, %v6301_v51  ;;  %v6266_v40 = vmul.f32 %v6234_v28, %v6108_v20  ;;  %v6237_v20 = vld [vmem:[%s17245_s6 + $0x30] sm:$0xff] }
 0xc63   :  { %v6110_v10 = vpop.f32.mrf.mxu1  ;;  %v6339_v8 = vadd.f32 %v6338_v29, %v6337_v59  ;;  %v6389_v28 = vld [vmem:[%s17244_s9 + $0xb0] sm:$0xff] }
 0xc64   :  { %v6312_v54 = vadd.f32 %v6311_v6, %v6310_v37  ;;  %v6273_v53 = vmul.f32 %v6241_v49, %v6110_v10  ;;  %v6348_v61 = vadd.f32 %v6347_v27, %v6346_v13  ;;  %v6246_v49 = vld [vmem:[%s17245_s6 + $0x78] sm:$0xff]  ;;  %v6253_v27 = vld [vmem:[%s17245_s6 + $0xb0] sm:$0xff] }
 0xc65   :  { %v6112_v62 = vpop.f32.mrf.mxu1 }
 0xc66   :  { %6463 = vmatprep.mubr.f32.mxu0 %v6312_v54  ;;  %v6274_v15 = vmul.f32 %v6242_v9, %v6112_v62  ;;  %v6313_v48 = vadd.f32 %v6273_v53, %v6265_v36  ;;  %v6254_v9 = vld [vmem:[%s17245_s6 + $0xb8] sm:$0xff] }
 0xc67   :  { %v6116_v34 = vpop.f32.mrf.mxu1  ;;  %6464 = vmatmul.mubr.f32.vlgmr.msra.gmra.mxu0 %v6303_v55  ;;  %v6390_v55 = vld [vmem:[%s17244_s9 + $0xb8] sm:$0xff] }
 0xc68   :  { %v6281_v56 = vmul.f32 %v6249_v30, %v6116_v34  ;;  %6564 = vmatpush1.xpose.msra.mxu0 %v6395_v4  ;;  %6603 = vmatprep.mubr.f32.mxu0 %v6348_v61  ;;  %v6322_v57 = vadd.f32 %v6274_v15, %v6266_v40  ;;  %v6382_v15 = vld [vmem:[%s17244_s9 + $0x78] sm:$0xff] }
 0xc69   :  { %v6118_v1 = vpop.f32.mrf.mxu1  ;;  %6565 = vmatprep.subr.mxu0 %v6388_v58  ;;  %v6261_v58 = vld [vmem:[%s17245_s6 + $0xf0] sm:$0xff] }
 0xc6a   :  { %v6282_v63 = vmul.f32 %v6250_v47, %v6118_v1  ;;  %v6314_v16 = vadd.f32 %v6313_v48, %v6281_v56  ;;  %v6381_v48 = vld [vmem:[%s17244_s9 + $0x70] sm:$0xff] }
 0xc6b   :  { %v6120_v26 = vpop.f32.mrf.mxu1 }
 0xc6c   :  { %v6289_v32 = vmul.f32 %v6257_v3, %v6120_v26  ;;  %6566 = vmatpush1.xpose.msra.mxu0 %v6387_v60  ;;  %v6323_v2 = vadd.f32 %v6322_v57, %v6282_v63 }
 0xc6d   :  { %v6122_v38 = vpop.f32.mrf.mxu1  ;;  %6567 = vmatprep.subr.mxu0 %v6380_v46 }
 0xc6e   :  { %v6315_v18 = vadd.f32 %v6314_v16, %v6289_v32  ;;  %v6290_v14 = vmul.f32 %v6258_v23, %v6122_v38  ;;  %v6374_v23 = vld [vmem:[%s17244_s9 + $0x38] sm:$0xff]  ;;  %v6373_v32 = vld [vmem:[%s17244_s9 + $0x30] sm:$0xff] }
 0xc70   :  { %v6316_v5 = vrot.slane %v6315_v18, 4  ;;  %v6324_v22 = vadd.f32 %v6323_v2, %v6290_v14  ;;  %6568 = vmatpush1.xpose.msra.mxu0 %v6379_v35 }
 0xc71   :  { %6569 = vmatprep.subr.mxu0 %v6372_v45 }
 0xc72   :  { %v6317_v41 = vadd.f32 %v6316_v5, %v6315_v18  ;;  %v6325_v33 = vrot.slane %v6324_v22, 4 }
 0xc74   :  { %v6318_v31 = vrot.slane %v6317_v41, 2  ;;  %v6326_v12 = vadd.f32 %v6325_v33, %v6324_v22  ;;  %6570 = vmatpush1.xpose.msra.mxu0 %v6371_v52  ;;  %v9977_v33 = vld [vmem:[%s17247_s12 + $0x50] sm:$0xff] }
 0xc75   :  { %10194 = vmatprep.subr.mxu0 %v17246_v17 }
 0xc76   :  { %v6319_v24 = vadd.f32 %v6318_v31, %v6317_v41  ;;  %v6327_v0 = vrot.slane %v6326_v12, 2  ;;  %v9978_v41 = vld [vmem:[%s17247_s12 + $0x58] sm:$0xff]  ;;  %v9976_v31 = vld [vmem:[%s17247_s12 + $0x48] sm:$0xff] }
 0xc77   :  { %v6212_v51 = vpop.f32.mrf.mxu1  ;;  %6604 = vmatmul.mubr.f32.vlgmr.msra.gmra.mxu0 %v6339_v8 }
 0xc78   :  { %v6328_v43 = vadd.f32 %v6327_v0, %v6326_v12  ;;  %10202 = vmatprep.mubr.msk.f32.mxu0 %vm11215_vm4, %v17246_v17  ;;  %v6320_v21 = vrot.slane %v6319_v24, 1  ;;  %v6269_v30 = vmul.f32 %v6237_v20, %v6212_v51  ;;  %10195 = vmatpush3.msra.mxu0 %v9978_v41  ;;  %v9975_v12 = vld [vmem:[%s17247_s12 + $0x40] sm:$0xff] }
 0xc79   :  { %v6214_v39 = vpop.f32.mrf.mxu1  ;;  %10196 = vmatprep.subr.mxu0 %v17246_v17  ;;  %v6680_v20 = vld [vmem:[%s17248_s24 + $0x2] sm:$0x1] }
 0xc7a   :  { %v6329_v37 = vrot.slane %v6328_v43, 1  ;;  %v6321_v6 = vadd.f32 %v6320_v21, %v6319_v24  ;;  %v6270_v34 = vmul.f32 %v6238_v11, %v6214_v39  ;;  %10197 = vmatpush3.msra.mxu0 %v9977_v33 }
 0xc7b   :  { %v6216_v19 = vpop.f32.mrf.mxu1  ;;  %10198 = vmatprep.subr.mxu0 %v17246_v17 }
 0xc7c   :  { %v6330_v13 = vadd.f32 %v6329_v37, %v6328_v43  ;;  %v6277_v54 = vmul.f32 %v6245_v50, %v6216_v19  ;;  %10199 = vmatpush3.msra.mxu0 %v9976_v31 }
 0xc7d   :  { %v6218_v10 = vpop.f32.mrf.mxu1  ;;  %10200 = vmatprep.subr.mxu0 %v17246_v17 }
 0xc7e   :  { %6533 = vmatprep.mubr.f32.mxu1 %v6330_v13  ;;  %v6278_v4 = vmul.f32 %v6246_v49, %v6218_v10  ;;  %v6349_v47 = vadd.f32 %v6277_v54, %v6269_v30  ;;  %10201 = vmatpush3.msra.mxu0 %v9975_v12 }
 0xc7f   :  { %v6222_v62 = vpop.f32.mrf.mxu1  ;;  %6534 = vmatmul.mubr.f32.vlgmr.msra.gmra.mxu1 %v6321_v6 }
 0xc80   :  { %v6285_v53 = vmul.f32 %v6253_v27, %v6222_v62  ;;  %6634 = vmatpush1.xpose.msra.mxu1 %v6397_v42  ;;  %v6358_v1 = vadd.f32 %v6278_v4, %v6270_v34 }
 0xc81   :  { %v6224_v61 = vpop.f32.mrf.mxu1  ;;  %6635 = vmatprep.subr.mxu1 %v6390_v55 }
 0xc82   :  { %v6286_v36 = vmul.f32 %v6254_v9, %v6224_v61  ;;  %v6350_v3 = vadd.f32 %v6349_v47, %v6285_v53 }
 0xc83   :  { %v6226_v56 = vpop.f32.mrf.mxu1 }
 0xc84   :  { %v6293_v60 = vmul.f32 %v6261_v58, %v6226_v56  ;;  %6636 = vmatpush1.xpose.msra.mxu1 %v6389_v28  ;;  %v6359_v63 = vadd.f32 %v6358_v1, %v6286_v36 }
 0xc85   :  { %v6228_v40 = vpop.f32.mrf.mxu1  ;;  %6637 = vmatprep.subr.mxu1 %v6382_v15 }
 0xc86   :  { %v6351_v46 = vadd.f32 %v6350_v3, %v6293_v60  ;;  %v6294_v26 = vmul.f32 %v6262_v25, %v6228_v40 }
 0xc88   :  { %v6352_v57 = vrot.slane %v6351_v46, 4  ;;  %v6360_v16 = vadd.f32 %v6359_v63, %v6294_v26  ;;  %6638 = vmatpush1.xpose.msra.mxu1 %v6381_v48 }
 0xc89   :  { %6639 = vmatprep.subr.mxu1 %v6374_v23 }
 0xc8a   :  { %v6353_v59 = vadd.f32 %v6352_v57, %v6351_v46  ;;  %v6361_v38 = vrot.slane %v6360_v16, 4 }
 0xc8c   :  { %v6354_v35 = vrot.slane %v6353_v59, 2  ;;  %v6362_v2 = vadd.f32 %v6361_v38, %v6360_v16  ;;  %6640 = vmatpush1.xpose.msra.mxu1 %v6373_v32 }
 0xc8e   :  { %v6355_v18 = vadd.f32 %v6354_v35, %v6353_v59  ;;  %v6363_v14 = vrot.slane %v6362_v2, 2 }
 0xc90   :  { %v6364_v45 = vadd.f32 %v6363_v14, %v6362_v2  ;;  %v6356_v5 = vrot.slane %v6355_v18, 1 }
 0xc92   :  { %v6365_v22 = vrot.slane %v6364_v45, 1  ;;  %v6357_v52 = vadd.f32 %v6356_v5, %v6355_v18 }
 0xc94   :  { %v6366_v29 = vadd.f32 %v6365_v22, %v6364_v45 }
 0xc96   :  { %6673 = vmatprep.mubr.f32.mxu1 %v6366_v29 }
 0xc97   :  { %6674 = vmatmul.mubr.f32.vlgmr.msra.gmra.mxu1 %v6357_v52 }
 0xd27   :  { %v6465_v8 = vpop.f32.mrf.mxu0 }
 0xd29   :  { %v6467_v24 = vpop.f32.mrf.mxu0 }
 0xd37   :  { %v6605_v0 = vpop.f32.mrf.mxu0 }
 0xd39   :  { %v6607_v51 = vpop.f32.mrf.mxu0 }
 0xd3f   :  { %v6535_v43 = vpop.f32.mrf.mxu1 }
 0xd40   :  { %v6536_v39 = vadd.f32 %v6535_v43, %v6465_v8 }
 0xd41   :  { %v6537_v21 = vpop.f32.mrf.mxu1 }
 0xd42   :  { %v6606_v37 = vadd.f32 %v6605_v0, %v6536_v39 }
 0xd57   :  { %v6675_v19 = vpop.f32.mrf.mxu1 }
 0xd58   :  { %v6676_v50 = vadd.f32 %v6675_v19, %v6606_v37 }
 0xd59   :  { %v6677_v13 = vpop.f32.mrf.mxu1 }
 0xd5a   :  { %v6679_v6 = vmul.f32 0.015625, %v6676_v50 }
 0xd5c   :  { %v6681_v10 = vadd.f32 %v6680_v20, %v6679_v6 }
 0xd5e   :  { %v6682_v49 = vsub.f32 0.0, %v6681_v10 }
 0xd60   :  { %v6683_v27 = vmul.f32 1.442695, %v6682_v49 }
 0xd62   :  { %10931 = vpow2.f32 %v6683_v27 }
 0xd6f   :  { %v10932_v42 = vpop.eup %10931 }
 0xd70   :  { %v6685_v54 = vadd.f32 1.0, %v10932_v42 }
 0xd72   :  { %10933 = vrcp.f32 %v6685_v54 }
 0xd7f   :  { %v10934_v55 = vpop.eup %10933 }
 0xd80   :  { %v6687_v11 = vmul.f32 %v10934_v55, %v6681_v10 }
 0xd82   :  { %10203 = vmatmul.mubr.msk.f32.vlgmr.msra.gmra.mxu0 %vm1787_vm1, %v6687_v11 }
 0xe42   :  { %v6762_v62 = vpop.f32.mrf.mxu0 }
 0xe43   :  { %v15337_v9 = vadd.f32 %v6762_v62, %v14938_v7 }
 0xe44   :  { %v10204_v30 = vpop.f32.mrf.mxu0 }
 0xe45   :  { %11197 = dma.done.wait [#allocation17 + $0x9], 3072 }
 0xe46   :  { %11198 = vsyncadd [#allocation17 + $0x9], 4294964224 }
 0xe47   :  { %11199 = dma.done.wait [#allocation17 + $0xa], 512 }
 0xe48   :  { %11200 = vsyncadd [#allocation17 + $0xa], 4294966784  ;;  %v17430_v4 = vld [vmem:[#allocation376_spill] sm:$0xff]  ;;  %v17431_v61 = vld [vmem:[#allocation378_spill] sm:$0xff]  ;;  %7376 = vmatprep.mubr.bf16.mxu0 %v11214_v44 }
 0xe49   :  { %v6818_v53 = vsub.f32 0.0, %v17430_v4  ;;  %v6820_v58 = vsub.f32 0.0, %v17431_v61  ;;  %v17432_v28 = vld [vmem:[#allocation375_spill] sm:$0xff]  ;;  %v17433_v47 = vld [vmem:[#allocation377_spill] sm:$0xff] }
 0xe4a   :  { %v6817_v34 = vsub.f32 0.0, %v17432_v28  ;;  %v6819_v36 = vsub.f32 0.0, %v17433_v47 }
 0xe4b   :  { %11201 = dma.done.wait [#allocation17 + $0xb], 6144 }
 0xe4c   :  { %11202 = vsyncadd [#allocation17 + $0xb], 4294961152  ;;  %v17434_v15 = vld [vmem:[#allocation372_spill] sm:$0xff]  ;;  %v17435_v56 = vld [vmem:[#allocation374_spill] sm:$0xff]  ;;  %v6863_v60 = vmul.f32 1.442695, %v6818_v53 }
 0xe4d   :  { %v6814_v7 = vsub.f32 0.0, %v17434_v15  ;;  %v6816_v25 = vsub.f32 0.0, %v17435_v56  ;;  %v17436_v1 = vld [vmem:[#allocation371_spill] sm:$0xff]  ;;  %v6867_v40 = vmul.f32 1.442695, %v6820_v58  ;;  %v17437_v63 = vld [vmem:[#allocation380_spill] sm:$0xff] }
 0xe4e   :  { %v6813_v3 = vsub.f32 0.0, %v17436_v1  ;;  %v6861_v48 = vmul.f32 1.442695, %v6817_v34  ;;  %v17438_v46 = vld [vmem:[#allocation379_spill] sm:$0xff]  ;;  %v6865_v23 = vmul.f32 1.442695, %v6819_v36  ;;  %10935 = vpow2.f32 %v6863_v60 }
 0xe4f   :  { %v9981_v26 = vcombine.high %v17438_v46, %v17437_v63  ;;  %v17439_v57 = vld [vmem:[#allocation373_spill] sm:$0xff]  ;;  %v6855_v32 = vmul.f32 1.442695, %v6814_v7  ;;  %v17440_v59 = vld [vmem:[#allocation368_spill] sm:$0xff]  ;;  %10937 = vpow2.f32 %v6867_v40  ;;  %v6859_v35 = vmul.f32 1.442695, %v6816_v25 }
 0xe50   :  { %v6815_v16 = vsub.f32 0.0, %v17439_v57  ;;  %v6810_v38 = vsub.f32 0.0, %v17440_v59  ;;  %v17441_v2 = vld [vmem:[#allocation370_spill] sm:$0xff]  ;;  %10939 = vpow2.f32 %v6861_v48  ;;  %v6853_v14 = vmul.f32 1.442695, %v6813_v3  ;;  %v17442_v45 = vld [vmem:[#allocation367_spill] sm:$0xff] }
 0xe51   :  { %9990 = vmatprep.mubr.msk.bf16.mxu1 %vm5649_vm5, %v9981_v26  ;;  %v6812_v18 = vsub.f32 0.0, %v17441_v2  ;;  %v6809_v5 = vsub.f32 0.0, %v17442_v45  ;;  %10941 = vpow2.f32 %v6865_v23  ;;  %v17443_v29 = vld [vmem:[#allocation369_spill] sm:$0xff]  ;;  %v17444_v33 = vld [vmem:[#allocation364_spill] sm:$0xff]  ;;  %v17445_v8 = vld [vmem:[#allocation366_spill] sm:$0xff] }
 0xe52   :  { %v6857_v22 = vmul.f32 1.442695, %v6815_v16  ;;  %v6811_v52 = vsub.f32 0.0, %v17443_v29  ;;  %10943 = vpow2.f32 %v6855_v32  ;;  %v6847_v41 = vmul.f32 1.442695, %v6810_v38  ;;  %v17446_v51 = vld [vmem:[#allocation363_spill] sm:$0xff] }
 0xe53   :  { %v6806_v31 = vsub.f32 0.0, %v17444_v33  ;;  %10945 = vpow2.f32 %v6859_v35  ;;  %v6851_v12 = vmul.f32 1.442695, %v6812_v18  ;;  %v6808_v24 = vsub.f32 0.0, %v17445_v8  ;;  %v17447_v39 = vld [vmem:[#allocation365_spill] sm:$0xff]  ;;  %v17448_v6 = vld [vmem:[#allocation427_spill] sm:$0xff] }
 0xe54   :  { %10947 = vpow2.f32 %v6853_v14  ;;  %v6845_v0 = vmul.f32 1.442695, %v6809_v5  ;;  %v6805_v43 = vsub.f32 0.0, %v17446_v51  ;;  %v6849_v21 = vmul.f32 1.442695, %v6811_v52  ;;  %v17449_v10 = vld [vmem:[#allocation423_spill] sm:$0xff] }
 0xe55   :  { %10949 = vpow2.f32 %v6857_v22  ;;  %v6807_v37 = vsub.f32 0.0, %v17447_v39  ;;  %v6839_v19 = vmul.f32 1.442695, %v6806_v31  ;;  %v6843_v50 = vmul.f32 1.442695, %v6808_v24  ;;  %v17450_v54 = vld [vmem:[#allocation419_spill] sm:$0xff] }
 0xe56   :  { %10951 = vpow2.f32 %v6847_v41  ;;  %v6837_v20 = vmul.f32 1.442695, %v6805_v43  ;;  %v10033_v49 = vcombine.high %v17449_v10, %v17448_v6  ;;  %v10032_v27 = vcombine.low %v17449_v10, %v17448_v6  ;;  %v17451_v55 = vld [vmem:[#allocation415_spill] sm:$0xff] }
 0xe57   :  { %10953 = vpow2.f32 %v6851_v12  ;;  %v6841_v13 = vmul.f32 1.442695, %v6807_v37  ;;  %v10025_v11 = vcombine.high %v17451_v55, %v17450_v54  ;;  %v10024_v34 = vcombine.low %v17451_v55, %v17450_v54  ;;  %v17452_v25 = vld [vmem:[#allocation411_spill] sm:$0xff] }
 0xe58   :  { %10955 = vpow2.f32 %v6845_v0  ;;  %7348 = vmatprep.subr.bf16.mxu0 %v10033_v49  ;;  %v17453_v3 = vld [vmem:[#allocation407_spill] sm:$0xff] }
 0xe59   :  { %10957 = vpow2.f32 %v6849_v21  ;;  %7349 = vmatpush1.bf16.msra.mxu0 %v10032_v27  ;;  %v10017_v60 = vcombine.high %v17453_v3, %v17452_v25  ;;  %v10016_v38 = vcombine.low %v17453_v3, %v17452_v25  ;;  %v17454_v14 = vld [vmem:[#allocation403_spill] sm:$0xff]  ;;  %v17459_v27 = vld [vmem:[#allocation362_spill] sm:$0xff] }
 0xe5a   :  { %10959 = vpow2.f32 %v6839_v19  ;;  %7350 = vmatprep.subr.bf16.mxu0 %v10025_v11  ;;  %v17455_v5 = vld [vmem:[#allocation399_spill] sm:$0xff]  ;;  %v17456_v19 = vld [vmem:[#allocation360_spill] sm:$0xff] }
 0xe5b   :  { %v10936_v42 = vpop.eup %10935  ;;  %10961 = vpow2.f32 %v6843_v50  ;;  %v10009_v22 = vcombine.high %v17455_v5, %v17454_v14  ;;  %v10008_v43 = vcombine.low %v17455_v5, %v17454_v14  ;;  %v6802_v50 = vsub.f32 0.0, %v17456_v19  ;;  %v17460_v11 = vld [vmem:[#allocation359_spill] sm:$0xff] }
 0xe5c   :  { %v10938_v62 = vpop.eup %10937  ;;  %v6890_v30 = vadd.f32 1.0, %v10936_v42  ;;  %10963 = vpow2.f32 %v6837_v20  ;;  %v17457_v20 = vld [vmem:[#allocation395_spill] sm:$0xff]  ;;  %v6804_v42 = vsub.f32 0.0, %v17459_v27 }
 0xe5d   :  { %v10940_v53 = vpop.eup %10939  ;;  %v6892_v58 = vadd.f32 1.0, %v10938_v62  ;;  %10965 = vpow2.f32 %v6841_v13  ;;  %7351 = vmatpush1.bf16.msra.mxu0 %v10024_v34  ;;  %v17458_v13 = vld [vmem:[#allocation391_spill] sm:$0xff]  ;;  %v6801_v62 = vsub.f32 0.0, %v17460_v11  ;;  %v6831_v3 = vmul.f32 1.442695, %v6802_v50 }
 0xe5e   :  { %v10942_v36 = vpop.eup %10941  ;;  %10967 = vrcp.f32 %v6890_v30  ;;  %v6889_v7 = vadd.f32 1.0, %v10940_v53  ;;  %7352 = vmatprep.subr.bf16.mxu0 %v10017_v60  ;;  %v10001_v6 = vcombine.high %v17458_v13, %v17457_v20  ;;  %v17462_v60 = vld [vmem:[#allocation356_spill] sm:$0xff]  ;;  %v17464_v14 = vld [vmem:[#allocation355_spill] sm:$0xff] }
 0xe5f   :  { %v10944_v40 = vpop.eup %10943  ;;  %10969 = vrcp.f32 %v6892_v58  ;;  %v6891_v48 = vadd.f32 1.0, %v10942_v36  ;;  %v17461_v58 = vld [vmem:[#allocation361_spill] sm:$0xff]  ;;  %v10000_v36 = vcombine.low %v17458_v13, %v17457_v20  ;;  %v6797_v5 = vsub.f32 0.0, %v17464_v14 }
 0xe60   :  { %v10946_v26 = vpop.eup %10945  ;;  %10971 = vrcp.f32 %v6889_v7  ;;  %v6886_v23 = vadd.f32 1.0, %v10944_v40  ;;  %v6803_v34 = vsub.f32 0.0, %v17461_v58  ;;  %v6798_v40 = vsub.f32 0.0, %v17462_v60 }
 0xe61   :  { %v10948_v16 = vpop.eup %10947  ;;  %10973 = vrcp.f32 %v6891_v48  ;;  %v6888_v32 = vadd.f32 1.0, %v10946_v26  ;;  %7353 = vmatpush1.bf16.msra.mxu0 %v10016_v38 }
 0xe62   :  { %v10950_v35 = vpop.eup %10949  ;;  %10975 = vrcp.f32 %v6886_v23  ;;  %v6885_v18 = vadd.f32 1.0, %v10948_v16  ;;  %7354 = vmatprep.subr.bf16.mxu0 %v10009_v22  ;;  %v6835_v23 = vmul.f32 1.442695, %v6804_v42  ;;  %v17463_v16 = vld [vmem:[#allocation358_spill] sm:$0xff] }
 0xe63   :  { %v10952_v52 = vpop.eup %10951  ;;  %10977 = vrcp.f32 %v6888_v32  ;;  %v6887_v41 = vadd.f32 1.0, %v10950_v35  ;;  %v6800_v32 = vsub.f32 0.0, %v17463_v16 }
 0xe64   :  { %v10954_v31 = vpop.eup %10953  ;;  %10979 = vrcp.f32 %v6885_v18  ;;  %v6882_v12 = vadd.f32 1.0, %v10952_v52  ;;  %v6829_v18 = vmul.f32 1.442695, %v6801_v62 }
 0xe65   :  { %v10956_v24 = vpop.eup %10955  ;;  %10981 = vrcp.f32 %v6887_v41  ;;  %v6884_v0 = vadd.f32 1.0, %v10954_v31  ;;  %7355 = vmatpush1.bf16.msra.mxu0 %v10008_v43  ;;  %v6833_v41 = vmul.f32 1.442695, %v6803_v34  ;;  %v17465_v31 = vld [vmem:[#allocation357_spill] sm:$0xff]  ;;  %v6823_v43 = vmul.f32 1.442695, %v6798_v40 }
 0xe66   :  { %v10958_v21 = vpop.eup %10957  ;;  %10983 = vrcp.f32 %v6882_v12  ;;  %v6881_v37 = vadd.f32 1.0, %v10956_v24  ;;  %7356 = vmatprep.subr.bf16.mxu0 %v10001_v6  ;;  %v6799_v12 = vsub.f32 0.0, %v17465_v31  ;;  %v6827_v50 = vmul.f32 1.442695, %v6800_v32 }
 0xe67   :  { %v10960_v10 = vpop.eup %10959  ;;  %10985 = vrcp.f32 %v6884_v0  ;;  %v6883_v49 = vadd.f32 1.0, %v10958_v21 }
 0xe68   :  { %v10962_v54 = vpop.eup %10961  ;;  %10987 = vrcp.f32 %v6881_v37  ;;  %v6878_v55 = vadd.f32 1.0, %v10960_v10 }
 0xe69   :  { %v10964_v30 = vpop.eup %10963  ;;  %10989 = vrcp.f32 %v6883_v49  ;;  %v6880_v53 = vadd.f32 1.0, %v10962_v54  ;;  %7357 = vmatpush1.bf16.msra.mxu0 %v10000_v36 }
 0xe6a   :  { %v10966_v7 = vpop.eup %10965  ;;  %10991 = vrcp.f32 %v6878_v55  ;;  %v6877_v25 = vadd.f32 1.0, %v10964_v30 }
 0xe6b   :  { %v10968_v48 = vpop.eup %10967  ;;  %10993 = vrcp.f32 %v6880_v53  ;;  %v6879_v26 = vadd.f32 1.0, %v10966_v7 }
 0xe6c   :  { %v10970_v38 = vpop.eup %10969  ;;  %v6936_v35 = vmul.f32 %v10968_v48, %v17430_v4  ;;  %10995 = vrcp.f32 %v6877_v25 }
 0xe6d   :  { %v10972_v22 = vpop.eup %10971  ;;  %v6940_v52 = vmul.f32 %v10970_v38, %v17431_v61  ;;  %10997 = vrcp.f32 %v6879_v26  ;;  %v6821_v61 = vmul.f32 1.442695, %v6797_v5 }
 0xe6e   :  { %v10974_v24 = vpop.eup %10973  ;;  %v6934_v0 = vmul.f32 %v10972_v22, %v17432_v28  ;;  %10999 = vpow2.f32 %v6831_v3  ;;  %v6825_v28 = vmul.f32 1.442695, %v6799_v12 }
 0xe6f   :  { %v10976_v21 = vpop.eup %10975  ;;  %v6956_v37 = vpack.c.bf16 %v6940_v52, %v6936_v35  ;;  %v6938_v4 = vmul.f32 %v10974_v24, %v17433_v47  ;;  %11001 = vpow2.f32 %v6835_v23 }
 0xe70   :  { %v10978_v20 = vpop.eup %10977  ;;  %v6928_v13 = vmul.f32 %v10976_v21, %v17434_v15  ;;  %11003 = vpow2.f32 %v6829_v18 }
 0xe71   :  { %v10980_v6 = vpop.eup %10979  ;;  %9984 = vmatprep.subr.msk.bf16.mxu1 %vm5649_vm5, %v6956_v37  ;;  %v6955_v10 = vpack.c.bf16 %v6938_v4, %v6934_v0  ;;  %v6932_v49 = vmul.f32 %v10978_v20, %v17435_v56  ;;  %11005 = vpow2.f32 %v6833_v41 }
 0xe72   :  { %v10982_v42 = vpop.eup %10981  ;;  %11007 = vpow2.f32 %v6823_v43  ;;  %v6926_v55 = vmul.f32 %v10980_v6, %v17436_v1 }
 0xe73   :  { %v10984_v54 = vpop.eup %10983  ;;  %7004 = vmatpush1.bf16.xpose.msra.mxu1 %v6955_v10  ;;  %v6954_v47 = vpack.c.bf16 %v6932_v49, %v6928_v13  ;;  %v6930_v62 = vmul.f32 %v10982_v42, %v17439_v57  ;;  %11009 = vpow2.f32 %v6827_v50 }
 0xe74   :  { %v10986_v15 = vpop.eup %10985  ;;  %v6920_v30 = vmul.f32 %v10984_v54, %v17440_v59  ;;  %11011 = vpow2.f32 %v6821_v61 }
 0xe75   :  { %v10988_v53 = vpop.eup %10987  ;;  %9985 = vmatprep.subr.msk.bf16.mxu1 %vm5649_vm5, %v6954_v47  ;;  %v6924_v56 = vmul.f32 %v10986_v15, %v17441_v2  ;;  %11013 = vpow2.f32 %v6825_v28  ;;  %v6953_v7 = vpack.c.bf16 %v6930_v62, %v6926_v55 }
 0xe76   :  { %v10990_v34 = vpop.eup %10989  ;;  %v6918_v57 = vmul.f32 %v10988_v53, %v17442_v45  ;;  %v17467_v53 = vld [vmem:[#allocation425_spill] sm:$0xff] }
 0xe77   :  { %v10992_v36 = vpop.eup %10991  ;;  %v6952_v3 = vpack.c.bf16 %v6924_v56, %v6920_v30  ;;  %v6922_v59 = vmul.f32 %v10990_v34, %v17443_v29  ;;  %v17468_v34 = vld [vmem:[#allocation382_spill] sm:$0xff] }
 0xe78   :  { %v10994_v25 = vpop.eup %10993  ;;  %v6912_v23 = vmul.f32 %v10992_v36, %v17444_v33 }
 0xe79   :  { %v10996_v40 = vpop.eup %10995  ;;  %v6916_v2 = vmul.f32 %v10994_v25, %v17445_v8  ;;  %v6951_v52 = vpack.c.bf16 %v6922_v59, %v6918_v57  ;;  %v17471_v25 = vld [vmem:[#allocation417_spill] sm:$0xff] }
 0xe7a   :  { %v10998_v1 = vpop.eup %10997  ;;  %v6910_v43 = vmul.f32 %v10996_v40, %v17446_v51  ;;  %v17472_v40 = vld [vmem:[#allocation413_spill] sm:$0xff] }
 0xe7b   :  { %v11000_v48 = vpop.eup %10999  ;;  %7006 = vmatpush1.bf16.xpose.msra.mxu1 %v6953_v7  ;;  %v6950_v12 = vpack.c.bf16 %v6916_v2, %v6912_v23  ;;  %v6914_v21 = vmul.f32 %v10998_v1, %v17447_v39  ;;  %v17473_v1 = vld [vmem:[#allocation409_spill] sm:$0xff] }
 0xe7c   :  { %v11002_v26 = vpop.eup %11001  ;;  %9986 = vmatprep.subr.msk.bf16.mxu1 %vm5649_vm5, %v6952_v3  ;;  %v6874_v32 = vadd.f32 1.0, %v11000_v48  ;;  %v10020_v48 = vcombine.low %v17473_v1, %v17472_v40  ;;  %v17474_v57 = vld [vmem:[#allocation405_spill] sm:$0xff] }
 0xe7d   :  { %v11004_v38 = vpop.eup %11003  ;;  %v6876_v35 = vadd.f32 1.0, %v11002_v26  ;;  %v6949_v4 = vpack.c.bf16 %v6914_v21, %v6910_v43  ;;  %v17475_v59 = vld [vmem:[#allocation401_spill] sm:$0xff] }
 0xe7e   :  { %v11006_v18 = vpop.eup %11005  ;;  %11015 = vrcp.f32 %v6874_v32  ;;  %v6873_v5 = vadd.f32 1.0, %v11004_v38  ;;  %v10013_v26 = vcombine.high %v17475_v59, %v17474_v57  ;;  %v10012_v23 = vcombine.low %v17475_v59, %v17474_v57  ;;  %v17476_v2 = vld [vmem:[#allocation397_spill] sm:$0xff]  ;;  %v17500_v59 = vld [vmem:[#allocation406_spill] sm:$0xff] }
 0xe7f   :  { %v11008_v22 = vpop.eup %11007  ;;  %11017 = vrcp.f32 %v6876_v35  ;;  %v6875_v41 = vadd.f32 1.0, %v11006_v18  ;;  %v17477_v32 = vld [vmem:[#allocation393_spill] sm:$0xff]  ;;  %v17478_v18 = vld [vmem:[#allocation387_spill] sm:$0xff] }
 0xe80   :  { %v11010_v45 = vpop.eup %11009  ;;  %11019 = vrcp.f32 %v6873_v5  ;;  %v6870_v29 = vadd.f32 1.0, %v11008_v22  ;;  %v10005_v38 = vcombine.high %v17477_v32, %v17476_v2  ;;  %v10004_v35 = vcombine.low %v17477_v32, %v17476_v2  ;;  %v17479_v5 = vld [vmem:[#allocation383_spill] sm:$0xff]  ;;  %v17502_v32 = vld [vmem:[#allocation398_spill] sm:$0xff] }
 0xe81   :  { %v11012_v24 = vpop.eup %11011  ;;  %11021 = vrcp.f32 %v6875_v41  ;;  %v6872_v0 = vadd.f32 1.0, %v11010_v45  ;;  %v9993_v22 = vcombine.high %v17479_v5, %v17478_v18  ;;  %v17480_v41 = vld [vmem:[#allocation389_spill] sm:$0xff] }
 0xe82   :  { %v11014_v33 = vpop.eup %11013  ;;  %11023 = vrcp.f32 %v6870_v29  ;;  %v6869_v8 = vadd.f32 1.0, %v11012_v24  ;;  %v17481_v45 = vld [vmem:[#allocation385_spill] sm:$0xff]  ;;  %v17482_v24 = vld [vmem:[#allocation428_spill] sm:$0xff] }
 0xe83   :  { %7008 = vmatpush1.bf16.xpose.msra.mxu1 %v6951_v52  ;;  %11025 = vrcp.f32 %v6872_v0  ;;  %v6871_v37 = vadd.f32 1.0, %v11014_v33  ;;  %v9992_v52 = vcombine.low %v17479_v5, %v17478_v18  ;;  %7358 = vmatprep.subr.bf16.mxu0 %v9993_v22  ;;  %v9996_v29 = vcombine.low %v17481_v45, %v17480_v41  ;;  %v17483_v0 = vld [vmem:[#allocation424_spill] sm:$0xff]  ;;  %v17504_v5 = vld [vmem:[#allocation390_spill] sm:$0xff] }
 0xe84   :  { %9987 = vmatprep.subr.msk.bf16.mxu1 %vm5649_vm5, %v6950_v12  ;;  %11027 = vrcp.f32 %v6869_v8  ;;  %v9997_v12 = vcombine.high %v17481_v45, %v17480_v41  ;;  %v10035_v33 = vcombine.high %v17483_v0, %v17482_v24  ;;  %v17505_v22 = vld [vmem:[#allocation386_spill] sm:$0xff] }
 0xe85   :  { %11029 = vrcp.f32 %v6871_v37  ;;  %7359 = vmatpush1.bf16.msra.mxu0 %v9992_v52  ;;  %v10034_v37 = vcombine.low %v17483_v0, %v17482_v24  ;;  %v9999_v52 = vcombine.high %v17505_v22, %v17504_v5  ;;  %v9998_v41 = vcombine.low %v17505_v22, %v17504_v5  ;;  %v7717_v45 = vld [vmem:[%s17244_s9 + $0xc8] sm:$0xff]  ;;  %v7708_v24 = vld [vmem:[%s17244_s9 + $0x80] sm:$0xff] }
 0xe86   :  { %7401 = vmatprep.subr.bf16.mxu0 %v10035_v33  ;;  %v7701_v0 = vld [vmem:[%s17244_s9 + $0x48] sm:$0xff]  ;;  %v7700_v33 = vld [vmem:[%s17244_s9 + $0x40] sm:$0xff] }
 0xe8b   :  { %v11016_v50 = vpop.eup %11015  ;;  %7010 = vmatpush1.bf16.xpose.msra.mxu1 %v6949_v4 }
 0xe8c   :  { %v11018_v20 = vpop.eup %11017  ;;  %v6904_v13 = vmul.f32 %v11016_v50, %v17456_v19  ;;  %v17484_v50 = vld [vmem:[#allocation420_spill] sm:$0xff] }
 0xe8d   :  { %v11020_v61 = vpop.eup %11019  ;;  %v6908_v6 = vmul.f32 %v11018_v20, %v17459_v27  ;;  %v17485_v20 = vld [vmem:[#allocation416_spill] sm:$0xff] }
 0xe8e   :  { %v11022_v10 = vpop.eup %11021  ;;  %v6902_v51 = vmul.f32 %v11020_v61, %v17460_v11 }
 0xe8f   :  { %v11024_v49 = vpop.eup %11023  ;;  %v6948_v39 = vpack.c.bf16 %v6908_v6, %v6904_v13  ;;  %v6906_v28 = vmul.f32 %v11022_v10, %v17461_v58  ;;  %v17466_v58 = vld [vmem:[#allocation429_spill] sm:$0xff]  ;;  %v10027_v13 = vcombine.high %v17485_v20, %v17484_v50  ;;  %v10026_v10 = vcombine.low %v17485_v20, %v17484_v50  ;;  %v7711_v50 = vld [vmem:[%s17244_s9 + $0x98] sm:$0xff]  ;;  %v7710_v20 = vld [vmem:[%s17244_s9 + $0x90] sm:$0xff] }
 0xe90   :  { %v11026_v42 = vpop.eup %11025  ;;  %v6896_v54 = vmul.f32 %v11024_v49, %v17462_v60  ;;  %v10037_v56 = vcombine.high %v17467_v53, %v17466_v58  ;;  %v9980_v60 = vcombine.low %v17438_v46, %v17437_v63  ;;  %v10036_v7 = vcombine.low %v17467_v53, %v17466_v58  ;;  %v17487_v49 = vld [vmem:[#allocation408_spill] sm:$0xff] }
 0xe91   :  { %v11028_v47 = vpop.eup %11027  ;;  %9988 = vmatprep.subr.msk.bf16.mxu1 %vm5649_vm5, %v6948_v39  ;;  %v6947_v55 = vpack.c.bf16 %v6906_v28, %v6902_v51  ;;  %v6900_v62 = vmul.f32 %v11026_v42, %v17463_v16  ;;  %v17469_v16 = vld [vmem:[#allocation381_spill] sm:$0xff]  ;;  %v10021_v63 = vcombine.high %v17473_v1, %v17472_v40  ;;  %v17486_v51 = vld [vmem:[#allocation412_spill] sm:$0xff] }
 0xe92   :  { %v11030_v19 = vpop.eup %11029  ;;  %v6894_v27 = vmul.f32 %v11028_v47, %v17464_v14  ;;  %v9983_v36 = vcombine.high %v17469_v16, %v17468_v34  ;;  %v17470_v14 = vld [vmem:[#allocation421_spill] sm:$0xff]  ;;  %v9982_v46 = vcombine.low %v17469_v16, %v17468_v34  ;;  %v10019_v39 = vcombine.high %v17487_v49, %v17486_v51 }
 0xe93   :  { %7012 = vmatpush1.bf16.xpose.msra.mxu1 %v6947_v55  ;;  %v6946_v15 = vpack.c.bf16 %v6900_v62, %v6896_v54  ;;  %v6898_v11 = vmul.f32 %v11030_v19, %v17465_v31  ;;  %v10029_v31 = vcombine.high %v17471_v25, %v17470_v14  ;;  %v10028_v3 = vcombine.low %v17471_v25, %v17470_v14  ;;  %v17488_v55 = vld [vmem:[#allocation404_spill] sm:$0xff] }
 0xe94   :  { %v10018_v54 = vcombine.low %v17487_v49, %v17486_v51  ;;  %v17489_v62 = vld [vmem:[#allocation400_spill] sm:$0xff] }
 0xe95   :  { %9989 = vmatprep.subr.msk.bf16.mxu1 %vm5649_vm5, %v6946_v15  ;;  %v6945_v30 = vpack.c.bf16 %v6898_v11, %v6894_v27  ;;  %v10011_v19 = vcombine.high %v17489_v62, %v17488_v55  ;;  %v10010_v27 = vcombine.low %v17489_v62, %v17488_v55  ;;  %v17490_v11 = vld [vmem:[#allocation396_spill] sm:$0xff]  ;;  %v7565_v62 = vld [vmem:[%s17245_s6 + $0x48] sm:$0xff] }
 0xe96   :  { %v7723_v51 = vld [vmem:[%s17244_s9 + $0xf8] sm:$0xff] }
 0xe9b   :  { %7014 = vmatpush1.bf16.xpose.msra.mxu1 %v6945_v30  ;;  %v17491_v30 = vld [vmem:[#allocation392_spill] sm:$0xff] }
 0xe9c   :  { %7454 = vmatprep.subr.bf16.mxu1 %v10037_v56  ;;  %v10003_v58 = vcombine.high %v17491_v30, %v17490_v11  ;;  %v10002_v53 = vcombine.low %v17491_v30, %v17490_v11  ;;  %v17492_v56 = vld [vmem:[#allocation388_spill] sm:$0xff]  ;;  %v7569_v11 = vld [vmem:[%s17245_s6 + $0x68] sm:$0xff] }
 0xe9d   :  { %v7572_v30 = vld [vmem:[%s17245_s6 + $0x80] sm:$0xff] }
 0xea2   :  { %7032 = vmatmul.mubr.bf16.vlgmr.msra.gmra.mxu1 %v9980_v60  ;;  %v17493_v60 = vld [vmem:[#allocation384_spill] sm:$0xff] }
 0xea3   :  { %9991 = vmatprep.mubr.msk.bf16.mxu1 %vm5649_vm5, %v9983_v36  ;;  %7455 = vmatpush1.bf16.msra.mxu1 %v10036_v7  ;;  %v9995_v34 = vcombine.high %v17493_v60, %v17492_v56  ;;  %v9994_v16 = vcombine.low %v17493_v60, %v17492_v56  ;;  %v17494_v36 = vld [vmem:[#allocation430_spill] sm:$0xff] }
 0xea4   :  { %7456 = vmatprep.subr.bf16.mxu1 %v10029_v31  ;;  %v17495_v7 = vld [vmem:[#allocation426_spill] sm:$0xff] }
 0xea5   :  { %v10039_v14 = vcombine.high %v17495_v7, %v17494_v36  ;;  %v10038_v25 = vcombine.low %v17495_v7, %v17494_v36  ;;  %v17496_v31 = vld [vmem:[#allocation422_spill] sm:$0xff] }
 0xea6   :  { %v7561_v56 = vld [vmem:[%s17245_s6 + $0x28] sm:$0xff] }
 0xea7   :  { %7457 = vmatpush1.bf16.msra.mxu1 %v10028_v3  ;;  %v17497_v3 = vld [vmem:[#allocation418_spill] sm:$0xff] }
 0xea8   :  { %7458 = vmatprep.subr.bf16.mxu1 %v10021_v63  ;;  %v10031_v40 = vcombine.high %v17497_v3, %v17496_v31  ;;  %v10030_v1 = vcombine.low %v17497_v3, %v17496_v31  ;;  %v17498_v63 = vld [vmem:[#allocation414_spill] sm:$0xff] }
 0xea9   :  { %v7573_v36 = vld [vmem:[%s17245_s6 + $0x88] sm:$0xff] }
 0xeaa   :  { %7040 = vmatmul.mubr.bf16.gmra.mxu1 %v9982_v46  ;;  %v17499_v46 = vld [vmem:[#allocation410_spill] sm:$0xff] }
 0xeab   :  { %7459 = vmatpush1.bf16.msra.mxu1 %v10020_v48  ;;  %7482 = vmatprep.mubr.bf16.mxu1 %v11214_v44  ;;  %v10023_v48 = vcombine.high %v17499_v46, %v17498_v63  ;;  %v10022_v57 = vcombine.low %v17499_v46, %v17498_v63  ;;  %v7577_v7 = vld [vmem:[%s17245_s6 + $0xa8] sm:$0xff]  ;;  %v7580_v63 = vld [vmem:[%s17245_s6 + $0xc0] sm:$0xff] }
 0xeac   :  { %7460 = vmatprep.subr.bf16.mxu1 %v10013_v26  ;;  %v17501_v26 = vld [vmem:[#allocation402_spill] sm:$0xff] }
 0xead   :  { %v10014_v2 = vcombine.low %v17501_v26, %v17500_v59 }
 0xeaf   :  { %7461 = vmatpush1.bf16.msra.mxu1 %v10012_v23  ;;  %v10015_v23 = vcombine.high %v17501_v26, %v17500_v59 }
 0xeb0   :  { %7462 = vmatprep.subr.bf16.mxu1 %v10005_v38  ;;  %v17503_v38 = vld [vmem:[#allocation394_spill] sm:$0xff] }
 0xeb1   :  { %v10006_v18 = vcombine.low %v17503_v38, %v17502_v32 }
 0xeb3   :  { %7463 = vmatpush1.bf16.msra.mxu1 %v10004_v35  ;;  %v10007_v35 = vcombine.high %v17503_v38, %v17502_v32  ;;  %v7581_v38 = vld [vmem:[%s17245_s6 + $0xc8] sm:$0xff] }
 0xeb4   :  { %7464 = vmatprep.subr.bf16.mxu1 %v9997_v12  ;;  %v7716_v12 = vld [vmem:[%s17244_s9 + $0xc0] sm:$0xff] }
 0xeb7   :  { %7465 = vmatpush1.bf16.msra.mxu1 %v9996_v29  ;;  %v7709_v29 = vld [vmem:[%s17244_s9 + $0x88] sm:$0xff] }
 0xeb8   :  { %7748 = vmatprep.subr.mxu1 %v7717_v45 }
 0xf62   :  { %v7033_v8 = vpop.f32.mrf.mxu1 }
 0xf64   :  { %v7035_v43 = vpop.f32.mrf.mxu1 }
 0xf65   :  { %v7692_v43 = vld [vmem:[%s17244_s9] sm:$0xff] }
 0xf66   :  { %v7036_v21 = vpop.f32.mrf.mxu1 }
 0xf67   :  { %v15457_v4 = vpack.c.bf16 %v7036_v21, %v7033_v8  ;;  %v7693_v8 = vld [vmem:[%s17244_s9 + $0x8] sm:$0xff] }
 0xf68   :  { %v7038_v61 = vpop.f32.mrf.mxu1  ;;  %v7721_v21 = vld [vmem:[%s17244_s9 + $0xe8] sm:$0xff] }
 0xf69   :  { %10040 = vmatmul.mubr.msk.bf16.vlgmr.msra.gmra.mxu0 %vm3127_vm3, %v15457_v4  ;;  %10044 = vmatmul.mubr.msk.bf16.vlgmr.msra.gmra.mxu1 %vm3127_vm3, %v15457_v4  ;;  %v7702_v61 = vld [vmem:[%s17244_s9 + $0x50] sm:$0xff] }
 0xf6a   :  { %7402 = vmatpush1.bf16.msra.mxu0 %v10034_v37  ;;  %v7041_v6 = vpop.f32.mrf.mxu1  ;;  %7386 = vmatprep.mubr.bf16.mxu0 %v11214_v44  ;;  %v7719_v37 = vld [vmem:[%s17244_s9 + $0xd8] sm:$0xff] }
 0xf6b   :  { %7403 = vmatprep.subr.bf16.mxu0 %v10027_v13  ;;  %7492 = vmatprep.mubr.bf16.mxu1 %v11214_v44  ;;  %v7703_v13 = vld [vmem:[%s17244_s9 + $0x58] sm:$0xff] }
 0xf6c   :  { %v7043_v28 = vpop.f32.mrf.mxu1  ;;  %7749 = vmatpush1.xpose.msra.mxu1 %v7716_v12 }
 0xf6d   :  { %7750 = vmatprep.subr.mxu1 %v7709_v29 }
 0xf6e   :  { %7404 = vmatpush1.bf16.msra.mxu0 %v10026_v10  ;;  %v7044_v42 = vpop.f32.mrf.mxu1  ;;  %v7694_v10 = vld [vmem:[%s17244_s9 + $0x10] sm:$0xff] }
 0xf6f   :  { %v7049_v47 = vpack.c.bf16 %v7044_v42, %v7041_v6  ;;  %7405 = vmatprep.subr.bf16.mxu0 %v10019_v39  ;;  %v7695_v6 = vld [vmem:[%s17244_s9 + $0x18] sm:$0xff] }
 0xf70   :  { %v7046_v15 = vpop.f32.mrf.mxu1  ;;  %7751 = vmatpush1.xpose.msra.mxu1 %v7708_v24 }
 0xf71   :  { %10041 = vmatmul.mubr.msk.bf16.gmra.mxu0 %vm3127_vm3, %v7049_v47  ;;  %10045 = vmatmul.mubr.msk.bf16.gmra.mxu1 %vm3127_vm3, %v7049_v47 }
 0xf72   :  { %7406 = vmatpush1.bf16.msra.mxu0 %v10018_v54  ;;  %7429 = vmatprep.mubr.bf16.mxu0 %v11214_v44 }
 0xf73   :  { %7407 = vmatprep.subr.bf16.mxu0 %v10011_v19  ;;  %7752 = vmatprep.subr.mxu1 %v7701_v0  ;;  %v7556_v19 = vld [vmem:[%s17245_s6] sm:$0xff] }
 0xf74   :  { %7753 = vmatpush1.xpose.msra.mxu1 %v7700_v33 }
 0xf75   :  { %7754 = vmatprep.subr.mxu1 %v7693_v8  ;;  %v7584_v8 = vld [vmem:[%s17245_s6 + $0xe0] sm:$0xff] }
 0xf76   :  { %7408 = vmatpush1.bf16.msra.mxu0 %v10010_v27 }
 0xf77   :  { %7409 = vmatprep.subr.bf16.mxu0 %v10003_v58  ;;  %v7557_v58 = vld [vmem:[%s17245_s6 + $0x8] sm:$0xff] }
 0xf78   :  { %7755 = vmatpush1.xpose.msra.mxu1 %v7692_v43 }
 0xf79   :  { %7888 = vmatprep.subr.mxu1 %v7721_v21 }
 0xf7a   :  { %7410 = vmatpush1.bf16.msra.mxu0 %v10002_v53 }
 0xf7b   :  { %7411 = vmatprep.subr.bf16.mxu0 %v9995_v34 }
 0xf7e   :  { %7412 = vmatpush1.bf16.msra.mxu0 %v9994_v16 }
 0xf7f   :  { %7507 = vmatprep.subr.bf16.mxu0 %v10039_v14 }
 0xf81   :  { %10042 = vmatmul.mubr.msk.bf16.vlgmr.msra.gmra.mxu0 %vm3127_vm3, %v15457_v4 }
 0xf82   :  { %7508 = vmatpush1.bf16.msra.mxu0 %v10038_v25  ;;  %7439 = vmatprep.mubr.bf16.mxu0 %v11214_v44 }
 0xf83   :  { %7509 = vmatprep.subr.bf16.mxu0 %v10031_v40 }
 0xf86   :  { %7510 = vmatpush1.bf16.msra.mxu0 %v10030_v1 }
 0xf87   :  { %7511 = vmatprep.subr.bf16.mxu0 %v10023_v48 }
 0xf89   :  { %10043 = vmatmul.mubr.msk.bf16.gmra.mxu0 %vm3127_vm3, %v7049_v47 }
 0xf8a   :  { %7512 = vmatpush1.bf16.msra.mxu0 %v10022_v57  ;;  %7535 = vmatprep.mubr.bf16.mxu0 %v11214_v44  ;;  %v7568_v57 = vld [vmem:[%s17245_s6 + $0x60] sm:$0xff] }
 0xf8b   :  { %7513 = vmatprep.subr.bf16.mxu0 %v10015_v23 }
 0xf8e   :  { %7514 = vmatpush1.bf16.msra.mxu0 %v10014_v2 }
 0xf8f   :  { %7515 = vmatprep.subr.bf16.mxu0 %v10007_v35  ;;  %v7585_v35 = vld [vmem:[%s17245_s6 + $0xe8] sm:$0xff] }
 0xf92   :  { %7516 = vmatpush1.bf16.msra.mxu0 %v10006_v18  ;;  %v7560_v18 = vld [vmem:[%s17245_s6 + $0x20] sm:$0xff] }
 0xf93   :  { %7517 = vmatprep.subr.bf16.mxu0 %v9999_v52  ;;  %v7576_v52 = vld [vmem:[%s17245_s6 + $0xa0] sm:$0xff] }
 0xf96   :  { %7518 = vmatpush1.bf16.msra.mxu0 %v9998_v41 }
 0xf97   :  { %7818 = vmatprep.subr.mxu0 %v7719_v37 }
 0xf99   :  { %10046 = vmatmul.mubr.msk.bf16.vlgmr.msra.gmra.mxu0 %vm3127_vm3, %v15457_v4  ;;  %v7718_v4 = vld [vmem:[%s17244_s9 + $0xd0] sm:$0xff] }
 0xf9a   :  { %7545 = vmatprep.mubr.bf16.mxu0 %v11214_v44  ;;  %7819 = vmatpush1.xpose.msra.mxu0 %v7718_v4 }
 0xf9b   :  { %7820 = vmatprep.subr.mxu0 %v7711_v50 }
 0xf9e   :  { %7821 = vmatpush1.xpose.msra.mxu0 %v7710_v20 }
 0xf9f   :  { %7822 = vmatprep.subr.mxu0 %v7703_v13 }
 0xfa1   :  { %10047 = vmatmul.mubr.msk.bf16.gmra.mxu0 %vm3127_vm3, %v7049_v47  ;;  %v7564_v47 = vld [vmem:[%s17245_s6 + $0x40] sm:$0xff] }
 0xfa2   :  { %7823 = vmatpush1.xpose.msra.mxu0 %v7702_v61 }
 0xfa3   :  { %7824 = vmatprep.subr.mxu0 %v7695_v6 }
 0xfa6   :  { %7825 = vmatpush1.xpose.msra.mxu0 %v7694_v10 }
 0xfa7   :  { %7958 = vmatprep.subr.mxu0 %v7723_v51 }
0x1029   :  { %v7378_v49 = vpop.f32.mrf.mxu0  ;;  %v7484_v39 = vpop.f32.mrf.mxu1 }
0x102a   :  { %v7588_v14 = vmul.f32 %v7556_v19, %v7378_v49  ;;  %v7592_v37 = vmul.f32 %v7560_v18, %v7484_v39  ;;  %v7582_v18 = vld [vmem:[%s17245_s6 + $0xd0] sm:$0xff] }
0x102b   :  { %v7380_v28 = vpop.f32.mrf.mxu0  ;;  %v7486_v42 = vpop.f32.mrf.mxu1 }
0x102c   :  { %v7589_v3 = vmul.f32 %v7557_v58, %v7380_v28  ;;  %v7593_v46 = vmul.f32 %v7561_v56, %v7486_v42 }
0x102d   :  { %v7382_v54 = vpop.f32.mrf.mxu0  ;;  %v7488_v55 = vpop.f32.mrf.mxu1 }
0x102e   :  { %v7596_v53 = vmul.f32 %v7564_v47, %v7382_v54  ;;  %v7600_v45 = vmul.f32 %v7568_v57, %v7488_v55  ;;  %v7559_v57 = vld [vmem:[%s17245_s6 + $0x18] sm:$0xff] }
0x102f   :  { %v7384_v15 = vpop.f32.mrf.mxu0  ;;  %v7490_v27 = vpop.f32.mrf.mxu1 }
0x1030   :  { %v7597_v60 = vmul.f32 %v7565_v62, %v7384_v15  ;;  %v7601_v25 = vmul.f32 %v7569_v11, %v7490_v27  ;;  %v7620_v48 = vadd.f32 %v7596_v53, %v7588_v14  ;;  %v7656_v61 = vadd.f32 %v7600_v45, %v7592_v37  ;;  %v7705_v45 = vld [vmem:[%s17244_s9 + $0x68] sm:$0xff] }
0x1031   :  { %v7388_v34 = vpop.f32.mrf.mxu0  ;;  %v7494_v16 = vpop.f32.mrf.mxu1 }
0x1032   :  { %v7604_v31 = vmul.f32 %v7572_v30, %v7388_v34  ;;  %v7629_v23 = vadd.f32 %v7597_v60, %v7589_v3  ;;  %v7665_v5 = vadd.f32 %v7601_v25, %v7593_v46  ;;  %v7608_v4 = vmul.f32 %v7576_v52, %v7494_v16  ;;  %v7566_v34 = vld [vmem:[%s17245_s6 + $0x50] sm:$0xff]  ;;  %v7567_v3 = vld [vmem:[%s17245_s6 + $0x58] sm:$0xff] }
0x1033   :  { %v7390_v40 = vpop.f32.mrf.mxu0  ;;  %v7496_v1 = vpop.f32.mrf.mxu1 }
0x1034   :  { %v7605_v59 = vmul.f32 %v7573_v36, %v7390_v40  ;;  %v7609_v26 = vmul.f32 %v7577_v7, %v7496_v1  ;;  %v7621_v22 = vadd.f32 %v7620_v48, %v7604_v31  ;;  %v7657_v28 = vadd.f32 %v7656_v61, %v7608_v4  ;;  %v7558_v36 = vld [vmem:[%s17245_s6 + $0x10] sm:$0xff]  ;;  %v7720_v1 = vld [vmem:[%s17244_s9 + $0xe0] sm:$0xff]  ;;  %v7713_v48 = vld [vmem:[%s17244_s9 + $0xa8] sm:$0xff] }
0x1035   :  { %v7392_v2 = vpop.f32.mrf.mxu0  ;;  %v7498_v32 = vpop.f32.mrf.mxu1  ;;  %v7574_v40 = vld [vmem:[%s17245_s6 + $0x90] sm:$0xff] }
0x1036   :  { %v7612_v41 = vmul.f32 %v7580_v63, %v7392_v2  ;;  %v7630_v12 = vadd.f32 %v7629_v23, %v7605_v59  ;;  %v7666_v0 = vadd.f32 %v7665_v5, %v7609_v26  ;;  %v7616_v6 = vmul.f32 %v7584_v8, %v7498_v32  ;;  %v7575_v26 = vld [vmem:[%s17245_s6 + $0x98] sm:$0xff]  ;;  %v7712_v5 = vld [vmem:[%s17244_s9 + $0xa0] sm:$0xff] }
0x1037   :  { %v7394_v29 = vpop.f32.mrf.mxu0  ;;  %v7500_v24 = vpop.f32.mrf.mxu1 }
0x1038   :  { %v7622_v33 = vadd.f32 %v7621_v22, %v7612_v41  ;;  %v7613_v43 = vmul.f32 %v7581_v38, %v7394_v29  ;;  %v7617_v21 = vmul.f32 %v7585_v35, %v7500_v24  ;;  %v7658_v55 = vadd.f32 %v7657_v28, %v7616_v6  ;;  %v7583_v29 = vld [vmem:[%s17245_s6 + $0xd8] sm:$0xff] }
0x103a   :  { %v7623_v50 = vrot.slane %v7622_v33, 4  ;;  %v7631_v20 = vadd.f32 %v7630_v12, %v7613_v43  ;;  %v7667_v13 = vadd.f32 %v7666_v0, %v7617_v21  ;;  %v7659_v30 = vrot.slane %v7658_v55, 4  ;;  %v7704_v21 = vld [vmem:[%s17244_s9 + $0x60] sm:$0xff] }
0x103c   :  { %v7624_v10 = vadd.f32 %v7623_v50, %v7622_v33  ;;  %v7632_v51 = vrot.slane %v7631_v20, 4  ;;  %v7668_v49 = vrot.slane %v7667_v13, 4  ;;  %v7660_v25 = vadd.f32 %v7659_v30, %v7658_v55  ;;  %v7570_v30 = vld [vmem:[%s17245_s6 + $0x70] sm:$0xff] }
0x103e   :  { %v7625_v42 = vrot.slane %v7624_v10, 2  ;;  %v7633_v54 = vadd.f32 %v7632_v51, %v7631_v20  ;;  %v7669_v47 = vadd.f32 %v7668_v49, %v7667_v13  ;;  %v7661_v38 = vrot.slane %v7660_v25, 2  ;;  %v7697_v20 = vld [vmem:[%s17244_s9 + $0x28] sm:$0xff] }
0x1040   :  { %v7626_v62 = vadd.f32 %v7625_v42, %v7624_v10  ;;  %v7634_v19 = vrot.slane %v7633_v54, 2  ;;  %v7670_v15 = vrot.slane %v7669_v47, 2  ;;  %v7662_v8 = vadd.f32 %v7661_v38, %v7660_v25  ;;  %v7696_v10 = vld [vmem:[%s17244_s9 + $0x20] sm:$0xff]  ;;  %v7563_v25 = vld [vmem:[%s17245_s6 + $0x38] sm:$0xff] }
0x1041   :  { %v7431_v27 = vpop.f32.mrf.mxu0  ;;  %v7587_v38 = vld [vmem:[%s17245_s6 + $0xf8] sm:$0xff] }
0x1042   :  { %v7635_v11 = vadd.f32 %v7634_v19, %v7633_v54  ;;  %v7627_v39 = vrot.slane %v7626_v62, 1  ;;  %v7671_v53 = vadd.f32 %v7670_v15, %v7669_v47  ;;  %v7590_v23 = vmul.f32 %v7558_v36, %v7431_v27  ;;  %v7722_v36 = vld [vmem:[%s17244_s9 + $0xf0] sm:$0xff] }
0x1043   :  { %v7433_v58 = vpop.f32.mrf.mxu0  ;;  %v7663_v6 = vrot.slane %v7662_v8, 1 }
0x1044   :  { %v7636_v56 = vrot.slane %v7635_v11, 1  ;;  %v7672_v16 = vrot.slane %v7671_v53, 1  ;;  %v7628_v14 = vadd.f32 %v7627_v39, %v7626_v62  ;;  %v7591_v22 = vmul.f32 %v7559_v57, %v7433_v58  ;;  %v7562_v58 = vld [vmem:[%s17245_s6 + $0x30] sm:$0xff] }
0x1045   :  { %v7435_v60 = vpop.f32.mrf.mxu0  ;;  %v7664_v54 = vadd.f32 %v7663_v6, %v7662_v8  ;;  %v7714_v57 = vld [vmem:[%s17244_s9 + $0xb0] sm:$0xff] }
0x1046   :  { %v7637_v7 = vadd.f32 %v7636_v56, %v7635_v11  ;;  %v7598_v63 = vmul.f32 %v7566_v34, %v7435_v60  ;;  %v7673_v46 = vadd.f32 %v7672_v16, %v7671_v53  ;;  %v7571_v34 = vld [vmem:[%s17245_s6 + $0x78] sm:$0xff]  ;;  %v7578_v16 = vld [vmem:[%s17245_s6 + $0xb0] sm:$0xff] }
0x1047   :  { %v7437_v31 = vpop.f32.mrf.mxu0 }
0x1048   :  { %7788 = vmatprep.mubr.f32.mxu1 %v7637_v7  ;;  %v7599_v2 = vmul.f32 %v7567_v3, %v7437_v31  ;;  %v7638_v52 = vadd.f32 %v7598_v63, %v7590_v23  ;;  %v7579_v3 = vld [vmem:[%s17245_s6 + $0xb8] sm:$0xff] }
0x1049   :  { %v7441_v59 = vpop.f32.mrf.mxu0  ;;  %7789 = vmatmul.mubr.f32.vlgmr.msra.gmra.mxu1 %v7628_v14  ;;  %v7715_v14 = vld [vmem:[%s17244_s9 + $0xb8] sm:$0xff] }
0x104a   :  { %v7606_v32 = vmul.f32 %v7574_v40, %v7441_v59  ;;  %7889 = vmatpush1.xpose.msra.mxu1 %v7720_v1  ;;  %7928 = vmatprep.mubr.f32.mxu1 %v7673_v46  ;;  %v7647_v24 = vadd.f32 %v7599_v2, %v7591_v22  ;;  %v7707_v2 = vld [vmem:[%s17244_s9 + $0x78] sm:$0xff] }
0x104b   :  { %v7443_v35 = vpop.f32.mrf.mxu0  ;;  %7890 = vmatprep.subr.mxu1 %v7713_v48  ;;  %v7586_v48 = vld [vmem:[%s17245_s6 + $0xf0] sm:$0xff] }
0x104c   :  { %v7607_v41 = vmul.f32 %v7575_v26, %v7443_v35  ;;  %v7639_v0 = vadd.f32 %v7638_v52, %v7606_v32  ;;  %v7706_v52 = vld [vmem:[%s17244_s9 + $0x70] sm:$0xff] }
0x104d   :  { %v7445_v12 = vpop.f32.mrf.mxu0 }
0x104e   :  { %v7614_v33 = vmul.f32 %v7582_v18, %v7445_v12  ;;  %7891 = vmatpush1.xpose.msra.mxu1 %v7712_v5  ;;  %v7648_v37 = vadd.f32 %v7647_v24, %v7607_v41 }
0x104f   :  { %v7447_v43 = vpop.f32.mrf.mxu0  ;;  %7892 = vmatprep.subr.mxu1 %v7705_v45 }
0x1050   :  { %v7640_v4 = vadd.f32 %v7639_v0, %v7614_v33  ;;  %v7615_v50 = vmul.f32 %v7583_v29, %v7447_v43  ;;  %v7699_v29 = vld [vmem:[%s17244_s9 + $0x38] sm:$0xff]  ;;  %v7698_v33 = vld [vmem:[%s17244_s9 + $0x30] sm:$0xff] }
0x1052   :  { %v7641_v13 = vrot.slane %v7640_v4, 4  ;;  %v7649_v61 = vadd.f32 %v7648_v37, %v7615_v50  ;;  %7893 = vmatpush1.xpose.msra.mxu1 %v7704_v21 }
0x1053   :  { %7894 = vmatprep.subr.mxu1 %v7697_v20 }
0x1054   :  { %v7642_v51 = vadd.f32 %v7641_v13, %v7640_v4  ;;  %v7650_v49 = vrot.slane %v7649_v61, 4 }
0x1056   :  { %v7643_v28 = vrot.slane %v7642_v51, 2  ;;  %v7651_v42 = vadd.f32 %v7650_v49, %v7649_v61  ;;  %7895 = vmatpush1.xpose.msra.mxu1 %v7696_v10  ;;  %v10050_v49 = vld [vmem:[%s17247_s12 + $0x70] sm:$0xff] }
0x1057   :  { %10205 = vmatprep.subr.mxu1 %v17246_v17 }
0x1058   :  { %v7644_v47 = vadd.f32 %v7643_v28, %v7642_v51  ;;  %v7652_v55 = vrot.slane %v7651_v42, 2  ;;  %v10051_v51 = vld [vmem:[%s17247_s12 + $0x78] sm:$0xff]  ;;  %v10049_v28 = vld [vmem:[%s17247_s12 + $0x68] sm:$0xff] }
0x1059   :  { %v7537_v62 = vpop.f32.mrf.mxu0  ;;  %7929 = vmatmul.mubr.f32.vlgmr.msra.gmra.mxu1 %v7664_v54 }
0x105a   :  { %v7653_v19 = vadd.f32 %v7652_v55, %v7651_v42  ;;  %10213 = vmatprep.mubr.msk.f32.mxu1 %vm11215_vm4, %v17246_v17  ;;  %v7645_v15 = vrot.slane %v7644_v47, 1  ;;  %v7594_v40 = vmul.f32 %v7562_v58, %v7537_v62  ;;  %10206 = vmatpush3.msra.mxu1 %v10051_v51  ;;  %v10048_v42 = vld [vmem:[%s17247_s12 + $0x60] sm:$0xff] }
0x105b   :  { %v7539_v27 = vpop.f32.mrf.mxu0  ;;  %10207 = vmatprep.subr.mxu1 %v17246_v17  ;;  %v8005_v58 = vld [vmem:[%s17248_s24 + $0x3] sm:$0x1] }
0x105c   :  { %v7654_v11 = vrot.slane %v7653_v19, 1  ;;  %v7646_v56 = vadd.f32 %v7645_v15, %v7644_v47  ;;  %v7595_v59 = vmul.f32 %v7563_v25, %v7539_v27  ;;  %10208 = vmatpush3.msra.mxu1 %v10050_v49 }
0x105d   :  { %v7541_v39 = vpop.f32.mrf.mxu0  ;;  %10209 = vmatprep.subr.mxu1 %v17246_v17 }
0x105e   :  { %v7655_v53 = vadd.f32 %v7654_v11, %v7653_v19  ;;  %v7602_v7 = vmul.f32 %v7570_v30, %v7541_v39  ;;  %10210 = vmatpush3.msra.mxu1 %v10049_v28 }
0x105f   :  { %v7543_v60 = vpop.f32.mrf.mxu0  ;;  %10211 = vmatprep.subr.mxu1 %v17246_v17 }
0x1060   :  { %7858 = vmatprep.mubr.f32.mxu0 %v7655_v53  ;;  %v7603_v1 = vmul.f32 %v7571_v34, %v7543_v60  ;;  %v7674_v26 = vadd.f32 %v7602_v7, %v7594_v40  ;;  %10212 = vmatpush3.msra.mxu1 %v10048_v42 }
0x1061   :  { %v7547_v31 = vpop.f32.mrf.mxu0  ;;  %7859 = vmatmul.mubr.f32.vlgmr.msra.gmra.mxu0 %v7646_v56 }
0x1062   :  { %v7610_v63 = vmul.f32 %v7578_v16, %v7547_v31  ;;  %7959 = vmatpush1.xpose.msra.mxu0 %v7722_v36  ;;  %v7683_v35 = vadd.f32 %v7603_v1, %v7595_v59 }
0x1063   :  { %v7549_v46 = vpop.f32.mrf.mxu0  ;;  %7960 = vmatprep.subr.mxu0 %v7715_v14 }
0x1064   :  { %v7611_v23 = vmul.f32 %v7579_v3, %v7549_v46  ;;  %v7675_v18 = vadd.f32 %v7674_v26, %v7610_v63 }
0x1065   :  { %v7551_v32 = vpop.f32.mrf.mxu0 }
0x1066   :  { %v7618_v5 = vmul.f32 %v7586_v48, %v7551_v32  ;;  %7961 = vmatpush1.xpose.msra.mxu0 %v7714_v57  ;;  %v7684_v41 = vadd.f32 %v7683_v35, %v7611_v23 }
0x1067   :  { %v7553_v22 = vpop.f32.mrf.mxu0  ;;  %7962 = vmatprep.subr.mxu0 %v7707_v2 }
0x1068   :  { %v7676_v45 = vadd.f32 %v7675_v18, %v7618_v5  ;;  %v7619_v12 = vmul.f32 %v7587_v38, %v7553_v22 }
0x106a   :  { %v7677_v24 = vrot.slane %v7676_v45, 4  ;;  %v7685_v0 = vadd.f32 %v7684_v41, %v7619_v12  ;;  %7963 = vmatpush1.xpose.msra.mxu0 %v7706_v52 }
0x106b   :  { %7964 = vmatprep.subr.mxu0 %v7699_v29 }
0x106c   :  { %v7678_v8 = vadd.f32 %v7677_v24, %v7676_v45  ;;  %v7686_v43 = vrot.slane %v7685_v0, 4 }
0x106e   :  { %v7679_v21 = vrot.slane %v7678_v8, 2  ;;  %v7687_v37 = vadd.f32 %v7686_v43, %v7685_v0  ;;  %7965 = vmatpush1.xpose.msra.mxu0 %v7698_v33 }
0x1070   :  { %v7680_v4 = vadd.f32 %v7679_v21, %v7678_v8  ;;  %v7688_v50 = vrot.slane %v7687_v37, 2 }
0x1072   :  { %v7689_v20 = vadd.f32 %v7688_v50, %v7687_v37  ;;  %v7681_v13 = vrot.slane %v7680_v4, 1 }
0x1074   :  { %v7690_v61 = vrot.slane %v7689_v20, 1  ;;  %v7682_v10 = vadd.f32 %v7681_v13, %v7680_v4 }
0x1076   :  { %v7691_v6 = vadd.f32 %v7690_v61, %v7689_v20 }
0x1078   :  { %7998 = vmatprep.mubr.f32.mxu0 %v7691_v6 }
0x1079   :  { %7999 = vmatmul.mubr.f32.vlgmr.msra.gmra.mxu0 %v7682_v10 }
0x1109   :  { %v7790_v54 = vpop.f32.mrf.mxu1 }
0x110b   :  { %v7792_v47 = vpop.f32.mrf.mxu1 }
0x1119   :  { %v7930_v55 = vpop.f32.mrf.mxu1 }
0x111b   :  { %v7932_v62 = vpop.f32.mrf.mxu1 }
0x1121   :  { %v7860_v19 = vpop.f32.mrf.mxu0 }
0x1122   :  { %v7861_v27 = vadd.f32 %v7860_v19, %v7790_v54 }
0x1123   :  { %v7862_v15 = vpop.f32.mrf.mxu0 }
0x1124   :  { %v7931_v11 = vadd.f32 %v7930_v55, %v7861_v27 }
0x1139   :  { %v8000_v39 = vpop.f32.mrf.mxu0 }
0x113a   :  { %v8001_v30 = vadd.f32 %v8000_v39, %v7931_v11 }
0x113b   :  { %v8002_v53 = vpop.f32.mrf.mxu0 }
0x113c   :  { %v8004_v56 = vmul.f32 0.015625, %v8001_v30 }
0x113e   :  { %v8006_v60 = vadd.f32 %v8005_v58, %v8004_v56 }
0x1140   :  { %v8007_v34 = vsub.f32 0.0, %v8006_v60 }
0x1142   :  { %v8008_v16 = vmul.f32 1.442695, %v8007_v34 }
0x1144   :  { %11031 = vpow2.f32 %v8008_v16 }
0x1151   :  { %v11032_v36 = vpop.eup %11031 }
0x1152   :  { %v8010_v7 = vadd.f32 1.0, %v11032_v36 }
0x1154   :  { %11033 = vrcp.f32 %v8010_v7 }
0x1161   :  { %v11034_v14 = vpop.eup %11033 }
0x1162   :  { %v8012_v25 = vmul.f32 %v11034_v14, %v8006_v60 }
0x1164   :  { %10214 = vmatmul.mubr.msk.f32.vlgmr.msra.gmra.mxu1 %vm1787_vm1, %v8012_v25 }
0x1224   :  { %v8087_v31 = vpop.f32.mrf.mxu1 }
0x1225   :  { %v15736_v3 = vadd.f32 %v8087_v31, %v15337_v9 }
0x1226   :  { %v10215_v40 = vpop.f32.mrf.mxu1 }
0x1227   :  { %11203 = dma.done.wait [#allocation17 + $0xc], 3072 }
0x1228   :  { %11204 = vsyncadd [#allocation17 + $0xc], 4294964224 }
0x1229   :  { %11205 = dma.done.wait [#allocation17 + $0xd], 512 }
0x122a   :  { %11206 = vsyncadd [#allocation17 + $0xd], 4294966784  ;;  %v17506_v1 = vld [vmem:[#allocation452_spill] sm:$0xff]  ;;  %v17507_v46 = vld [vmem:[#allocation454_spill] sm:$0xff]  ;;  %8701 = vmatprep.mubr.bf16.mxu1 %v11214_v44 }
0x122b   :  { %v8143_v63 = vsub.f32 0.0, %v17506_v1  ;;  %v8145_v48 = vsub.f32 0.0, %v17507_v46  ;;  %v17508_v57 = vld [vmem:[#allocation451_spill] sm:$0xff]  ;;  %v17509_v26 = vld [vmem:[#allocation453_spill] sm:$0xff] }
0x122c   :  { %v8142_v59 = vsub.f32 0.0, %v17508_v57  ;;  %v8144_v23 = vsub.f32 0.0, %v17509_v26 }
0x122d   :  { %11207 = dma.done.wait [#allocation17 + $0xe], 6144 }
0x122e   :  { %11208 = vsyncadd [#allocation17 + $0xe], 4294961152  ;;  %v17510_v2 = vld [vmem:[#allocation448_spill] sm:$0xff]  ;;  %v17511_v32 = vld [vmem:[#allocation450_spill] sm:$0xff]  ;;  %v8188_v5 = vmul.f32 1.442695, %v8143_v63 }
0x122f   :  { %v8139_v9 = vsub.f32 0.0, %v17510_v2  ;;  %v8141_v38 = vsub.f32 0.0, %v17511_v32  ;;  %v17512_v35 = vld [vmem:[#allocation447_spill] sm:$0xff]  ;;  %v8192_v22 = vmul.f32 1.442695, %v8145_v48  ;;  %v17513_v41 = vld [vmem:[#allocation456_spill] sm:$0xff] }
0x1230   :  { %v8138_v18 = vsub.f32 0.0, %v17512_v35  ;;  %v8186_v52 = vmul.f32 1.442695, %v8142_v59  ;;  %v17514_v45 = vld [vmem:[#allocation455_spill] sm:$0xff]  ;;  %v8190_v29 = vmul.f32 1.442695, %v8144_v23  ;;  %11035 = vpow2.f32 %v8188_v5 }
0x1231   :  { %v10054_v12 = vcombine.high %v17514_v45, %v17513_v41  ;;  %v17515_v24 = vld [vmem:[#allocation449_spill] sm:$0xff]  ;;  %v8180_v33 = vmul.f32 1.442695, %v8139_v9  ;;  %v17516_v8 = vld [vmem:[#allocation444_spill] sm:$0xff]  ;;  %11037 = vpow2.f32 %v8192_v22  ;;  %v8184_v21 = vmul.f32 1.442695, %v8141_v38 }
0x1232   :  { %v8140_v0 = vsub.f32 0.0, %v17515_v24  ;;  %v8135_v43 = vsub.f32 0.0, %v17516_v8  ;;  %v17517_v37 = vld [vmem:[#allocation446_spill] sm:$0xff]  ;;  %11039 = vpow2.f32 %v8186_v52  ;;  %v8178_v50 = vmul.f32 1.442695, %v8138_v18  ;;  %v17518_v20 = vld [vmem:[#allocation443_spill] sm:$0xff] }
0x1233   :  { %10063 = vmatprep.mubr.msk.bf16.mxu0 %vm5649_vm5, %v10054_v12  ;;  %v8137_v4 = vsub.f32 0.0, %v17517_v37  ;;  %v8134_v13 = vsub.f32 0.0, %v17518_v20  ;;  %11041 = vpow2.f32 %v8190_v29  ;;  %v17519_v6 = vld [vmem:[#allocation445_spill] sm:$0xff]  ;;  %v17520_v49 = vld [vmem:[#allocation440_spill] sm:$0xff]  ;;  %v17521_v54 = vld [vmem:[#allocation442_spill] sm:$0xff]  ;;  %s17582_s2 = sld [smem:[#allocation516_spill]] }
0x1234   :  { %v8182_v61 = vmul.f32 1.442695, %v8140_v0  ;;  %v8136_v10 = vsub.f32 0.0, %v17519_v6  ;;  %11043 = vpow2.f32 %v8180_v33  ;;  %v8172_v51 = vmul.f32 1.442695, %v8135_v43  ;;  %v17522_v62 = vld [vmem:[#allocation439_spill] sm:$0xff] }
0x1235   :  { %v8131_v28 = vsub.f32 0.0, %v17520_v49  ;;  %11045 = vpow2.f32 %v8184_v21  ;;  %v8176_v42 = vmul.f32 1.442695, %v8137_v4  ;;  %v8133_v47 = vsub.f32 0.0, %v17521_v54  ;;  %v17523_v27 = vld [vmem:[#allocation441_spill] sm:$0xff]  ;;  %v17524_v56 = vld [vmem:[#allocation503_spill] sm:$0xff] }
0x1236   :  { %11047 = vpow2.f32 %v8178_v50  ;;  %v8170_v55 = vmul.f32 1.442695, %v8134_v13  ;;  %v8130_v19 = vsub.f32 0.0, %v17522_v62  ;;  %v8174_v15 = vmul.f32 1.442695, %v8136_v10  ;;  %v17525_v60 = vld [vmem:[#allocation499_spill] sm:$0xff] }
0x1237   :  { %11049 = vpow2.f32 %v8182_v61  ;;  %v8132_v11 = vsub.f32 0.0, %v17523_v27  ;;  %v8164_v39 = vmul.f32 1.442695, %v8131_v28  ;;  %v8168_v30 = vmul.f32 1.442695, %v8133_v47  ;;  %v17526_v7 = vld [vmem:[#allocation495_spill] sm:$0xff] }
0x1238   :  { %11051 = vpow2.f32 %v8172_v51  ;;  %v8162_v58 = vmul.f32 1.442695, %v8130_v19  ;;  %v10106_v34 = vcombine.high %v17525_v60, %v17524_v56  ;;  %v10105_v16 = vcombine.low %v17525_v60, %v17524_v56  ;;  %v17527_v14 = vld [vmem:[#allocation491_spill] sm:$0xff]  ;;  %s11216_s1 = smov [#allocation18]  }
0x1239   :  { %11053 = vpow2.f32 %v8176_v42  ;;  %v8166_v53 = vmul.f32 1.442695, %v8132_v11  ;;  %v10098_v25 = vcombine.high %v17527_v14, %v17526_v7  ;;  %v10097_v59 = vcombine.low %v17527_v14, %v17526_v7  ;;  %v17528_v38 = vld [vmem:[#allocation487_spill] sm:$0xff]  ;;  %s9509_s14 = sshll.u32 %s11216_s1, 4  ;;  %s9510_s14 = int_to_ptr.vmem [resolvable:$true] %s9509_s14 }
0x123a   :  { %11055 = vpow2.f32 %v8170_v55  ;;  %8673 = vmatprep.subr.bf16.mxu1 %v10106_v34  ;;  %v17529_v18 = vld [vmem:[#allocation483_spill] sm:$0xff]  ;;  %s11139_s13 = scalar_lea.vmem %s9510_s14, 128  ;;  %p11144_p1 = scmp.lt.s32.totalorder %s9510_s14, %s9510_s14 }
0x123b   :  { %11057 = vpow2.f32 %v8174_v15  ;;  %8674 = vmatpush1.bf16.msra.mxu1 %v10105_v16  ;;  %v10090_v5 = vcombine.high %v17529_v18, %v17528_v38  ;;  %v10089_v43 = vcombine.low %v17529_v18, %v17528_v38  ;;  %v17530_v50 = vld [vmem:[#allocation479_spill] sm:$0xff]  ;;  %v17535_v16 = vld [vmem:[#allocation438_spill] sm:$0xff]  ;;  %p11140_p0 = scmp.ne.s32.totalorder %s9510_s14, %s11139_s13  ;;  %p11145_p2 = scmp.lt.s32.totalorder %s11139_s13, %s11139_s13 }
0x123c   :  { %11059 = vpow2.f32 %v8164_v39  ;;  %8675 = vmatprep.subr.bf16.mxu1 %v10098_v25  ;;  %v17531_v13 = vld [vmem:[#allocation475_spill] sm:$0xff]  ;;  %v17532_v39 = vld [vmem:[#allocation436_spill] sm:$0xff] }
0x123d   :  { %v11036_v36 = vpop.eup %11035  ;;  %11061 = vpow2.f32 %v8168_v30  ;;  %v10082_v61 = vcombine.high %v17531_v13, %v17530_v50  ;;  %v10081_v19 = vcombine.low %v17531_v13, %v17530_v50  ;;  %v8127_v30 = vsub.f32 0.0, %v17532_v39  ;;  %v17536_v25 = vld [vmem:[#allocation435_spill] sm:$0xff]  ;;  %p11146_p3 = por %p11145_p2, %p11144_p1 }
0x123e   :  { %v11038_v31 = vpop.eup %11037  ;;  %v8215_v40 = vadd.f32 1.0, %v11036_v36  ;;  %11063 = vpow2.f32 %v8162_v58  ;;  %v17533_v58 = vld [vmem:[#allocation471_spill] sm:$0xff]  ;;  %v8129_v36 = vsub.f32 0.0, %v17535_v16 }
0x123f   :  { %v11040_v63 = vpop.eup %11039  ;;  %v8217_v48 = vadd.f32 1.0, %v11038_v31  ;;  %11065 = vpow2.f32 %v8166_v53  ;;  %8676 = vmatpush1.bf16.msra.mxu1 %v10097_v59  ;;  %v17534_v53 = vld [vmem:[#allocation467_spill] sm:$0xff]  ;;  %v8126_v31 = vsub.f32 0.0, %v17536_v25  ;;  %v8156_v18 = vmul.f32 1.442695, %v8127_v30  ;;  %p11147_p4 = pnand %p11146_p3, %p11140_p0 }
0x1240   :  { %v11042_v23 = vpop.eup %11041  ;;  %11067 = vrcp.f32 %v8215_v40  ;;  %v8214_v9 = vadd.f32 1.0, %v11040_v63  ;;  %8677 = vmatprep.subr.bf16.mxu1 %v10090_v5  ;;  %v10074_v56 = vcombine.high %v17534_v53, %v17533_v58  ;;  %v17538_v5 = vld [vmem:[#allocation432_spill] sm:$0xff]  ;;  %v17540_v50 = vld [vmem:[#allocation431_spill] sm:$0xff] }
0x1241   :  { %v11044_v22 = vpop.eup %11043  ;;  %11069 = vrcp.f32 %v8217_v48  ;;  %v8216_v52 = vadd.f32 1.0, %v11042_v23  ;;  %v17537_v48 = vld [vmem:[#allocation437_spill] sm:$0xff]  ;;  %v10073_v23 = vcombine.low %v17534_v53, %v17533_v58  ;;  %v8122_v13 = vsub.f32 0.0, %v17540_v50 }
0x1242   :  { %v11046_v12 = vpop.eup %11045  ;;  %11071 = vrcp.f32 %v8214_v9  ;;  %v8211_v29 = vadd.f32 1.0, %v11044_v22  ;;  %v8128_v59 = vsub.f32 0.0, %v17537_v48  ;;  %v8123_v22 = vsub.f32 0.0, %v17538_v5 }
0x1243   :  { %v11048_v0 = vpop.eup %11047  ;;  %11073 = vrcp.f32 %v8216_v52  ;;  %v8213_v33 = vadd.f32 1.0, %v11046_v12  ;;  %8678 = vmatpush1.bf16.msra.mxu1 %v10089_v43 }
0x1244   :  { %v11050_v21 = vpop.eup %11049  ;;  %11075 = vrcp.f32 %v8211_v29  ;;  %v8210_v4 = vadd.f32 1.0, %v11048_v0  ;;  %8679 = vmatprep.subr.bf16.mxu1 %v10082_v61  ;;  %v8160_v29 = vmul.f32 1.442695, %v8129_v36  ;;  %v17539_v0 = vld [vmem:[#allocation434_spill] sm:$0xff] }
0x1245   :  { %v11052_v10 = vpop.eup %11051  ;;  %11077 = vrcp.f32 %v8213_v33  ;;  %v8212_v51 = vadd.f32 1.0, %v11050_v21  ;;  %v8125_v33 = vsub.f32 0.0, %v17539_v0 }
0x1246   :  { %v11054_v28 = vpop.eup %11053  ;;  %11079 = vrcp.f32 %v8210_v4  ;;  %v8207_v42 = vadd.f32 1.0, %v11052_v10  ;;  %v8154_v4 = vmul.f32 1.442695, %v8126_v31 }
0x1247   :  { %v11056_v47 = vpop.eup %11055  ;;  %11081 = vrcp.f32 %v8212_v51  ;;  %v8209_v55 = vadd.f32 1.0, %v11054_v28  ;;  %8680 = vmatpush1.bf16.msra.mxu1 %v10081_v19  ;;  %v8158_v51 = vmul.f32 1.442695, %v8128_v59  ;;  %v17541_v28 = vld [vmem:[#allocation433_spill] sm:$0xff]  ;;  %v8148_v19 = vmul.f32 1.442695, %v8123_v22 }
0x1248   :  { %v11058_v15 = vpop.eup %11057  ;;  %11083 = vrcp.f32 %v8207_v42  ;;  %v8206_v11 = vadd.f32 1.0, %v11056_v47  ;;  %8681 = vmatprep.subr.bf16.mxu1 %v10074_v56  ;;  %v8124_v42 = vsub.f32 0.0, %v17541_v28  ;;  %v8152_v30 = vmul.f32 1.442695, %v8125_v33 }
0x1249   :  { %v11060_v60 = vpop.eup %11059  ;;  %11085 = vrcp.f32 %v8209_v55  ;;  %v8208_v34 = vadd.f32 1.0, %v11058_v15 }
0x124a   :  { %v11062_v7 = vpop.eup %11061  ;;  %11087 = vrcp.f32 %v8206_v11  ;;  %v8203_v14 = vadd.f32 1.0, %v11060_v60 }
0x124b   :  { %v11064_v40 = vpop.eup %11063  ;;  %11089 = vrcp.f32 %v8208_v34  ;;  %v8205_v63 = vadd.f32 1.0, %v11062_v7  ;;  %8682 = vmatpush1.bf16.msra.mxu1 %v10073_v23 }
0x124c   :  { %v11066_v9 = vpop.eup %11065  ;;  %11091 = vrcp.f32 %v8203_v14  ;;  %v8202_v38 = vadd.f32 1.0, %v11064_v40 }
0x124d   :  { %v11068_v52 = vpop.eup %11067  ;;  %11093 = vrcp.f32 %v8205_v63  ;;  %v8204_v12 = vadd.f32 1.0, %v11066_v9 }
0x124e   :  { %v11070_v43 = vpop.eup %11069  ;;  %v8261_v21 = vmul.f32 %v11068_v52, %v17506_v1  ;;  %11095 = vrcp.f32 %v8202_v38 }
0x124f   :  { %v11072_v61 = vpop.eup %11071  ;;  %v8265_v10 = vmul.f32 %v11070_v43, %v17507_v46  ;;  %11097 = vrcp.f32 %v8204_v12  ;;  %v8146_v46 = vmul.f32 1.442695, %v8122_v13 }
0x1250   :  { %v11074_v47 = vpop.eup %11073  ;;  %v8259_v55 = vmul.f32 %v11072_v61, %v17508_v57  ;;  %11099 = vpow2.f32 %v8156_v18  ;;  %v8150_v57 = vmul.f32 1.442695, %v8124_v42 }
0x1251   :  { %v11076_v15 = vpop.eup %11075  ;;  %v8281_v11 = vpack.c.bf16 %v8265_v10, %v8261_v21  ;;  %v8263_v1 = vmul.f32 %v11074_v47, %v17509_v26  ;;  %11101 = vpow2.f32 %v8160_v29 }
0x1252   :  { %v11078_v58 = vpop.eup %11077  ;;  %v8253_v53 = vmul.f32 %v11076_v15, %v17510_v2  ;;  %11103 = vpow2.f32 %v8154_v4 }
0x1253   :  { %v11080_v56 = vpop.eup %11079  ;;  %10057 = vmatprep.subr.msk.bf16.mxu0 %vm5649_vm5, %v8281_v11  ;;  %v8280_v60 = vpack.c.bf16 %v8263_v1, %v8259_v55  ;;  %v8257_v34 = vmul.f32 %v11078_v58, %v17511_v32  ;;  %11105 = vpow2.f32 %v8158_v51 }
0x1254   :  { %v11082_v36 = vpop.eup %11081  ;;  %11107 = vpow2.f32 %v8148_v19  ;;  %v8251_v14 = vmul.f32 %v11080_v56, %v17512_v35 }
0x1255   :  { %v11084_v7 = vpop.eup %11083  ;;  %8329 = vmatpush1.bf16.xpose.msra.mxu0 %v8280_v60  ;;  %v8279_v26 = vpack.c.bf16 %v8257_v34, %v8253_v53  ;;  %v8255_v31 = vmul.f32 %v11082_v36, %v17515_v24  ;;  %11109 = vpow2.f32 %v8152_v30 }
0x1256   :  { %v11086_v2 = vpop.eup %11085  ;;  %v8245_v40 = vmul.f32 %v11084_v7, %v17516_v8  ;;  %11111 = vpow2.f32 %v8146_v46 }
0x1257   :  { %v11088_v63 = vpop.eup %11087  ;;  %10058 = vmatprep.subr.msk.bf16.mxu0 %vm5649_vm5, %v8279_v26  ;;  %v8249_v32 = vmul.f32 %v11086_v2, %v17517_v37  ;;  %11113 = vpow2.f32 %v8150_v57  ;;  %v8278_v9 = vpack.c.bf16 %v8255_v31, %v8251_v14 }
0x1258   :  { %v11090_v59 = vpop.eup %11089  ;;  %v8243_v24 = vmul.f32 %v11088_v63, %v17518_v20  ;;  %v17543_v63 = vld [vmem:[#allocation501_spill] sm:$0xff] }
0x1259   :  { %v11092_v23 = vpop.eup %11091  ;;  %v8277_v18 = vpack.c.bf16 %v8249_v32, %v8245_v40  ;;  %v8247_v8 = vmul.f32 %v11090_v59, %v17519_v6  ;;  %v17544_v59 = vld [vmem:[#allocation458_spill] sm:$0xff] }
0x125a   :  { %v11094_v38 = vpop.eup %11093  ;;  %v8237_v29 = vmul.f32 %v11092_v23, %v17520_v49 }
0x125b   :  { %v11096_v22 = vpop.eup %11095  ;;  %v8241_v37 = vmul.f32 %v11094_v38, %v17521_v54  ;;  %v8276_v10 = vpack.c.bf16 %v8247_v8, %v8243_v24  ;;  %v17547_v38 = vld [vmem:[#allocation493_spill] sm:$0xff] }
0x125c   :  { %v11098_v35 = vpop.eup %11097  ;;  %v8235_v19 = vmul.f32 %v11096_v22, %v17522_v62  ;;  %v17548_v22 = vld [vmem:[#allocation489_spill] sm:$0xff] }
0x125d   :  { %v11100_v52 = vpop.eup %11099  ;;  %8331 = vmatpush1.bf16.xpose.msra.mxu0 %v8278_v9  ;;  %v8275_v42 = vpack.c.bf16 %v8241_v37, %v8237_v29  ;;  %v8239_v15 = vmul.f32 %v11098_v35, %v17523_v27  ;;  %v17549_v35 = vld [vmem:[#allocation485_spill] sm:$0xff] }
0x125e   :  { %v11102_v12 = vpop.eup %11101  ;;  %10059 = vmatprep.subr.msk.bf16.mxu0 %vm5649_vm5, %v8277_v18  ;;  %v8199_v33 = vadd.f32 1.0, %v11100_v52  ;;  %v10093_v52 = vcombine.low %v17549_v35, %v17548_v22  ;;  %v17550_v24 = vld [vmem:[#allocation481_spill] sm:$0xff] }
0x125f   :  { %v11104_v43 = vpop.eup %11103  ;;  %v8201_v21 = vadd.f32 1.0, %v11102_v12  ;;  %v8274_v1 = vpack.c.bf16 %v8239_v15, %v8235_v19  ;;  %v17551_v8 = vld [vmem:[#allocation477_spill] sm:$0xff] }
0x1260   :  { %v11106_v4 = vpop.eup %11105  ;;  %11115 = vrcp.f32 %v8199_v33  ;;  %v8198_v13 = vadd.f32 1.0, %v11104_v43  ;;  %v10086_v12 = vcombine.high %v17551_v8, %v17550_v24  ;;  %v10085_v29 = vcombine.low %v17551_v8, %v17550_v24  ;;  %v17552_v37 = vld [vmem:[#allocation473_spill] sm:$0xff]  ;;  %v17576_v8 = vld [vmem:[#allocation482_spill] sm:$0xff] }
0x1261   :  { %v11108_v61 = vpop.eup %11107  ;;  %11117 = vrcp.f32 %v8201_v21  ;;  %v8200_v51 = vadd.f32 1.0, %v11106_v4  ;;  %v17553_v33 = vld [vmem:[#allocation469_spill] sm:$0xff]  ;;  %v17554_v4 = vld [vmem:[#allocation463_spill] sm:$0xff] }
0x1262   :  { %v11110_v20 = vpop.eup %11109  ;;  %11119 = vrcp.f32 %v8198_v13  ;;  %v8195_v6 = vadd.f32 1.0, %v11108_v61  ;;  %v10078_v43 = vcombine.high %v17553_v33, %v17552_v37  ;;  %v10077_v21 = vcombine.low %v17553_v33, %v17552_v37  ;;  %v17555_v13 = vld [vmem:[#allocation459_spill] sm:$0xff]  ;;  %v17578_v33 = vld [vmem:[#allocation474_spill] sm:$0xff] }
0x1263   :  { %v11112_v47 = vpop.eup %11111  ;;  %11121 = vrcp.f32 %v8200_v51  ;;  %v8197_v55 = vadd.f32 1.0, %v11110_v20  ;;  %v10066_v61 = vcombine.high %v17555_v13, %v17554_v4  ;;  %v17556_v51 = vld [vmem:[#allocation465_spill] sm:$0xff] }
0x1264   :  { %v11114_v49 = vpop.eup %11113  ;;  %11123 = vrcp.f32 %v8195_v6  ;;  %v8194_v54 = vadd.f32 1.0, %v11112_v47  ;;  %v17557_v20 = vld [vmem:[#allocation461_spill] sm:$0xff]  ;;  %v17558_v47 = vld [vmem:[#allocation504_spill] sm:$0xff] }
0x1265   :  { %8333 = vmatpush1.bf16.xpose.msra.mxu0 %v8276_v10  ;;  %11125 = vrcp.f32 %v8197_v55  ;;  %v8196_v11 = vadd.f32 1.0, %v11114_v49  ;;  %v10065_v10 = vcombine.low %v17555_v13, %v17554_v4  ;;  %8683 = vmatprep.subr.bf16.mxu1 %v10066_v61  ;;  %v10069_v6 = vcombine.low %v17557_v20, %v17556_v51  ;;  %v17559_v55 = vld [vmem:[#allocation500_spill] sm:$0xff]  ;;  %v17580_v13 = vld [vmem:[#allocation466_spill] sm:$0xff] }
0x1266   :  { %10060 = vmatprep.subr.msk.bf16.mxu0 %vm5649_vm5, %v8275_v42  ;;  %11127 = vrcp.f32 %v8194_v54  ;;  %v10070_v42 = vcombine.high %v17557_v20, %v17556_v51  ;;  %v10108_v49 = vcombine.high %v17559_v55, %v17558_v47  ;;  %v17581_v61 = vld [vmem:[#allocation462_spill] sm:$0xff] }
0x1267   :  { %11129 = vrcp.f32 %v8196_v11  ;;  %8684 = vmatpush1.bf16.msra.mxu1 %v10065_v10  ;;  %v10107_v11 = vcombine.low %v17559_v55, %v17558_v47  ;;  %v10072_v10 = vcombine.high %v17581_v61, %v17580_v13  ;;  %v10071_v51 = vcombine.low %v17581_v61, %v17580_v13  ;;  %v9042_v20 = vld [vmem:[%s17244_s9 + $0xc8] sm:$0xff]  ;;  %v9025_v55 = vld [vmem:[%s17244_s9 + $0x40] sm:$0xff] }
0x1268   :  { %8726 = vmatprep.subr.bf16.mxu1 %v10108_v49  ;;  %v9026_v47 = vld [vmem:[%s17244_s9 + $0x48] sm:$0xff]  ;;  %v8901_v61 = vld [vmem:[%s17245_s6 + $0xa0] sm:$0xff] }
0x1269   :  { %v9018_v49 = vld [vmem:[%s17244_s9 + $0x8] sm:$0xff] }
0x126d   :  { %v11116_v30 = vpop.eup %11115  ;;  %8335 = vmatpush1.bf16.xpose.msra.mxu0 %v8274_v1 }
0x126e   :  { %v11118_v58 = vpop.eup %11117  ;;  %v8229_v53 = vmul.f32 %v11116_v30, %v17532_v39  ;;  %v17560_v30 = vld [vmem:[#allocation496_spill] sm:$0xff] }
0x126f   :  { %v11120_v46 = vpop.eup %11119  ;;  %v8233_v56 = vmul.f32 %v11118_v58, %v17535_v16  ;;  %v17561_v58 = vld [vmem:[#allocation492_spill] sm:$0xff] }
0x1270   :  { %v11122_v60 = vpop.eup %11121  ;;  %v8227_v62 = vmul.f32 %v11120_v46, %v17536_v25 }
0x1271   :  { %v11124_v34 = vpop.eup %11123  ;;  %v8273_v27 = vpack.c.bf16 %v8233_v56, %v8229_v53  ;;  %v8231_v57 = vmul.f32 %v11122_v60, %v17537_v48  ;;  %v17542_v48 = vld [vmem:[#allocation505_spill] sm:$0xff]  ;;  %v10100_v53 = vcombine.high %v17561_v58, %v17560_v30  ;;  %v10099_v60 = vcombine.low %v17561_v58, %v17560_v30  ;;  %v9035_v30 = vld [vmem:[%s17244_s9 + $0x90] sm:$0xff]  ;;  %v9028_v58 = vld [vmem:[%s17244_s9 + $0x58] sm:$0xff] }
0x1272   :  { %v11126_v36 = vpop.eup %11125  ;;  %v8221_v7 = vmul.f32 %v11124_v34, %v17538_v5  ;;  %v10110_v32 = vcombine.high %v17543_v63, %v17542_v48  ;;  %v10053_v5 = vcombine.low %v17514_v45, %v17513_v41  ;;  %v10109_v9 = vcombine.low %v17543_v63, %v17542_v48  ;;  %v17563_v34 = vld [vmem:[#allocation484_spill] sm:$0xff] }
0x1273   :  { %v11128_v26 = vpop.eup %11127  ;;  %10061 = vmatprep.subr.msk.bf16.mxu0 %vm5649_vm5, %v8273_v27  ;;  %v8272_v14 = vpack.c.bf16 %v8231_v57, %v8227_v62  ;;  %v8225_v31 = vmul.f32 %v11126_v36, %v17539_v0  ;;  %v17545_v0 = vld [vmem:[#allocation457_spill] sm:$0xff]  ;;  %v10094_v41 = vcombine.high %v17549_v35, %v17548_v22  ;;  %v17562_v62 = vld [vmem:[#allocation488_spill] sm:$0xff] }
0x1274   :  { %v11130_v39 = vpop.eup %11129  ;;  %v8219_v16 = vmul.f32 %v11128_v26, %v17540_v50  ;;  %v10056_v23 = vcombine.high %v17545_v0, %v17544_v59  ;;  %v17546_v50 = vld [vmem:[#allocation497_spill] sm:$0xff]  ;;  %v10055_v45 = vcombine.low %v17545_v0, %v17544_v59  ;;  %v10092_v27 = vcombine.high %v17563_v34, %v17562_v62 }
0x1275   :  { %8337 = vmatpush1.bf16.xpose.msra.mxu0 %v8272_v14  ;;  %v8271_v2 = vpack.c.bf16 %v8225_v31, %v8221_v7  ;;  %v8223_v25 = vmul.f32 %v11130_v39, %v17541_v28  ;;  %v10102_v28 = vcombine.high %v17547_v38, %v17546_v50  ;;  %v10101_v18 = vcombine.low %v17547_v38, %v17546_v50  ;;  %v17564_v14 = vld [vmem:[#allocation480_spill] sm:$0xff] }
0x1276   :  { %v10091_v7 = vcombine.low %v17563_v34, %v17562_v62  ;;  %v17565_v31 = vld [vmem:[#allocation476_spill] sm:$0xff] }
0x1277   :  { %10062 = vmatprep.subr.msk.bf16.mxu0 %vm5649_vm5, %v8271_v2  ;;  %v8270_v40 = vpack.c.bf16 %v8223_v25, %v8219_v16  ;;  %v10084_v39 = vcombine.high %v17565_v31, %v17564_v14  ;;  %v10083_v16 = vcombine.low %v17565_v31, %v17564_v14  ;;  %v17566_v25 = vld [vmem:[#allocation472_spill] sm:$0xff]  ;;  %v8890_v14 = vld [vmem:[%s17245_s6 + $0x48] sm:$0xff] }
0x1278   :  { %v8881_v31 = vld [vmem:[%s17245_s6] sm:$0xff] }
0x127d   :  { %8339 = vmatpush1.bf16.xpose.msra.mxu0 %v8270_v40  ;;  %v17567_v40 = vld [vmem:[#allocation468_spill] sm:$0xff] }
0x127e   :  { %8779 = vmatprep.subr.bf16.mxu0 %v10110_v32  ;;  %v10076_v48 = vcombine.high %v17567_v40, %v17566_v25  ;;  %v10075_v63 = vcombine.low %v17567_v40, %v17566_v25  ;;  %v17568_v32 = vld [vmem:[#allocation464_spill] sm:$0xff]  ;;  %v8882_v40 = vld [vmem:[%s17245_s6 + $0x8] sm:$0xff] }
0x127f   :  { %v8897_v25 = vld [vmem:[%s17245_s6 + $0x80] sm:$0xff] }
0x1284   :  { %8357 = vmatmul.mubr.bf16.vlgmr.msra.gmra.mxu0 %v10053_v5  ;;  %v17569_v5 = vld [vmem:[#allocation460_spill] sm:$0xff] }
0x1285   :  { %10064 = vmatprep.mubr.msk.bf16.mxu0 %vm5649_vm5, %v10056_v23  ;;  %8780 = vmatpush1.bf16.msra.mxu0 %v10109_v9  ;;  %v10068_v59 = vcombine.high %v17569_v5, %v17568_v32  ;;  %v10067_v0 = vcombine.low %v17569_v5, %v17568_v32  ;;  %v17570_v23 = vld [vmem:[#allocation506_spill] sm:$0xff] }
0x1286   :  { %8781 = vmatprep.subr.bf16.mxu0 %v10102_v28  ;;  %v17571_v9 = vld [vmem:[#allocation502_spill] sm:$0xff] }
0x1287   :  { %v10112_v50 = vcombine.high %v17571_v9, %v17570_v23  ;;  %v10111_v38 = vcombine.low %v17571_v9, %v17570_v23  ;;  %v17572_v28 = vld [vmem:[#allocation498_spill] sm:$0xff] }
0x1288   :  { %v8902_v23 = vld [vmem:[%s17245_s6 + $0xa8] sm:$0xff] }
0x1289   :  { %8782 = vmatpush1.bf16.msra.mxu0 %v10101_v18  ;;  %v17573_v18 = vld [vmem:[#allocation494_spill] sm:$0xff] }
0x128a   :  { %8783 = vmatprep.subr.bf16.mxu0 %v10094_v41  ;;  %v10104_v22 = vcombine.high %v17573_v18, %v17572_v28  ;;  %v10103_v35 = vcombine.low %v17573_v18, %v17572_v28  ;;  %v17574_v41 = vld [vmem:[#allocation490_spill] sm:$0xff] }
0x128c   :  { %8365 = vmatmul.mubr.bf16.gmra.mxu0 %v10055_v45  ;;  %v17575_v45 = vld [vmem:[#allocation486_spill] sm:$0xff] }
0x128d   :  { %8784 = vmatpush1.bf16.msra.mxu0 %v10093_v52  ;;  %8807 = vmatprep.mubr.bf16.mxu0 %v11214_v44  ;;  %v10096_v52 = vcombine.high %v17575_v45, %v17574_v41  ;;  %v10095_v24 = vcombine.low %v17575_v45, %v17574_v41 }
0x128e   :  { %8785 = vmatprep.subr.bf16.mxu0 %v10086_v12  ;;  %v17577_v12 = vld [vmem:[#allocation478_spill] sm:$0xff] }
0x128f   :  { %v10087_v37 = vcombine.low %v17577_v12, %v17576_v8 }
0x1291   :  { %8786 = vmatpush1.bf16.msra.mxu0 %v10085_v29  ;;  %v10088_v29 = vcombine.high %v17577_v12, %v17576_v8 }
0x1292   :  { %8787 = vmatprep.subr.bf16.mxu0 %v10078_v43  ;;  %v17579_v43 = vld [vmem:[#allocation470_spill] sm:$0xff] }
0x1293   :  { %v10079_v4 = vcombine.low %v17579_v43, %v17578_v33 }
0x1295   :  { %8788 = vmatpush1.bf16.msra.mxu0 %v10077_v21  ;;  %v10080_v21 = vcombine.high %v17579_v43, %v17578_v33  ;;  %v8906_v33 = vld [vmem:[%s17245_s6 + $0xc8] sm:$0xff] }
0x1296   :  { %8789 = vmatprep.subr.bf16.mxu0 %v10070_v42  ;;  %v9041_v42 = vld [vmem:[%s17244_s9 + $0xc0] sm:$0xff]  ;;  %v8910_v43 = vld [vmem:[%s17245_s6 + $0xe8] sm:$0xff] }
0x1299   :  { %8790 = vmatpush1.bf16.msra.mxu0 %v10069_v6  ;;  %v9034_v6 = vld [vmem:[%s17244_s9 + $0x88] sm:$0xff] }
0x129a   :  { %9073 = vmatprep.subr.mxu0 %v9042_v20 }
0x1344   :  { %v8358_v54 = vpop.f32.mrf.mxu0 }
0x1346   :  { %v8360_v19 = vpop.f32.mrf.mxu0 }
0x1347   :  { %v9046_v19 = vld [vmem:[%s17244_s9 + $0xe8] sm:$0xff] }
0x1348   :  { %v8361_v15 = vpop.f32.mrf.mxu0 }
0x1349   :  { %v15856_v1 = vpack.c.bf16 %v8361_v15, %v8358_v54  ;;  %v9017_v54 = vld [vmem:[%s17244_s9] sm:$0xff]  ;;  %v9044_v15 = vld [vmem:[%s17244_s9 + $0xd8] sm:$0xff] }
0x134a   :  { %v8363_v46 = vpop.f32.mrf.mxu0 }
0x134b   :  { %10113 = vmatmul.mubr.msk.bf16.vlgmr.msra.gmra.mxu1 %vm3127_vm3, %v15856_v1  ;;  %10117 = vmatmul.mubr.msk.bf16.vlgmr.msra.gmra.mxu0 %vm3127_vm3, %v15856_v1  ;;  %v9020_v46 = vld [vmem:[%s17244_s9 + $0x18] sm:$0xff] }
0x134c   :  { %8727 = vmatpush1.bf16.msra.mxu1 %v10107_v11  ;;  %v8366_v56 = vpop.f32.mrf.mxu0  ;;  %8711 = vmatprep.mubr.bf16.mxu1 %v11214_v44  ;;  %v9043_v11 = vld [vmem:[%s17244_s9 + $0xd0] sm:$0xff] }
0x134d   :  { %8728 = vmatprep.subr.bf16.mxu1 %v10100_v53  ;;  %8817 = vmatprep.mubr.bf16.mxu0 %v11214_v44  ;;  %v9027_v53 = vld [vmem:[%s17244_s9 + $0x50] sm:$0xff] }
0x134e   :  { %v8368_v57 = vpop.f32.mrf.mxu0  ;;  %9074 = vmatpush1.xpose.msra.mxu0 %v9041_v42 }
0x134f   :  { %9075 = vmatprep.subr.mxu0 %v9034_v6 }
0x1350   :  { %8729 = vmatpush1.bf16.msra.mxu1 %v10099_v60  ;;  %v8369_v36 = vpop.f32.mrf.mxu0  ;;  %v9048_v60 = vld [vmem:[%s17244_s9 + $0xf8] sm:$0xff] }
0x1351   :  { %v8374_v26 = vpack.c.bf16 %v8369_v36, %v8366_v56  ;;  %8730 = vmatprep.subr.bf16.mxu1 %v10092_v27  ;;  %v9019_v56 = vld [vmem:[%s17244_s9 + $0x10] sm:$0xff] }
0x1352   :  { %v8371_v2 = vpop.f32.mrf.mxu0 }
0x1353   :  { %10114 = vmatmul.mubr.msk.bf16.gmra.mxu1 %vm3127_vm3, %v8374_v26  ;;  %10118 = vmatmul.mubr.msk.bf16.gmra.mxu0 %vm3127_vm3, %v8374_v26 }
0x1354   :  { %8731 = vmatpush1.bf16.msra.mxu1 %v10091_v7  ;;  %8754 = vmatprep.mubr.bf16.mxu1 %v11214_v44  ;;  %v8889_v7 = vld [vmem:[%s17245_s6 + $0x40] sm:$0xff] }
0x1355   :  { %8732 = vmatprep.subr.bf16.mxu1 %v10084_v39 }
0x1358   :  { %8733 = vmatpush1.bf16.msra.mxu1 %v10083_v16  ;;  %v8894_v16 = vld [vmem:[%s17245_s6 + $0x68] sm:$0xff] }
0x1359   :  { %8734 = vmatprep.subr.bf16.mxu1 %v10076_v48 }
0x135c   :  { %8735 = vmatpush1.bf16.msra.mxu1 %v10075_v63  ;;  %v8886_v63 = vld [vmem:[%s17245_s6 + $0x28] sm:$0xff] }
0x135d   :  { %8736 = vmatprep.subr.bf16.mxu1 %v10068_v59 }
0x1360   :  { %8737 = vmatpush1.bf16.msra.mxu1 %v10067_v0  ;;  %v8898_v0 = vld [vmem:[%s17245_s6 + $0x88] sm:$0xff] }
0x1361   :  { %8832 = vmatprep.subr.bf16.mxu1 %v10112_v50 }
0x1363   :  { %10115 = vmatmul.mubr.msk.bf16.vlgmr.msra.gmra.mxu1 %vm3127_vm3, %v15856_v1 }
0x1364   :  { %8833 = vmatpush1.bf16.msra.mxu1 %v10111_v38  ;;  %8764 = vmatprep.mubr.bf16.mxu1 %v11214_v44 }
0x1365   :  { %8834 = vmatprep.subr.bf16.mxu1 %v10104_v22 }
0x1368   :  { %8835 = vmatpush1.bf16.msra.mxu1 %v10103_v35  ;;  %v8905_v35 = vld [vmem:[%s17245_s6 + $0xc0] sm:$0xff] }
0x1369   :  { %8836 = vmatprep.subr.bf16.mxu1 %v10096_v52  ;;  %v8893_v52 = vld [vmem:[%s17245_s6 + $0x60] sm:$0xff] }
0x136b   :  { %10116 = vmatmul.mubr.msk.bf16.gmra.mxu1 %vm3127_vm3, %v8374_v26 }
0x136c   :  { %8837 = vmatpush1.bf16.msra.mxu1 %v10095_v24  ;;  %8860 = vmatprep.mubr.bf16.mxu1 %v11214_v44 }
0x136d   :  { %8838 = vmatprep.subr.bf16.mxu1 %v10088_v29 }
0x1370   :  { %8839 = vmatpush1.bf16.msra.mxu1 %v10087_v37 }
0x1371   :  { %8840 = vmatprep.subr.bf16.mxu1 %v10080_v21  ;;  %v8885_v21 = vld [vmem:[%s17245_s6 + $0x20] sm:$0xff] }
0x1374   :  { %8841 = vmatpush1.bf16.msra.mxu1 %v10079_v4 }
0x1375   :  { %8842 = vmatprep.subr.bf16.mxu1 %v10072_v10 }
0x1378   :  { %8843 = vmatpush1.bf16.msra.mxu1 %v10071_v51 }
0x1379   :  { %9143 = vmatprep.subr.mxu1 %v9044_v15 }
0x137b   :  { %10119 = vmatmul.mubr.msk.bf16.vlgmr.msra.gmra.mxu1 %vm3127_vm3, %v15856_v1  ;;  %v9036_v1 = vld [vmem:[%s17244_s9 + $0x98] sm:$0xff] }
0x137c   :  { %8870 = vmatprep.mubr.bf16.mxu1 %v11214_v44  ;;  %v9033_v44 = vld [vmem:[%s17244_s9 + $0x80] sm:$0xff]  ;;  %9144 = vmatpush1.xpose.msra.mxu1 %v9043_v11 }
0x137d   :  { %9076 = vmatpush1.xpose.msra.mxu0 %v9033_v44  ;;  %9145 = vmatprep.subr.mxu1 %v9036_v1 }
0x137e   :  { %9077 = vmatprep.subr.mxu0 %v9026_v47 }
0x1380   :  { %9146 = vmatpush1.xpose.msra.mxu1 %v9035_v30 }
0x1381   :  { %9078 = vmatpush1.xpose.msra.mxu0 %v9025_v55  ;;  %9147 = vmatprep.subr.mxu1 %v9028_v58  ;;  %v8909_v55 = vld [vmem:[%s17245_s6 + $0xe0] sm:$0xff] }
0x1382   :  { %9079 = vmatprep.subr.mxu0 %v9018_v49 }
0x1383   :  { %10120 = vmatmul.mubr.msk.bf16.gmra.mxu1 %vm3127_vm3, %v8374_v26 }
0x1384   :  { %9148 = vmatpush1.xpose.msra.mxu1 %v9027_v53 }
0x1385   :  { %9080 = vmatpush1.xpose.msra.mxu0 %v9017_v54  ;;  %9149 = vmatprep.subr.mxu1 %v9020_v46 }
0x1386   :  { %9213 = vmatprep.subr.mxu0 %v9046_v19 }
0x1388   :  { %9150 = vmatpush1.xpose.msra.mxu1 %v9019_v56 }
0x1389   :  { %9283 = vmatprep.subr.mxu1 %v9048_v60 }
0x140b   :  { %v8703_v62 = vpop.f32.mrf.mxu1  ;;  %v8809_v34 = vpop.f32.mrf.mxu0 }
0x140c   :  { %v8913_v9 = vmul.f32 %v8881_v31, %v8703_v62  ;;  %v8917_v19 = vmul.f32 %v8885_v21, %v8809_v34  ;;  %v9037_v21 = vld [vmem:[%s17244_s9 + $0xa0] sm:$0xff] }
0x140d   :  { %v8705_v27 = vpop.f32.mrf.mxu1  ;;  %v8811_v57 = vpop.f32.mrf.mxu0 }
0x140e   :  { %v8914_v28 = vmul.f32 %v8882_v40, %v8705_v27  ;;  %v8918_v41 = vmul.f32 %v8886_v63, %v8811_v57 }
0x140f   :  { %v8707_v36 = vpop.f32.mrf.mxu1  ;;  %v8813_v26 = vpop.f32.mrf.mxu0 }
0x1410   :  { %v8921_v48 = vmul.f32 %v8889_v7, %v8707_v36  ;;  %v8925_v51 = vmul.f32 %v8893_v52, %v8813_v26 }
0x1411   :  { %v8709_v39 = vpop.f32.mrf.mxu1  ;;  %v8815_v2 = vpop.f32.mrf.mxu0 }
0x1412   :  { %v8922_v32 = vmul.f32 %v8890_v14, %v8709_v39  ;;  %v8926_v50 = vmul.f32 %v8894_v16, %v8815_v2  ;;  %v8945_v45 = vadd.f32 %v8921_v48, %v8913_v9  ;;  %v8981_v58 = vadd.f32 %v8925_v51, %v8917_v19 }
0x1413   :  { %v8713_v5 = vpop.f32.mrf.mxu1  ;;  %v8819_v59 = vpop.f32.mrf.mxu0 }
0x1414   :  { %v8929_v38 = vmul.f32 %v8897_v25, %v8713_v5  ;;  %v8954_v12 = vadd.f32 %v8922_v32, %v8914_v28  ;;  %v8990_v4 = vadd.f32 %v8926_v50, %v8918_v41  ;;  %v8933_v15 = vmul.f32 %v8901_v61, %v8819_v59  ;;  %v8891_v32 = vld [vmem:[%s17245_s6 + $0x50] sm:$0xff]  ;;  %v9038_v41 = vld [vmem:[%s17244_s9 + $0xa8] sm:$0xff] }
0x1415   :  { %v8715_v18 = vpop.f32.mrf.mxu1  ;;  %v8821_v22 = vpop.f32.mrf.mxu0  ;;  %v8883_v59 = vld [vmem:[%s17245_s6 + $0x10] sm:$0xff] }
0x1416   :  { %v8930_v24 = vmul.f32 %v8898_v0, %v8715_v18  ;;  %v8934_v8 = vmul.f32 %v8902_v23, %v8821_v22  ;;  %v8946_v13 = vadd.f32 %v8945_v45, %v8929_v38  ;;  %v8982_v62 = vadd.f32 %v8981_v58, %v8933_v15  ;;  %v8892_v38 = vld [vmem:[%s17245_s6 + $0x58] sm:$0xff]  ;;  %v8899_v28 = vld [vmem:[%s17245_s6 + $0x90] sm:$0xff]  ;;  %v9045_v18 = vld [vmem:[%s17244_s9 + $0xe0] sm:$0xff] }
0x1417   :  { %v8717_v29 = vpop.f32.mrf.mxu1  ;;  %v8823_v37 = vpop.f32.mrf.mxu0  ;;  %v8884_v45 = vld [vmem:[%s17245_s6 + $0x18] sm:$0xff] }
0x1418   :  { %v8937_v10 = vmul.f32 %v8905_v35, %v8717_v29  ;;  %v8955_v20 = vadd.f32 %v8954_v12, %v8930_v24  ;;  %v8991_v44 = vadd.f32 %v8990_v4, %v8934_v8  ;;  %v8941_v53 = vmul.f32 %v8909_v55, %v8823_v37  ;;  %v8900_v24 = vld [vmem:[%s17245_s6 + $0x98] sm:$0xff] }
0x1419   :  { %v8719_v42 = vpop.f32.mrf.mxu1  ;;  %v8825_v6 = vpop.f32.mrf.mxu0 }
0x141a   :  { %v8947_v47 = vadd.f32 %v8946_v13, %v8937_v10  ;;  %v8938_v49 = vmul.f32 %v8906_v33, %v8719_v42  ;;  %v8942_v54 = vmul.f32 %v8910_v43, %v8825_v6  ;;  %v8983_v7 = vadd.f32 %v8982_v62, %v8941_v53  ;;  %v8907_v43 = vld [vmem:[%s17245_s6 + $0xd0] sm:$0xff]  ;;  %v9030_v10 = vld [vmem:[%s17244_s9 + $0x68] sm:$0xff]  ;;  %v9021_v53 = vld [vmem:[%s17244_s9 + $0x20] sm:$0xff] }
0x141c   :  { %v8948_v11 = vrot.slane %v8947_v47, 4  ;;  %v8956_v1 = vadd.f32 %v8955_v20, %v8938_v49  ;;  %v8992_v30 = vadd.f32 %v8991_v44, %v8942_v54  ;;  %v8984_v16 = vrot.slane %v8983_v7, 4  ;;  %v8908_v20 = vld [vmem:[%s17245_s6 + $0xd8] sm:$0xff]  ;;  %v9029_v49 = vld [vmem:[%s17244_s9 + $0x60] sm:$0xff] }
0x141e   :  { %v8949_v46 = vadd.f32 %v8948_v11, %v8947_v47  ;;  %v8957_v56 = vrot.slane %v8956_v1, 4  ;;  %v8993_v60 = vrot.slane %v8992_v30, 4  ;;  %v8985_v9 = vadd.f32 %v8984_v16, %v8983_v7  ;;  %v9022_v11 = vld [vmem:[%s17244_s9 + $0x28] sm:$0xff]  ;;  %v8887_v16 = vld [vmem:[%s17245_s6 + $0x30] sm:$0xff] }
0x1420   :  { %v8950_v27 = vrot.slane %v8949_v46, 2  ;;  %v8958_v57 = vadd.f32 %v8957_v56, %v8956_v1  ;;  %v8994_v36 = vadd.f32 %v8993_v60, %v8992_v30  ;;  %v8986_v37 = vrot.slane %v8985_v9, 2 }
0x1422   :  { %v8951_v26 = vadd.f32 %v8950_v27, %v8949_v46  ;;  %v8959_v14 = vrot.slane %v8958_v57, 2  ;;  %v8995_v31 = vrot.slane %v8994_v36, 2  ;;  %v8987_v47 = vadd.f32 %v8986_v37, %v8985_v9 }
0x1423   :  { %v8756_v39 = vpop.f32.mrf.mxu1 }
0x1424   :  { %v8960_v2 = vadd.f32 %v8959_v14, %v8958_v57  ;;  %v8952_v34 = vrot.slane %v8951_v26, 1  ;;  %v8996_v40 = vadd.f32 %v8995_v31, %v8994_v36  ;;  %v8915_v8 = vmul.f32 %v8883_v59, %v8756_v39 }
0x1425   :  { %v8758_v25 = vpop.f32.mrf.mxu1  ;;  %v8988_v58 = vrot.slane %v8987_v47, 1 }
0x1426   :  { %v8961_v48 = vrot.slane %v8960_v2, 1  ;;  %v8997_v5 = vrot.slane %v8996_v40, 1  ;;  %v8953_v23 = vadd.f32 %v8952_v34, %v8951_v26  ;;  %v8916_v4 = vmul.f32 %v8884_v45, %v8758_v25  ;;  %v8895_v34 = vld [vmem:[%s17245_s6 + $0x70] sm:$0xff] }
0x1427   :  { %v8760_v63 = vpop.f32.mrf.mxu1  ;;  %v8989_v27 = vadd.f32 %v8988_v58, %v8987_v47 }
0x1428   :  { %v8962_v0 = vadd.f32 %v8961_v48, %v8960_v2  ;;  %v8923_v22 = vmul.f32 %v8891_v32, %v8760_v63  ;;  %v8998_v35 = vadd.f32 %v8997_v5, %v8996_v40  ;;  %v8896_v63 = vld [vmem:[%s17245_s6 + $0x78] sm:$0xff]  ;;  %v8903_v32 = vld [vmem:[%s17245_s6 + $0xb0] sm:$0xff] }
0x1429   :  { %v8762_v50 = vpop.f32.mrf.mxu1  ;;  %v9047_v5 = vld [vmem:[%s17244_s9 + $0xf0] sm:$0xff] }
0x142a   :  { %9113 = vmatprep.mubr.f32.mxu0 %v8962_v0  ;;  %v8924_v12 = vmul.f32 %v8892_v38, %v8762_v50  ;;  %v8963_v13 = vadd.f32 %v8923_v22, %v8915_v8  ;;  %v9040_v0 = vld [vmem:[%s17244_s9 + $0xb8] sm:$0xff] }
0x142b   :  { %v8766_v52 = vpop.f32.mrf.mxu1  ;;  %9114 = vmatmul.mubr.f32.vlgmr.msra.gmra.mxu0 %v8953_v23  ;;  %v8888_v23 = vld [vmem:[%s17245_s6 + $0x38] sm:$0xff] }
0x142c   :  { %v8931_v29 = vmul.f32 %v8899_v28, %v8766_v52  ;;  %9214 = vmatpush1.xpose.msra.mxu0 %v9045_v18  ;;  %9253 = vmatprep.mubr.f32.mxu0 %v8998_v35  ;;  %v8972_v42 = vadd.f32 %v8924_v12, %v8916_v4  ;;  %v8904_v50 = vld [vmem:[%s17245_s6 + $0xb8] sm:$0xff]  ;;  %v8911_v35 = vld [vmem:[%s17245_s6 + $0xf0] sm:$0xff] }
0x142d   :  { %v8768_v33 = vpop.f32.mrf.mxu1  ;;  %9215 = vmatprep.subr.mxu0 %v9038_v41  ;;  %v9039_v41 = vld [vmem:[%s17244_s9 + $0xb0] sm:$0xff]  ;;  %v9032_v8 = vld [vmem:[%s17244_s9 + $0x78] sm:$0xff] }
0x142e   :  { %v8932_v61 = vmul.f32 %v8900_v24, %v8768_v33  ;;  %v8964_v6 = vadd.f32 %v8963_v13, %v8931_v29  ;;  %v8912_v29 = vld [vmem:[%s17245_s6 + $0xf8] sm:$0xff]  ;;  %v9031_v4 = vld [vmem:[%s17244_s9 + $0x70] sm:$0xff] }
0x142f   :  { %v8770_v51 = vpop.f32.mrf.mxu1 }
0x1430   :  { %v8939_v44 = vmul.f32 %v8907_v43, %v8770_v51  ;;  %9216 = vmatpush1.xpose.msra.mxu0 %v9037_v21  ;;  %v8973_v54 = vadd.f32 %v8972_v42, %v8932_v61  ;;  %v9024_v51 = vld [vmem:[%s17244_s9 + $0x38] sm:$0xff] }
0x1431   :  { %v8772_v55 = vpop.f32.mrf.mxu1  ;;  %9217 = vmatprep.subr.mxu0 %v9030_v10 }
0x1432   :  { %v8965_v19 = vadd.f32 %v8964_v6, %v8939_v44  ;;  %v8940_v15 = vmul.f32 %v8908_v20, %v8772_v55  ;;  %v9023_v6 = vld [vmem:[%s17244_s9 + $0x30] sm:$0xff] }
0x1434   :  { %v8966_v1 = vrot.slane %v8965_v19, 4  ;;  %v8974_v30 = vadd.f32 %v8973_v54, %v8940_v15  ;;  %9218 = vmatpush1.xpose.msra.mxu0 %v9029_v49 }
0x1435   :  { %9219 = vmatprep.subr.mxu0 %v9022_v11 }
0x1436   :  { %v8967_v46 = vadd.f32 %v8966_v1, %v8965_v19  ;;  %v8975_v56 = vrot.slane %v8974_v30, 4 }
0x1438   :  { %v8968_v60 = vrot.slane %v8967_v46, 2  ;;  %v8976_v62 = vadd.f32 %v8975_v56, %v8974_v30  ;;  %9220 = vmatpush1.xpose.msra.mxu0 %v9021_v53  ;;  %v10124_v53 = vld [vmem:[%s17247_s12 + $0x98] sm:$0xff]  ;;  %v10122_v56 = vld [vmem:[%s17247_s12 + $0x88] sm:$0xff] }
0x1439   :  { %10216 = vmatprep.subr.mxu0 %v17246_v17 }
0x143a   :  { %v8969_v57 = vadd.f32 %v8968_v60, %v8967_v46  ;;  %v8977_v36 = vrot.slane %v8976_v62, 2  ;;  %v10123_v46 = vld [vmem:[%s17247_s12 + $0x90] sm:$0xff]  ;;  %v10121_v60 = vld [vmem:[%s17247_s12 + $0x80] sm:$0xff] }
0x143b   :  { %v8862_v7 = vpop.f32.mrf.mxu1  ;;  %9254 = vmatmul.mubr.f32.vlgmr.msra.gmra.mxu0 %v8989_v27 }
0x143c   :  { %v8978_v26 = vadd.f32 %v8977_v36, %v8976_v62  ;;  %10224 = vmatprep.mubr.msk.f32.mxu0 %vm11215_vm4, %v17246_v17  ;;  %v8970_v14 = vrot.slane %v8969_v57, 1  ;;  %v8919_v38 = vmul.f32 %v8887_v16, %v8862_v7  ;;  %10217 = vmatpush3.msra.mxu0 %v10124_v53 }
0x143d   :  { %v8864_v31 = vpop.f32.mrf.mxu1  ;;  %10218 = vmatprep.subr.mxu0 %v17246_v17 }
0x143e   :  { %v8979_v39 = vrot.slane %v8978_v26, 1  ;;  %v8971_v40 = vadd.f32 %v8970_v14, %v8969_v57  ;;  %v8920_v45 = vmul.f32 %v8888_v23, %v8864_v31  ;;  %10219 = vmatpush3.msra.mxu0 %v10123_v46  ;;  %v9426_v23 = vld [vmem:[%s17582_s2 + $0x18] sm:$0xff] }
0x143f   :  { %v8866_v2 = vpop.f32.mrf.mxu1  ;;  %10220 = vmatprep.subr.mxu0 %v17246_v17 }
0x1440   :  { %v8980_v25 = vadd.f32 %v8979_v39, %v8978_v26  ;;  %v8927_v59 = vmul.f32 %v8895_v34, %v8866_v2  ;;  %10221 = vmatpush3.msra.mxu0 %v10122_v56  ;;  %v9330_v34 = vld [vmem:[%s17248_s24 + $0x4] sm:$0x1] }
0x1441   :  { %v8868_v48 = vpop.f32.mrf.mxu1  ;;  %10222 = vmatprep.subr.mxu0 %v17246_v17 }
0x1442   :  { %9183 = vmatprep.mubr.f32.mxu1 %v8980_v25  ;;  %v8928_v28 = vmul.f32 %v8896_v63, %v8868_v48  ;;  %v8999_v52 = vadd.f32 %v8927_v59, %v8919_v38  ;;  %10223 = vmatpush3.msra.mxu0 %v10121_v60  ;;  %v9423_v38 = vld [vmem:[%s17582_s2] sm:$0xff] }
0x1443   :  { %v8872_v9 = vpop.f32.mrf.mxu1  ;;  %9184 = vmatmul.mubr.f32.vlgmr.msra.gmra.mxu1 %v8971_v40 }
0x1444   :  { %v8935_v18 = vmul.f32 %v8903_v32, %v8872_v9  ;;  %9284 = vmatpush1.xpose.msra.mxu1 %v9047_v5  ;;  %v9008_v37 = vadd.f32 %v8928_v28, %v8920_v45  ;;  %v9425_v9 = vld [vmem:[%s17582_s2 + $0x10] sm:$0xff] }
0x1445   :  { %v8874_v22 = vpop.f32.mrf.mxu1  ;;  %9285 = vmatprep.subr.mxu1 %v9040_v0 }
0x1446   :  { %v8936_v24 = vmul.f32 %v8904_v50, %v8874_v22  ;;  %v9000_v33 = vadd.f32 %v8999_v52, %v8935_v18  ;;  %v9424_v50 = vld [vmem:[%s17582_s2 + $0x8] sm:$0xff] }
0x1447   :  { %v8876_v12 = vpop.f32.mrf.mxu1 }
0x1448   :  { %v8943_v43 = vmul.f32 %v8911_v35, %v8876_v12  ;;  %9286 = vmatpush1.xpose.msra.mxu1 %v9039_v41  ;;  %v9009_v13 = vadd.f32 %v9008_v37, %v8936_v24 }
0x1449   :  { %v8878_v21 = vpop.f32.mrf.mxu1  ;;  %9287 = vmatprep.subr.mxu1 %v9032_v8 }
0x144a   :  { %v9001_v61 = vadd.f32 %v9000_v33, %v8943_v43  ;;  %v8944_v10 = vmul.f32 %v8912_v29, %v8878_v21 }
0x144c   :  { %v9002_v20 = vrot.slane %v9001_v61, 4  ;;  %v9010_v42 = vadd.f32 %v9009_v13, %v8944_v10  ;;  %9288 = vmatpush1.xpose.msra.mxu1 %v9031_v4 }
0x144d   :  { %9289 = vmatprep.subr.mxu1 %v9024_v51 }
0x144e   :  { %v9003_v44 = vadd.f32 %v9002_v20, %v9001_v61  ;;  %v9011_v47 = vrot.slane %v9010_v42, 4 }
0x1450   :  { %v9004_v55 = vrot.slane %v9003_v44, 2  ;;  %v9012_v49 = vadd.f32 %v9011_v47, %v9010_v42  ;;  %9290 = vmatpush1.xpose.msra.mxu1 %v9023_v6 }
0x1451   :  { %10227 = vmatprep.subr.mxu1 %v17246_v17 }
0x1452   :  { %v9005_v54 = vadd.f32 %v9004_v55, %v9003_v44  ;;  %v9013_v19 = vrot.slane %v9012_v49, 2 }
0x1454   :  { %v9014_v15 = vadd.f32 %v9013_v19, %v9012_v49  ;;  %v9006_v11 = vrot.slane %v9005_v54, 1 }
0x1456   :  { %v9015_v1 = vrot.slane %v9014_v15, 1  ;;  %v9007_v58 = vadd.f32 %v9006_v11, %v9005_v54 }
0x1458   :  { %v9016_v30 = vadd.f32 %v9015_v1, %v9014_v15 }
0x145a   :  { %9323 = vmatprep.mubr.f32.mxu1 %v9016_v30 }
0x145b   :  { %9324 = vmatmul.mubr.f32.vlgmr.msra.gmra.mxu1 %v9007_v58 }
0x145c   :  { %10235 = vmatprep.mubr.msk.f32.mxu1 %vm11215_vm4, %v17246_v17  ;;  %10228 = vmatpush3.msra.mxu1 %v9426_v23 }
0x145d   :  { %10229 = vmatprep.subr.mxu1 %v17246_v17 }
0x145e   :  { %10230 = vmatpush3.msra.mxu1 %v9425_v9 }
0x145f   :  { %10231 = vmatprep.subr.mxu1 %v17246_v17 }
0x1460   :  { %10232 = vmatpush3.msra.mxu1 %v9424_v50 }
0x1461   :  { %10233 = vmatprep.subr.mxu1 %v17246_v17 }
0x1462   :  { %10234 = vmatpush3.msra.mxu1 %v9423_v38 }
0x14eb   :  { %v9115_v62 = vpop.f32.mrf.mxu0 }
0x14ed   :  { %v9117_v27 = vpop.f32.mrf.mxu0 }
0x14fb   :  { %v9255_v57 = vpop.f32.mrf.mxu0 }
0x14fd   :  { %v9257_v36 = vpop.f32.mrf.mxu0 }
0x1503   :  { %v9185_v7 = vpop.f32.mrf.mxu1 }
0x1504   :  { %v9186_v14 = vadd.f32 %v9185_v7, %v9115_v62 }
0x1505   :  { %v9187_v26 = vpop.f32.mrf.mxu1 }
0x1506   :  { %v9256_v31 = vadd.f32 %v9255_v57, %v9186_v14 }
0x151b   :  { %v9325_v39 = vpop.f32.mrf.mxu1 }
0x151c   :  { %v9326_v2 = vadd.f32 %v9325_v39, %v9256_v31 }
0x151d   :  { %v9327_v16 = vpop.f32.mrf.mxu1 }
0x151e   :  { %v9329_v25 = vmul.f32 0.015625, %v9326_v2 }
0x1520   :  { %v9331_v40 = vadd.f32 %v9330_v34, %v9329_v25 }
0x1522   :  { %v9332_v48 = vsub.f32 0.0, %v9331_v40 }
0x1524   :  { %v9333_v63 = vmul.f32 1.442695, %v9332_v48 }
0x1526   :  { %11131 = vpow2.f32 %v9333_v63 }
0x1533   :  { %v11132_v32 = vpop.eup %11131 }
0x1534   :  { %v9335_v5 = vadd.f32 1.0, %v11132_v32 }
0x1536   :  { %11133 = vrcp.f32 %v9335_v5 }
0x1543   :  { %v11134_v59 = vpop.eup %11133 }
0x1544   :  { %v9337_v0 = vmul.f32 %v11134_v59, %v9331_v40 }
0x1546   :  { %10225 = vmatmul.mubr.msk.f32.vlgmr.msra.gmra.mxu0 %vm1787_vm1, %v9337_v0 }
0x1606   :  { %v9412_v28 = vpop.f32.mrf.mxu0 }
0x1607   :  { %v9416_v18 = vadd.f32 %v9412_v28, %v15736_v3 }
0x1608   :  { %v10226_v22 = vpop.f32.mrf.mxu0 }
0x1609   :  { %v9417_v35 = vsub.f32 0.0, %v9416_v18 }
0x160b   :  { %v9418_v41 = vmul.f32 1.442695, %v9417_v35 }
0x160d   :  { %11135 = vpow2.f32 %v9418_v41 }
0x161a   :  { %v11136_v45 = vpop.eup %11135 }
0x161b   :  { %v9420_v52 = vadd.f32 1.0, %v11136_v45 }
0x161d   :  { %11137 = vrcp.f32 %v9420_v52 }
0x162a   :  { %v11138_v24 = vpop.eup %11137 }
0x162b   :  { %v9422_v8 = vmul.f32 %v11138_v24, %v9416_v18 }
0x162d   :  { %10236 = vmatmul.mubr.msk.f32.vlgmr.msra.gmra.mxu1 %vm1787_vm1, %v9422_v8 }
0x162e   :  { %11150 = shalt.err (!%p11147_p4)
}
0x162f   :  { %9512 = dma.vmem_to_hbm [thread:$0]  %s9510_s14, 128, %s16188_s25, [#allocation19]   ;;  %vm9501_vm6 = vcmask 253952  }
0x1630   :  { %s17583_s28 = sld [smem:[#allocation517_spill]]  ;;  %s11217_s6 = smov [#allocation20]  }
0x1631   :  { %s9519_s8 = sshll.u32 %s11217_s6, 4  ;;  %s9520_s8 = int_to_ptr.vmem [resolvable:$true] %s9519_s8 }
0x1632   :  { %s11159_s9 = scalar_lea.vmem %s9520_s8, 16  ;;  %s11163_s19 = scalar_lea.vmem %s9520_s8, 32 }
0x1633   :  { %p11160_p5 = scmp.ne.s32.totalorder %s9520_s8, %s11159_s9  ;;  %p11164_p6 = scmp.lt.s32.totalorder %s9520_s8, %s9520_s8 }
0x1634   :  { %p11165_p7 = scmp.lt.s32.totalorder %s11163_s19, %s11159_s9 }
0x1636   :  { %v9427_v17 = vld [vmem:[%s17583_s28] sm:$0x1]  ;;  %p11166_p8 = por %p11165_p7, %p11164_p6 }
0x1638   :  { %p11167_p9 = pnand %p11166_p8, %p11160_p5 }
0x16ed   :  { %v9497_v3 = vpop.f32.mrf.mxu1 }
0x16ee   :  { %v9498_v12 = vadd.f32 %v9497_v3, %v9427_v17 }
0x16ef   :  { %v10237_v29 = vpop.f32.mrf.mxu1 }
0x16f0   :  { %9502 = vst.msk [vmem:[#allocation20] sm:$0x1] %vm9501_vm6, %v9498_v12 }
0x16f1   :  { %11170 = shalt.err (!%p11167_p9)
}
0x16f2   :  { %9522 = dma.vmem_to_hbm [thread:$0]  %s9520_s8, 16, %s16189_s26, [#allocation21]  }
0x16f3   :  { %11209 = dma.done.wait [#allocation19], 128  }
0x16f4   :  { %11210 = vsyncadd [#allocation19], 4294967168 }
0x16f5   :  { %11211 = dma.done.wait [#allocation21], 16  }
0x16f6   :  { %11212 = vsyncadd [#allocation21], 4294967280 }
0x16f7   :  { %9529 = vsyncpa [#allocation19], 1 }
0x16f8   :  { %9530 = vsyncpa [#allocation21], 1 }
0x16f9   :  { %9531 = vsyncmov [#allocation17] }
0x16fc   :  { %s9532_s18 = vpop.sfrf %9531 }
0x16fd   :  { %p10127_p10 = scmp.ne.s32.totalorder %s9532_s18, 0 }
0x16ff   :  { %9536 = shalt.err (%p10127_p10)  }
0x1700   :  { %9538 = vsyncmov [#allocation17 + $0x1] }
0x1703   :  { %s9539_s4 = vpop.sfrf %9538 }
0x1704   :  { %p10128_p11 = scmp.ne.s32.totalorder %s9539_s4, 0 }
0x1706   :  { %9543 = shalt.err (%p10128_p11)  }
0x1707   :  { %9545 = vsyncmov [#allocation17 + $0x2] }
0x170a   :  { %s9546_s20 = vpop.sfrf %9545 }
0x170b   :  { %p10129_p12 = scmp.ne.s32.totalorder %s9546_s20, 0 }
0x170d   :  { %9550 = shalt.err (%p10129_p12)  }
0x170e   :  { %9552 = vsyncmov [#allocation17 + $0x3] }
0x1711   :  { %s9553_s26 = vpop.sfrf %9552 }
0x1712   :  { %p10130_p13 = scmp.ne.s32.totalorder %s9553_s26, 0 }
0x1714   :  { %9557 = shalt.err (%p10130_p13)  }
0x1715   :  { %9559 = vsyncmov [#allocation17 + $0x4] }
0x1718   :  { %s9560_s29 = vpop.sfrf %9559 }
0x1719   :  { %p10131_p0 = scmp.ne.s32.totalorder %s9560_s29, 0 }
0x171b   :  { %9564 = shalt.err (%p10131_p0)  }
0x171c   :  { %9566 = vsyncmov [#allocation17 + $0x5] }
0x171f   :  { %s9567_s15 = vpop.sfrf %9566 }
0x1720   :  { %p10132_p1 = scmp.ne.s32.totalorder %s9567_s15, 0 }
0x1722   :  { %9571 = shalt.err (%p10132_p1)  }
0x1723   :  { %9573 = vsyncmov [#allocation17 + $0x6] }
0x1726   :  { %s9574_s0 = vpop.sfrf %9573 }
0x1727   :  { %p10133_p2 = scmp.ne.s32.totalorder %s9574_s0, 0 }
0x1729   :  { %9578 = shalt.err (%p10133_p2)  }
0x172a   :  { %9580 = vsyncmov [#allocation17 + $0x7] }
0x172d   :  { %s9581_s17 = vpop.sfrf %9580 }
0x172e   :  { %p10134_p3 = scmp.ne.s32.totalorder %s9581_s17, 0 }
0x1730   :  { %9585 = shalt.err (%p10134_p3)  }
0x1731   :  { %9587 = vsyncmov [#allocation17 + $0x8] }
0x1734   :  { %s9588_s12 = vpop.sfrf %9587 }
0x1735   :  { %p10135_p4 = scmp.ne.s32.totalorder %s9588_s12, 0 }
0x1737   :  { %9592 = shalt.err (%p10135_p4)  }
0x1738   :  { %9594 = vsyncmov [#allocation17 + $0x9] }
0x173b   :  { %s9595_s30 = vpop.sfrf %9594 }
0x173c   :  { %p10136_p5 = scmp.ne.s32.totalorder %s9595_s30, 0 }
0x173e   :  { %9599 = shalt.err (%p10136_p5)  }
0x173f   :  { %9601 = vsyncmov [#allocation17 + $0xa] }
0x1742   :  { %s9602_s2 = vpop.sfrf %9601 }
0x1743   :  { %p10137_p6 = scmp.ne.s32.totalorder %s9602_s2, 0 }
0x1745   :  { %9606 = shalt.err (%p10137_p6)  }
0x1746   :  { %9608 = vsyncmov [#allocation17 + $0xb] }
0x1749   :  { %s9609_s24 = vpop.sfrf %9608 }
0x174a   :  { %p10138_p7 = scmp.ne.s32.totalorder %s9609_s24, 0 }
0x174c   :  { %9613 = shalt.err (%p10138_p7)  }
0x174d   :  { %9615 = vsyncmov [#allocation17 + $0xc] }
0x1750   :  { %s9616_s5 = vpop.sfrf %9615 }
0x1751   :  { %p10139_p8 = scmp.ne.s32.totalorder %s9616_s5, 0 }
0x1753   :  { %9620 = shalt.err (%p10139_p8)  }
0x1754   :  { %9622 = vsyncmov [#allocation17 + $0xd] }
0x1757   :  { %s9623_s10 = vpop.sfrf %9622 }
0x1758   :  { %p10140_p9 = scmp.ne.s32.totalorder %s9623_s10, 0 }
0x175a   :  { %9627 = shalt.err (%p10140_p9)  }
0x175b   :  { %9629 = vsyncmov [#allocation17 + $0xe] }
0x175e   :  { %s9630_s16 = vpop.sfrf %9629 }
0x175f   :  { %p10141_p10 = scmp.ne.s32.totalorder %s9630_s16, 0 }
0x1761   :  { %9634 = shalt.err (%p10141_p10)  }

</bundles_post_ra>
